<compile_context>
chip_gen: v6e
topology: v6e:2x2x1
jax: 0.10.0
libtpu: 0.0.40
codegen_flags: <defaults>
</compile_context>

<pallas_src>
import jax
import jax.numpy as jnp
from jax import lax
from jax.experimental import pallas as pl
from jax.experimental.pallas import tpu as pltpu

EPS = 1e-5  # nn.BatchNorm2d default eps

# Dueling-head tiling constants.
F_IN = 3136          # 7*7*64 flattened conv features
F_PAD = 3200         # padded to a multiple of 128 for lane-aligned K tiling
TK = 640             # K tile (F_PAD / 5), multiple of 128
HID = 512            # fc hidden width (concatenated -> 1024)


# ----------------------------------------------------------------------------
# Pallas kernels
# ----------------------------------------------------------------------------
def conv_bn_relu_kernel(p_ref, w_ref, g_ref, beta_ref, o_ref):
    """Fused  (im2col patches @ W)  ->  BatchNorm(batch stats)  ->  ReLU.

    p_ref: (M, K)  im2col patches, M = N*H_out*W_out  (rows = NHWC order)
    w_ref: (K, C)  conv weight reshaped to (kh*kw*C_in, C_out)
    g_ref, beta_ref: (1, C)  BN gamma / beta
    o_ref: (M, C)

    Conv bias is intentionally omitted: a per-channel constant added before
    training-mode BatchNorm cancels exactly in (y - mean).
    """
    y = jnp.dot(p_ref[...], w_ref[...], preferred_element_type=jnp.float32)
    m = y.shape[0]                      # static block dim
    inv_m = 1.0 / m
    # One-pass batch statistics over all M = N*H*W rows (grid=(1,) => full M).
    mean = jnp.sum(y, axis=0, keepdims=True) * inv_m
    mean_sq = jnp.sum(y * y, axis=0, keepdims=True) * inv_m
    var = mean_sq - mean * mean
    y = g_ref[...] * (y - mean) * lax.rsqrt(var + EPS) + beta_ref[...]
    o_ref[...] = jnp.maximum(y, 0.0)


def dueling_head_kernel(x_ref, w1_ref, b1_ref, w2_ref, b2_ref, o_ref, acc_ref):
    """K-tiled fused dueling head.

    Per grid step k:  acc += x[:, k-tile] @ W1[k-tile, :]   (bf16 MXU, f32 acc)
    Final step:       h = relu(acc + b1)            # [relu(fc_val)|relu(fc_adv)]
                      Q = h @ W2 + b2               # block-diag val/adv heads with
                                                    # the dueling combine folded in
    x_ref:  (N, TK)       f32 activation tile
    w1_ref: (TK, 1024)    bf16  [fc_val.W | fc_adv.W] rows in HWC order
    b1_ref: (1, 1024)     f32
    w2_ref: (1024, 2)     f32  block-diag(val, adv) @ dueling-combine matrix
    b2_ref: (1, 2)        f32
    o_ref:  (N, 2)        f32  Q-values
    acc_ref: (N, 1024)    f32 VMEM scratch
    """
    k = pl.program_id(0)

    @pl.when(k == 0)
    def _init():
        acc_ref[...] = jnp.zeros_like(acc_ref)

    acc_ref[...] += jnp.dot(x_ref[...].astype(jnp.bfloat16), w1_ref[...],
                            preferred_element_type=jnp.float32)

    @pl.when(k == pl.num_programs(0) - 1)
    def _finalize():
        h = jnp.maximum(acc_ref[...] + b1_ref[...], 0.0)
        o_ref[...] = (jnp.dot(h, w2_ref[...], preferred_element_type=jnp.float32)
                      + b2_ref[...])


# ----------------------------------------------------------------------------
# pallas_call wrappers
# ----------------------------------------------------------------------------
def conv_bn_relu(patches, w2d, gamma, beta):
    M, K = patches.shape
    C = w2d.shape[1]
    return pl.pallas_call(
        conv_bn_relu_kernel,
        out_shape=jax.ShapeDtypeStruct((M, C), jnp.float32),
        grid=(1,),
        in_specs=[pl.BlockSpec((M, K), lambda i: (0, 0)),
                  pl.BlockSpec((K, C), lambda i: (0, 0)),
                  pl.BlockSpec((1, C), lambda i: (0, 0)),
                  pl.BlockSpec((1, C), lambda i: (0, 0))],
        out_specs=pl.BlockSpec((M, C), lambda i: (0, 0)),
    )(patches, w2d, gamma, beta)


def dueling_head(x_flat_pad, w1, b1, w2, b2):
    N = x_flat_pad.shape[0]
    H2 = w1.shape[1]                    # 1024
    n_k = F_PAD // TK                   # 5 pipelined K steps
    return pl.pallas_call(
        dueling_head_kernel,
        out_shape=jax.ShapeDtypeStruct((N, 2), jnp.float32),
        grid=(n_k,),
        in_specs=[
            pl.BlockSpec((N, TK), lambda k: (0, k)),
            pl.BlockSpec((TK, H2), lambda k: (k, 0)),
            pl.BlockSpec((1, H2), lambda k: (0, 0)),
            pl.BlockSpec((H2, 2), lambda k: (0, 0)),
            pl.BlockSpec((1, 2), lambda k: (0, 0)),
        ],
        out_specs=pl.BlockSpec((N, 2), lambda k: (0, 0)),
        scratch_shapes=[pltpu.VMEM((N, H2), jnp.float32)],
        compiler_params=pltpu.CompilerParams(
            dimension_semantics=("arbitrary",),
        ),
    )(x_flat_pad, w1, b1, w2, b2)


# ----------------------------------------------------------------------------
# Glue: NHWC strided-slice patch extraction (no gathers, no per-layer transposes)
# ----------------------------------------------------------------------------
def extract_patches_nhwc(x, kh, kw, stride):
    N, H, W, C = x.shape
    Ho = (H - kh) // stride + 1
    Wo = (W - kw) // stride + 1
    cols = []
    for i in range(kh):
        for j in range(kw):
            cols.append(x[:, i:i + (Ho - 1) * stride + 1:stride,
                          j:j + (Wo - 1) * stride + 1:stride, :])   # (N,Ho,Wo,C)
    p = jnp.stack(cols, axis=3)                                     # (N,Ho,Wo,kh*kw,C)
    return p.reshape(N * Ho * Wo, kh * kw * C), Ho, Wo


def conv_layer(x_nhwc, w_mat, gamma, beta, kh, kw, stride):
    """Conv2d (valid) + BatchNorm2d(training stats) + ReLU, NHWC in / NHWC out."""
    N = x_nhwc.shape[0]
    patches, Ho, Wo = extract_patches_nhwc(x_nhwc, kh, kw, stride)
    out = conv_bn_relu(patches, w_mat, gamma, beta)                 # (M, C_out)
    return out.reshape(N, Ho, Wo, w_mat.shape[1])


# ----------------------------------------------------------------------------
# Parameter init (deterministic, synthetic) with one-time layout transforms
# ----------------------------------------------------------------------------
def init_params(key):
    ks = jax.random.split(key, 12)
    s = 0.05

    def conv_w(k, cout, cin, kh, kw):
        # PyTorch layout (C_out, C_in, kh, kw) -> (kh*kw*C_in, C_out), matching the
        # (i, j, c)-ordered im2col columns of extract_patches_nhwc.
        w = jax.random.normal(k, (cout, cin, kh, kw), jnp.float32) * s
        return jnp.transpose(w, (2, 3, 1, 0)).reshape(kh * kw * cin, cout)

    # ---- dueling head: fc_val / fc_adv (rows generated in PyTorch CHW flatten
    # order, permuted once to the HWC order produced by the NHWC conv3 flatten).
    wv = jax.random.normal(ks[3], (F_IN, HID), jnp.float32) * 0.02
    wa = jax.random.normal(ks[4], (F_IN, HID), jnp.float32) * 0.02
    bv = jax.random.normal(ks[5], (1, HID), jnp.float32) * 0.02
    ba = jax.random.normal(ks[6], (1, HID), jnp.float32) * 0.02
    hh, ww, cc = jnp.meshgrid(jnp.arange(7), jnp.arange(7), jnp.arange(64),
                              indexing="ij")
    perm = (cc * 49 + hh * 7 + ww).reshape(-1)          # HWC position -> CHW row
    w1 = jnp.concatenate([wv, wa], axis=1)[perm]        # (3136, 1024), HWC rows
    w1 = jnp.pad(w1, ((0, F_PAD - F_IN), (0, 0))).astype(jnp.bfloat16)
    b1 = jnp.concatenate([bv, ba], axis=1)              # (1, 1024) f32

    # ---- val / adv heads as one block-diagonal matmul, with the exact linear
    # dueling combine  Q = val + adv - mean(adv)  folded in:
    #   y = [hv|ha] @ blockdiag(wval, wadv) + [bval|badv]   (N, 3)
    #   Q = y @ T,  T = [[1,1],[.5,-.5],[-.5,.5]]
    wval = jax.random.normal(ks[7], (HID, 1), jnp.float32) * 0.02
    wadv = jax.random.normal(ks[8], (HID, 2), jnp.float32) * 0.02
    bval = jax.random.normal(ks[9], (1, 1), jnp.float32) * 0.02
    badv = jax.random.normal(ks[10], (1, 2), jnp.float32) * 0.02
    w2_bd = jnp.zeros((2 * HID, 3), jnp.float32)
    w2_bd = w2_bd.at[:HID, 0:1].set(wval)
    w2_bd = w2_bd.at[HID:, 1:3].set(wadv)
    b2_bd = jnp.concatenate([bval, badv], axis=1)       # (1, 3)
    T = jnp.array([[1.0, 1.0], [0.5, -0.5], [-0.5, 0.5]], jnp.float32)
    w2 = w2_bd @ T                                      # (1024, 2)
    b2 = b2_bd @ T                                      # (1, 2)

    return {
        "w1c": conv_w(ks[0], 32, 4, 8, 8),   "g1": jnp.ones((1, 32), jnp.float32),
        "beta1": jnp.zeros((1, 32), jnp.float32),
        "w2c": conv_w(ks[1], 64, 32, 4, 4),  "g2": jnp.ones((1, 64), jnp.float32),
        "beta2": jnp.zeros((1, 64), jnp.float32),
        "w3c": conv_w(ks[2], 64, 64, 3, 3),  "g3": jnp.ones((1, 64), jnp.float32),
        "beta3": jnp.zeros((1, 64), jnp.float32),
        "w1h": w1, "b1h": b1, "w2h": w2, "b2h": b2,
    }


# ----------------------------------------------------------------------------
# Full forward
# ----------------------------------------------------------------------------
@jax.jit
def ddqn4_forward(x_nchw, p):
    # TODO(synk): BatchNorm running_mean/running_var buffers are not tracked;
    # the forward uses per-batch statistics (training-mode output).
    x = x_nchw.astype(jnp.float32)                       # x.float()
    x = jnp.transpose(x, (0, 2, 3, 1))                   # single NCHW->NHWC at entry
    x = conv_layer(x, p["w1c"], p["g1"], p["beta1"], 8, 8, 4)   # (N,20,20,32)
    x = conv_layer(x, p["w2c"], p["g2"], p["beta2"], 4, 4, 2)   # (N,9,9,64)
    x = conv_layer(x, p["w3c"], p["g3"], p["beta3"], 3, 3, 1)   # (N,7,7,64)
    xf = x.reshape(x.shape[0], -1)                       # (N, 3136) HWC order
    xf = jnp.pad(xf, ((0, 0), (0, F_PAD - F_IN)))        # zero-pad K to 3200
    return dueling_head(xf, p["w1h"], p["b1h"], p["w2h"], p["b2h"])   # (N, 2)


if __name__ == "__main__":
    key = jax.random.PRNGKey(0)
    k_in, k_par = jax.random.split(key)
    # DDQN4 implies 4x84x84 inputs (7*7*64 flatten after the three convs).
    x = jax.random.uniform(k_in, (2, 4, 84, 84), jnp.float32)
    params = init_params(k_par)
    out = ddqn4_forward(x, params)
    out = jax.block_until_ready(out)
    assert out.shape == (2, 2) and out.dtype == jnp.float32
    print("KERNEL_OK")
</pallas_src>

<mosaic_0001>
module attributes {stable_mosaic.version = 11 : i64} {
  func.func @conv_bn_relu_kernel(%arg0: i32, %arg1: memref<800x256xf32, #tpu.memory_space<vmem>>, %arg2: memref<256x32xf32, #tpu.memory_space<vmem>>, %arg3: memref<1x32xf32, #tpu.memory_space<vmem>>, %arg4: memref<1x32xf32, #tpu.memory_space<vmem>>, %arg5: memref<800x32xf32, #tpu.memory_space<vmem>>) attributes {dimension_semantics = [#tpu.dimension_semantics<arbitrary>], iteration_bounds = array<i64: 1>, scalar_prefetch = 0 : i64, scratch_operands = 0 : i64, tpu.core_type = #tpu.core_type<tc>, window_params = [{pipeline_mode = #tpu.pipeline_mode<synchronous>, transform_indices = @transform_0, window_bounds = array<i64: 800, 256>}, {pipeline_mode = #tpu.pipeline_mode<synchronous>, transform_indices = @transform_1, window_bounds = array<i64: 256, 32>}, {pipeline_mode = #tpu.pipeline_mode<synchronous>, transform_indices = @transform_2, window_bounds = array<i64: 1, 32>}, {pipeline_mode = #tpu.pipeline_mode<synchronous>, transform_indices = @transform_3, window_bounds = array<i64: 1, 32>}, {pipeline_mode = #tpu.pipeline_mode<synchronous>, transform_indices = @transform_4, window_bounds = array<i64: 800, 32>}]} {
    %c0 = arith.constant 0 : index
    %c0_0 = arith.constant 0 : index
    %0 = vector.load %arg1[%c0, %c0_0] : memref<800x256xf32, #tpu.memory_space<vmem>>, vector<800x256xf32>
    %c0_1 = arith.constant 0 : index
    %c0_2 = arith.constant 0 : index
    %1 = vector.load %arg2[%c0_1, %c0_2] : memref<256x32xf32, #tpu.memory_space<vmem>>, vector<256x32xf32>
    %cst = arith.constant dense<0.000000e+00> : vector<800x32xf32>
    %2 = tpu.matmul %0, %1, %cst {dimension_numbers = #tpu.dot_dimension_numbers<[1], [0], [0], [1], [0, 0, 1, 1], [], []>} : vector<800x256xf32>, vector<256x32xf32>, vector<800x32xf32> -> vector<800x32xf32>
    %cst_3 = arith.constant dense<0.000000e+00> : vector<32xf32>
    %3 = vector.multi_reduction <add>, %2, %cst_3 [0] : vector<800x32xf32> to vector<32xf32>
    %4 = vector.shape_cast %3 : vector<32xf32> to vector<1x32xf32>
    %cst_4 = arith.constant 1.250000e-03 : f32
    %5 = vector.broadcast %cst_4 : f32 to vector<1x32xf32>
    %6 = arith.mulf %4, %5 : vector<1x32xf32>
    %7 = arith.mulf %2, %2 : vector<800x32xf32>
    %cst_5 = arith.constant dense<0.000000e+00> : vector<32xf32>
    %8 = vector.multi_reduction <add>, %7, %cst_5 [0] : vector<800x32xf32> to vector<32xf32>
    %9 = vector.shape_cast %8 : vector<32xf32> to vector<1x32xf32>
    %cst_6 = arith.constant 1.250000e-03 : f32
    %10 = vector.broadcast %cst_6 : f32 to vector<1x32xf32>
    %11 = arith.mulf %9, %10 : vector<1x32xf32>
    %12 = arith.mulf %6, %6 : vector<1x32xf32>
    %13 = arith.subf %11, %12 : vector<1x32xf32>
    %c0_7 = arith.constant 0 : index
    %c0_8 = arith.constant 0 : index
    %14 = vector.load %arg3[%c0_7, %c0_8] : memref<1x32xf32, #tpu.memory_space<vmem>>, vector<1x32xf32>
    %15 = vector.broadcast %6 : vector<1x32xf32> to vector<800x32xf32>
    %16 = arith.subf %2, %15 : vector<800x32xf32>
    %17 = vector.broadcast %14 : vector<1x32xf32> to vector<800x32xf32>
    %18 = arith.mulf %17, %16 : vector<800x32xf32>
    %cst_9 = arith.constant 9.99999974E-6 : f32
    %19 = vector.broadcast %cst_9 : f32 to vector<1x32xf32>
    %20 = arith.addf %13, %19 : vector<1x32xf32>
    %21 = math.rsqrt %20 : vector<1x32xf32>
    %22 = vector.broadcast %21 : vector<1x32xf32> to vector<800x32xf32>
    %23 = arith.mulf %18, %22 : vector<800x32xf32>
    %c0_10 = arith.constant 0 : index
    %c0_11 = arith.constant 0 : index
    %24 = vector.load %arg4[%c0_10, %c0_11] : memref<1x32xf32, #tpu.memory_space<vmem>>, vector<1x32xf32>
    %25 = vector.broadcast %24 : vector<1x32xf32> to vector<800x32xf32>
    %26 = arith.addf %23, %25 : vector<800x32xf32>
    %cst_12 = arith.constant 0.000000e+00 : f32
    %27 = vector.broadcast %cst_12 : f32 to vector<800x32xf32>
    %28 = arith.maximumf %26, %27 : vector<800x32xf32>
    %c0_13 = arith.constant 0 : index
    %c0_14 = arith.constant 0 : index
    %29 = vector.load %arg5[%c0_13, %c0_14] : memref<800x32xf32, #tpu.memory_space<vmem>>, vector<800x32xf32>
    tpu.vector_store %arg5[%c0_13, %c0_14], %28 {strides = array<i32>} : memref<800x32xf32, #tpu.memory_space<vmem>>, vector<800x32xf32>,
    return
  }
  func.func @transform_0(%arg0: i32) -> (i32, i32) {
    %c0_i32 = arith.constant 0 : i32
    %c0_i32_0 = arith.constant 0 : i32
    %c0_i32_1 = arith.constant 0 : i32
    return %c0_i32, %c0_i32_0 : i32, i32
  }
  func.func @transform_1(%arg0: i32) -> (i32, i32) {
    %c0_i32 = arith.constant 0 : i32
    %c0_i32_0 = arith.constant 0 : i32
    %c0_i32_1 = arith.constant 0 : i32
    return %c0_i32, %c0_i32_0 : i32, i32
  }
  func.func @transform_2(%arg0: i32) -> (i32, i32) {
    %c0_i32 = arith.constant 0 : i32
    %c0_i32_0 = arith.constant 0 : i32
    %c0_i32_1 = arith.constant 0 : i32
    return %c0_i32, %c0_i32_0 : i32, i32
  }
  func.func @transform_3(%arg0: i32) -> (i32, i32) {
    %c0_i32 = arith.constant 0 : i32
    %c0_i32_0 = arith.constant 0 : i32
    %c0_i32_1 = arith.constant 0 : i32
    return %c0_i32, %c0_i32_0 : i32, i32
  }
  func.func @transform_4(%arg0: i32) -> (i32, i32) {
    %c0_i32 = arith.constant 0 : i32
    %c0_i32_0 = arith.constant 0 : i32
    %c0_i32_1 = arith.constant 0 : i32
    return %c0_i32, %c0_i32_0 : i32, i32
  }
}

module attributes {stable_mosaic.version = 11 : i64} {
  func.func @conv_bn_relu_kernel(%arg0: i32, %arg1: memref<162x512xf32, #tpu.memory_space<vmem>>, %arg2: memref<512x64xf32, #tpu.memory_space<vmem>>, %arg3: memref<1x64xf32, #tpu.memory_space<vmem>>, %arg4: memref<1x64xf32, #tpu.memory_space<vmem>>, %arg5: memref<162x64xf32, #tpu.memory_space<vmem>>) attributes {dimension_semantics = [#tpu.dimension_semantics<arbitrary>], iteration_bounds = array<i64: 1>, scalar_prefetch = 0 : i64, scratch_operands = 0 : i64, tpu.core_type = #tpu.core_type<tc>, window_params = [{pipeline_mode = #tpu.pipeline_mode<synchronous>, transform_indices = @transform_0, window_bounds = array<i64: 162, 512>}, {pipeline_mode = #tpu.pipeline_mode<synchronous>, transform_indices = @transform_1, window_bounds = array<i64: 512, 64>}, {pipeline_mode = #tpu.pipeline_mode<synchronous>, transform_indices = @transform_2, window_bounds = array<i64: 1, 64>}, {pipeline_mode = #tpu.pipeline_mode<synchronous>, transform_indices = @transform_3, window_bounds = array<i64: 1, 64>}, {pipeline_mode = #tpu.pipeline_mode<synchronous>, transform_indices = @transform_4, window_bounds = array<i64: 162, 64>}]} {
    %c0 = arith.constant 0 : index
    %c0_0 = arith.constant 0 : index
    %0 = vector.load %arg1[%c0, %c0_0] : memref<162x512xf32, #tpu.memory_space<vmem>>, vector<162x512xf32>
    %c0_1 = arith.constant 0 : index
    %c0_2 = arith.constant 0 : index
    %1 = vector.load %arg2[%c0_1, %c0_2] : memref<512x64xf32, #tpu.memory_space<vmem>>, vector<512x64xf32>
    %cst = arith.constant dense<0.000000e+00> : vector<162x64xf32>
    %2 = tpu.matmul %0, %1, %cst {dimension_numbers = #tpu.dot_dimension_numbers<[1], [0], [0], [1], [0, 0, 1, 1], [], []>} : vector<162x512xf32>, vector<512x64xf32>, vector<162x64xf32> -> vector<162x64xf32>
    %cst_3 = arith.constant dense<0.000000e+00> : vector<64xf32>
    %3 = vector.multi_reduction <add>, %2, %cst_3 [0] : vector<162x64xf32> to vector<64xf32>
    %4 = vector.shape_cast %3 : vector<64xf32> to vector<1x64xf32>
    %cst_4 = arith.constant 0.00617283955 : f32
    %5 = vector.broadcast %cst_4 : f32 to vector<1x64xf32>
    %6 = arith.mulf %4, %5 : vector<1x64xf32>
    %7 = arith.mulf %2, %2 : vector<162x64xf32>
    %cst_5 = arith.constant dense<0.000000e+00> : vector<64xf32>
    %8 = vector.multi_reduction <add>, %7, %cst_5 [0] : vector<162x64xf32> to vector<64xf32>
    %9 = vector.shape_cast %8 : vector<64xf32> to vector<1x64xf32>
    %cst_6 = arith.constant 0.00617283955 : f32
    %10 = vector.broadcast %cst_6 : f32 to vector<1x64xf32>
    %11 = arith.mulf %9, %10 : vector<1x64xf32>
    %12 = arith.mulf %6, %6 : vector<1x64xf32>
    %13 = arith.subf %11, %12 : vector<1x64xf32>
    %c0_7 = arith.constant 0 : index
    %c0_8 = arith.constant 0 : index
    %14 = vector.load %arg3[%c0_7, %c0_8] : memref<1x64xf32, #tpu.memory_space<vmem>>, vector<1x64xf32>
    %15 = vector.broadcast %6 : vector<1x64xf32> to vector<162x64xf32>
    %16 = arith.subf %2, %15 : vector<162x64xf32>
    %17 = vector.broadcast %14 : vector<1x64xf32> to vector<162x64xf32>
    %18 = arith.mulf %17, %16 : vector<162x64xf32>
    %cst_9 = arith.constant 9.99999974E-6 : f32
    %19 = vector.broadcast %cst_9 : f32 to vector<1x64xf32>
    %20 = arith.addf %13, %19 : vector<1x64xf32>
    %21 = math.rsqrt %20 : vector<1x64xf32>
    %22 = vector.broadcast %21 : vector<1x64xf32> to vector<162x64xf32>
    %23 = arith.mulf %18, %22 : vector<162x64xf32>
    %c0_10 = arith.constant 0 : index
    %c0_11 = arith.constant 0 : index
    %24 = vector.load %arg4[%c0_10, %c0_11] : memref<1x64xf32, #tpu.memory_space<vmem>>, vector<1x64xf32>
    %25 = vector.broadcast %24 : vector<1x64xf32> to vector<162x64xf32>
    %26 = arith.addf %23, %25 : vector<162x64xf32>
    %cst_12 = arith.constant 0.000000e+00 : f32
    %27 = vector.broadcast %cst_12 : f32 to vector<162x64xf32>
    %28 = arith.maximumf %26, %27 : vector<162x64xf32>
    %c0_13 = arith.constant 0 : index
    %c0_14 = arith.constant 0 : index
    %29 = vector.load %arg5[%c0_13, %c0_14] : memref<162x64xf32, #tpu.memory_space<vmem>>, vector<162x64xf32>
    tpu.vector_store %arg5[%c0_13, %c0_14], %28 {strides = array<i32>} : memref<162x64xf32, #tpu.memory_space<vmem>>, vector<162x64xf32>,
    return
  }
  func.func @transform_0(%arg0: i32) -> (i32, i32) {
    %c0_i32 = arith.constant 0 : i32
    %c0_i32_0 = arith.constant 0 : i32
    %c0_i32_1 = arith.constant 0 : i32
    return %c0_i32, %c0_i32_0 : i32, i32
  }
  func.func @transform_1(%arg0: i32) -> (i32, i32) {
    %c0_i32 = arith.constant 0 : i32
    %c0_i32_0 = arith.constant 0 : i32
    %c0_i32_1 = arith.constant 0 : i32
    return %c0_i32, %c0_i32_0 : i32, i32
  }
  func.func @transform_2(%arg0: i32) -> (i32, i32) {
    %c0_i32 = arith.constant 0 : i32
    %c0_i32_0 = arith.constant 0 : i32
    %c0_i32_1 = arith.constant 0 : i32
    return %c0_i32, %c0_i32_0 : i32, i32
  }
  func.func @transform_3(%arg0: i32) -> (i32, i32) {
    %c0_i32 = arith.constant 0 : i32
    %c0_i32_0 = arith.constant 0 : i32
    %c0_i32_1 = arith.constant 0 : i32
    return %c0_i32, %c0_i32_0 : i32, i32
  }
  func.func @transform_4(%arg0: i32) -> (i32, i32) {
    %c0_i32 = arith.constant 0 : i32
    %c0_i32_0 = arith.constant 0 : i32
    %c0_i32_1 = arith.constant 0 : i32
    return %c0_i32, %c0_i32_0 : i32, i32
  }
}

module attributes {stable_mosaic.version = 11 : i64} {
  func.func @conv_bn_relu_kernel(%arg0: i32, %arg1: memref<98x576xf32, #tpu.memory_space<vmem>>, %arg2: memref<576x64xf32, #tpu.memory_space<vmem>>, %arg3: memref<1x64xf32, #tpu.memory_space<vmem>>, %arg4: memref<1x64xf32, #tpu.memory_space<vmem>>, %arg5: memref<98x64xf32, #tpu.memory_space<vmem>>) attributes {dimension_semantics = [#tpu.dimension_semantics<arbitrary>], iteration_bounds = array<i64: 1>, scalar_prefetch = 0 : i64, scratch_operands = 0 : i64, tpu.core_type = #tpu.core_type<tc>, window_params = [{pipeline_mode = #tpu.pipeline_mode<synchronous>, transform_indices = @transform_0, window_bounds = array<i64: 98, 576>}, {pipeline_mode = #tpu.pipeline_mode<synchronous>, transform_indices = @transform_1, window_bounds = array<i64: 576, 64>}, {pipeline_mode = #tpu.pipeline_mode<synchronous>, transform_indices = @transform_2, window_bounds = array<i64: 1, 64>}, {pipeline_mode = #tpu.pipeline_mode<synchronous>, transform_indices = @transform_3, window_bounds = array<i64: 1, 64>}, {pipeline_mode = #tpu.pipeline_mode<synchronous>, transform_indices = @transform_4, window_bounds = array<i64: 98, 64>}]} {
    %c0 = arith.constant 0 : index
    %c0_0 = arith.constant 0 : index
    %0 = vector.load %arg1[%c0, %c0_0] : memref<98x576xf32, #tpu.memory_space<vmem>>, vector<98x576xf32>
    %c0_1 = arith.constant 0 : index
    %c0_2 = arith.constant 0 : index
    %1 = vector.load %arg2[%c0_1, %c0_2] : memref<576x64xf32, #tpu.memory_space<vmem>>, vector<576x64xf32>
    %cst = arith.constant dense<0.000000e+00> : vector<98x64xf32>
    %2 = tpu.matmul %0, %1, %cst {dimension_numbers = #tpu.dot_dimension_numbers<[1], [0], [0], [1], [0, 0, 1, 1], [], []>} : vector<98x576xf32>, vector<576x64xf32>, vector<98x64xf32> -> vector<98x64xf32>
    %cst_3 = arith.constant dense<0.000000e+00> : vector<64xf32>
    %3 = vector.multi_reduction <add>, %2, %cst_3 [0] : vector<98x64xf32> to vector<64xf32>
    %4 = vector.shape_cast %3 : vector<64xf32> to vector<1x64xf32>
    %cst_4 = arith.constant 0.0102040814 : f32
    %5 = vector.broadcast %cst_4 : f32 to vector<1x64xf32>
    %6 = arith.mulf %4, %5 : vector<1x64xf32>
    %7 = arith.mulf %2, %2 : vector<98x64xf32>
    %cst_5 = arith.constant dense<0.000000e+00> : vector<64xf32>
    %8 = vector.multi_reduction <add>, %7, %cst_5 [0] : vector<98x64xf32> to vector<64xf32>
    %9 = vector.shape_cast %8 : vector<64xf32> to vector<1x64xf32>
    %cst_6 = arith.constant 0.0102040814 : f32
    %10 = vector.broadcast %cst_6 : f32 to vector<1x64xf32>
    %11 = arith.mulf %9, %10 : vector<1x64xf32>
    %12 = arith.mulf %6, %6 : vector<1x64xf32>
    %13 = arith.subf %11, %12 : vector<1x64xf32>
    %c0_7 = arith.constant 0 : index
    %c0_8 = arith.constant 0 : index
    %14 = vector.load %arg3[%c0_7, %c0_8] : memref<1x64xf32, #tpu.memory_space<vmem>>, vector<1x64xf32>
    %15 = vector.broadcast %6 : vector<1x64xf32> to vector<98x64xf32>
    %16 = arith.subf %2, %15 : vector<98x64xf32>
    %17 = vector.broadcast %14 : vector<1x64xf32> to vector<98x64xf32>
    %18 = arith.mulf %17, %16 : vector<98x64xf32>
    %cst_9 = arith.constant 9.99999974E-6 : f32
    %19 = vector.broadcast %cst_9 : f32 to vector<1x64xf32>
    %20 = arith.addf %13, %19 : vector<1x64xf32>
    %21 = math.rsqrt %20 : vector<1x64xf32>
    %22 = vector.broadcast %21 : vector<1x64xf32> to vector<98x64xf32>
    %23 = arith.mulf %18, %22 : vector<98x64xf32>
    %c0_10 = arith.constant 0 : index
    %c0_11 = arith.constant 0 : index
    %24 = vector.load %arg4[%c0_10, %c0_11] : memref<1x64xf32, #tpu.memory_space<vmem>>, vector<1x64xf32>
    %25 = vector.broadcast %24 : vector<1x64xf32> to vector<98x64xf32>
    %26 = arith.addf %23, %25 : vector<98x64xf32>
    %cst_12 = arith.constant 0.000000e+00 : f32
    %27 = vector.broadcast %cst_12 : f32 to vector<98x64xf32>
    %28 = arith.maximumf %26, %27 : vector<98x64xf32>
    %c0_13 = arith.constant 0 : index
    %c0_14 = arith.constant 0 : index
    %29 = vector.load %arg5[%c0_13, %c0_14] : memref<98x64xf32, #tpu.memory_space<vmem>>, vector<98x64xf32>
    tpu.vector_store %arg5[%c0_13, %c0_14], %28 {strides = array<i32>} : memref<98x64xf32, #tpu.memory_space<vmem>>, vector<98x64xf32>,
    return
  }
  func.func @transform_0(%arg0: i32) -> (i32, i32) {
    %c0_i32 = arith.constant 0 : i32
    %c0_i32_0 = arith.constant 0 : i32
    %c0_i32_1 = arith.constant 0 : i32
    return %c0_i32, %c0_i32_0 : i32, i32
  }
  func.func @transform_1(%arg0: i32) -> (i32, i32) {
    %c0_i32 = arith.constant 0 : i32
    %c0_i32_0 = arith.constant 0 : i32
    %c0_i32_1 = arith.constant 0 : i32
    return %c0_i32, %c0_i32_0 : i32, i32
  }
  func.func @transform_2(%arg0: i32) -> (i32, i32) {
    %c0_i32 = arith.constant 0 : i32
    %c0_i32_0 = arith.constant 0 : i32
    %c0_i32_1 = arith.constant 0 : i32
    return %c0_i32, %c0_i32_0 : i32, i32
  }
  func.func @transform_3(%arg0: i32) -> (i32, i32) {
    %c0_i32 = arith.constant 0 : i32
    %c0_i32_0 = arith.constant 0 : i32
    %c0_i32_1 = arith.constant 0 : i32
    return %c0_i32, %c0_i32_0 : i32, i32
  }
  func.func @transform_4(%arg0: i32) -> (i32, i32) {
    %c0_i32 = arith.constant 0 : i32
    %c0_i32_0 = arith.constant 0 : i32
    %c0_i32_1 = arith.constant 0 : i32
    return %c0_i32, %c0_i32_0 : i32, i32
  }
}

module attributes {stable_mosaic.version = 11 : i64} {
  func.func @dueling_head_kernel(%arg0: i32, %arg1: memref<2x640xf32, #tpu.memory_space<vmem>>, %arg2: memref<640x1024xbf16, #tpu.memory_space<vmem>>, %arg3: memref<1x1024xf32, #tpu.memory_space<vmem>>, %arg4: memref<1024x2xf32, #tpu.memory_space<vmem>>, %arg5: memref<1x2xf32, #tpu.memory_space<vmem>>, %arg6: memref<2x2xf32, #tpu.memory_space<vmem>>, %arg7: memref<2x1024xf32, #tpu.memory_space<vmem>>) attributes {dimension_semantics = [#tpu.dimension_semantics<arbitrary>], iteration_bounds = array<i64: 5>, scalar_prefetch = 0 : i64, scratch_operands = 1 : i64, tpu.core_type = #tpu.core_type<tc>, window_params = [{transform_indices = @transform_0, window_bounds = array<i64: 2, 640>}, {transform_indices = @transform_1, window_bounds = array<i64: 640, 1024>}, {pipeline_mode = #tpu.pipeline_mode<synchronous>, transform_indices = @transform_2, window_bounds = array<i64: 1, 1024>}, {pipeline_mode = #tpu.pipeline_mode<synchronous>, transform_indices = @transform_3, window_bounds = array<i64: 1024, 2>}, {pipeline_mode = #tpu.pipeline_mode<synchronous>, transform_indices = @transform_4, window_bounds = array<i64: 1, 2>}, {pipeline_mode = #tpu.pipeline_mode<synchronous>, transform_indices = @transform_5, window_bounds = array<i64: 2, 2>}]} {
    %c0_i32 = arith.constant 0 : i32
    %0 = arith.cmpi eq, %arg0, %c0_i32 : i32
    %1 = arith.extui %0 : i1 to i32
    %c0_i32_0 = arith.constant 0 : i32
    %2 = arith.cmpi ne, %1, %c0_i32_0 : i32
    scf.if %2 {
      %cst_9 = arith.constant 0.000000e+00 : f32
      %13 = vector.broadcast %cst_9 : f32 to vector<2x1024xf32>
      %c0_10 = arith.constant 0 : index
      %c0_11 = arith.constant 0 : index
      %14 = vector.load %arg7[%c0_10, %c0_11] : memref<2x1024xf32, #tpu.memory_space<vmem>>, vector<2x1024xf32>
      tpu.vector_store %arg7[%c0_10, %c0_11], %13 {strides = array<i32>} : memref<2x1024xf32, #tpu.memory_space<vmem>>, vector<2x1024xf32>,
    } else {
    }
    %c0 = arith.constant 0 : index
    %c0_1 = arith.constant 0 : index
    %3 = vector.load %arg7[%c0, %c0_1] : memref<2x1024xf32, #tpu.memory_space<vmem>>, vector<2x1024xf32>
    %c0_2 = arith.constant 0 : index
    %c0_3 = arith.constant 0 : index
    %4 = vector.load %arg1[%c0_2, %c0_3] : memref<2x640xf32, #tpu.memory_space<vmem>>, vector<2x640xf32>
    %5 = arith.truncf %4 : vector<2x640xf32> to vector<2x640xbf16>
    %c0_4 = arith.constant 0 : index
    %c0_5 = arith.constant 0 : index
    %6 = vector.load %arg2[%c0_4, %c0_5] : memref<640x1024xbf16, #tpu.memory_space<vmem>>, vector<640x1024xbf16>
    %cst = arith.constant dense<0.000000e+00> : vector<2x1024xf32>
    %7 = tpu.matmul %5, %6, %cst {dimension_numbers = #tpu.dot_dimension_numbers<[1], [0], [0], [1], [0, 0, 1, 1], [], []>} : vector<2x640xbf16>, vector<640x1024xbf16>, vector<2x1024xf32> -> vector<2x1024xf32>
    %8 = arith.addf %3, %7 : vector<2x1024xf32>
    %c0_6 = arith.constant 0 : index
    %c0_7 = arith.constant 0 : index
    %9 = vector.load %arg7[%c0_6, %c0_7] : memref<2x1024xf32, #tpu.memory_space<vmem>>, vector<2x1024xf32>
    tpu.vector_store %arg7[%c0_6, %c0_7], %8 {strides = array<i32>} : memref<2x1024xf32, #tpu.memory_space<vmem>>, vector<2x1024xf32>,
    %c4_i32 = arith.constant 4 : i32
    %10 = arith.cmpi eq, %arg0, %c4_i32 : i32
    %11 = arith.extui %10 : i1 to i32
    %c0_i32_8 = arith.constant 0 : i32
    %12 = arith.cmpi ne, %11, %c0_i32_8 : i32
    scf.if %12 {
      %c0_9 = arith.constant 0 : index
      %c0_10 = arith.constant 0 : index
      %13 = vector.load %arg7[%c0_9, %c0_10] : memref<2x1024xf32, #tpu.memory_space<vmem>>, vector<2x1024xf32>
      %c0_11 = arith.constant 0 : index
      %c0_12 = arith.constant 0 : index
      %14 = vector.load %arg3[%c0_11, %c0_12] : memref<1x1024xf32, #tpu.memory_space<vmem>>, vector<1x1024xf32>
      %15 = vector.broadcast %14 : vector<1x1024xf32> to vector<2x1024xf32>
      %16 = arith.addf %13, %15 : vector<2x1024xf32>
      %cst_13 = arith.constant 0.000000e+00 : f32
      %17 = vector.broadcast %cst_13 : f32 to vector<2x1024xf32>
      %18 = arith.maximumf %16, %17 : vector<2x1024xf32>
      %c0_14 = arith.constant 0 : index
      %c0_15 = arith.constant 0 : index
      %19 = vector.load %arg4[%c0_14, %c0_15] : memref<1024x2xf32, #tpu.memory_space<vmem>>, vector<1024x2xf32>
      %cst_16 = arith.constant dense<0.000000e+00> : vector<2x2xf32>
      %20 = tpu.matmul %18, %19, %cst_16 {dimension_numbers = #tpu.dot_dimension_numbers<[1], [0], [0], [1], [0, 0, 1, 1], [], []>} : vector<2x1024xf32>, vector<1024x2xf32>, vector<2x2xf32> -> vector<2x2xf32>
      %c0_17 = arith.constant 0 : index
      %c0_18 = arith.constant 0 : index
      %21 = vector.load %arg5[%c0_17, %c0_18] : memref<1x2xf32, #tpu.memory_space<vmem>>, vector<1x2xf32>
      %22 = vector.broadcast %21 : vector<1x2xf32> to vector<2x2xf32>
      %23 = arith.addf %20, %22 : vector<2x2xf32>
      %c0_19 = arith.constant 0 : index
      %c0_20 = arith.constant 0 : index
      %24 = vector.load %arg6[%c0_19, %c0_20] : memref<2x2xf32, #tpu.memory_space<vmem>>, vector<2x2xf32>
      tpu.vector_store %arg6[%c0_19, %c0_20], %23 {strides = array<i32>} : memref<2x2xf32, #tpu.memory_space<vmem>>, vector<2x2xf32>,
    } else {
    }
    return
  }
  func.func @transform_0(%arg0: i32) -> (i32, i32) {
    %c0_i32 = arith.constant 0 : i32
    %c0_i32_0 = arith.constant 0 : i32
    return %c0_i32, %arg0 : i32, i32
  }
  func.func @transform_1(%arg0: i32) -> (i32, i32) {
    %c0_i32 = arith.constant 0 : i32
    %c0_i32_0 = arith.constant 0 : i32
    return %arg0, %c0_i32 : i32, i32
  }
  func.func @transform_2(%arg0: i32) -> (i32, i32) {
    %c0_i32 = arith.constant 0 : i32
    %c0_i32_0 = arith.constant 0 : i32
    %c0_i32_1 = arith.constant 0 : i32
    return %c0_i32, %c0_i32_0 : i32, i32
  }
  func.func @transform_3(%arg0: i32) -> (i32, i32) {
    %c0_i32 = arith.constant 0 : i32
    %c0_i32_0 = arith.constant 0 : i32
    %c0_i32_1 = arith.constant 0 : i32
    return %c0_i32, %c0_i32_0 : i32, i32
  }
  func.func @transform_4(%arg0: i32) -> (i32, i32) {
    %c0_i32 = arith.constant 0 : i32
    %c0_i32_0 = arith.constant 0 : i32
    %c0_i32_1 = arith.constant 0 : i32
    return %c0_i32, %c0_i32_0 : i32, i32
  }
  func.func @transform_5(%arg0: i32) -> (i32, i32) {
    %c0_i32 = arith.constant 0 : i32
    %c0_i32_0 = arith.constant 0 : i32
    %c0_i32_1 = arith.constant 0 : i32
    return %c0_i32, %c0_i32_0 : i32, i32
  }
}

</mosaic_0001>

<bundles_post_ra>
// kernel: ddqn4_forward.4
= control target key start
LH: loop header
LB: loop body
LE: loop exit
PB: predicated region body
PF: predicated region fallthrough
CT: control target
= control target key end

     0   :  { %v2018_v0 = vmov 0.0   ;;  %vm814_vm0 = vcmask 261120   ;;  %s5629_s1 = inlined_call_operand.vmem [shape: f32[256,32], index: 1, kind: input, shape index: {}]   ;;  %s5630_s0 = inlined_call_operand.vmem [shape: f32[800,256], index: 0, kind: input, shape index: {}]   ;;  %s5631_s2 = inlined_call_operand.vmem [shape: f32[1,32], index: 2, kind: input, shape index: {}]   ;;  %s5632_s3 = inlined_call_operand.vmem [shape: f32[1,32], index: 3, kind: input, shape index: {}]   ;;  %s5633_s4 = inlined_call_operand.vmem [shape: f32[800,32], index: 4, kind: output, shape index: {}]  }
   0x1   :  { %249 = vmatprep.subr.mxu0 %v2018_v0  ;;  %v232_v1 = vld [vmem:[%s5629_s1 + $0x78] sm:$0xff]  ;;  %v231_v2 = vld [vmem:[%s5629_s1 + $0x70] sm:$0xff]  ;;  %1951 = vmatprep.subr.mxu1 %v2018_v0  ;;  %v230_v3 = vld [vmem:[%s5629_s1 + $0x68] sm:$0xff] }
   0x2   :  { %250 = vmatpush1.msra.mxu0 %v232_v1  ;;  %1983 = vmatpush1.msra.mxu1 %v232_v1  ;;  %v229_v4 = vld [vmem:[%s5629_s1 + $0x60] sm:$0xff]  ;;  %v228_v5 = vld [vmem:[%s5629_s1 + $0x58] sm:$0xff]  ;;  %v227_v6 = vld [vmem:[%s5629_s1 + $0x50] sm:$0xff] }
   0x3   :  { %251 = vmatprep.subr.mxu0 %v2018_v0  ;;  %1952 = vmatprep.subr.mxu1 %v2018_v0  ;;  %v226_v7 = vld [vmem:[%s5629_s1 + $0x48] sm:$0xff]  ;;  %v225_v9 = vld [vmem:[%s5629_s1 + $0x40] sm:$0xff]  ;;  %v224_v10 = vld [vmem:[%s5629_s1 + $0x38] sm:$0xff] }
   0x4   :  { %252 = vmatpush1.msra.mxu0 %v231_v2  ;;  %1984 = vmatpush1.msra.mxu1 %v231_v2  ;;  %v18_v8 = vld [vmem:[%s5630_s0 + $0x8] sm:$0xff]  ;;  %v223_v11 = vld [vmem:[%s5629_s1 + $0x30] sm:$0xff]  ;;  %v221_v13 = vld [vmem:[%s5629_s1 + $0x20] sm:$0xff] }
   0x5   :  { %253 = vmatprep.subr.mxu0 %v2018_v0  ;;  %1953 = vmatprep.subr.mxu1 %v2018_v0  ;;  %v222_v12 = vld [vmem:[%s5629_s1 + $0x28] sm:$0xff]  ;;  %v220_v14 = vld [vmem:[%s5629_s1 + $0x18] sm:$0xff]  ;;  %v219_v15 = vld [vmem:[%s5629_s1 + $0x10] sm:$0xff] }
   0x6   :  { %254 = vmatpush1.msra.mxu0 %v230_v3  ;;  %1985 = vmatpush1.msra.mxu1 %v230_v3  ;;  %v218_v16 = vld [vmem:[%s5629_s1 + $0x8] sm:$0xff]  ;;  %v217_v17 = vld [vmem:[%s5629_s1] sm:$0xff]  ;;  %v248_v18 = vld [vmem:[%s5629_s1 + $0xf8] sm:$0xff] }
   0x7   :  { %255 = vmatprep.subr.mxu0 %v2018_v0  ;;  %1954 = vmatprep.subr.mxu1 %v2018_v0  ;;  %v247_v19 = vld [vmem:[%s5629_s1 + $0xf0] sm:$0xff]  ;;  %v246_v20 = vld [vmem:[%s5629_s1 + $0xe8] sm:$0xff]  ;;  %v245_v21 = vld [vmem:[%s5629_s1 + $0xe0] sm:$0xff] }
   0x8   :  { %256 = vmatpush1.msra.mxu0 %v229_v4  ;;  %1986 = vmatpush1.msra.mxu1 %v229_v4  ;;  %v244_v22 = vld [vmem:[%s5629_s1 + $0xd8] sm:$0xff]  ;;  %v243_v23 = vld [vmem:[%s5629_s1 + $0xd0] sm:$0xff]  ;;  %v242_v24 = vld [vmem:[%s5629_s1 + $0xc8] sm:$0xff] }
   0x9   :  { %257 = vmatprep.subr.mxu0 %v2018_v0  ;;  %1955 = vmatprep.subr.mxu1 %v2018_v0  ;;  %v241_v25 = vld [vmem:[%s5629_s1 + $0xc0] sm:$0xff]  ;;  %v240_v26 = vld [vmem:[%s5629_s1 + $0xb8] sm:$0xff]  ;;  %v239_v27 = vld [vmem:[%s5629_s1 + $0xb0] sm:$0xff] }
   0xa   :  { %258 = vmatpush1.msra.mxu0 %v228_v5  ;;  %1987 = vmatpush1.msra.mxu1 %v228_v5  ;;  %v238_v28 = vld [vmem:[%s5629_s1 + $0xa8] sm:$0xff]  ;;  %v237_v29 = vld [vmem:[%s5629_s1 + $0xa0] sm:$0xff]  ;;  %v236_v30 = vld [vmem:[%s5629_s1 + $0x98] sm:$0xff] }
   0xb   :  { %259 = vmatprep.subr.mxu0 %v2018_v0  ;;  %1956 = vmatprep.subr.mxu1 %v2018_v0  ;;  %v235_v31 = vld [vmem:[%s5629_s1 + $0x90] sm:$0xff]  ;;  %v234_v32 = vld [vmem:[%s5629_s1 + $0x88] sm:$0xff]  ;;  %v233_v33 = vld [vmem:[%s5629_s1 + $0x80] sm:$0xff] }
   0xc   :  { %260 = vmatpush1.msra.mxu0 %v227_v6  ;;  %313 = vmatprep.mubr.f32.mxu0 %v18_v8  ;;  %v17_v34 = vld [vmem:[%s5630_s0] sm:$0xff]  ;;  %v20_v35 = vld [vmem:[%s5630_s0 + $0x18] sm:$0xff]  ;;  %v118_v36 = vld [vmem:[%s5630_s0 + $0x328] sm:$0xff] }
   0xd   :  { %261 = vmatprep.subr.mxu0 %v2018_v0  ;;  %1988 = vmatpush1.msra.mxu1 %v227_v6  ;;  %v117_v37 = vld [vmem:[%s5630_s0 + $0x320] sm:$0xff]  ;;  %v120_v38 = vld [vmem:[%s5630_s0 + $0x338] sm:$0xff]  ;;  %v19_v39 = vld [vmem:[%s5630_s0 + $0x10] sm:$0xff] }
   0xe   :  { %262 = vmatpush1.msra.mxu0 %v226_v7  ;;  %1957 = vmatprep.subr.mxu1 %v2018_v0  ;;  %v22_v40 = vld [vmem:[%s5630_s0 + $0x28] sm:$0xff]  ;;  %v119_v41 = vld [vmem:[%s5630_s0 + $0x330] sm:$0xff]  ;;  %v21_v43 = vld [vmem:[%s5630_s0 + $0x20] sm:$0xff] }
   0xf   :  { %263 = vmatprep.subr.mxu0 %v2018_v0  ;;  %1989 = vmatpush1.msra.mxu1 %v226_v7  ;;  %v122_v42 = vld [vmem:[%s5630_s0 + $0x348] sm:$0xff]  ;;  %v24_v44 = vld [vmem:[%s5630_s0 + $0x38] sm:$0xff]  ;;  %v121_v45 = vld [vmem:[%s5630_s0 + $0x340] sm:$0xff] }
  0x10   :  { %264 = vmatpush1.msra.mxu0 %v225_v9  ;;  %1958 = vmatprep.subr.mxu1 %v2018_v0  ;;  %v124_v46 = vld [vmem:[%s5630_s0 + $0x358] sm:$0xff]  ;;  %v23_v47 = vld [vmem:[%s5630_s0 + $0x30] sm:$0xff]  ;;  %v26_v48 = vld [vmem:[%s5630_s0 + $0x48] sm:$0xff] }
  0x11   :  { %265 = vmatprep.subr.mxu0 %v2018_v0  ;;  %1990 = vmatpush1.msra.mxu1 %v225_v9  ;;  %v123_v49 = vld [vmem:[%s5630_s0 + $0x350] sm:$0xff]  ;;  %v126_v50 = vld [vmem:[%s5630_s0 + $0x368] sm:$0xff]  ;;  %v25_v51 = vld [vmem:[%s5630_s0 + $0x40] sm:$0xff] }
  0x12   :  { %266 = vmatpush1.msra.mxu0 %v224_v10  ;;  %1959 = vmatprep.subr.mxu1 %v2018_v0  ;;  %v28_v52 = vld [vmem:[%s5630_s0 + $0x58] sm:$0xff]  ;;  %v125_v53 = vld [vmem:[%s5630_s0 + $0x360] sm:$0xff]  ;;  %v27_v55 = vld [vmem:[%s5630_s0 + $0x50] sm:$0xff] }
  0x13   :  { %267 = vmatprep.subr.mxu0 %v2018_v0  ;;  %1991 = vmatpush1.msra.mxu1 %v224_v10  ;;  %v128_v54 = vld [vmem:[%s5630_s0 + $0x378] sm:$0xff]  ;;  %v30_v56 = vld [vmem:[%s5630_s0 + $0x68] sm:$0xff]  ;;  %v127_v57 = vld [vmem:[%s5630_s0 + $0x370] sm:$0xff] }
  0x14   :  { %268 = vmatpush1.msra.mxu0 %v223_v11  ;;  %1960 = vmatprep.subr.mxu1 %v2018_v0  ;;  %v130_v58 = vld [vmem:[%s5630_s0 + $0x388] sm:$0xff]  ;;  %v29_v59 = vld [vmem:[%s5630_s0 + $0x60] sm:$0xff]  ;;  %v32_v60 = vld [vmem:[%s5630_s0 + $0x78] sm:$0xff] }
  0x15   :  { %269 = vmatprep.subr.mxu0 %v2018_v0  ;;  %1992 = vmatpush1.msra.mxu1 %v223_v11  ;;  %v129_v61 = vld [vmem:[%s5630_s0 + $0x380] sm:$0xff]  ;;  %v132_v62 = vld [vmem:[%s5630_s0 + $0x398] sm:$0xff]  ;;  %v31_v63 = vld [vmem:[%s5630_s0 + $0x70] sm:$0xff] }
  0x16   :  { %270 = vmatpush1.msra.mxu0 %v222_v12  ;;  %1961 = vmatprep.subr.mxu1 %v2018_v0  ;;  %v131_v1 = vld [vmem:[%s5630_s0 + $0x390] sm:$0xff]  ;;  %v134_v2 = vld [vmem:[%s5630_s0 + $0x3a8] sm:$0xff]  ;;  %v33_v3 = vld [vmem:[%s5630_s0 + $0x80] sm:$0xff] }
  0x17   :  { %271 = vmatprep.subr.mxu0 %v2018_v0  ;;  %1993 = vmatpush1.msra.mxu1 %v222_v12  ;;  %v36_v4 = vld [vmem:[%s5630_s0 + $0x98] sm:$0xff]  ;;  %v133_v5 = vld [vmem:[%s5630_s0 + $0x3a0] sm:$0xff]  ;;  %v35_v7 = vld [vmem:[%s5630_s0 + $0x90] sm:$0xff] }
  0x18   :  { %272 = vmatpush1.msra.mxu0 %v221_v13  ;;  %1962 = vmatprep.subr.mxu1 %v2018_v0  ;;  %v136_v6 = vld [vmem:[%s5630_s0 + $0x3b8] sm:$0xff]  ;;  %v38_v8 = vld [vmem:[%s5630_s0 + $0xa8] sm:$0xff]  ;;  %v135_v9 = vld [vmem:[%s5630_s0 + $0x3b0] sm:$0xff] }
  0x19   :  { %273 = vmatprep.subr.mxu0 %v2018_v0  ;;  %1994 = vmatpush1.msra.mxu1 %v221_v13  ;;  %v138_v10 = vld [vmem:[%s5630_s0 + $0x3c8] sm:$0xff]  ;;  %v37_v11 = vld [vmem:[%s5630_s0 + $0xa0] sm:$0xff]  ;;  %v40_v12 = vld [vmem:[%s5630_s0 + $0xb8] sm:$0xff] }
  0x1a   :  { %274 = vmatpush1.msra.mxu0 %v220_v14  ;;  %1963 = vmatprep.subr.mxu1 %v2018_v0  ;;  %v137_v13 = vld [vmem:[%s5630_s0 + $0x3c0] sm:$0xff] }
  0x1b   :  { %275 = vmatprep.subr.mxu0 %v2018_v0  ;;  %1995 = vmatpush1.msra.mxu1 %v220_v14  ;;  %v140_v14 = vld [vmem:[%s5630_s0 + $0x3d8] sm:$0xff] }
  0x1c   :  { %276 = vmatpush1.msra.mxu0 %v219_v15  ;;  %1964 = vmatprep.subr.mxu1 %v2018_v0 }
  0x1d   :  { %277 = vmatprep.subr.mxu0 %v2018_v0  ;;  %1996 = vmatpush1.msra.mxu1 %v219_v15  ;;  %v39_v15 = vld [vmem:[%s5630_s0 + $0xb0] sm:$0xff] }
  0x1e   :  { %278 = vmatpush1.msra.mxu0 %v218_v16  ;;  %1965 = vmatprep.subr.mxu1 %v2018_v0 }
  0x1f   :  { %279 = vmatprep.subr.mxu0 %v2018_v0  ;;  %1997 = vmatpush1.msra.mxu1 %v218_v16  ;;  %v42_v16 = vld [vmem:[%s5630_s0 + $0xc8] sm:$0xff] }
  0x20   :  { %280 = vmatpush1.msra.mxu0 %v217_v17  ;;  %1966 = vmatprep.subr.mxu1 %v2018_v0 }
  0x21   :  { %281 = vmatprep.subr.mxu0 %v2018_v0  ;;  %1998 = vmatpush1.msra.mxu1 %v217_v17  ;;  %v139_v17 = vld [vmem:[%s5630_s0 + $0x3d0] sm:$0xff] }
  0x22   :  { %282 = vmatpush2.msra.mxu0 %v248_v18  ;;  %1967 = vmatprep.subr.mxu1 %v2018_v0 }
  0x23   :  { %283 = vmatprep.subr.mxu0 %v2018_v0  ;;  %1999 = vmatpush2.msra.mxu1 %v248_v18  ;;  %v142_v18 = vld [vmem:[%s5630_s0 + $0x3e8] sm:$0xff] }
  0x24   :  { %284 = vmatpush2.msra.mxu0 %v247_v19  ;;  %1968 = vmatprep.subr.mxu1 %v2018_v0 }
  0x25   :  { %285 = vmatprep.subr.mxu0 %v2018_v0  ;;  %2000 = vmatpush2.msra.mxu1 %v247_v19  ;;  %v41_v19 = vld [vmem:[%s5630_s0 + $0xc0] sm:$0xff] }
  0x26   :  { %286 = vmatpush2.msra.mxu0 %v246_v20  ;;  %1969 = vmatprep.subr.mxu1 %v2018_v0 }
  0x27   :  { %287 = vmatprep.subr.mxu0 %v2018_v0  ;;  %2001 = vmatpush2.msra.mxu1 %v246_v20  ;;  %v44_v20 = vld [vmem:[%s5630_s0 + $0xd8] sm:$0xff] }
  0x28   :  { %288 = vmatpush2.msra.mxu0 %v245_v21  ;;  %1970 = vmatprep.subr.mxu1 %v2018_v0 }
  0x29   :  { %289 = vmatprep.subr.mxu0 %v2018_v0  ;;  %2002 = vmatpush2.msra.mxu1 %v245_v21  ;;  %v141_v21 = vld [vmem:[%s5630_s0 + $0x3e0] sm:$0xff] }
  0x2a   :  { %290 = vmatpush2.msra.mxu0 %v244_v22  ;;  %1971 = vmatprep.subr.mxu1 %v2018_v0 }
  0x2b   :  { %291 = vmatprep.subr.mxu0 %v2018_v0  ;;  %2003 = vmatpush2.msra.mxu1 %v244_v22  ;;  %v144_v22 = vld [vmem:[%s5630_s0 + $0x3f8] sm:$0xff] }
  0x2c   :  { %292 = vmatpush2.msra.mxu0 %v243_v23  ;;  %1972 = vmatprep.subr.mxu1 %v2018_v0 }
  0x2d   :  { %293 = vmatprep.subr.mxu0 %v2018_v0  ;;  %2004 = vmatpush2.msra.mxu1 %v243_v23  ;;  %v43_v23 = vld [vmem:[%s5630_s0 + $0xd0] sm:$0xff] }
  0x2e   :  { %294 = vmatpush2.msra.mxu0 %v242_v24  ;;  %1973 = vmatprep.subr.mxu1 %v2018_v0 }
  0x2f   :  { %295 = vmatprep.subr.mxu0 %v2018_v0  ;;  %2005 = vmatpush2.msra.mxu1 %v242_v24  ;;  %v46_v24 = vld [vmem:[%s5630_s0 + $0xe8] sm:$0xff] }
  0x30   :  { %296 = vmatpush2.msra.mxu0 %v241_v25  ;;  %1974 = vmatprep.subr.mxu1 %v2018_v0 }
  0x31   :  { %297 = vmatprep.subr.mxu0 %v2018_v0  ;;  %2006 = vmatpush2.msra.mxu1 %v241_v25  ;;  %v143_v25 = vld [vmem:[%s5630_s0 + $0x3f0] sm:$0xff] }
  0x32   :  { %298 = vmatpush2.msra.mxu0 %v240_v26  ;;  %1975 = vmatprep.subr.mxu1 %v2018_v0 }
  0x33   :  { %299 = vmatprep.subr.mxu0 %v2018_v0  ;;  %2007 = vmatpush2.msra.mxu1 %v240_v26  ;;  %v146_v26 = vld [vmem:[%s5630_s0 + $0x408] sm:$0xff] }
  0x34   :  { %300 = vmatpush2.msra.mxu0 %v239_v27  ;;  %1976 = vmatprep.subr.mxu1 %v2018_v0 }
  0x35   :  { %301 = vmatprep.subr.mxu0 %v2018_v0  ;;  %2008 = vmatpush2.msra.mxu1 %v239_v27  ;;  %v45_v27 = vld [vmem:[%s5630_s0 + $0xe0] sm:$0xff] }
  0x36   :  { %302 = vmatpush2.msra.mxu0 %v238_v28  ;;  %1977 = vmatprep.subr.mxu1 %v2018_v0 }
  0x37   :  { %303 = vmatprep.subr.mxu0 %v2018_v0  ;;  %2009 = vmatpush2.msra.mxu1 %v238_v28  ;;  %v48_v28 = vld [vmem:[%s5630_s0 + $0xf8] sm:$0xff] }
  0x38   :  { %304 = vmatpush2.msra.mxu0 %v237_v29  ;;  %1978 = vmatprep.subr.mxu1 %v2018_v0 }
  0x39   :  { %305 = vmatprep.subr.mxu0 %v2018_v0  ;;  %2010 = vmatpush2.msra.mxu1 %v237_v29  ;;  %v145_v29 = vld [vmem:[%s5630_s0 + $0x400] sm:$0xff] }
  0x3a   :  { %306 = vmatpush2.msra.mxu0 %v236_v30  ;;  %1979 = vmatprep.subr.mxu1 %v2018_v0 }
  0x3b   :  { %307 = vmatprep.subr.mxu0 %v2018_v0  ;;  %2011 = vmatpush2.msra.mxu1 %v236_v30  ;;  %v148_v30 = vld [vmem:[%s5630_s0 + $0x418] sm:$0xff] }
  0x3c   :  { %308 = vmatpush2.msra.mxu0 %v235_v31  ;;  %1980 = vmatprep.subr.mxu1 %v2018_v0 }
  0x3d   :  { %309 = vmatprep.subr.mxu0 %v2018_v0  ;;  %2012 = vmatpush2.msra.mxu1 %v235_v31  ;;  %v47_v31 = vld [vmem:[%s5630_s0 + $0xf0] sm:$0xff] }
  0x3e   :  { %310 = vmatpush2.msra.mxu0 %v234_v32  ;;  %1981 = vmatprep.subr.mxu1 %v2018_v0 }
  0x3f   :  { %311 = vmatprep.subr.mxu0 %v2018_v0  ;;  %2013 = vmatpush2.msra.mxu1 %v234_v32  ;;  %v50_v32 = vld [vmem:[%s5630_s0 + $0x108] sm:$0xff] }
  0x40   :  { %312 = vmatpush2.msra.mxu0 %v233_v33  ;;  %1982 = vmatprep.subr.mxu1 %v2018_v0  ;;  %v34_v0 = vld [vmem:[%s5630_s0 + $0x88] sm:$0xff] }
  0x41   :  { %314 = vmatmul.mubr.f32.vlgmr.msra.gmra.mxu0 %v17_v34  ;;  %2014 = vmatpush2.msra.mxu1 %v233_v33  ;;  %v147_v33 = vld [vmem:[%s5630_s0 + $0x410] sm:$0xff]  ;;  %v150_v34 = vld [vmem:[%s5630_s0 + $0x428] sm:$0xff] }
  0x42   :  { %318 = vmatprep.mubr.f32.mxu0 %v20_v35  ;;  %563 = vmatprep.mubr.f32.mxu1 %v118_v36  ;;  %v49_v35 = vld [vmem:[%s5630_s0 + $0x100] sm:$0xff]  ;;  %v52_v36 = vld [vmem:[%s5630_s0 + $0x118] sm:$0xff] }
  0x43   :  { %564 = vmatmul.mubr.f32.vlgmr.msra.gmra.mxu1 %v117_v37  ;;  %v149_v37 = vld [vmem:[%s5630_s0 + $0x420] sm:$0xff] }
  0x44   :  { %568 = vmatprep.mubr.f32.mxu1 %v120_v38  ;;  %v152_v38 = vld [vmem:[%s5630_s0 + $0x438] sm:$0xff] }
  0x45   :  { %319 = vmatmul.mubr.f32.gmra.mxu0 %v19_v39  ;;  %v51_v39 = vld [vmem:[%s5630_s0 + $0x110] sm:$0xff] }
  0x46   :  { %323 = vmatprep.mubr.f32.mxu0 %v22_v40  ;;  %v54_v40 = vld [vmem:[%s5630_s0 + $0x128] sm:$0xff] }
  0x47   :  { %569 = vmatmul.mubr.f32.gmra.mxu1 %v119_v41  ;;  %v151_v41 = vld [vmem:[%s5630_s0 + $0x430] sm:$0xff] }
  0x48   :  { %573 = vmatprep.mubr.f32.mxu1 %v122_v42  ;;  %v154_v42 = vld [vmem:[%s5630_s0 + $0x448] sm:$0xff] }
  0x49   :  { %324 = vmatmul.mubr.f32.gmra.mxu0 %v21_v43  ;;  %v53_v43 = vld [vmem:[%s5630_s0 + $0x120] sm:$0xff] }
  0x4a   :  { %328 = vmatprep.mubr.f32.mxu0 %v24_v44  ;;  %v56_v44 = vld [vmem:[%s5630_s0 + $0x138] sm:$0xff] }
  0x4b   :  { %574 = vmatmul.mubr.f32.gmra.mxu1 %v121_v45  ;;  %v153_v45 = vld [vmem:[%s5630_s0 + $0x440] sm:$0xff] }
  0x4c   :  { %578 = vmatprep.mubr.f32.mxu1 %v124_v46  ;;  %v156_v46 = vld [vmem:[%s5630_s0 + $0x458] sm:$0xff] }
  0x4d   :  { %329 = vmatmul.mubr.f32.gmra.mxu0 %v23_v47  ;;  %v55_v47 = vld [vmem:[%s5630_s0 + $0x130] sm:$0xff] }
  0x4e   :  { %333 = vmatprep.mubr.f32.mxu0 %v26_v48  ;;  %v58_v48 = vld [vmem:[%s5630_s0 + $0x148] sm:$0xff] }
  0x4f   :  { %579 = vmatmul.mubr.f32.gmra.mxu1 %v123_v49  ;;  %v155_v49 = vld [vmem:[%s5630_s0 + $0x450] sm:$0xff] }
  0x50   :  { %583 = vmatprep.mubr.f32.mxu1 %v126_v50  ;;  %v158_v50 = vld [vmem:[%s5630_s0 + $0x468] sm:$0xff] }
  0x51   :  { %334 = vmatmul.mubr.f32.gmra.mxu0 %v25_v51  ;;  %v57_v51 = vld [vmem:[%s5630_s0 + $0x140] sm:$0xff] }
  0x52   :  { %338 = vmatprep.mubr.f32.mxu0 %v28_v52  ;;  %v60_v52 = vld [vmem:[%s5630_s0 + $0x158] sm:$0xff] }
  0x53   :  { %584 = vmatmul.mubr.f32.gmra.mxu1 %v125_v53  ;;  %v157_v53 = vld [vmem:[%s5630_s0 + $0x460] sm:$0xff] }
  0x54   :  { %588 = vmatprep.mubr.f32.mxu1 %v128_v54  ;;  %v160_v54 = vld [vmem:[%s5630_s0 + $0x478] sm:$0xff] }
  0x55   :  { %339 = vmatmul.mubr.f32.gmra.mxu0 %v27_v55  ;;  %v59_v55 = vld [vmem:[%s5630_s0 + $0x150] sm:$0xff] }
  0x56   :  { %343 = vmatprep.mubr.f32.mxu0 %v30_v56  ;;  %v62_v56 = vld [vmem:[%s5630_s0 + $0x168] sm:$0xff] }
  0x57   :  { %589 = vmatmul.mubr.f32.gmra.mxu1 %v127_v57  ;;  %v159_v57 = vld [vmem:[%s5630_s0 + $0x470] sm:$0xff] }
  0x58   :  { %593 = vmatprep.mubr.f32.mxu1 %v130_v58  ;;  %v162_v58 = vld [vmem:[%s5630_s0 + $0x488] sm:$0xff] }
  0x59   :  { %344 = vmatmul.mubr.f32.gmra.mxu0 %v29_v59  ;;  %v61_v59 = vld [vmem:[%s5630_s0 + $0x160] sm:$0xff] }
  0x5a   :  { %348 = vmatprep.mubr.f32.mxu0 %v32_v60  ;;  %v64_v60 = vld [vmem:[%s5630_s0 + $0x178] sm:$0xff] }
  0x5b   :  { %594 = vmatmul.mubr.f32.gmra.mxu1 %v129_v61  ;;  %v161_v61 = vld [vmem:[%s5630_s0 + $0x480] sm:$0xff] }
  0x5c   :  { %598 = vmatprep.mubr.f32.mxu1 %v132_v62  ;;  %v164_v62 = vld [vmem:[%s5630_s0 + $0x498] sm:$0xff] }
  0x5d   :  { %349 = vmatmul.mubr.f32.gmra.mxu0 %v31_v63  ;;  %v63_v63 = vld [vmem:[%s5630_s0 + $0x170] sm:$0xff] }
  0x5e   :  { %353 = vmatprep.mubr.f32.mxu0 %v34_v0  ;;  %v66_v0 = vld [vmem:[%s5630_s0 + $0x188] sm:$0xff] }
  0x5f   :  { %599 = vmatmul.mubr.f32.gmra.mxu1 %v131_v1  ;;  %v163_v1 = vld [vmem:[%s5630_s0 + $0x490] sm:$0xff] }
  0x60   :  { %603 = vmatprep.mubr.f32.mxu1 %v134_v2  ;;  %v166_v2 = vld [vmem:[%s5630_s0 + $0x4a8] sm:$0xff] }
  0x61   :  { %354 = vmatmul.mubr.f32.gmra.mxu0 %v33_v3  ;;  %v65_v3 = vld [vmem:[%s5630_s0 + $0x180] sm:$0xff] }
  0x62   :  { %358 = vmatprep.mubr.f32.mxu0 %v36_v4  ;;  %v68_v4 = vld [vmem:[%s5630_s0 + $0x198] sm:$0xff] }
  0x63   :  { %604 = vmatmul.mubr.f32.gmra.mxu1 %v133_v5  ;;  %v165_v5 = vld [vmem:[%s5630_s0 + $0x4a0] sm:$0xff] }
  0x64   :  { %608 = vmatprep.mubr.f32.mxu1 %v136_v6  ;;  %v168_v6 = vld [vmem:[%s5630_s0 + $0x4b8] sm:$0xff] }
  0x65   :  { %359 = vmatmul.mubr.f32.gmra.mxu0 %v35_v7  ;;  %v67_v7 = vld [vmem:[%s5630_s0 + $0x190] sm:$0xff] }
  0x66   :  { %363 = vmatprep.mubr.f32.mxu0 %v38_v8  ;;  %v70_v8 = vld [vmem:[%s5630_s0 + $0x1a8] sm:$0xff] }
  0x67   :  { %609 = vmatmul.mubr.f32.gmra.mxu1 %v135_v9  ;;  %v167_v9 = vld [vmem:[%s5630_s0 + $0x4b0] sm:$0xff] }
  0x68   :  { %613 = vmatprep.mubr.f32.mxu1 %v138_v10  ;;  %v170_v10 = vld [vmem:[%s5630_s0 + $0x4c8] sm:$0xff] }
  0x69   :  { %364 = vmatmul.mubr.f32.gmra.mxu0 %v37_v11  ;;  %v69_v11 = vld [vmem:[%s5630_s0 + $0x1a0] sm:$0xff] }
  0x6a   :  { %368 = vmatprep.mubr.f32.mxu0 %v40_v12  ;;  %v72_v12 = vld [vmem:[%s5630_s0 + $0x1b8] sm:$0xff] }
  0x6b   :  { %614 = vmatmul.mubr.f32.gmra.mxu1 %v137_v13  ;;  %v169_v13 = vld [vmem:[%s5630_s0 + $0x4c0] sm:$0xff] }
  0x6c   :  { %618 = vmatprep.mubr.f32.mxu1 %v140_v14  ;;  %v172_v14 = vld [vmem:[%s5630_s0 + $0x4d8] sm:$0xff] }
  0x6d   :  { %369 = vmatmul.mubr.f32.gmra.mxu0 %v39_v15  ;;  %v71_v15 = vld [vmem:[%s5630_s0 + $0x1b0] sm:$0xff] }
  0x6e   :  { %373 = vmatprep.mubr.f32.mxu0 %v42_v16  ;;  %v74_v16 = vld [vmem:[%s5630_s0 + $0x1c8] sm:$0xff] }
  0x6f   :  { %619 = vmatmul.mubr.f32.gmra.mxu1 %v139_v17  ;;  %v171_v17 = vld [vmem:[%s5630_s0 + $0x4d0] sm:$0xff] }
  0x70   :  { %623 = vmatprep.mubr.f32.mxu1 %v142_v18  ;;  %v174_v18 = vld [vmem:[%s5630_s0 + $0x4e8] sm:$0xff] }
  0x71   :  { %374 = vmatmul.mubr.f32.gmra.mxu0 %v41_v19  ;;  %v73_v19 = vld [vmem:[%s5630_s0 + $0x1c0] sm:$0xff] }
  0x72   :  { %378 = vmatprep.mubr.f32.mxu0 %v44_v20  ;;  %v76_v20 = vld [vmem:[%s5630_s0 + $0x1d8] sm:$0xff] }
  0x73   :  { %624 = vmatmul.mubr.f32.gmra.mxu1 %v141_v21  ;;  %v173_v21 = vld [vmem:[%s5630_s0 + $0x4e0] sm:$0xff] }
  0x74   :  { %628 = vmatprep.mubr.f32.mxu1 %v144_v22  ;;  %v176_v22 = vld [vmem:[%s5630_s0 + $0x4f8] sm:$0xff] }
  0x75   :  { %379 = vmatmul.mubr.f32.gmra.mxu0 %v43_v23  ;;  %v75_v23 = vld [vmem:[%s5630_s0 + $0x1d0] sm:$0xff] }
  0x76   :  { %383 = vmatprep.mubr.f32.mxu0 %v46_v24  ;;  %v78_v24 = vld [vmem:[%s5630_s0 + $0x1e8] sm:$0xff] }
  0x77   :  { %629 = vmatmul.mubr.f32.gmra.mxu1 %v143_v25  ;;  %v175_v25 = vld [vmem:[%s5630_s0 + $0x4f0] sm:$0xff] }
  0x78   :  { %633 = vmatprep.mubr.f32.mxu1 %v146_v26  ;;  %v178_v26 = vld [vmem:[%s5630_s0 + $0x508] sm:$0xff] }
  0x79   :  { %384 = vmatmul.mubr.f32.gmra.mxu0 %v45_v27  ;;  %v77_v27 = vld [vmem:[%s5630_s0 + $0x1e0] sm:$0xff] }
  0x7a   :  { %388 = vmatprep.mubr.f32.mxu0 %v48_v28  ;;  %v80_v28 = vld [vmem:[%s5630_s0 + $0x1f8] sm:$0xff] }
  0x7b   :  { %634 = vmatmul.mubr.f32.gmra.mxu1 %v145_v29  ;;  %v177_v29 = vld [vmem:[%s5630_s0 + $0x500] sm:$0xff] }
  0x7c   :  { %638 = vmatprep.mubr.f32.mxu1 %v148_v30  ;;  %v180_v30 = vld [vmem:[%s5630_s0 + $0x518] sm:$0xff] }
  0x7d   :  { %389 = vmatmul.mubr.f32.gmra.mxu0 %v47_v31  ;;  %v79_v31 = vld [vmem:[%s5630_s0 + $0x1f0] sm:$0xff] }
  0x7e   :  { %393 = vmatprep.mubr.f32.mxu0 %v50_v32  ;;  %v82_v32 = vld [vmem:[%s5630_s0 + $0x208] sm:$0xff] }
  0x7f   :  { %639 = vmatmul.mubr.f32.gmra.mxu1 %v147_v33  ;;  %v179_v33 = vld [vmem:[%s5630_s0 + $0x510] sm:$0xff] }
  0x80   :  { %643 = vmatprep.mubr.f32.mxu1 %v150_v34  ;;  %v182_v34 = vld [vmem:[%s5630_s0 + $0x528] sm:$0xff] }
  0x81   :  { %394 = vmatmul.mubr.f32.gmra.mxu0 %v49_v35  ;;  %v81_v35 = vld [vmem:[%s5630_s0 + $0x200] sm:$0xff] }
  0x82   :  { %398 = vmatprep.mubr.f32.mxu0 %v52_v36  ;;  %v84_v36 = vld [vmem:[%s5630_s0 + $0x218] sm:$0xff] }
  0x83   :  { %644 = vmatmul.mubr.f32.gmra.mxu1 %v149_v37  ;;  %v181_v37 = vld [vmem:[%s5630_s0 + $0x520] sm:$0xff] }
  0x84   :  { %648 = vmatprep.mubr.f32.mxu1 %v152_v38  ;;  %v184_v38 = vld [vmem:[%s5630_s0 + $0x538] sm:$0xff] }
  0x85   :  { %399 = vmatmul.mubr.f32.gmra.mxu0 %v51_v39  ;;  %v83_v39 = vld [vmem:[%s5630_s0 + $0x210] sm:$0xff] }
  0x86   :  { %403 = vmatprep.mubr.f32.mxu0 %v54_v40  ;;  %v86_v40 = vld [vmem:[%s5630_s0 + $0x228] sm:$0xff] }
  0x87   :  { %649 = vmatmul.mubr.f32.gmra.mxu1 %v151_v41  ;;  %v183_v41 = vld [vmem:[%s5630_s0 + $0x530] sm:$0xff] }
  0x88   :  { %653 = vmatprep.mubr.f32.mxu1 %v154_v42  ;;  %v186_v42 = vld [vmem:[%s5630_s0 + $0x548] sm:$0xff] }
  0x89   :  { %404 = vmatmul.mubr.f32.gmra.mxu0 %v53_v43  ;;  %v85_v43 = vld [vmem:[%s5630_s0 + $0x220] sm:$0xff] }
  0x8a   :  { %408 = vmatprep.mubr.f32.mxu0 %v56_v44  ;;  %v88_v44 = vld [vmem:[%s5630_s0 + $0x238] sm:$0xff] }
  0x8b   :  { %654 = vmatmul.mubr.f32.gmra.mxu1 %v153_v45  ;;  %v185_v45 = vld [vmem:[%s5630_s0 + $0x540] sm:$0xff] }
  0x8c   :  { %658 = vmatprep.mubr.f32.mxu1 %v156_v46  ;;  %v188_v46 = vld [vmem:[%s5630_s0 + $0x558] sm:$0xff] }
  0x8d   :  { %409 = vmatmul.mubr.f32.gmra.mxu0 %v55_v47  ;;  %v87_v47 = vld [vmem:[%s5630_s0 + $0x230] sm:$0xff] }
  0x8e   :  { %413 = vmatprep.mubr.f32.mxu0 %v58_v48  ;;  %v90_v48 = vld [vmem:[%s5630_s0 + $0x248] sm:$0xff] }
  0x8f   :  { %659 = vmatmul.mubr.f32.gmra.mxu1 %v155_v49  ;;  %v187_v49 = vld [vmem:[%s5630_s0 + $0x550] sm:$0xff] }
  0x90   :  { %663 = vmatprep.mubr.f32.mxu1 %v158_v50  ;;  %v190_v50 = vld [vmem:[%s5630_s0 + $0x568] sm:$0xff] }
  0x91   :  { %414 = vmatmul.mubr.f32.gmra.mxu0 %v57_v51  ;;  %v89_v51 = vld [vmem:[%s5630_s0 + $0x240] sm:$0xff] }
  0x92   :  { %418 = vmatprep.mubr.f32.mxu0 %v60_v52  ;;  %v92_v52 = vld [vmem:[%s5630_s0 + $0x258] sm:$0xff] }
  0x93   :  { %664 = vmatmul.mubr.f32.gmra.mxu1 %v157_v53  ;;  %v189_v53 = vld [vmem:[%s5630_s0 + $0x560] sm:$0xff] }
  0x94   :  { %668 = vmatprep.mubr.f32.mxu1 %v160_v54  ;;  %v192_v54 = vld [vmem:[%s5630_s0 + $0x578] sm:$0xff] }
  0x95   :  { %419 = vmatmul.mubr.f32.gmra.mxu0 %v59_v55  ;;  %v91_v55 = vld [vmem:[%s5630_s0 + $0x250] sm:$0xff] }
  0x96   :  { %423 = vmatprep.mubr.f32.mxu0 %v62_v56  ;;  %v94_v56 = vld [vmem:[%s5630_s0 + $0x268] sm:$0xff] }
  0x97   :  { %669 = vmatmul.mubr.f32.gmra.mxu1 %v159_v57  ;;  %v191_v57 = vld [vmem:[%s5630_s0 + $0x570] sm:$0xff] }
  0x98   :  { %673 = vmatprep.mubr.f32.mxu1 %v162_v58  ;;  %v194_v58 = vld [vmem:[%s5630_s0 + $0x588] sm:$0xff] }
  0x99   :  { %424 = vmatmul.mubr.f32.gmra.mxu0 %v61_v59  ;;  %v93_v59 = vld [vmem:[%s5630_s0 + $0x260] sm:$0xff] }
  0x9a   :  { %428 = vmatprep.mubr.f32.mxu0 %v64_v60  ;;  %v96_v60 = vld [vmem:[%s5630_s0 + $0x278] sm:$0xff] }
  0x9b   :  { %674 = vmatmul.mubr.f32.gmra.mxu1 %v161_v61  ;;  %v193_v61 = vld [vmem:[%s5630_s0 + $0x580] sm:$0xff] }
  0x9c   :  { %678 = vmatprep.mubr.f32.mxu1 %v164_v62  ;;  %v196_v62 = vld [vmem:[%s5630_s0 + $0x598] sm:$0xff] }
  0x9d   :  { %429 = vmatmul.mubr.f32.gmra.mxu0 %v63_v63  ;;  %v95_v63 = vld [vmem:[%s5630_s0 + $0x270] sm:$0xff] }
  0x9e   :  { %433 = vmatprep.mubr.f32.mxu0 %v66_v0  ;;  %v98_v0 = vld [vmem:[%s5630_s0 + $0x288] sm:$0xff] }
  0x9f   :  { %679 = vmatmul.mubr.f32.gmra.mxu1 %v163_v1  ;;  %v195_v1 = vld [vmem:[%s5630_s0 + $0x590] sm:$0xff] }
  0xa0   :  { %683 = vmatprep.mubr.f32.mxu1 %v166_v2  ;;  %v198_v2 = vld [vmem:[%s5630_s0 + $0x5a8] sm:$0xff] }
  0xa1   :  { %434 = vmatmul.mubr.f32.gmra.mxu0 %v65_v3  ;;  %v97_v3 = vld [vmem:[%s5630_s0 + $0x280] sm:$0xff] }
  0xa2   :  { %438 = vmatprep.mubr.f32.mxu0 %v68_v4  ;;  %v100_v4 = vld [vmem:[%s5630_s0 + $0x298] sm:$0xff] }
  0xa3   :  { %684 = vmatmul.mubr.f32.gmra.mxu1 %v165_v5  ;;  %v197_v5 = vld [vmem:[%s5630_s0 + $0x5a0] sm:$0xff] }
  0xa4   :  { %688 = vmatprep.mubr.f32.mxu1 %v168_v6  ;;  %v200_v6 = vld [vmem:[%s5630_s0 + $0x5b8] sm:$0xff] }
  0xa5   :  { %439 = vmatmul.mubr.f32.gmra.mxu0 %v67_v7  ;;  %v99_v7 = vld [vmem:[%s5630_s0 + $0x290] sm:$0xff] }
  0xa6   :  { %443 = vmatprep.mubr.f32.mxu0 %v70_v8  ;;  %v102_v8 = vld [vmem:[%s5630_s0 + $0x2a8] sm:$0xff] }
  0xa7   :  { %689 = vmatmul.mubr.f32.gmra.mxu1 %v167_v9  ;;  %v199_v9 = vld [vmem:[%s5630_s0 + $0x5b0] sm:$0xff] }
  0xa8   :  { %693 = vmatprep.mubr.f32.mxu1 %v170_v10  ;;  %v202_v10 = vld [vmem:[%s5630_s0 + $0x5c8] sm:$0xff] }
  0xa9   :  { %444 = vmatmul.mubr.f32.gmra.mxu0 %v69_v11  ;;  %v101_v11 = vld [vmem:[%s5630_s0 + $0x2a0] sm:$0xff] }
  0xaa   :  { %448 = vmatprep.mubr.f32.mxu0 %v72_v12  ;;  %v104_v12 = vld [vmem:[%s5630_s0 + $0x2b8] sm:$0xff] }
  0xab   :  { %694 = vmatmul.mubr.f32.gmra.mxu1 %v169_v13  ;;  %v201_v13 = vld [vmem:[%s5630_s0 + $0x5c0] sm:$0xff] }
  0xac   :  { %698 = vmatprep.mubr.f32.mxu1 %v172_v14  ;;  %v204_v14 = vld [vmem:[%s5630_s0 + $0x5d8] sm:$0xff] }
  0xad   :  { %449 = vmatmul.mubr.f32.gmra.mxu0 %v71_v15  ;;  %v103_v15 = vld [vmem:[%s5630_s0 + $0x2b0] sm:$0xff] }
  0xae   :  { %453 = vmatprep.mubr.f32.mxu0 %v74_v16  ;;  %v106_v16 = vld [vmem:[%s5630_s0 + $0x2c8] sm:$0xff] }
  0xaf   :  { %699 = vmatmul.mubr.f32.gmra.mxu1 %v171_v17  ;;  %v203_v17 = vld [vmem:[%s5630_s0 + $0x5d0] sm:$0xff] }
  0xb0   :  { %703 = vmatprep.mubr.f32.mxu1 %v174_v18  ;;  %v206_v18 = vld [vmem:[%s5630_s0 + $0x5e8] sm:$0xff] }
  0xb1   :  { %454 = vmatmul.mubr.f32.gmra.mxu0 %v73_v19  ;;  %v105_v19 = vld [vmem:[%s5630_s0 + $0x2c0] sm:$0xff] }
  0xb2   :  { %458 = vmatprep.mubr.f32.mxu0 %v76_v20  ;;  %v108_v20 = vld [vmem:[%s5630_s0 + $0x2d8] sm:$0xff] }
  0xb3   :  { %704 = vmatmul.mubr.f32.gmra.mxu1 %v173_v21  ;;  %v205_v21 = vld [vmem:[%s5630_s0 + $0x5e0] sm:$0xff] }
  0xb4   :  { %708 = vmatprep.mubr.f32.mxu1 %v176_v22  ;;  %v208_v22 = vld [vmem:[%s5630_s0 + $0x5f8] sm:$0xff] }
  0xb5   :  { %459 = vmatmul.mubr.f32.gmra.mxu0 %v75_v23  ;;  %v107_v23 = vld [vmem:[%s5630_s0 + $0x2d0] sm:$0xff] }
  0xb6   :  { %463 = vmatprep.mubr.f32.mxu0 %v78_v24  ;;  %v110_v24 = vld [vmem:[%s5630_s0 + $0x2e8] sm:$0xff] }
  0xb7   :  { %709 = vmatmul.mubr.f32.gmra.mxu1 %v175_v25  ;;  %v207_v25 = vld [vmem:[%s5630_s0 + $0x5f0] sm:$0xff] }
  0xb8   :  { %713 = vmatprep.mubr.f32.mxu1 %v178_v26  ;;  %v210_v26 = vld [vmem:[%s5630_s0 + $0x608] sm:$0xff] }
  0xb9   :  { %464 = vmatmul.mubr.f32.gmra.mxu0 %v77_v27  ;;  %v109_v27 = vld [vmem:[%s5630_s0 + $0x2e0] sm:$0xff] }
  0xba   :  { %468 = vmatprep.mubr.f32.mxu0 %v80_v28  ;;  %v112_v28 = vld [vmem:[%s5630_s0 + $0x2f8] sm:$0xff] }
  0xbb   :  { %714 = vmatmul.mubr.f32.gmra.mxu1 %v177_v29  ;;  %v209_v29 = vld [vmem:[%s5630_s0 + $0x600] sm:$0xff] }
  0xbc   :  { %718 = vmatprep.mubr.f32.mxu1 %v180_v30  ;;  %v212_v30 = vld [vmem:[%s5630_s0 + $0x618] sm:$0xff] }
  0xbd   :  { %469 = vmatmul.mubr.f32.gmra.mxu0 %v79_v31  ;;  %v111_v31 = vld [vmem:[%s5630_s0 + $0x2f0] sm:$0xff] }
  0xbe   :  { %473 = vmatprep.mubr.f32.mxu0 %v82_v32  ;;  %v114_v32 = vld [vmem:[%s5630_s0 + $0x308] sm:$0xff] }
  0xbf   :  { %719 = vmatmul.mubr.f32.gmra.mxu1 %v179_v33  ;;  %v211_v33 = vld [vmem:[%s5630_s0 + $0x610] sm:$0xff] }
  0xc0   :  { %723 = vmatprep.mubr.f32.mxu1 %v182_v34  ;;  %v214_v34 = vld [vmem:[%s5630_s0 + $0x628] sm:$0xff] }
  0xc1   :  { %474 = vmatmul.mubr.f32.gmra.mxu0 %v81_v35  ;;  %v113_v35 = vld [vmem:[%s5630_s0 + $0x300] sm:$0xff] }
  0xc2   :  { %478 = vmatprep.mubr.f32.mxu0 %v84_v36  ;;  %v116_v36 = vld [vmem:[%s5630_s0 + $0x318] sm:$0xff] }
  0xc3   :  { %724 = vmatmul.mubr.f32.gmra.mxu1 %v181_v37  ;;  %v213_v37 = vld [vmem:[%s5630_s0 + $0x620] sm:$0xff] }
  0xc4   :  { %728 = vmatprep.mubr.f32.mxu1 %v184_v38 }
  0xc5   :  { %479 = vmatmul.mubr.f32.gmra.mxu0 %v83_v39  ;;  %v216_v39 = vld [vmem:[%s5630_s0 + $0x638] sm:$0xff] }
  0xc6   :  { %483 = vmatprep.mubr.f32.mxu0 %v86_v40  ;;  %v115_v40 = vld [vmem:[%s5630_s0 + $0x310] sm:$0xff] }
  0xc7   :  { %729 = vmatmul.mubr.f32.gmra.mxu1 %v183_v41 }
  0xc8   :  { %733 = vmatprep.mubr.f32.mxu1 %v186_v42 }
  0xc9   :  { %484 = vmatmul.mubr.f32.gmra.mxu0 %v85_v43  ;;  %v215_v43 = vld [vmem:[%s5630_s0 + $0x630] sm:$0xff] }
  0xca   :  { %488 = vmatprep.mubr.f32.mxu0 %v88_v44 }
  0xcb   :  { %734 = vmatmul.mubr.f32.gmra.mxu1 %v185_v45 }
  0xcc   :  { %738 = vmatprep.mubr.f32.mxu1 %v188_v46 }
  0xcd   :  { %489 = vmatmul.mubr.f32.gmra.mxu0 %v87_v47 }
  0xce   :  { %493 = vmatprep.mubr.f32.mxu0 %v90_v48 }
  0xcf   :  { %739 = vmatmul.mubr.f32.gmra.mxu1 %v187_v49 }
  0xd0   :  { %743 = vmatprep.mubr.f32.mxu1 %v190_v50 }
  0xd1   :  { %494 = vmatmul.mubr.f32.gmra.mxu0 %v89_v51 }
  0xd2   :  { %498 = vmatprep.mubr.f32.mxu0 %v92_v52 }
  0xd3   :  { %744 = vmatmul.mubr.f32.gmra.mxu1 %v189_v53 }
  0xd4   :  { %748 = vmatprep.mubr.f32.mxu1 %v192_v54 }
  0xd5   :  { %499 = vmatmul.mubr.f32.gmra.mxu0 %v91_v55 }
  0xd6   :  { %503 = vmatprep.mubr.f32.mxu0 %v94_v56 }
  0xd7   :  { %749 = vmatmul.mubr.f32.gmra.mxu1 %v191_v57 }
  0xd8   :  { %753 = vmatprep.mubr.f32.mxu1 %v194_v58 }
  0xd9   :  { %504 = vmatmul.mubr.f32.gmra.mxu0 %v93_v59 }
  0xda   :  { %508 = vmatprep.mubr.f32.mxu0 %v96_v60 }
  0xdb   :  { %754 = vmatmul.mubr.f32.gmra.mxu1 %v193_v61 }
  0xdc   :  { %758 = vmatprep.mubr.f32.mxu1 %v196_v62 }
  0xdd   :  { %509 = vmatmul.mubr.f32.gmra.mxu0 %v95_v63 }
  0xde   :  { %513 = vmatprep.mubr.f32.mxu0 %v98_v0 }
  0xdf   :  { %759 = vmatmul.mubr.f32.gmra.mxu1 %v195_v1 }
  0xe0   :  { %763 = vmatprep.mubr.f32.mxu1 %v198_v2 }
  0xe1   :  { %514 = vmatmul.mubr.f32.gmra.mxu0 %v97_v3 }
  0xe2   :  { %518 = vmatprep.mubr.f32.mxu0 %v100_v4 }
  0xe3   :  { %764 = vmatmul.mubr.f32.gmra.mxu1 %v197_v5 }
  0xe4   :  { %768 = vmatprep.mubr.f32.mxu1 %v200_v6 }
  0xe5   :  { %519 = vmatmul.mubr.f32.gmra.mxu0 %v99_v7 }
  0xe6   :  { %523 = vmatprep.mubr.f32.mxu0 %v102_v8 }
  0xe7   :  { %769 = vmatmul.mubr.f32.gmra.mxu1 %v199_v9 }
  0xe8   :  { %773 = vmatprep.mubr.f32.mxu1 %v202_v10 }
  0xe9   :  { %524 = vmatmul.mubr.f32.gmra.mxu0 %v101_v11 }
  0xea   :  { %528 = vmatprep.mubr.f32.mxu0 %v104_v12 }
  0xeb   :  { %774 = vmatmul.mubr.f32.gmra.mxu1 %v201_v13 }
  0xec   :  { %778 = vmatprep.mubr.f32.mxu1 %v204_v14 }
  0xed   :  { %529 = vmatmul.mubr.f32.gmra.mxu0 %v103_v15 }
  0xee   :  { %533 = vmatprep.mubr.f32.mxu0 %v106_v16 }
  0xef   :  { %779 = vmatmul.mubr.f32.gmra.mxu1 %v203_v17 }
  0xf0   :  { %783 = vmatprep.mubr.f32.mxu1 %v206_v18 }
  0xf1   :  { %534 = vmatmul.mubr.f32.gmra.mxu0 %v105_v19 }
  0xf2   :  { %538 = vmatprep.mubr.f32.mxu0 %v108_v20 }
  0xf3   :  { %784 = vmatmul.mubr.f32.gmra.mxu1 %v205_v21 }
  0xf4   :  { %788 = vmatprep.mubr.f32.mxu1 %v208_v22 }
  0xf5   :  { %539 = vmatmul.mubr.f32.gmra.mxu0 %v107_v23 }
  0xf6   :  { %543 = vmatprep.mubr.f32.mxu0 %v110_v24 }
  0xf7   :  { %789 = vmatmul.mubr.f32.gmra.mxu1 %v207_v25 }
  0xf8   :  { %793 = vmatprep.mubr.f32.mxu1 %v210_v26 }
  0xf9   :  { %544 = vmatmul.mubr.f32.gmra.mxu0 %v109_v27 }
  0xfa   :  { %548 = vmatprep.mubr.f32.mxu0 %v112_v28 }
  0xfb   :  { %794 = vmatmul.mubr.f32.gmra.mxu1 %v209_v29 }
  0xfc   :  { %798 = vmatprep.mubr.f32.mxu1 %v212_v30 }
  0xfd   :  { %549 = vmatmul.mubr.f32.gmra.mxu0 %v111_v31 }
  0xfe   :  { %553 = vmatprep.mubr.f32.mxu0 %v114_v32 }
  0xff   :  { %799 = vmatmul.mubr.f32.gmra.mxu1 %v211_v33 }
 0x100   :  { %803 = vmatprep.mubr.f32.mxu1 %v214_v34 }
 0x101   :  { %v2795_v38 = vpop.f32.mrf.mxu0  ;;  %554 = vmatmul.mubr.f32.gmra.mxu0 %v113_v35 }
 0x102   :  { %5772 = vst [vmem:[#allocation2_spill] sm:$0xff] %v2795_v38  ;;  %558 = vmatprep.mubr.f32.mxu0 %v116_v36 }
 0x103   :  { %v317_v41 = vpop.f32.mrf.mxu0  ;;  %v2803_v42 = vpop.f32.mrf.mxu1  ;;  %804 = vmatmul.mubr.f32.gmra.mxu1 %v213_v37 }
 0x104   :  { %5773 = vst [vmem:[#allocation3_spill] sm:$0xff] %v2803_v42  ;;  %808 = vmatprep.mubr.f32.mxu1 %v216_v39 }
 0x105   :  { %v2808_v44 = vpop.f32.mrf.mxu0  ;;  %559 = vmatmul.mubr.f32.gmra.mxu0 %v115_v40  ;;  %v567_v45 = vpop.f32.mrf.mxu1 }
 0x106   :  { %5774 = vst [vmem:[#allocation4_spill] sm:$0xff] %v2808_v44 }
 0x107   :  { %v322_v46 = vpop.f32.mrf.mxu0  ;;  %v2810_v47 = vpop.f32.mrf.mxu1  ;;  %809 = vmatmul.mubr.f32.gmra.mxu1 %v215_v43 }
 0x109   :  { %v2812_v48 = vpop.f32.mrf.mxu0  ;;  %v572_v49 = vpop.f32.mrf.mxu1 }
 0x10a   :  { %5775 = vst [vmem:[#allocation5_spill] sm:$0xff] %v2812_v48 }
 0x10b   :  { %v327_v50 = vpop.f32.mrf.mxu0  ;;  %v2814_v51 = vpop.f32.mrf.mxu1 }
 0x10d   :  { %v2816_v52 = vpop.f32.mrf.mxu0  ;;  %v577_v53 = vpop.f32.mrf.mxu1 }
 0x10e   :  { %5776 = vst [vmem:[#allocation6_spill] sm:$0xff] %v2816_v52 }
 0x10f   :  { %v332_v54 = vpop.f32.mrf.mxu0  ;;  %v2818_v55 = vpop.f32.mrf.mxu1 }
 0x111   :  { %v2820_v56 = vpop.f32.mrf.mxu0  ;;  %v582_v57 = vpop.f32.mrf.mxu1 }
 0x112   :  { %5777 = vst [vmem:[#allocation7_spill] sm:$0xff] %v2820_v56 }
 0x113   :  { %v337_v58 = vpop.f32.mrf.mxu0  ;;  %v2822_v59 = vpop.f32.mrf.mxu1 }
 0x115   :  { %v2824_v60 = vpop.f32.mrf.mxu0  ;;  %v587_v61 = vpop.f32.mrf.mxu1 }
 0x116   :  { %5778 = vst [vmem:[#allocation8_spill] sm:$0xff] %v2824_v60 }
 0x117   :  { %v342_v62 = vpop.f32.mrf.mxu0  ;;  %v2826_v63 = vpop.f32.mrf.mxu1 }
 0x119   :  { %v2828_v0 = vpop.f32.mrf.mxu0  ;;  %v592_v1 = vpop.f32.mrf.mxu1 }
 0x11a   :  { %5779 = vst [vmem:[#allocation9_spill] sm:$0xff] %v2828_v0 }
 0x11b   :  { %v347_v2 = vpop.f32.mrf.mxu0  ;;  %v2830_v3 = vpop.f32.mrf.mxu1 }
 0x11d   :  { %v2832_v4 = vpop.f32.mrf.mxu0  ;;  %v597_v5 = vpop.f32.mrf.mxu1 }
 0x11e   :  { %5780 = vst [vmem:[#allocation10_spill] sm:$0xff] %v2832_v4 }
 0x11f   :  { %v352_v6 = vpop.f32.mrf.mxu0  ;;  %v2834_v7 = vpop.f32.mrf.mxu1 }
 0x121   :  { %v2836_v8 = vpop.f32.mrf.mxu0  ;;  %v602_v9 = vpop.f32.mrf.mxu1 }
 0x122   :  { %5781 = vst [vmem:[#allocation11_spill] sm:$0xff] %v2836_v8 }
 0x123   :  { %v357_v10 = vpop.f32.mrf.mxu0  ;;  %v2838_v11 = vpop.f32.mrf.mxu1 }
 0x125   :  { %v2840_v12 = vpop.f32.mrf.mxu0  ;;  %v607_v13 = vpop.f32.mrf.mxu1 }
 0x126   :  { %5782 = vst [vmem:[#allocation12_spill] sm:$0xff] %v2840_v12 }
 0x127   :  { %v362_v14 = vpop.f32.mrf.mxu0  ;;  %v2842_v15 = vpop.f32.mrf.mxu1 }
 0x129   :  { %v2844_v16 = vpop.f32.mrf.mxu0  ;;  %v612_v17 = vpop.f32.mrf.mxu1 }
 0x12a   :  { %5783 = vst [vmem:[#allocation13_spill] sm:$0xff] %v2844_v16 }
 0x12b   :  { %v367_v18 = vpop.f32.mrf.mxu0  ;;  %v2846_v19 = vpop.f32.mrf.mxu1 }
 0x12d   :  { %v2848_v20 = vpop.f32.mrf.mxu0  ;;  %v617_v21 = vpop.f32.mrf.mxu1 }
 0x12e   :  { %5784 = vst [vmem:[#allocation14_spill] sm:$0xff] %v2848_v20 }
 0x12f   :  { %v372_v22 = vpop.f32.mrf.mxu0  ;;  %v2850_v23 = vpop.f32.mrf.mxu1 }
 0x131   :  { %v2852_v24 = vpop.f32.mrf.mxu0  ;;  %v622_v25 = vpop.f32.mrf.mxu1 }
 0x132   :  { %5785 = vst [vmem:[#allocation15_spill] sm:$0xff] %v2852_v24 }
 0x133   :  { %v377_v26 = vpop.f32.mrf.mxu0  ;;  %v2854_v27 = vpop.f32.mrf.mxu1 }
 0x135   :  { %v2856_v28 = vpop.f32.mrf.mxu0  ;;  %v627_v29 = vpop.f32.mrf.mxu1 }
 0x136   :  { %5786 = vst [vmem:[#allocation16_spill] sm:$0xff] %v2856_v28 }
 0x137   :  { %v382_v30 = vpop.f32.mrf.mxu0  ;;  %v2858_v31 = vpop.f32.mrf.mxu1 }
 0x138   :  { %5787 = vst [vmem:[#allocation17_spill] sm:$0xff] %v2858_v31 }
 0x139   :  { %v2860_v32 = vpop.f32.mrf.mxu0  ;;  %v632_v33 = vpop.f32.mrf.mxu1 }
 0x13a   :  { %5788 = vst [vmem:[#allocation18_spill] sm:$0xff] %v2860_v32 }
 0x13b   :  { %v387_v34 = vpop.f32.mrf.mxu0  ;;  %v2862_v35 = vpop.f32.mrf.mxu1 }
 0x13c   :  { %5789 = vst [vmem:[#allocation19_spill] sm:$0xff] %v2862_v35 }
 0x13d   :  { %v2864_v36 = vpop.f32.mrf.mxu0  ;;  %v637_v37 = vpop.f32.mrf.mxu1 }
 0x13e   :  { %5790 = vst [vmem:[#allocation20_spill] sm:$0xff] %v2864_v36 }
 0x13f   :  { %v392_v39 = vpop.f32.mrf.mxu0  ;;  %v2866_v40 = vpop.f32.mrf.mxu1 }
 0x140   :  { %5791 = vst [vmem:[#allocation21_spill] sm:$0xff] %v2866_v40 }
 0x141   :  { %v2868_v41 = vpop.f32.mrf.mxu0  ;;  %v642_v43 = vpop.f32.mrf.mxu1 }
 0x142   :  { %5792 = vst [vmem:[#allocation22_spill] sm:$0xff] %v2868_v41 }
 0x143   :  { %v397_v45 = vpop.f32.mrf.mxu0  ;;  %v2870_v46 = vpop.f32.mrf.mxu1 }
 0x145   :  { %v2872_v49 = vpop.f32.mrf.mxu0  ;;  %v647_v50 = vpop.f32.mrf.mxu1 }
 0x146   :  { %5793 = vst [vmem:[#allocation23_spill] sm:$0xff] %v2872_v49  ;;  %v1022_v50 = vmul.f32 %v2808_v44, %v2808_v44 }
 0x147   :  { %v402_v53 = vpop.f32.mrf.mxu0  ;;  %v2874_v54 = vpop.f32.mrf.mxu1 }
 0x149   :  { %v2876_v57 = vpop.f32.mrf.mxu0  ;;  %v652_v58 = vpop.f32.mrf.mxu1 }
 0x14a   :  { %5794 = vst [vmem:[#allocation24_spill] sm:$0xff] %v2876_v57 }
 0x14b   :  { %v407_v61 = vpop.f32.mrf.mxu0  ;;  %v2878_v62 = vpop.f32.mrf.mxu1 }
 0x14c   :  { %v1021_v61 = vmul.f32 %v2795_v38, %v2795_v38 }
 0x14d   :  { %v2880_v1 = vpop.f32.mrf.mxu0  ;;  %v657_v2 = vpop.f32.mrf.mxu1 }
 0x14e   :  { %5795 = vst [vmem:[#allocation25_spill] sm:$0xff] %v2880_v1  ;;  %v816_v2 = vsel %vm814_vm0, %v2808_v44, 0.0 }
 0x14f   :  { %v412_v5 = vpop.f32.mrf.mxu0  ;;  %v2882_v6 = vpop.f32.mrf.mxu1 }
 0x150   :  { %v1023_v5 = vmul.f32 %v2812_v48, %v2812_v48 }
 0x151   :  { %v2884_v9 = vpop.f32.mrf.mxu0  ;;  %v662_v10 = vpop.f32.mrf.mxu1 }
 0x152   :  { %5796 = vst [vmem:[#allocation26_spill] sm:$0xff] %v2884_v9  ;;  %v1124_v44 = vsel %vm814_vm0, %v1023_v5, 0.0 }
 0x153   :  { %v417_v13 = vpop.f32.mrf.mxu0  ;;  %v2886_v14 = vpop.f32.mrf.mxu1 }
 0x154   :  { %5797 = vst [vmem:[#allocation27_spill] sm:$0xff] %v2886_v14 }
 0x155   :  { %v2888_v17 = vpop.f32.mrf.mxu0  ;;  %v667_v18 = vpop.f32.mrf.mxu1 }
 0x156   :  { %5798 = vst [vmem:[#allocation28_spill] sm:$0xff] %v2888_v17  ;;  %v815_v18 = vsel %vm814_vm0, %v2795_v38, 0.0 }
 0x157   :  { %v422_v21 = vpop.f32.mrf.mxu0  ;;  %v2890_v22 = vpop.f32.mrf.mxu1 }
 0x158   :  { %5799 = vst [vmem:[#allocation29_spill] sm:$0xff] %v2890_v22  ;;  %v1122_v21 = vsel %vm814_vm0, %v1022_v50, 0.0  ;;  %v1025_v50 = vmul.f32 %v2820_v56, %v2820_v56 }
 0x159   :  { %v2892_v25 = vpop.f32.mrf.mxu0  ;;  %v672_v26 = vpop.f32.mrf.mxu1 }
 0x15a   :  { %5800 = vst [vmem:[#allocation30_spill] sm:$0xff] %v2892_v25  ;;  %v818_v26 = vsel %vm814_vm0, %v2812_v48, 0.0 }
 0x15b   :  { %v427_v29 = vpop.f32.mrf.mxu0  ;;  %v2894_v30 = vpop.f32.mrf.mxu1 }
 0x15c   :  { %5801 = vst [vmem:[#allocation31_spill] sm:$0xff] %v2894_v30  ;;  %v1024_v29 = vmul.f32 %v2816_v52, %v2816_v52  ;;  %v1128_v30 = vsel %vm814_vm0, %v1025_v50, 0.0 }
 0x15d   :  { %v2896_v33 = vpop.f32.mrf.mxu0  ;;  %v677_v34 = vpop.f32.mrf.mxu1 }
 0x15e   :  { %5802 = vst [vmem:[#allocation32_spill] sm:$0xff] %v2896_v33  ;;  %v817_v34 = vadd.f32 %v816_v2, %v815_v18  ;;  %v1126_v2 = vsel %vm814_vm0, %v1024_v29, 0.0  ;;  %v822_v18 = vsel %vm814_vm0, %v2820_v56, 0.0 }
 0x15f   :  { %v432_v37 = vpop.f32.mrf.mxu0  ;;  %v2898_v39 = vpop.f32.mrf.mxu1 }
 0x160   :  { %5803 = vst [vmem:[#allocation33_spill] sm:$0xff] %v2898_v39 }
 0x161   :  { %v2900_v43 = vpop.f32.mrf.mxu0  ;;  %v682_v45 = vpop.f32.mrf.mxu1 }
 0x162   :  { %5804 = vst [vmem:[#allocation34_spill] sm:$0xff] %v2900_v43 }
 0x163   :  { %v437_v53 = vpop.f32.mrf.mxu0  ;;  %v2904_v58 = vpop.f32.mrf.mxu1 }
 0x164   :  { %5805 = vst [vmem:[#allocation35_spill] sm:$0xff] %v2904_v58  ;;  %v1121_v53 = vsel %vm814_vm0, %v1021_v61, 0.0  ;;  %v819_v58 = vadd.f32 %v818_v26, %v817_v34  ;;  %v1026_v61 = vmul.f32 %v2824_v60, %v2824_v60 }
 0x165   :  { %v2912_v10 = vpop.f32.mrf.mxu0  ;;  %v687_v13 = vpop.f32.mrf.mxu1  ;;  %v1123_v38 = vadd.f32 %v1122_v21, %v1121_v53  ;;  %v824_v21 = vsel %vm814_vm0, %v2824_v60, 0.0 }
 0x166   :  { %5806 = vst [vmem:[#allocation36_spill] sm:$0xff] %v2912_v10  ;;  %v820_v13 = vsel %vm814_vm0, %v2816_v52, 0.0  ;;  %v1130_v56 = vsel %vm814_vm0, %v1026_v61, 0.0 }
 0x167   :  { %v442_v37 = vpop.f32.mrf.mxu0  ;;  %v2921_v45 = vpop.f32.mrf.mxu1  ;;  %v1125_v5 = vadd.f32 %v1124_v44, %v1123_v38  ;;  %v826_v38 = vsel %vm814_vm0, %v2828_v0, 0.0  ;;  %v1028_v44 = vmul.f32 %v2832_v4, %v2832_v4 }
 0x168   :  { %5807 = vst [vmem:[#allocation37_spill] sm:$0xff] %v2921_v45  ;;  %v821_v37 = vadd.f32 %v820_v13, %v819_v58 }
 0x169   :  { %v2929_v48 = vpop.f32.mrf.mxu0  ;;  %v692_v39 = vpop.f32.mrf.mxu1  ;;  %v1127_v26 = vadd.f32 %v1126_v2, %v1125_v5  ;;  %v828_v2 = vsel %vm814_vm0, %v2832_v4, 0.0 }
 0x16a   :  { %5808 = vst [vmem:[#allocation38_spill] sm:$0xff] %v2929_v48  ;;  %v1027_v39 = vmul.f32 %v2828_v0, %v2828_v0  ;;  %v823_v29 = vadd.f32 %v822_v18, %v821_v37  ;;  %v1029_v18 = vmul.f32 %v2836_v8, %v2836_v8  ;;  %v1134_v0 = vsel %vm814_vm0, %v1028_v44, 0.0 }
 0x16b   :  { %v447_v45 = vpop.f32.mrf.mxu0  ;;  %v2936_v52 = vpop.f32.mrf.mxu1  ;;  %v1129_v58 = vadd.f32 %v1128_v30, %v1127_v26  ;;  %v830_v30 = vsel %vm814_vm0, %v2836_v8, 0.0 }
 0x16c   :  { %v825_v45 = vadd.f32 %v824_v21, %v823_v29  ;;  %v1132_v60 = vsel %vm814_vm0, %v1027_v39, 0.0  ;;  %v1030_v21 = vmul.f32 %v2840_v12, %v2840_v12  ;;  %v1136_v4 = vsel %vm814_vm0, %v1029_v18, 0.0 }
 0x16d   :  { %v2943_v34 = vpop.f32.mrf.mxu0  ;;  %v697_v53 = vpop.f32.mrf.mxu1  ;;  %v1131_v61 = vadd.f32 %v1130_v56, %v1129_v58  ;;  %v832_v56 = vsel %vm814_vm0, %v2840_v12, 0.0 }
 0x16e   :  { %5809 = vst [vmem:[#allocation39_spill] sm:$0xff] %v2943_v34  ;;  %v827_v5 = vadd.f32 %v826_v38, %v825_v45  ;;  %v1031_v38 = vmul.f32 %v2844_v16, %v2844_v16  ;;  %v1138_v8 = vsel %vm814_vm0, %v1030_v21, 0.0 }
 0x16f   :  { %v452_v13 = vpop.f32.mrf.mxu0  ;;  %v2950_v50 = vpop.f32.mrf.mxu1  ;;  %v1133_v39 = vadd.f32 %v1132_v60, %v1131_v61  ;;  %v834_v60 = vsel %vm814_vm0, %v2844_v16, 0.0 }
 0x170   :  { %v829_v26 = vadd.f32 %v828_v2, %v827_v5  ;;  %v1032_v2 = vmul.f32 %v2848_v20, %v2848_v20  ;;  %v1140_v12 = vsel %vm814_vm0, %v1031_v38, 0.0 }
 0x171   :  { %v2957_v37 = vpop.f32.mrf.mxu0  ;;  %v702_v53 = vpop.f32.mrf.mxu1  ;;  %v1135_v44 = vadd.f32 %v1134_v0, %v1133_v39  ;;  %v836_v0 = vsel %vm814_vm0, %v2848_v20, 0.0 }
 0x172   :  { %5810 = vst [vmem:[#allocation40_spill] sm:$0xff] %v2957_v37  ;;  %v831_v58 = vadd.f32 %v830_v30, %v829_v26  ;;  %v1033_v30 = vmul.f32 %v2852_v24, %v2852_v24  ;;  %v1142_v16 = vsel %vm814_vm0, %v1032_v2, 0.0 }
 0x173   :  { %v457_v29 = vpop.f32.mrf.mxu0  ;;  %v2964_v13 = vpop.f32.mrf.mxu1  ;;  %v1137_v18 = vadd.f32 %v1136_v4, %v1135_v44  ;;  %v838_v4 = vsel %vm814_vm0, %v2852_v24, 0.0 }
 0x174   :  { %v833_v61 = vadd.f32 %v832_v56, %v831_v58  ;;  %v1034_v56 = vmul.f32 %v2856_v28, %v2856_v28  ;;  %v1144_v20 = vsel %vm814_vm0, %v1033_v30, 0.0 }
 0x175   :  { %v2971_v45 = vpop.f32.mrf.mxu0  ;;  %v707_v53 = vpop.f32.mrf.mxu1  ;;  %v1139_v21 = vadd.f32 %v1138_v8, %v1137_v18  ;;  %v840_v8 = vsel %vm814_vm0, %v2856_v28, 0.0 }
 0x176   :  { %5811 = vst [vmem:[#allocation41_spill] sm:$0xff] %v2971_v45  ;;  %v835_v39 = vadd.f32 %v834_v60, %v833_v61  ;;  %v1035_v60 = vmul.f32 %v2860_v32, %v2860_v32  ;;  %v1146_v24 = vsel %vm814_vm0, %v1034_v56, 0.0 }
 0x177   :  { %v462_v5 = vpop.f32.mrf.mxu0  ;;  %v2978_v29 = vpop.f32.mrf.mxu1  ;;  %v1141_v38 = vadd.f32 %v1140_v12, %v1139_v21  ;;  %v842_v12 = vsel %vm814_vm0, %v2860_v32, 0.0 }
 0x178   :  { %v837_v44 = vadd.f32 %v836_v0, %v835_v39  ;;  %v1036_v0 = vmul.f32 %v2864_v36, %v2864_v36  ;;  %v1148_v28 = vsel %vm814_vm0, %v1035_v60, 0.0 }
 0x179   :  { %v2985_v26 = vpop.f32.mrf.mxu0  ;;  %v712_v53 = vpop.f32.mrf.mxu1  ;;  %v1143_v2 = vadd.f32 %v1142_v16, %v1141_v38  ;;  %v844_v16 = vsel %vm814_vm0, %v2864_v36, 0.0 }
 0x17a   :  { %5812 = vst [vmem:[#allocation42_spill] sm:$0xff] %v2985_v26  ;;  %v839_v18 = vadd.f32 %v838_v4, %v837_v44  ;;  %v1037_v4 = vmul.f32 %v2868_v41, %v2868_v41  ;;  %v1150_v32 = vsel %vm814_vm0, %v1036_v0, 0.0 }
 0x17b   :  { %v467_v58 = vpop.f32.mrf.mxu0  ;;  %v2992_v5 = vpop.f32.mrf.mxu1  ;;  %v1145_v30 = vadd.f32 %v1144_v20, %v1143_v2  ;;  %v846_v20 = vsel %vm814_vm0, %v2868_v41, 0.0 }
 0x17c   :  { %v841_v21 = vadd.f32 %v840_v8, %v839_v18  ;;  %v1038_v8 = vmul.f32 %v2872_v49, %v2872_v49  ;;  %v1152_v36 = vsel %vm814_vm0, %v1037_v4, 0.0 }
 0x17d   :  { %v2999_v61 = vpop.f32.mrf.mxu0  ;;  %v717_v53 = vpop.f32.mrf.mxu1  ;;  %v1147_v56 = vadd.f32 %v1146_v24, %v1145_v30  ;;  %v848_v24 = vsel %vm814_vm0, %v2872_v49, 0.0 }
 0x17e   :  { %5813 = vst [vmem:[#allocation43_spill] sm:$0xff] %v2999_v61  ;;  %v843_v38 = vadd.f32 %v842_v12, %v841_v21  ;;  %v1039_v12 = vmul.f32 %v2876_v57, %v2876_v57  ;;  %v1154_v41 = vsel %vm814_vm0, %v1038_v8, 0.0 }
 0x17f   :  { %v472_v39 = vpop.f32.mrf.mxu0  ;;  %v3006_v58 = vpop.f32.mrf.mxu1  ;;  %v1149_v60 = vadd.f32 %v1148_v28, %v1147_v56  ;;  %v850_v28 = vsel %vm814_vm0, %v2876_v57, 0.0 }
 0x180   :  { %v845_v2 = vadd.f32 %v844_v16, %v843_v38  ;;  %v1040_v16 = vmul.f32 %v2880_v1, %v2880_v1  ;;  %v1156_v49 = vsel %vm814_vm0, %v1039_v12, 0.0 }
 0x181   :  { %v3013_v44 = vpop.f32.mrf.mxu0  ;;  %v722_v53 = vpop.f32.mrf.mxu1  ;;  %v1151_v0 = vadd.f32 %v1150_v32, %v1149_v60  ;;  %v852_v32 = vsel %vm814_vm0, %v2880_v1, 0.0 }
 0x182   :  { %5814 = vst [vmem:[#allocation44_spill] sm:$0xff] %v3013_v44  ;;  %v847_v30 = vadd.f32 %v846_v20, %v845_v2  ;;  %v1041_v20 = vmul.f32 %v2884_v9, %v2884_v9  ;;  %v1158_v57 = vsel %vm814_vm0, %v1040_v16, 0.0 }
 0x183   :  { %v477_v18 = vpop.f32.mrf.mxu0  ;;  %v3020_v39 = vpop.f32.mrf.mxu1  ;;  %v1153_v4 = vadd.f32 %v1152_v36, %v1151_v0  ;;  %v854_v36 = vsel %vm814_vm0, %v2884_v9, 0.0 }
 0x184   :  { %v849_v56 = vadd.f32 %v848_v24, %v847_v30  ;;  %v1042_v24 = vmul.f32 %v2888_v17, %v2888_v17  ;;  %v1160_v1 = vsel %vm814_vm0, %v1041_v20, 0.0 }
 0x185   :  { %v3027_v21 = vpop.f32.mrf.mxu0  ;;  %v727_v53 = vpop.f32.mrf.mxu1  ;;  %v1155_v8 = vadd.f32 %v1154_v41, %v1153_v4  ;;  %v856_v41 = vsel %vm814_vm0, %v2888_v17, 0.0 }
 0x186   :  { %5815 = vst [vmem:[#allocation45_spill] sm:$0xff] %v3027_v21  ;;  %v851_v60 = vadd.f32 %v850_v28, %v849_v56  ;;  %v1043_v28 = vmul.f32 %v2892_v25, %v2892_v25  ;;  %v1162_v9 = vsel %vm814_vm0, %v1042_v24, 0.0 }
 0x187   :  { %v482_v38 = vpop.f32.mrf.mxu0  ;;  %v3034_v18 = vpop.f32.mrf.mxu1  ;;  %v1157_v12 = vadd.f32 %v1156_v49, %v1155_v8  ;;  %v858_v49 = vsel %vm814_vm0, %v2892_v25, 0.0 }
 0x188   :  { %5816 = vst [vmem:[#allocation46_spill] sm:$0xff] %v3034_v18  ;;  %v853_v0 = vadd.f32 %v852_v32, %v851_v60  ;;  %v1044_v32 = vmul.f32 %v2896_v33, %v2896_v33  ;;  %v1164_v17 = vsel %vm814_vm0, %v1043_v28, 0.0 }
 0x189   :  { %v3041_v2 = vpop.f32.mrf.mxu0  ;;  %v732_v53 = vpop.f32.mrf.mxu1  ;;  %v1159_v16 = vadd.f32 %v1158_v57, %v1157_v12  ;;  %v860_v57 = vsel %vm814_vm0, %v2896_v33, 0.0 }
 0x18a   :  { %5817 = vst [vmem:[#allocation47_spill] sm:$0xff] %v3041_v2  ;;  %v855_v4 = vadd.f32 %v854_v36, %v853_v0  ;;  %v1045_v36 = vmul.f32 %v2900_v43, %v2900_v43  ;;  %v1166_v25 = vsel %vm814_vm0, %v1044_v32, 0.0 }
 0x18b   :  { %v487_v30 = vpop.f32.mrf.mxu0  ;;  %v3048_v38 = vpop.f32.mrf.mxu1  ;;  %v1161_v20 = vadd.f32 %v1160_v1, %v1159_v16  ;;  %v862_v1 = vsel %vm814_vm0, %v2900_v43, 0.0 }
 0x18c   :  { %5818 = vst [vmem:[#allocation48_spill] sm:$0xff] %v3048_v38  ;;  %v857_v8 = vadd.f32 %v856_v41, %v855_v4  ;;  %v1046_v41 = vmul.f32 %v2912_v10, %v2912_v10  ;;  %v1168_v33 = vsel %vm814_vm0, %v1045_v36, 0.0 }
 0x18d   :  { %v3055_v56 = vpop.f32.mrf.mxu0  ;;  %v737_v53 = vpop.f32.mrf.mxu1  ;;  %v1163_v24 = vadd.f32 %v1162_v9, %v1161_v20  ;;  %v864_v9 = vsel %vm814_vm0, %v2912_v10, 0.0 }
 0x18e   :  { %5819 = vst [vmem:[#allocation49_spill] sm:$0xff] %v3055_v56  ;;  %v859_v12 = vadd.f32 %v858_v49, %v857_v8  ;;  %v1047_v49 = vmul.f32 %v2929_v48, %v2929_v48  ;;  %v1170_v43 = vsel %vm814_vm0, %v1046_v41, 0.0 }
 0x18f   :  { %v492_v60 = vpop.f32.mrf.mxu0  ;;  %v3062_v30 = vpop.f32.mrf.mxu1  ;;  %v1165_v28 = vadd.f32 %v1164_v17, %v1163_v24  ;;  %v866_v17 = vsel %vm814_vm0, %v2929_v48, 0.0 }
 0x190   :  { %5820 = vst [vmem:[#allocation50_spill] sm:$0xff] %v3062_v30  ;;  %v861_v16 = vadd.f32 %v860_v57, %v859_v12  ;;  %v1048_v57 = vmul.f32 %v2943_v34, %v2943_v34  ;;  %v1172_v10 = vsel %vm814_vm0, %v1047_v49, 0.0 }
 0x191   :  { %v3069_v0 = vpop.f32.mrf.mxu0  ;;  %v742_v53 = vpop.f32.mrf.mxu1  ;;  %v1167_v32 = vadd.f32 %v1166_v25, %v1165_v28  ;;  %v868_v25 = vsel %vm814_vm0, %v2943_v34, 0.0 }
 0x192   :  { %5821 = vst [vmem:[#allocation51_spill] sm:$0xff] %v3069_v0  ;;  %v863_v20 = vadd.f32 %v862_v1, %v861_v16  ;;  %v1049_v1 = vmul.f32 %v2957_v37, %v2957_v37  ;;  %v1174_v48 = vsel %vm814_vm0, %v1048_v57, 0.0 }
 0x193   :  { %v497_v4 = vpop.f32.mrf.mxu0  ;;  %v3076_v60 = vpop.f32.mrf.mxu1  ;;  %v1169_v36 = vadd.f32 %v1168_v33, %v1167_v32  ;;  %v870_v33 = vsel %vm814_vm0, %v2957_v37, 0.0 }
 0x194   :  { %5822 = vst [vmem:[#allocation52_spill] sm:$0xff] %v3076_v60  ;;  %v865_v24 = vadd.f32 %v864_v9, %v863_v20  ;;  %v1050_v9 = vmul.f32 %v2971_v45, %v2971_v45  ;;  %v1176_v34 = vsel %vm814_vm0, %v1049_v1, 0.0 }
 0x195   :  { %v3083_v8 = vpop.f32.mrf.mxu0  ;;  %v747_v53 = vpop.f32.mrf.mxu1  ;;  %v1171_v41 = vadd.f32 %v1170_v43, %v1169_v36  ;;  %v872_v43 = vsel %vm814_vm0, %v2971_v45, 0.0 }
 0x196   :  { %5823 = vst [vmem:[#allocation53_spill] sm:$0xff] %v3083_v8  ;;  %v867_v28 = vadd.f32 %v866_v17, %v865_v24  ;;  %v1051_v17 = vmul.f32 %v2985_v26, %v2985_v26  ;;  %v1178_v37 = vsel %vm814_vm0, %v1050_v9, 0.0 }
 0x197   :  { %v502_v12 = vpop.f32.mrf.mxu0  ;;  %v3090_v4 = vpop.f32.mrf.mxu1  ;;  %v1173_v49 = vadd.f32 %v1172_v10, %v1171_v41  ;;  %v874_v10 = vsel %vm814_vm0, %v2985_v26, 0.0 }
 0x198   :  { %5824 = vst [vmem:[#allocation54_spill] sm:$0xff] %v3090_v4  ;;  %v869_v32 = vadd.f32 %v868_v25, %v867_v28  ;;  %v1052_v25 = vmul.f32 %v2999_v61, %v2999_v61  ;;  %v1180_v45 = vsel %vm814_vm0, %v1051_v17, 0.0 }
 0x199   :  { %v3097_v16 = vpop.f32.mrf.mxu0  ;;  %v752_v53 = vpop.f32.mrf.mxu1  ;;  %v1175_v57 = vadd.f32 %v1174_v48, %v1173_v49  ;;  %v876_v48 = vsel %vm814_vm0, %v2999_v61, 0.0 }
 0x19a   :  { %5825 = vst [vmem:[#allocation55_spill] sm:$0xff] %v3097_v16  ;;  %v871_v36 = vadd.f32 %v870_v33, %v869_v32  ;;  %v1053_v33 = vmul.f32 %v3013_v44, %v3013_v44  ;;  %v1182_v26 = vsel %vm814_vm0, %v1052_v25, 0.0 }
 0x19b   :  { %v507_v20 = vpop.f32.mrf.mxu0  ;;  %v3104_v12 = vpop.f32.mrf.mxu1  ;;  %v1177_v1 = vadd.f32 %v1176_v34, %v1175_v57  ;;  %v878_v34 = vsel %vm814_vm0, %v3013_v44, 0.0 }
 0x19c   :  { %5826 = vst [vmem:[#allocation56_spill] sm:$0xff] %v3104_v12  ;;  %v873_v41 = vadd.f32 %v872_v43, %v871_v36  ;;  %v1054_v43 = vmul.f32 %v3027_v21, %v3027_v21  ;;  %v1184_v61 = vsel %vm814_vm0, %v1053_v33, 0.0 }
 0x19d   :  { %v3111_v24 = vpop.f32.mrf.mxu0  ;;  %v757_v53 = vpop.f32.mrf.mxu1  ;;  %v1179_v9 = vadd.f32 %v1178_v37, %v1177_v1  ;;  %v880_v37 = vsel %vm814_vm0, %v3027_v21, 0.0 }
 0x19e   :  { %5827 = vst [vmem:[#allocation57_spill] sm:$0xff] %v3111_v24  ;;  %v875_v49 = vadd.f32 %v874_v10, %v873_v41  ;;  %v1055_v10 = vmul.f32 %v3041_v2, %v3041_v2  ;;  %v1186_v44 = vsel %vm814_vm0, %v1054_v43, 0.0 }
 0x19f   :  { %v512_v28 = vpop.f32.mrf.mxu0  ;;  %v3118_v20 = vpop.f32.mrf.mxu1  ;;  %v1181_v17 = vadd.f32 %v1180_v45, %v1179_v9  ;;  %v882_v45 = vsel %vm814_vm0, %v3041_v2, 0.0 }
 0x1a0   :  { %5828 = vst [vmem:[#allocation58_spill] sm:$0xff] %v3118_v20  ;;  %v877_v57 = vadd.f32 %v876_v48, %v875_v49  ;;  %v1056_v48 = vmul.f32 %v3055_v56, %v3055_v56  ;;  %v1188_v21 = vsel %vm814_vm0, %v1055_v10, 0.0 }
 0x1a1   :  { %v3125_v32 = vpop.f32.mrf.mxu0  ;;  %v762_v53 = vpop.f32.mrf.mxu1  ;;  %v1183_v25 = vadd.f32 %v1182_v26, %v1181_v17  ;;  %v884_v26 = vsel %vm814_vm0, %v3055_v56, 0.0 }
 0x1a2   :  { %5829 = vst [vmem:[#allocation59_spill] sm:$0xff] %v3125_v32  ;;  %v879_v1 = vadd.f32 %v878_v34, %v877_v57  ;;  %v1057_v34 = vmul.f32 %v3069_v0, %v3069_v0  ;;  %v1190_v2 = vsel %vm814_vm0, %v1056_v48, 0.0 }
 0x1a3   :  { %v517_v36 = vpop.f32.mrf.mxu0  ;;  %v3132_v28 = vpop.f32.mrf.mxu1  ;;  %v1185_v33 = vadd.f32 %v1184_v61, %v1183_v25  ;;  %v886_v61 = vsel %vm814_vm0, %v3069_v0, 0.0 }
 0x1a4   :  { %5830 = vst [vmem:[#allocation60_spill] sm:$0xff] %v3132_v28  ;;  %v881_v9 = vadd.f32 %v880_v37, %v879_v1  ;;  %v1058_v37 = vmul.f32 %v3083_v8, %v3083_v8  ;;  %v1192_v56 = vsel %vm814_vm0, %v1057_v34, 0.0 }
 0x1a5   :  { %v3139_v41 = vpop.f32.mrf.mxu0  ;;  %v767_v53 = vpop.f32.mrf.mxu1  ;;  %v1187_v43 = vadd.f32 %v1186_v44, %v1185_v33  ;;  %v888_v44 = vsel %vm814_vm0, %v3083_v8, 0.0 }
 0x1a6   :  { %5831 = vst [vmem:[#allocation61_spill] sm:$0xff] %v3139_v41  ;;  %v883_v17 = vadd.f32 %v882_v45, %v881_v9  ;;  %v1059_v45 = vmul.f32 %v3097_v16, %v3097_v16  ;;  %v1194_v0 = vsel %vm814_vm0, %v1058_v37, 0.0 }
 0x1a7   :  { %v522_v49 = vpop.f32.mrf.mxu0  ;;  %v3146_v36 = vpop.f32.mrf.mxu1  ;;  %v1189_v10 = vadd.f32 %v1188_v21, %v1187_v43  ;;  %v890_v21 = vsel %vm814_vm0, %v3097_v16, 0.0 }
 0x1a8   :  { %5832 = vst [vmem:[#allocation62_spill] sm:$0xff] %v3146_v36  ;;  %v885_v25 = vadd.f32 %v884_v26, %v883_v17  ;;  %v1060_v26 = vmul.f32 %v3111_v24, %v3111_v24  ;;  %v1196_v8 = vsel %vm814_vm0, %v1059_v45, 0.0 }
 0x1a9   :  { %v3153_v57 = vpop.f32.mrf.mxu0  ;;  %v772_v53 = vpop.f32.mrf.mxu1  ;;  %v1191_v48 = vadd.f32 %v1190_v2, %v1189_v10  ;;  %v892_v2 = vsel %vm814_vm0, %v3111_v24, 0.0 }
 0x1aa   :  { %5833 = vst [vmem:[#allocation63_spill] sm:$0xff] %v3153_v57  ;;  %v887_v33 = vadd.f32 %v886_v61, %v885_v25  ;;  %v1061_v61 = vmul.f32 %v3125_v32, %v3125_v32  ;;  %v1198_v16 = vsel %vm814_vm0, %v1060_v26, 0.0 }
 0x1ab   :  { %v527_v1 = vpop.f32.mrf.mxu0  ;;  %v3160_v49 = vpop.f32.mrf.mxu1  ;;  %v1193_v34 = vadd.f32 %v1192_v56, %v1191_v48  ;;  %v894_v56 = vsel %vm814_vm0, %v3125_v32, 0.0 }
 0x1ac   :  { %5834 = vst [vmem:[#allocation64_spill] sm:$0xff] %v3160_v49  ;;  %v889_v43 = vadd.f32 %v888_v44, %v887_v33  ;;  %v1062_v44 = vmul.f32 %v3139_v41, %v3139_v41  ;;  %v1200_v24 = vsel %vm814_vm0, %v1061_v61, 0.0 }
 0x1ad   :  { %v3167_v9 = vpop.f32.mrf.mxu0  ;;  %v777_v53 = vpop.f32.mrf.mxu1  ;;  %v1195_v37 = vadd.f32 %v1194_v0, %v1193_v34  ;;  %v896_v0 = vsel %vm814_vm0, %v3139_v41, 0.0 }
 0x1ae   :  { %5835 = vst [vmem:[#allocation65_spill] sm:$0xff] %v3167_v9  ;;  %v891_v10 = vadd.f32 %v890_v21, %v889_v43  ;;  %v1063_v21 = vmul.f32 %v3153_v57, %v3153_v57  ;;  %v1202_v32 = vsel %vm814_vm0, %v1062_v44, 0.0 }
 0x1af   :  { %v532_v17 = vpop.f32.mrf.mxu0  ;;  %v3174_v1 = vpop.f32.mrf.mxu1  ;;  %v1197_v45 = vadd.f32 %v1196_v8, %v1195_v37  ;;  %v898_v8 = vsel %vm814_vm0, %v3153_v57, 0.0 }
 0x1b0   :  { %5836 = vst [vmem:[#allocation66_spill] sm:$0xff] %v3174_v1  ;;  %v893_v48 = vadd.f32 %v892_v2, %v891_v10  ;;  %v1064_v2 = vmul.f32 %v3167_v9, %v3167_v9  ;;  %v1204_v41 = vsel %vm814_vm0, %v1063_v21, 0.0 }
 0x1b1   :  { %v3181_v25 = vpop.f32.mrf.mxu0  ;;  %v782_v53 = vpop.f32.mrf.mxu1  ;;  %v1199_v26 = vadd.f32 %v1198_v16, %v1197_v45  ;;  %v900_v16 = vsel %vm814_vm0, %v3167_v9, 0.0 }
 0x1b2   :  { %5837 = vst [vmem:[#allocation67_spill] sm:$0xff] %v3181_v25  ;;  %v895_v34 = vadd.f32 %v894_v56, %v893_v48  ;;  %v1065_v56 = vmul.f32 %v3181_v25, %v3181_v25  ;;  %v1206_v57 = vsel %vm814_vm0, %v1064_v2, 0.0 }
 0x1b3   :  { %v537_v33 = vpop.f32.mrf.mxu0  ;;  %v3188_v17 = vpop.f32.mrf.mxu1  ;;  %v1201_v61 = vadd.f32 %v1200_v24, %v1199_v26  ;;  %v902_v24 = vsel %vm814_vm0, %v3181_v25, 0.0 }
 0x1b4   :  { %5838 = vst [vmem:[#allocation68_spill] sm:$0xff] %v3188_v17  ;;  %v897_v37 = vadd.f32 %v896_v0, %v895_v34  ;;  %v1208_v9 = vsel %vm814_vm0, %v1065_v56, 0.0 }
 0x1b5   :  { %v3195_v43 = vpop.f32.mrf.mxu0  ;;  %v787_v53 = vpop.f32.mrf.mxu1  ;;  %v1203_v44 = vadd.f32 %v1202_v32, %v1201_v61 }
 0x1b6   :  { %5839 = vst [vmem:[#allocation69_spill] sm:$0xff] %v3195_v43  ;;  %v899_v45 = vadd.f32 %v898_v8, %v897_v37  ;;  %v1066_v0 = vmul.f32 %v3195_v43, %v3195_v43  ;;  %v904_v32 = vsel %vm814_vm0, %v3195_v43, 0.0 }
 0x1b7   :  { %v542_v10 = vpop.f32.mrf.mxu0  ;;  %v3202_v33 = vpop.f32.mrf.mxu1  ;;  %v1205_v21 = vadd.f32 %v1204_v41, %v1203_v44 }
 0x1b8   :  { %5840 = vst [vmem:[#allocation70_spill] sm:$0xff] %v3202_v33  ;;  %v901_v26 = vadd.f32 %v900_v16, %v899_v45  ;;  %v1210_v25 = vsel %vm814_vm0, %v1066_v0, 0.0 }
 0x1b9   :  { %v3209_v48 = vpop.f32.mrf.mxu0  ;;  %v792_v53 = vpop.f32.mrf.mxu1  ;;  %v1207_v2 = vadd.f32 %v1206_v57, %v1205_v21 }
 0x1ba   :  { %5841 = vst [vmem:[#allocation71_spill] sm:$0xff] %v3209_v48  ;;  %v1067_v8 = vmul.f32 %v3209_v48, %v3209_v48  ;;  %v903_v61 = vadd.f32 %v902_v24, %v901_v26  ;;  %v906_v41 = vsel %vm814_vm0, %v3209_v48, 0.0 }
 0x1bb   :  { %v547_v34 = vpop.f32.mrf.mxu0  ;;  %v3216_v10 = vpop.f32.mrf.mxu1  ;;  %v1209_v56 = vadd.f32 %v1208_v9, %v1207_v2 }
 0x1bc   :  { %5842 = vst [vmem:[#allocation72_spill] sm:$0xff] %v3216_v10  ;;  %v905_v44 = vadd.f32 %v904_v32, %v903_v61  ;;  %v1212_v43 = vsel %vm814_vm0, %v1067_v8, 0.0 }
 0x1bd   :  { %v3223_v37 = vpop.f32.mrf.mxu0  ;;  %v797_v53 = vpop.f32.mrf.mxu1  ;;  %v1211_v24 = vadd.f32 %v1210_v25, %v1209_v56 }
 0x1be   :  { %v1068_v16 = vmul.f32 %v3223_v37, %v3223_v37  ;;  %v908_v57 = vsel %vm814_vm0, %v3223_v37, 0.0  ;;  %v907_v21 = vadd.f32 %v906_v41, %v905_v44 }
 0x1bf   :  { %v552_v45 = vpop.f32.mrf.mxu0  ;;  %v3230_v34 = vpop.f32.mrf.mxu1  ;;  %v1213_v32 = vadd.f32 %v1212_v43, %v1211_v24 }
 0x1c0   :  { %5843 = vst [vmem:[#allocation73_spill] sm:$0xff] %v3230_v34  ;;  %v1214_v53 = vsel %vm814_vm0, %v1068_v16, 0.0  ;;  %v909_v2 = vadd.f32 %v908_v57, %v907_v21  ;;  %v1071_v16 = vmul.f32 %v2803_v42, %v2803_v42 }
 0x1c1   :  { %v3235_v26 = vpop.f32.mrf.mxu0  ;;  %v802_v0 = vpop.f32.mrf.mxu1  ;;  %v1215_v25 = vadd.f32 %v1214_v53, %v1213_v32  ;;  %v1072_v53 = vmul.f32 %v2810_v47, %v2810_v47 }
 0x1c2   :  { %5844 = vst [vmem:[#allocation74_spill] sm:$0xff] %v3235_v26  ;;  %v910_v48 = vsel %vm814_vm0, %v3235_v26, 0.0  ;;  %v1069_v9 = vmul.f32 %v3235_v26, %v3235_v26  ;;  %v1220_v26 = vsel %vm814_vm0, %v1071_v16, 0.0 }
 0x1c3   :  { %v557_v61 = vpop.f32.mrf.mxu0  ;;  %v3242_v8 = vpop.f32.mrf.mxu1  ;;  %v911_v41 = vadd.f32 %v910_v48, %v909_v2  ;;  %v914_v48 = vsel %vm814_vm0, %v2803_v42, 0.0  ;;  %v918_v42 = vsel %vm814_vm0, %v2814_v51, 0.0 }
 0x1c4   :  { %5845 = vst [vmem:[#allocation75_spill] sm:$0xff] %v3242_v8  ;;  %v1216_v45 = vsel %vm814_vm0, %v1069_v9, 0.0 }
 0x1c5   :  { %v3245_v56 = vpop.f32.mrf.mxu0  ;;  %v807_v44 = vpop.f32.mrf.mxu1  ;;  %v1217_v57 = vadd.f32 %v1216_v45, %v1215_v25  ;;  %v916_v45 = vsel %vm814_vm0, %v2810_v47, 0.0  ;;  %v1073_v25 = vmul.f32 %v2814_v51, %v2814_v51 }
 0x1c6   :  { %v912_v0 = vsel %vm814_vm0, %v3245_v56, 0.0  ;;  %v1070_v43 = vmul.f32 %v3245_v56, %v3245_v56 }
 0x1c7   :  { %v913_v24 = vadd.f32 %v912_v0, %v911_v41  ;;  %v562_v21 = vpop.f32.mrf.mxu0  ;;  %v3253_v61 = vpop.f32.mrf.mxu1  ;;  %v1224_v16 = vsel %vm814_vm0, %v1073_v25, 0.0 }
 0x1c8   :  { %5846 = vst [vmem:[#allocation76_spill] sm:$0xff] %v3253_v61  ;;  %v1218_v9 = vsel %vm814_vm0, %v1070_v43, 0.0  ;;  %v1222_v21 = vsel %vm814_vm0, %v1072_v53, 0.0  ;;  %v1074_v43 = vmul.f32 %v2818_v55, %v2818_v55 }
 0x1c9   :  { %v915_v32 = vadd.f32 %v914_v48, %v913_v24  ;;  %v1219_v2 = vadd.f32 %v1218_v9, %v1217_v57  ;;  %v812_v44 = vpop.f32.mrf.mxu1  ;;  %v920_v48 = vsel %vm814_vm0, %v2818_v55, 0.0  ;;  %v1075_v9 = vmul.f32 %v2822_v59, %v2822_v59 }
 0x1ca   :  { %v1226_v53 = vsel %vm814_vm0, %v1074_v43, 0.0  ;;  %v1076_v44 = vmul.f32 %v2826_v63, %v2826_v63 }
 0x1cb   :  { %v917_v41 = vadd.f32 %v916_v45, %v915_v32  ;;  %v1221_v0 = vadd.f32 %v1220_v26, %v1219_v2  ;;  %v922_v2 = vsel %vm814_vm0, %v2822_v59, 0.0  ;;  %v1228_v25 = vsel %vm814_vm0, %v1075_v9, 0.0 }
 0x1cc   :  { %v1230_v43 = vsel %vm814_vm0, %v1076_v44, 0.0 }
 0x1cd   :  { %v919_v57 = vadd.f32 %v918_v42, %v917_v41  ;;  %v1223_v24 = vadd.f32 %v1222_v21, %v1221_v0  ;;  %v924_v41 = vsel %vm814_vm0, %v2826_v63, 0.0  ;;  %v1077_v0 = vmul.f32 %v2830_v3, %v2830_v3 }
 0x1cf   :  { %v921_v32 = vadd.f32 %v920_v48, %v919_v57  ;;  %v1225_v26 = vadd.f32 %v1224_v16, %v1223_v24  ;;  %v926_v24 = vsel %vm814_vm0, %v2830_v3, 0.0  ;;  %v1078_v16 = vmul.f32 %v2834_v7, %v2834_v7 }
 0x1d0   :  { %v1232_v9 = vsel %vm814_vm0, %v1077_v0, 0.0 }
 0x1d1   :  { %v923_v42 = vadd.f32 %v922_v2, %v921_v32  ;;  %v1227_v45 = vadd.f32 %v1226_v53, %v1225_v26  ;;  %v928_v26 = vsel %vm814_vm0, %v2834_v7, 0.0  ;;  %v1079_v53 = vmul.f32 %v2838_v11, %v2838_v11 }
 0x1d2   :  { %v1234_v44 = vsel %vm814_vm0, %v1078_v16, 0.0 }
 0x1d3   :  { %v925_v21 = vadd.f32 %v924_v41, %v923_v42  ;;  %v1229_v57 = vadd.f32 %v1228_v25, %v1227_v45  ;;  %v930_v45 = vsel %vm814_vm0, %v2838_v11, 0.0  ;;  %v1080_v25 = vmul.f32 %v2842_v15, %v2842_v15 }
 0x1d4   :  { %v1236_v0 = vsel %vm814_vm0, %v1079_v53, 0.0 }
 0x1d5   :  { %v927_v48 = vadd.f32 %v926_v24, %v925_v21  ;;  %v1231_v32 = vadd.f32 %v1230_v43, %v1229_v57  ;;  %v932_v57 = vsel %vm814_vm0, %v2842_v15, 0.0  ;;  %v1081_v43 = vmul.f32 %v2846_v19, %v2846_v19 }
 0x1d6   :  { %v1238_v16 = vsel %vm814_vm0, %v1080_v25, 0.0 }
 0x1d7   :  { %v929_v2 = vadd.f32 %v928_v26, %v927_v48  ;;  %v1233_v42 = vadd.f32 %v1232_v9, %v1231_v32  ;;  %v934_v32 = vsel %vm814_vm0, %v2846_v19, 0.0  ;;  %v1082_v9 = vmul.f32 %v2850_v23, %v2850_v23 }
 0x1d8   :  { %v1240_v53 = vsel %vm814_vm0, %v1081_v43, 0.0 }
 0x1d9   :  { %v931_v41 = vadd.f32 %v930_v45, %v929_v2  ;;  %v1235_v21 = vadd.f32 %v1234_v44, %v1233_v42  ;;  %v936_v42 = vsel %vm814_vm0, %v2850_v23, 0.0  ;;  %v1083_v44 = vmul.f32 %v2854_v27, %v2854_v27 }
 0x1da   :  { %v1242_v25 = vsel %vm814_vm0, %v1082_v9, 0.0 }
 0x1db   :  { %v933_v24 = vadd.f32 %v932_v57, %v931_v41  ;;  %v1237_v48 = vadd.f32 %v1236_v0, %v1235_v21  ;;  %v938_v21 = vsel %vm814_vm0, %v2854_v27, 0.0  ;;  %v1084_v0 = vmul.f32 %v2858_v31, %v2858_v31 }
 0x1dc   :  { %v1244_v43 = vsel %vm814_vm0, %v1083_v44, 0.0 }
 0x1dd   :  { %v935_v26 = vadd.f32 %v934_v32, %v933_v24  ;;  %v1239_v2 = vadd.f32 %v1238_v16, %v1237_v48  ;;  %v940_v48 = vsel %vm814_vm0, %v2858_v31, 0.0  ;;  %v1085_v16 = vmul.f32 %v2862_v35, %v2862_v35  ;;  %v5910_v31 = vld [vmem:[#allocation72_spill] sm:$0xff] }
 0x1de   :  { %v1246_v9 = vsel %vm814_vm0, %v1084_v0, 0.0 }
 0x1df   :  { %v937_v45 = vadd.f32 %v936_v42, %v935_v26  ;;  %v1241_v41 = vadd.f32 %v1240_v53, %v1239_v2  ;;  %v942_v2 = vsel %vm814_vm0, %v2862_v35, 0.0  ;;  %v1086_v53 = vmul.f32 %v2866_v40, %v2866_v40  ;;  %v5911_v35 = vld [vmem:[#allocation73_spill] sm:$0xff] }
 0x1e0   :  { %v1248_v44 = vsel %vm814_vm0, %v1085_v16, 0.0 }
 0x1e1   :  { %v1243_v57 = vadd.f32 %v1242_v25, %v1241_v41  ;;  %v939_v24 = vadd.f32 %v938_v21, %v937_v45  ;;  %v944_v41 = vsel %vm814_vm0, %v2866_v40, 0.0  ;;  %v1087_v25 = vmul.f32 %v2870_v46, %v2870_v46  ;;  %v3689_v40 = vld [vmem:[%s5631_s2] ss:$0 sm:$0xff] }
 0x1e2   :  { %v1250_v0 = vsel %vm814_vm0, %v1086_v53, 0.0 }
 0x1e3   :  { %v941_v32 = vadd.f32 %v940_v48, %v939_v24  ;;  %v1245_v26 = vadd.f32 %v1244_v43, %v1243_v57  ;;  %v946_v24 = vsel %vm814_vm0, %v2870_v46, 0.0  ;;  %v1088_v43 = vmul.f32 %v2874_v54, %v2874_v54 }
 0x1e4   :  { %v1252_v16 = vsel %vm814_vm0, %v1087_v25, 0.0 }
 0x1e5   :  { %v943_v42 = vadd.f32 %v942_v2, %v941_v32  ;;  %v1247_v45 = vadd.f32 %v1246_v9, %v1245_v26  ;;  %v948_v26 = vsel %vm814_vm0, %v2874_v54, 0.0  ;;  %v1089_v9 = vmul.f32 %v2878_v62, %v2878_v62 }
 0x1e6   :  { %v1254_v53 = vsel %vm814_vm0, %v1088_v43, 0.0 }
 0x1e7   :  { %v945_v21 = vadd.f32 %v944_v41, %v943_v42  ;;  %v1249_v57 = vadd.f32 %v1248_v44, %v1247_v45  ;;  %v950_v45 = vsel %vm814_vm0, %v2878_v62, 0.0  ;;  %v1090_v44 = vmul.f32 %v2882_v6, %v2882_v6 }
 0x1e8   :  { %v1256_v25 = vsel %vm814_vm0, %v1089_v9, 0.0 }
 0x1e9   :  { %v947_v48 = vadd.f32 %v946_v24, %v945_v21  ;;  %v1251_v32 = vadd.f32 %v1250_v0, %v1249_v57  ;;  %v952_v57 = vsel %vm814_vm0, %v2882_v6, 0.0  ;;  %v1091_v0 = vmul.f32 %v2886_v14, %v2886_v14 }
 0x1ea   :  { %v1258_v43 = vsel %vm814_vm0, %v1090_v44, 0.0 }
 0x1eb   :  { %v949_v2 = vadd.f32 %v948_v26, %v947_v48  ;;  %v1253_v42 = vadd.f32 %v1252_v16, %v1251_v32  ;;  %v954_v32 = vsel %vm814_vm0, %v2886_v14, 0.0  ;;  %v1092_v16 = vmul.f32 %v2890_v22, %v2890_v22 }
 0x1ec   :  { %v1260_v9 = vsel %vm814_vm0, %v1091_v0, 0.0 }
 0x1ed   :  { %v951_v41 = vadd.f32 %v950_v45, %v949_v2  ;;  %v1255_v21 = vadd.f32 %v1254_v53, %v1253_v42  ;;  %v956_v42 = vsel %vm814_vm0, %v2890_v22, 0.0  ;;  %v5847_v53 = vld [vmem:[#allocation31_spill] sm:$0xff]  ;;  %v1262_v44 = vsel %vm814_vm0, %v1092_v16, 0.0 }
 0x1ee   :  { %v1093_v45 = vmul.f32 %v5847_v53, %v5847_v53 }
 0x1ef   :  { %v953_v24 = vadd.f32 %v952_v57, %v951_v41  ;;  %v1257_v48 = vadd.f32 %v1256_v25, %v1255_v21  ;;  %v958_v25 = vsel %vm814_vm0, %v5847_v53, 0.0  ;;  %v5848_v57 = vld [vmem:[#allocation33_spill] sm:$0xff] }
 0x1f0   :  { %v1094_v14 = vmul.f32 %v5848_v57, %v5848_v57  ;;  %v1264_v0 = vsel %vm814_vm0, %v1093_v45, 0.0 }
 0x1f1   :  { %v955_v26 = vadd.f32 %v954_v32, %v953_v24  ;;  %v1259_v2 = vadd.f32 %v1258_v43, %v1257_v48  ;;  %v960_v43 = vsel %vm814_vm0, %v5848_v57, 0.0  ;;  %v5849_v32 = vld [vmem:[#allocation35_spill] sm:$0xff] }
 0x1f2   :  { %v1095_v22 = vmul.f32 %v5849_v32, %v5849_v32  ;;  %v1266_v16 = vsel %vm814_vm0, %v1094_v14, 0.0 }
 0x1f3   :  { %v957_v41 = vadd.f32 %v956_v42, %v955_v26  ;;  %v1261_v21 = vadd.f32 %v1260_v9, %v1259_v2  ;;  %v962_v9 = vsel %vm814_vm0, %v5849_v32, 0.0  ;;  %v5850_v42 = vld [vmem:[#allocation37_spill] sm:$0xff] }
 0x1f4   :  { %v1096_v53 = vmul.f32 %v5850_v42, %v5850_v42  ;;  %v1268_v45 = vsel %vm814_vm0, %v1095_v22, 0.0 }
 0x1f5   :  { %v959_v24 = vadd.f32 %v958_v25, %v957_v41  ;;  %v1263_v48 = vadd.f32 %v1262_v44, %v1261_v21  ;;  %v964_v44 = vsel %vm814_vm0, %v5850_v42, 0.0  ;;  %v1097_v25 = vmul.f32 %v2936_v52, %v2936_v52 }
 0x1f6   :  { %v1270_v14 = vsel %vm814_vm0, %v1096_v53, 0.0 }
 0x1f7   :  { %v961_v26 = vadd.f32 %v960_v43, %v959_v24  ;;  %v1265_v2 = vadd.f32 %v1264_v0, %v1263_v48  ;;  %v966_v0 = vsel %vm814_vm0, %v2936_v52, 0.0  ;;  %v1098_v43 = vmul.f32 %v2950_v50, %v2950_v50 }
 0x1f8   :  { %v1272_v22 = vsel %vm814_vm0, %v1097_v25, 0.0 }
 0x1f9   :  { %v963_v41 = vadd.f32 %v962_v9, %v961_v26  ;;  %v1267_v21 = vadd.f32 %v1266_v16, %v1265_v2  ;;  %v968_v16 = vsel %vm814_vm0, %v2950_v50, 0.0  ;;  %v1099_v9 = vmul.f32 %v2964_v13, %v2964_v13 }
 0x1fa   :  { %v1274_v53 = vsel %vm814_vm0, %v1098_v43, 0.0 }
 0x1fb   :  { %v965_v24 = vadd.f32 %v964_v44, %v963_v41  ;;  %v1269_v48 = vadd.f32 %v1268_v45, %v1267_v21  ;;  %v970_v45 = vsel %vm814_vm0, %v2964_v13, 0.0  ;;  %v1100_v44 = vmul.f32 %v2978_v29, %v2978_v29 }
 0x1fc   :  { %v1276_v25 = vsel %vm814_vm0, %v1099_v9, 0.0 }
 0x1fd   :  { %v1271_v26 = vadd.f32 %v1270_v14, %v1269_v48  ;;  %v967_v2 = vadd.f32 %v966_v0, %v965_v24  ;;  %v972_v14 = vsel %vm814_vm0, %v2978_v29, 0.0  ;;  %v1101_v0 = vmul.f32 %v2992_v5, %v2992_v5 }
 0x1fe   :  { %v1278_v43 = vsel %vm814_vm0, %v1100_v44, 0.0 }
 0x1ff   :  { %v1273_v41 = vadd.f32 %v1272_v22, %v1271_v26  ;;  %v969_v21 = vadd.f32 %v968_v16, %v967_v2  ;;  %v974_v22 = vsel %vm814_vm0, %v2992_v5, 0.0  ;;  %v1102_v16 = vmul.f32 %v3006_v58, %v3006_v58 }
 0x200   :  { %v1280_v9 = vsel %vm814_vm0, %v1101_v0, 0.0 }
 0x201   :  { %v1275_v48 = vadd.f32 %v1274_v53, %v1273_v41  ;;  %v971_v24 = vadd.f32 %v970_v45, %v969_v21  ;;  %v976_v53 = vsel %vm814_vm0, %v3006_v58, 0.0  ;;  %v1103_v45 = vmul.f32 %v3020_v39, %v3020_v39 }
 0x202   :  { %v1282_v44 = vsel %vm814_vm0, %v1102_v16, 0.0 }
 0x203   :  { %v1277_v26 = vadd.f32 %v1276_v25, %v1275_v48  ;;  %v973_v2 = vadd.f32 %v972_v14, %v971_v24  ;;  %v978_v25 = vsel %vm814_vm0, %v3020_v39, 0.0  ;;  %v1104_v14 = vmul.f32 %v3034_v18, %v3034_v18 }
 0x204   :  { %v1284_v0 = vsel %vm814_vm0, %v1103_v45, 0.0 }
 0x205   :  { %v1279_v41 = vadd.f32 %v1278_v43, %v1277_v26  ;;  %v975_v21 = vadd.f32 %v974_v22, %v973_v2  ;;  %v980_v43 = vsel %vm814_vm0, %v3034_v18, 0.0  ;;  %v1105_v22 = vmul.f32 %v3048_v38, %v3048_v38  ;;  %v5913_v18 = vld [vmem:[#allocation76_spill] sm:$0xff] }
 0x206   :  { %v1286_v16 = vsel %vm814_vm0, %v1104_v14, 0.0 }
 0x207   :  { %v1281_v48 = vadd.f32 %v1280_v9, %v1279_v41  ;;  %v977_v24 = vadd.f32 %v976_v53, %v975_v21  ;;  %v982_v9 = vsel %vm814_vm0, %v3048_v38, 0.0  ;;  %v1106_v53 = vmul.f32 %v3062_v30, %v3062_v30 }
 0x208   :  { %v1288_v45 = vsel %vm814_vm0, %v1105_v22, 0.0 }
 0x209   :  { %v1283_v26 = vadd.f32 %v1282_v44, %v1281_v48  ;;  %v979_v2 = vadd.f32 %v978_v25, %v977_v24  ;;  %v984_v44 = vsel %vm814_vm0, %v3062_v30, 0.0  ;;  %v1107_v25 = vmul.f32 %v3076_v60, %v3076_v60  ;;  %v5912_v30 = vld [vmem:[#allocation75_spill] sm:$0xff] }
 0x20a   :  { %v1290_v14 = vsel %vm814_vm0, %v1106_v53, 0.0 }
 0x20b   :  { %v1285_v41 = vadd.f32 %v1284_v0, %v1283_v26  ;;  %v981_v21 = vadd.f32 %v980_v43, %v979_v2  ;;  %v986_v0 = vsel %vm814_vm0, %v3076_v60, 0.0  ;;  %v1108_v43 = vmul.f32 %v3090_v4, %v3090_v4 }
 0x20c   :  { %v1292_v22 = vsel %vm814_vm0, %v1107_v25, 0.0 }
 0x20d   :  { %v1287_v48 = vadd.f32 %v1286_v16, %v1285_v41  ;;  %v983_v24 = vadd.f32 %v982_v9, %v981_v21  ;;  %v988_v16 = vsel %vm814_vm0, %v3090_v4, 0.0  ;;  %v1109_v9 = vmul.f32 %v3104_v12, %v3104_v12 }
 0x20e   :  { %v1294_v53 = vsel %vm814_vm0, %v1108_v43, 0.0 }
 0x20f   :  { %v1289_v26 = vadd.f32 %v1288_v45, %v1287_v48  ;;  %v985_v2 = vadd.f32 %v984_v44, %v983_v24  ;;  %v990_v45 = vsel %vm814_vm0, %v3104_v12, 0.0  ;;  %v1110_v44 = vmul.f32 %v3118_v20, %v3118_v20 }
 0x210   :  { %v1296_v25 = vsel %vm814_vm0, %v1109_v9, 0.0 }
 0x211   :  { %v1291_v41 = vadd.f32 %v1290_v14, %v1289_v26  ;;  %v987_v21 = vadd.f32 %v986_v0, %v985_v2  ;;  %v992_v14 = vsel %vm814_vm0, %v3118_v20, 0.0  ;;  %v1111_v0 = vmul.f32 %v3132_v28, %v3132_v28 }
 0x212   :  { %v1298_v43 = vsel %vm814_vm0, %v1110_v44, 0.0 }
 0x213   :  { %v1293_v48 = vadd.f32 %v1292_v22, %v1291_v41  ;;  %v989_v24 = vadd.f32 %v988_v16, %v987_v21  ;;  %v994_v22 = vsel %vm814_vm0, %v3132_v28, 0.0  ;;  %v1112_v16 = vmul.f32 %v3146_v36, %v3146_v36 }
 0x214   :  { %v1300_v9 = vsel %vm814_vm0, %v1111_v0, 0.0 }
 0x215   :  { %v1295_v26 = vadd.f32 %v1294_v53, %v1293_v48  ;;  %v991_v2 = vadd.f32 %v990_v45, %v989_v24  ;;  %v996_v53 = vsel %vm814_vm0, %v3146_v36, 0.0  ;;  %v1113_v45 = vmul.f32 %v3160_v49, %v3160_v49 }
 0x216   :  { %v1302_v44 = vsel %vm814_vm0, %v1112_v16, 0.0 }
 0x217   :  { %v1297_v41 = vadd.f32 %v1296_v25, %v1295_v26  ;;  %v993_v21 = vadd.f32 %v992_v14, %v991_v2  ;;  %v998_v25 = vsel %vm814_vm0, %v3160_v49, 0.0  ;;  %v1114_v14 = vmul.f32 %v3174_v1, %v3174_v1 }
 0x218   :  { %v1304_v0 = vsel %vm814_vm0, %v1113_v45, 0.0 }
 0x219   :  { %v1299_v48 = vadd.f32 %v1298_v43, %v1297_v41  ;;  %v995_v24 = vadd.f32 %v994_v22, %v993_v21  ;;  %v1000_v43 = vsel %vm814_vm0, %v3174_v1, 0.0  ;;  %v1115_v22 = vmul.f32 %v3188_v17, %v3188_v17 }
 0x21a   :  { %v1306_v16 = vsel %vm814_vm0, %v1114_v14, 0.0 }
 0x21b   :  { %v1301_v26 = vadd.f32 %v1300_v9, %v1299_v48  ;;  %v997_v2 = vadd.f32 %v996_v53, %v995_v24  ;;  %v1002_v9 = vsel %vm814_vm0, %v3188_v17, 0.0  ;;  %v1116_v53 = vmul.f32 %v3202_v33, %v3202_v33 }
 0x21c   :  { %v1308_v45 = vsel %vm814_vm0, %v1115_v22, 0.0 }
 0x21d   :  { %v1303_v41 = vadd.f32 %v1302_v44, %v1301_v26  ;;  %v999_v21 = vadd.f32 %v998_v25, %v997_v2  ;;  %v1004_v44 = vsel %vm814_vm0, %v3202_v33, 0.0  ;;  %v1117_v25 = vmul.f32 %v3216_v10, %v3216_v10 }
 0x21e   :  { %v1310_v14 = vsel %vm814_vm0, %v1116_v53, 0.0 }
 0x21f   :  { %v1305_v48 = vadd.f32 %v1304_v0, %v1303_v41  ;;  %v1001_v24 = vadd.f32 %v1000_v43, %v999_v21  ;;  %v1006_v0 = vsel %vm814_vm0, %v3216_v10, 0.0  ;;  %v1118_v43 = vmul.f32 %v3230_v34, %v3230_v34 }
 0x220   :  { %v1312_v22 = vsel %vm814_vm0, %v1117_v25, 0.0 }
 0x221   :  { %v1307_v26 = vadd.f32 %v1306_v16, %v1305_v48  ;;  %v1003_v2 = vadd.f32 %v1002_v9, %v1001_v24  ;;  %v1008_v16 = vsel %vm814_vm0, %v3230_v34, 0.0  ;;  %v1119_v9 = vmul.f32 %v3242_v8, %v3242_v8 }
 0x223   :  { %v1309_v41 = vadd.f32 %v1308_v45, %v1307_v26  ;;  %v1005_v21 = vadd.f32 %v1004_v44, %v1003_v2  ;;  %v1120_v26 = vmul.f32 %v3253_v61, %v3253_v61  ;;  %v1314_v45 = vsel %vm814_vm0, %v1118_v43, 0.0 }
 0x224   :  { %v1010_v44 = vsel %vm814_vm0, %v3242_v8, 0.0 }
 0x225   :  { %v1311_v48 = vadd.f32 %v1310_v14, %v1309_v41  ;;  %v1007_v24 = vadd.f32 %v1006_v0, %v1005_v21  ;;  %v1012_v41 = vsel %vm814_vm0, %v3253_v61, 0.0  ;;  %v1316_v14 = vsel %vm814_vm0, %v1119_v9, 0.0 }
 0x226   :  { %v1318_v0 = vsel %vm814_vm0, %v1120_v26, 0.0 }
 0x227   :  { %v1313_v53 = vadd.f32 %v1312_v22, %v1311_v48  ;;  %v1009_v2 = vadd.f32 %v1008_v16, %v1007_v24 }
 0x229   :  { %v1315_v25 = vadd.f32 %v1314_v45, %v1313_v53  ;;  %v1011_v21 = vadd.f32 %v1010_v44, %v1009_v2  ;;  %v5855_v45 = vld [vmem:[#allocation5_spill] sm:$0xff]  ;;  %v5907_v44 = vld [vmem:[#allocation66_spill] sm:$0xff] }
 0x22b   :  { %v1317_v34 = vadd.f32 %v1316_v14, %v1315_v25  ;;  %v1013_v10 = vadd.f32 %v1012_v41, %v1011_v21  ;;  %v5858_v41 = vld [vmem:[#allocation8_spill] sm:$0xff]  ;;  %v5859_v21 = vld [vmem:[#allocation9_spill] sm:$0xff]  ;;  %v5893_v25 = vld [vmem:[#allocation59_spill] sm:$0xff] }
 0x22c   :  { %v5909_v14 = vld [vmem:[#allocation70_spill] sm:$0xff] }
 0x22d   :  { %v1014_v33 = vrot.slane %v1013_v10, 4  ;;  %v1319_v17 = vadd.f32 %v1318_v0, %v1317_v34  ;;  %v5860_v0 = vld [vmem:[#allocation10_spill] sm:$0xff] }
 0x22e   :  { %v5900_v34 = vld [vmem:[#allocation74_spill] sm:$0xff] }
 0x22f   :  { %v1015_v48 = vadd.f32 %v1014_v33, %v1013_v10  ;;  %v1320_v24 = vrot.slane %v1319_v17, 4  ;;  %v5853_v33 = vld [vmem:[#allocation2_spill] sm:$0xff]  ;;  %v5902_v10 = vld [vmem:[#allocation27_spill] sm:$0xff] }
 0x231   :  { %v1016_v22 = vrot.slane %v1015_v48, 2  ;;  %v1321_v43 = vadd.f32 %v1320_v24, %v1319_v17  ;;  %v5854_v17 = vld [vmem:[#allocation4_spill] sm:$0xff]  ;;  %v5861_v24 = vld [vmem:[#allocation11_spill] sm:$0xff] }
 0x233   :  { %v1017_v16 = vadd.f32 %v1016_v22, %v1015_v48  ;;  %v1322_v1 = vrot.slane %v1321_v43, 2  ;;  %v5895_v48 = vld [vmem:[#allocation63_spill] sm:$0xff]  ;;  %v5903_v22 = vld [vmem:[#allocation29_spill] sm:$0xff] }
 0x235   :  { %v1018_v8 = vrot.slane %v1017_v16, 1  ;;  %v1323_v49 = vadd.f32 %v1322_v1, %v1321_v43  ;;  %v5862_v43 = vld [vmem:[#allocation12_spill] sm:$0xff] }
 0x236   :  { %v5908_v1 = vld [vmem:[#allocation68_spill] sm:$0xff] }
 0x237   :  { %v1019_v36 = vadd.f32 %v1018_v8, %v1017_v16  ;;  %v1324_v61 = vrot.slane %v1323_v49, 1  ;;  %v5897_v16 = vld [vmem:[#allocation67_spill] sm:$0xff] }
 0x238   :  { %v5899_v8 = vld [vmem:[#allocation71_spill] sm:$0xff] }
 0x239   :  { %v3504_v53 = vmul.f32 0.00125, %v1019_v36  ;;  %v1325_v2 = vadd.f32 %v1324_v61, %v1323_v49  ;;  %v5856_v49 = vld [vmem:[#allocation6_spill] sm:$0xff]  ;;  %v5857_v61 = vld [vmem:[#allocation7_spill] sm:$0xff]  ;;  %v5898_v36 = vld [vmem:[#allocation69_spill] sm:$0xff] }
 0x23b   :  { %v3506_v9 = vmul.f32 0.00125, %v1325_v2  ;;  %v3510_v26 = vmul.f32 %v3504_v53, %v3504_v53  ;;  %v5914_v60 = vsub.f32 %v5853_v33, %v3504_v53  ;;  %v5915_v12 = vsub.f32 %v5854_v17, %v3504_v53 }
 0x23c   :  { %v5916_v28 = vsub.f32 %v5855_v45, %v3504_v53  ;;  %v5917_v38 = vsub.f32 %v5856_v49, %v3504_v53 }
 0x23d   :  { %5851 = vst [vmem:[#allocation33_spill] sm:$0xff] %v3506_v9  ;;  %5852 = vst [vmem:[#allocation35_spill] sm:$0xff] %v3510_v26  ;;  %v5901_v26 = vld [vmem:[#allocation3_spill] sm:$0xff]  ;;  %v3723_v4 = vmul.f32 %v3689_v40, %v5914_v60  ;;  %v3729_v20 = vmul.f32 %v3689_v40, %v5915_v12  ;;  %v5918_v60 = vsub.f32 %v5857_v61, %v3504_v53 }
 0x23e   :  { %v5904_v9 = vld [vmem:[#allocation31_spill] sm:$0xff]  ;;  %v3735_v2 = vmul.f32 %v3689_v40, %v5916_v28  ;;  %v3741_v33 = vmul.f32 %v3689_v40, %v5917_v38  ;;  %v5919_v12 = vsub.f32 %v5858_v41, %v3504_v53  ;;  %v5921_v28 = vsub.f32 %v5859_v21, %v3504_v53 }
 0x23f   :  { %v3747_v17 = vmul.f32 %v3689_v40, %v5918_v60  ;;  %v5923_v38 = vsub.f32 %v5860_v0, %v3504_v53  ;;  %v5925_v60 = vsub.f32 %v5861_v24, %v3504_v53 }
 0x240   :  { %v3753_v45 = vmul.f32 %v3689_v40, %v5919_v12  ;;  %v3759_v49 = vmul.f32 %v3689_v40, %v5921_v28  ;;  %v5927_v12 = vsub.f32 %v5862_v43, %v3504_v53  ;;  %v5929_v28 = vld [vmem:[#allocation13_spill] sm:$0xff] }
 0x241   :  { %v3765_v61 = vmul.f32 %v3689_v40, %v5923_v38  ;;  %v3771_v41 = vmul.f32 %v3689_v40, %v5925_v60  ;;  %v5932_v38 = vld [vmem:[#allocation14_spill] sm:$0xff]  ;;  %v5935_v60 = vld [vmem:[#allocation15_spill] sm:$0xff] }
 0x242   :  { %5920 = vst [vmem:[#allocation37_spill] sm:$0xff] %v3753_v45  ;;  %5922 = vst [vmem:[#allocation2_spill] sm:$0xff] %v3759_v49  ;;  %v3777_v21 = vmul.f32 %v3689_v40, %v5927_v12  ;;  %v5930_v49 = vsub.f32 %v5929_v28, %v3504_v53  ;;  %v5938_v12 = vld [vmem:[#allocation16_spill] sm:$0xff] }
 0x243   :  { %5924 = vst [vmem:[#allocation4_spill] sm:$0xff] %v3765_v61  ;;  %5926 = vst [vmem:[#allocation5_spill] sm:$0xff] %v3771_v41  ;;  %v5933_v61 = vsub.f32 %v5932_v38, %v3504_v53  ;;  %v5936_v41 = vsub.f32 %v5935_v60, %v3504_v53 }
 0x244   :  { %5928 = vst [vmem:[#allocation6_spill] sm:$0xff] %v3777_v21  ;;  %v3783_v0 = vmul.f32 %v3689_v40, %v5930_v49  ;;  %v5939_v21 = vsub.f32 %v5938_v12, %v3504_v53  ;;  %v5941_v49 = vld [vmem:[#allocation18_spill] sm:$0xff] }
 0x245   :  { %v3789_v24 = vmul.f32 %v3689_v40, %v5933_v61  ;;  %v3795_v43 = vmul.f32 %v3689_v40, %v5936_v41  ;;  %v5944_v61 = vld [vmem:[#allocation20_spill] sm:$0xff]  ;;  %v5947_v41 = vld [vmem:[#allocation22_spill] sm:$0xff] }
 0x246   :  { %5931 = vst [vmem:[#allocation7_spill] sm:$0xff] %v3783_v0  ;;  %v3801_v28 = vmul.f32 %v3689_v40, %v5939_v21  ;;  %v5942_v0 = vsub.f32 %v5941_v49, %v3504_v53  ;;  %v5950_v21 = vld [vmem:[#allocation23_spill] sm:$0xff] }
 0x247   :  { %5934 = vst [vmem:[#allocation8_spill] sm:$0xff] %v3789_v24  ;;  %5937 = vst [vmem:[#allocation9_spill] sm:$0xff] %v3795_v43  ;;  %v5945_v24 = vsub.f32 %v5944_v61, %v3504_v53  ;;  %v5948_v43 = vsub.f32 %v5947_v41, %v3504_v53 }
 0x248   :  { %5940 = vst [vmem:[#allocation10_spill] sm:$0xff] %v3801_v28  ;;  %v3807_v38 = vmul.f32 %v3689_v40, %v5942_v0  ;;  %v5951_v28 = vsub.f32 %v5950_v21, %v3504_v53  ;;  %v5953_v0 = vld [vmem:[#allocation24_spill] sm:$0xff] }
 0x249   :  { %v3813_v60 = vmul.f32 %v3689_v40, %v5945_v24  ;;  %v3819_v12 = vmul.f32 %v3689_v40, %v5948_v43  ;;  %v5956_v24 = vld [vmem:[#allocation25_spill] sm:$0xff]  ;;  %v5959_v43 = vld [vmem:[#allocation26_spill] sm:$0xff] }
 0x24a   :  { %5943 = vst [vmem:[#allocation11_spill] sm:$0xff] %v3807_v38  ;;  %v3825_v49 = vmul.f32 %v3689_v40, %v5951_v28  ;;  %v5954_v38 = vsub.f32 %v5953_v0, %v3504_v53  ;;  %v5962_v28 = vld [vmem:[#allocation28_spill] sm:$0xff] }
 0x24b   :  { %5946 = vst [vmem:[#allocation12_spill] sm:$0xff] %v3813_v60  ;;  %5949 = vst [vmem:[#allocation59_spill] sm:$0xff] %v3819_v12  ;;  %v5957_v60 = vsub.f32 %v5956_v24, %v3504_v53  ;;  %v5960_v12 = vsub.f32 %v5959_v43, %v3504_v53 }
 0x24c   :  { %5952 = vst [vmem:[#allocation63_spill] sm:$0xff] %v3825_v49  ;;  %v3831_v61 = vmul.f32 %v3689_v40, %v5954_v38  ;;  %v5963_v49 = vsub.f32 %v5962_v28, %v3504_v53  ;;  %v5965_v38 = vld [vmem:[#allocation30_spill] sm:$0xff] }
 0x24d   :  { %v3837_v41 = vmul.f32 %v3689_v40, %v5957_v60  ;;  %v3843_v21 = vmul.f32 %v3689_v40, %v5960_v12  ;;  %v5968_v60 = vld [vmem:[#allocation32_spill] sm:$0xff]  ;;  %v5971_v12 = vld [vmem:[#allocation34_spill] sm:$0xff] }
 0x24e   :  { %5955 = vst [vmem:[#allocation67_spill] sm:$0xff] %v3831_v61  ;;  %v3849_v0 = vmul.f32 %v3689_v40, %v5963_v49  ;;  %v5966_v61 = vsub.f32 %v5965_v38, %v3504_v53  ;;  %v5974_v49 = vld [vmem:[#allocation36_spill] sm:$0xff] }
 0x24f   :  { %5958 = vst [vmem:[#allocation69_spill] sm:$0xff] %v3837_v41  ;;  %5961 = vst [vmem:[#allocation71_spill] sm:$0xff] %v3843_v21  ;;  %v5969_v41 = vsub.f32 %v5968_v60, %v3504_v53  ;;  %v5972_v21 = vsub.f32 %v5971_v12, %v3504_v53 }
 0x250   :  { %5964 = vst [vmem:[#allocation74_spill] sm:$0xff] %v3849_v0  ;;  %v3855_v24 = vmul.f32 %v3689_v40, %v5966_v61  ;;  %v5975_v0 = vsub.f32 %v5974_v49, %v3504_v53  ;;  %v5977_v61 = vld [vmem:[#allocation38_spill] sm:$0xff] }
 0x251   :  { %v3861_v43 = vmul.f32 %v3689_v40, %v5969_v41  ;;  %v3867_v28 = vmul.f32 %v3689_v40, %v5972_v21  ;;  %v5980_v41 = vld [vmem:[#allocation39_spill] sm:$0xff]  ;;  %v5983_v21 = vld [vmem:[#allocation40_spill] sm:$0xff] }
 0x252   :  { %5967 = vst [vmem:[#allocation3_spill] sm:$0xff] %v3855_v24  ;;  %v3873_v38 = vmul.f32 %v3689_v40, %v5975_v0  ;;  %v5978_v24 = vsub.f32 %v5977_v61, %v3504_v53  ;;  %v5986_v0 = vld [vmem:[#allocation41_spill] sm:$0xff] }
 0x253   :  { %5970 = vst [vmem:[#allocation27_spill] sm:$0xff] %v3861_v43  ;;  %5973 = vst [vmem:[#allocation29_spill] sm:$0xff] %v3867_v28  ;;  %v5981_v43 = vsub.f32 %v5980_v41, %v3504_v53  ;;  %v5984_v28 = vsub.f32 %v5983_v21, %v3504_v53 }
 0x254   :  { %5976 = vst [vmem:[#allocation31_spill] sm:$0xff] %v3873_v38  ;;  %v3879_v60 = vmul.f32 %v3689_v40, %v5978_v24  ;;  %v5987_v38 = vsub.f32 %v5986_v0, %v3504_v53  ;;  %v5989_v24 = vld [vmem:[#allocation42_spill] sm:$0xff] }
 0x255   :  { %v3885_v12 = vmul.f32 %v3689_v40, %v5981_v43  ;;  %v3891_v49 = vmul.f32 %v3689_v40, %v5984_v28  ;;  %v5992_v43 = vld [vmem:[#allocation43_spill] sm:$0xff]  ;;  %v5995_v28 = vld [vmem:[#allocation44_spill] sm:$0xff] }
 0x256   :  { %5979 = vst [vmem:[#allocation66_spill] sm:$0xff] %v3879_v60  ;;  %v3897_v61 = vmul.f32 %v3689_v40, %v5987_v38  ;;  %v5990_v60 = vsub.f32 %v5989_v24, %v3504_v53  ;;  %v5998_v38 = vld [vmem:[#allocation45_spill] sm:$0xff] }
 0x257   :  { %5982 = vst [vmem:[#allocation68_spill] sm:$0xff] %v3885_v12  ;;  %5985 = vst [vmem:[#allocation70_spill] sm:$0xff] %v3891_v49  ;;  %v5993_v12 = vsub.f32 %v5992_v43, %v3504_v53  ;;  %v5996_v49 = vsub.f32 %v5995_v28, %v3504_v53 }
 0x258   :  { %5988 = vst [vmem:[#allocation72_spill] sm:$0xff] %v3897_v61  ;;  %v3903_v41 = vmul.f32 %v3689_v40, %v5990_v60  ;;  %v5999_v61 = vsub.f32 %v5998_v38, %v3504_v53  ;;  %v6001_v60 = vld [vmem:[#allocation47_spill] sm:$0xff] }
 0x259   :  { %v3909_v21 = vmul.f32 %v3689_v40, %v5993_v12  ;;  %v3915_v0 = vmul.f32 %v3689_v40, %v5996_v49  ;;  %v6004_v12 = vld [vmem:[#allocation49_spill] sm:$0xff]  ;;  %v6007_v49 = vld [vmem:[#allocation51_spill] sm:$0xff] }
 0x25a   :  { %5991 = vst [vmem:[#allocation73_spill] sm:$0xff] %v3903_v41  ;;  %v3921_v24 = vmul.f32 %v3689_v40, %v5999_v61  ;;  %v6002_v41 = vsub.f32 %v6001_v60, %v3504_v53  ;;  %v6010_v61 = vld [vmem:[#allocation53_spill] sm:$0xff] }
 0x25b   :  { %5994 = vst [vmem:[#allocation75_spill] sm:$0xff] %v3909_v21  ;;  %5997 = vst [vmem:[#allocation76_spill] sm:$0xff] %v3915_v0  ;;  %v6005_v21 = vsub.f32 %v6004_v12, %v3504_v53  ;;  %v6008_v0 = vsub.f32 %v6007_v49, %v3504_v53 }
 0x25c   :  { %6000 = vst [vmem:[#allocation13_spill] sm:$0xff] %v3921_v24  ;;  %v3927_v43 = vmul.f32 %v3689_v40, %v6002_v41  ;;  %v6011_v24 = vsub.f32 %v6010_v61, %v3504_v53  ;;  %v6013_v41 = vld [vmem:[#allocation55_spill] sm:$0xff] }
 0x25d   :  { %v3933_v28 = vmul.f32 %v3689_v40, %v6005_v21  ;;  %v3939_v38 = vmul.f32 %v3689_v40, %v6008_v0  ;;  %v6016_v21 = vld [vmem:[#allocation57_spill] sm:$0xff]  ;;  %v6018_v0 = vsub.f32 %v5893_v25, %v3504_v53 }
 0x25e   :  { %6003 = vst [vmem:[#allocation14_spill] sm:$0xff] %v3927_v43  ;;  %v3945_v60 = vmul.f32 %v3689_v40, %v6011_v24  ;;  %v6014_v43 = vsub.f32 %v6013_v41, %v3504_v53  ;;  %v6020_v24 = vld [vmem:[#allocation33_spill] sm:$0xff] }
 0x25f   :  { %6006 = vst [vmem:[#allocation15_spill] sm:$0xff] %v3933_v28  ;;  %6009 = vst [vmem:[#allocation16_spill] sm:$0xff] %v3939_v38  ;;  %v6017_v28 = vsub.f32 %v6016_v21, %v3504_v53  ;;  %v3963_v61 = vmul.f32 %v3689_v40, %v6018_v0  ;;  %v6023_v41 = vld [vmem:[#allocation61_spill] sm:$0xff] }
 0x260   :  { %6012 = vst [vmem:[#allocation18_spill] sm:$0xff] %v3945_v60  ;;  %v3951_v12 = vmul.f32 %v3689_v40, %v6014_v43  ;;  %v6021_v60 = vld [vmem:[#allocation35_spill] sm:$0xff]  ;;  %v6024_v43 = vsub.f32 %v6023_v41, %v3504_v53  ;;  %v6026_v25 = vld [vmem:[#allocation65_spill] sm:$0xff]  ;;  %v6030_v41 = vsub.f32 %v5899_v8, %v3504_v53 }
 0x261   :  { %v3957_v49 = vmul.f32 %v3689_v40, %v6017_v28  ;;  %6019 = vst [vmem:[#allocation22_spill] sm:$0xff] %v3963_v61  ;;  %v6022_v38 = vsub.f32 %v6020_v24, %v6021_v60  ;;  %v6025_v28 = vsub.f32 %v5895_v48, %v3504_v53  ;;  %v6027_v0 = vsub.f32 %v6026_v25, %v3504_v53 }
 0x262   :  { %6015 = vst [vmem:[#allocation20_spill] sm:$0xff] %v3951_v12  ;;  %v3972_v12 = vmul.f32 %v3689_v40, %v6024_v43  ;;  %v6029_v24 = vsub.f32 %v5898_v36, %v3504_v53  ;;  %v4002_v43 = vmul.f32 %v3689_v40, %v6030_v41  ;;  %v6032_v25 = vsub.f32 %v5900_v34, %v3504_v53 }
 0x263   :  { %v1536_v45 = vadd.f32 1e-05, %v6022_v38  ;;  %v3978_v21 = vmul.f32 %v3689_v40, %v6025_v28  ;;  %v3984_v61 = vmul.f32 %v3689_v40, %v6027_v0  ;;  %v6028_v38 = vsub.f32 %v5897_v16, %v3504_v53 }
 0x264   :  { %v3996_v48 = vmul.f32 %v3689_v40, %v6029_v24  ;;  %v6031_v28 = vsub.f32 %v3223_v37, %v3504_v53  ;;  %v4014_v36 = vmul.f32 %v3689_v40, %v6032_v25  ;;  %v6033_v0 = vsub.f32 %v3245_v56, %v3504_v53 }
 0x265   :  { %v3990_v60 = vmul.f32 %v3689_v40, %v6028_v38  ;;  %2016 = vrsqrt.f32 %v1536_v45  ;;  %v6034_v38 = vsub.f32 %v5901_v26, %v3504_v53  ;;  %v6035_v45 = vsub.f32 %v2810_v47, %v3504_v53 }
 0x266   :  { %v4008_v16 = vmul.f32 %v3689_v40, %v6031_v28  ;;  %v4020_v8 = vmul.f32 %v3689_v40, %v6033_v0  ;;  %v6036_v24 = vsub.f32 %v2814_v51, %v3504_v53  ;;  %v6037_v41 = vsub.f32 %v2818_v55, %v3504_v53 }
 0x267   :  { %v4026_v37 = vmul.f32 %v3689_v40, %v6034_v38  ;;  %v4032_v34 = vmul.f32 %v3689_v40, %v6035_v45  ;;  %v6038_v28 = vsub.f32 %v2822_v59, %v3504_v53  ;;  %v6039_v25 = vsub.f32 %v2826_v63, %v3504_v53 }
 0x268   :  { %v4038_v56 = vmul.f32 %v3689_v40, %v6036_v24  ;;  %v4044_v26 = vmul.f32 %v3689_v40, %v6037_v41  ;;  %v6040_v0 = vsub.f32 %v2830_v3, %v3504_v53  ;;  %v6041_v38 = vsub.f32 %v2834_v7, %v3504_v53 }
 0x269   :  { %v4050_v47 = vmul.f32 %v3689_v40, %v6038_v28  ;;  %v4056_v51 = vmul.f32 %v3689_v40, %v6039_v25  ;;  %v6042_v45 = vsub.f32 %v2838_v11, %v3504_v53  ;;  %v6043_v24 = vsub.f32 %v2842_v15, %v3504_v53 }
 0x26a   :  { %v4062_v55 = vmul.f32 %v3689_v40, %v6040_v0  ;;  %v4068_v59 = vmul.f32 %v3689_v40, %v6041_v38  ;;  %v6044_v41 = vsub.f32 %v2846_v19, %v3504_v53  ;;  %v6045_v28 = vsub.f32 %v2850_v23, %v3504_v53  ;;  %v6047_v0 = vld [vmem:[#allocation17_spill] sm:$0xff] }
 0x26b   :  { %v4074_v63 = vmul.f32 %v3689_v40, %v6042_v45  ;;  %v4080_v3 = vmul.f32 %v3689_v40, %v6043_v24  ;;  %v6046_v25 = vsub.f32 %v2854_v27, %v3504_v53  ;;  %v6048_v38 = vsub.f32 %v6047_v0, %v3504_v53  ;;  %v6049_v45 = vld [vmem:[#allocation19_spill] sm:$0xff] }
 0x26c   :  { %v4086_v7 = vmul.f32 %v3689_v40, %v6044_v41  ;;  %v4092_v11 = vmul.f32 %v3689_v40, %v6045_v28  ;;  %v6050_v24 = vsub.f32 %v6049_v45, %v3504_v53  ;;  %v6051_v41 = vld [vmem:[#allocation21_spill] sm:$0xff] }
 0x26d   :  { %v4098_v15 = vmul.f32 %v3689_v40, %v6046_v25  ;;  %v4104_v19 = vmul.f32 %v3689_v40, %v6048_v38  ;;  %v6052_v28 = vsub.f32 %v6051_v41, %v3504_v53  ;;  %v6053_v25 = vsub.f32 %v2870_v46, %v3504_v53 }
 0x26e   :  { %v4110_v23 = vmul.f32 %v3689_v40, %v6050_v24  ;;  %v6054_v38 = vsub.f32 %v2874_v54, %v3504_v53  ;;  %v6055_v24 = vsub.f32 %v2878_v62, %v3504_v53 }
 0x26f   :  { %v4116_v27 = vmul.f32 %v3689_v40, %v6052_v28  ;;  %v4122_v0 = vmul.f32 %v3689_v40, %v6053_v25  ;;  %v6056_v28 = vsub.f32 %v2882_v6, %v3504_v53  ;;  %v6057_v25 = vsub.f32 %v5902_v10, %v3504_v53 }
 0x270   :  { %v4128_v45 = vmul.f32 %v3689_v40, %v6054_v38  ;;  %v4134_v41 = vmul.f32 %v3689_v40, %v6055_v24  ;;  %v6058_v38 = vsub.f32 %v5903_v22, %v3504_v53  ;;  %v6059_v24 = vsub.f32 %v5904_v9, %v3504_v53 }
 0x271   :  { %v4140_v46 = vmul.f32 %v3689_v40, %v6056_v28  ;;  %v4146_v54 = vmul.f32 %v3689_v40, %v6057_v25  ;;  %v6060_v28 = vsub.f32 %v5848_v57, %v3504_v53  ;;  %v6061_v25 = vsub.f32 %v5849_v32, %v3504_v53 }
 0x272   :  { %v4152_v62 = vmul.f32 %v3689_v40, %v6058_v38  ;;  %v4158_v6 = vmul.f32 %v3689_v40, %v6059_v24  ;;  %v6062_v38 = vsub.f32 %v5850_v42, %v3504_v53  ;;  %v6063_v24 = vsub.f32 %v2936_v52, %v3504_v53 }
 0x273   :  { %v4164_v10 = vmul.f32 %v3689_v40, %v6060_v28  ;;  %v4170_v22 = vmul.f32 %v3689_v40, %v6061_v25  ;;  %v6064_v28 = vsub.f32 %v2950_v50, %v3504_v53  ;;  %v6065_v25 = vsub.f32 %v2964_v13, %v3504_v53 }
 0x274   :  { %v4176_v9 = vmul.f32 %v3689_v40, %v6062_v38  ;;  %v4182_v57 = vmul.f32 %v3689_v40, %v6063_v24  ;;  %v6066_v38 = vsub.f32 %v2978_v29, %v3504_v53  ;;  %v6068_v24 = vsub.f32 %v2992_v5, %v3504_v53 }
 0x275   :  { %v4188_v32 = vmul.f32 %v3689_v40, %v6064_v28  ;;  %v4194_v42 = vmul.f32 %v3689_v40, %v6065_v25  ;;  %v6070_v28 = vsub.f32 %v3006_v58, %v3504_v53  ;;  %v6072_v25 = vsub.f32 %v3020_v39, %v3504_v53 }
 0x276   :  { %v4200_v52 = vmul.f32 %v3689_v40, %v6066_v38  ;;  %v4206_v50 = vmul.f32 %v3689_v40, %v6068_v24  ;;  %v6074_v38 = vld [vmem:[#allocation46_spill] sm:$0xff]  ;;  %v6077_v24 = vld [vmem:[#allocation48_spill] sm:$0xff] }
 0x277   :  { %v4212_v13 = vmul.f32 %v3689_v40, %v6070_v28  ;;  %v4218_v29 = vmul.f32 %v3689_v40, %v6072_v25  ;;  %v6080_v28 = vld [vmem:[#allocation50_spill] sm:$0xff]  ;;  %v6083_v25 = vld [vmem:[#allocation52_spill] sm:$0xff] }
 0x278   :  { %6067 = vst [vmem:[#allocation23_spill] sm:$0xff] %v4200_v52  ;;  %6069 = vst [vmem:[#allocation24_spill] sm:$0xff] %v4206_v50  ;;  %v6075_v52 = vsub.f32 %v6074_v38, %v3504_v53  ;;  %v6078_v50 = vsub.f32 %v6077_v24, %v3504_v53 }
 0x279   :  { %6071 = vst [vmem:[#allocation25_spill] sm:$0xff] %v4212_v13  ;;  %6073 = vst [vmem:[#allocation26_spill] sm:$0xff] %v4218_v29  ;;  %v6081_v13 = vsub.f32 %v6080_v28, %v3504_v53  ;;  %v6084_v29 = vsub.f32 %v6083_v25, %v3504_v53 }
 0x27a   :  { %v4224_v5 = vmul.f32 %v3689_v40, %v6075_v52  ;;  %v4230_v58 = vmul.f32 %v3689_v40, %v6078_v50  ;;  %v6086_v52 = vld [vmem:[#allocation54_spill] sm:$0xff]  ;;  %v6089_v50 = vld [vmem:[#allocation56_spill] sm:$0xff] }
 0x27b   :  { %v4236_v39 = vmul.f32 %v3689_v40, %v6081_v13  ;;  %v4242_v38 = vmul.f32 %v3689_v40, %v6084_v29  ;;  %v6092_v13 = vld [vmem:[#allocation58_spill] sm:$0xff]  ;;  %v6094_v29 = vld [vmem:[#allocation60_spill] sm:$0xff] }
 0x27c   :  { %6076 = vst [vmem:[#allocation28_spill] sm:$0xff] %v4224_v5  ;;  %6079 = vst [vmem:[#allocation30_spill] sm:$0xff] %v4230_v58  ;;  %v6087_v5 = vsub.f32 %v6086_v52, %v3504_v53  ;;  %v6090_v58 = vsub.f32 %v6089_v50, %v3504_v53 }
 0x27d   :  { %6082 = vst [vmem:[#allocation32_spill] sm:$0xff] %v4236_v39  ;;  %6085 = vst [vmem:[#allocation34_spill] sm:$0xff] %v4242_v38  ;;  %v6093_v39 = vsub.f32 %v6092_v13, %v3504_v53  ;;  %v6095_v38 = vsub.f32 %v6094_v29, %v3504_v53 }
 0x27e   :  { %v4248_v24 = vmul.f32 %v3689_v40, %v6087_v5  ;;  %v4254_v28 = vmul.f32 %v3689_v40, %v6090_v58  ;;  %v6096_v5 = vld [vmem:[#allocation62_spill] sm:$0xff]  ;;  %v6098_v58 = vld [vmem:[#allocation64_spill] sm:$0xff] }
 0x27f   :  { %v4260_v25 = vmul.f32 %v3689_v40, %v6093_v39  ;;  %v4266_v52 = vmul.f32 %v3689_v40, %v6095_v38  ;;  %v6100_v39 = vsub.f32 %v5907_v44, %v3504_v53  ;;  %v6101_v38 = vsub.f32 %v5908_v1, %v3504_v53 }
 0x280   :  { %6088 = vst [vmem:[#allocation36_spill] sm:$0xff] %v4248_v24  ;;  %6091 = vst [vmem:[#allocation38_spill] sm:$0xff] %v4254_v28  ;;  %v6097_v24 = vsub.f32 %v6096_v5, %v3504_v53  ;;  %v6099_v28 = vsub.f32 %v6098_v58, %v3504_v53  ;;  %v6104_v44 = vsub.f32 %v5910_v31, %v3504_v53 }
 0x281   :  { %v4284_v29 = vmul.f32 %v3689_v40, %v6100_v39  ;;  %v4290_v5 = vmul.f32 %v3689_v40, %v6101_v38  ;;  %v6105_v1 = vsub.f32 %v5911_v35, %v3504_v53 }
 0x282   :  { %v4272_v50 = vmul.f32 %v3689_v40, %v6097_v24  ;;  %v4278_v13 = vmul.f32 %v3689_v40, %v6099_v28  ;;  %v6102_v24 = vsub.f32 %v5909_v14, %v3504_v53  ;;  %v4298_v28 = vpop.eup %2016  ;;  %v4304_v39 = vmul.f32 %v3689_v40, %v6104_v44 }
 0x283   :  { %v4310_v38 = vmul.f32 %v3689_v40, %v6105_v1  ;;  %v6106_v14 = vsub.f32 %v5912_v30, %v3504_v53  ;;  %v4326_v44 = vmul.f32 %v4298_v28, %v3723_v4  ;;  %v4330_v35 = vmul.f32 %v4298_v28, %v3729_v20 }
 0x284   :  { %v4296_v58 = vmul.f32 %v3689_v40, %v6102_v24  ;;  %v4334_v30 = vmul.f32 %v4298_v28, %v3735_v2  ;;  %v4338_v1 = vmul.f32 %v4298_v28, %v3741_v33 }
 0x285   :  { %v4316_v24 = vmul.f32 %v3689_v40, %v6106_v14  ;;  %v6116_v14 = vld [vmem:[#allocation5_spill] sm:$0xff] }
 0x286   :  { %6103 = vst [vmem:[#allocation39_spill] sm:$0xff] %v4296_v58  ;;  %v6107_v58 = vsub.f32 %v5913_v18, %v3504_v53  ;;  %6108 = vst [vmem:[#allocation40_spill] sm:$0xff] %v4338_v1  ;;  %v6110_v18 = vld [vmem:[#allocation37_spill] sm:$0xff]  ;;  %v6112_v53 = vld [vmem:[#allocation2_spill] sm:$0xff]  ;;  %v4358_v33 = vmul.f32 %v4298_v28, %v6116_v14 }
 0x287   :  { %v4346_v4 = vmul.f32 %v4298_v28, %v6110_v18  ;;  %v4350_v20 = vmul.f32 %v4298_v28, %v6112_v53  ;;  %v6118_v1 = vld [vmem:[#allocation6_spill] sm:$0xff] }
 0x288   :  { %v4322_v31 = vmul.f32 %v3689_v40, %v6107_v58  ;;  %v4342_v40 = vmul.f32 %v4298_v28, %v3747_v17  ;;  %v6114_v58 = vld [vmem:[#allocation4_spill] sm:$0xff]  ;;  %6117 = vst [vmem:[#allocation45_spill] sm:$0xff] %v4358_v33  ;;  %v4362_v17 = vmul.f32 %v4298_v28, %v6118_v1  ;;  %v6128_v33 = vld [vmem:[#allocation11_spill] sm:$0xff] }
 0x289   :  { %6111 = vst [vmem:[#allocation42_spill] sm:$0xff] %v4346_v4  ;;  %6113 = vst [vmem:[#allocation43_spill] sm:$0xff] %v4350_v20  ;;  %v4354_v2 = vmul.f32 %v4298_v28, %v6114_v58  ;;  %v6122_v4 = vld [vmem:[#allocation8_spill] sm:$0xff]  ;;  %v6124_v20 = vld [vmem:[#allocation9_spill] sm:$0xff]  ;;  %v4382_v1 = vmul.f32 %v4298_v28, %v6128_v33 }
 0x28a   :  { %6109 = vst [vmem:[#allocation41_spill] sm:$0xff] %v4342_v40  ;;  %6119 = vst [vmem:[#allocation47_spill] sm:$0xff] %v4362_v17  ;;  %v6120_v40 = vld [vmem:[#allocation7_spill] sm:$0xff]  ;;  %v4370_v53 = vmul.f32 %v4298_v28, %v6122_v4  ;;  %v4374_v58 = vmul.f32 %v4298_v28, %v6124_v20  ;;  %v6130_v17 = vld [vmem:[#allocation12_spill] sm:$0xff] }
 0x28b   :  { %6115 = vst [vmem:[#allocation44_spill] sm:$0xff] %v4354_v2  ;;  %v4366_v18 = vmul.f32 %v4298_v28, %v6120_v40  ;;  %v6126_v2 = vld [vmem:[#allocation10_spill] sm:$0xff]  ;;  %6129 = vst [vmem:[#allocation57_spill] sm:$0xff] %v4382_v1  ;;  %v4386_v40 = vmul.f32 %v4298_v28, %v6130_v17  ;;  %v6140_v1 = vld [vmem:[#allocation71_spill] sm:$0xff] }
 0x28c   :  { %6123 = vst [vmem:[#allocation51_spill] sm:$0xff] %v4370_v53  ;;  %6125 = vst [vmem:[#allocation53_spill] sm:$0xff] %v4374_v58  ;;  %v4378_v14 = vmul.f32 %v4298_v28, %v6126_v2  ;;  %v6134_v53 = vld [vmem:[#allocation63_spill] sm:$0xff]  ;;  %v4406_v17 = vmul.f32 %v4298_v28, %v6140_v1 }
 0x28d   :  { %6121 = vst [vmem:[#allocation49_spill] sm:$0xff] %v4366_v18  ;;  %6131 = vst [vmem:[#allocation33_spill] sm:$0xff] %v4386_v40  ;;  %v6132_v18 = vld [vmem:[#allocation59_spill] sm:$0xff]  ;;  %v4394_v20 = vmul.f32 %v4298_v28, %v6134_v53  ;;  %v6142_v40 = vld [vmem:[#allocation74_spill] sm:$0xff] }
 0x28e   :  { %6127 = vst [vmem:[#allocation55_spill] sm:$0xff] %v4378_v14  ;;  %v4390_v4 = vmul.f32 %v4298_v28, %v6132_v18  ;;  %v6136_v58 = vld [vmem:[#allocation67_spill] sm:$0xff]  ;;  %v6138_v14 = vld [vmem:[#allocation69_spill] sm:$0xff]  ;;  %6141 = vst [vmem:[#allocation19_spill] sm:$0xff] %v4406_v17  ;;  %v4410_v18 = vmul.f32 %v4298_v28, %v6142_v40 }
 0x28f   :  { %6135 = vst [vmem:[#allocation61_spill] sm:$0xff] %v4394_v20  ;;  %v4398_v2 = vmul.f32 %v4298_v28, %v6136_v58  ;;  %v4402_v33 = vmul.f32 %v4298_v28, %v6138_v14  ;;  %v6146_v20 = vld [vmem:[#allocation27_spill] sm:$0xff]  ;;  %v6152_v17 = vld [vmem:[#allocation66_spill] sm:$0xff] }
 0x290   :  { %6133 = vst [vmem:[#allocation35_spill] sm:$0xff] %v4390_v4  ;;  %6143 = vst [vmem:[#allocation21_spill] sm:$0xff] %v4410_v18  ;;  %v6144_v4 = vld [vmem:[#allocation3_spill] sm:$0xff]  ;;  %v4418_v58 = vmul.f32 %v4298_v28, %v6146_v20  ;;  %v4430_v40 = vmul.f32 %v4298_v28, %v6152_v17  ;;  %v6154_v18 = vld [vmem:[#allocation68_spill] sm:$0xff] }
 0x291   :  { %6137 = vst [vmem:[#allocation65_spill] sm:$0xff] %v4398_v2  ;;  %6139 = vst [vmem:[#allocation17_spill] sm:$0xff] %v4402_v33  ;;  %v4414_v53 = vmul.f32 %v4298_v28, %v6144_v4  ;;  %v6148_v2 = vld [vmem:[#allocation29_spill] sm:$0xff]  ;;  %v6150_v33 = vld [vmem:[#allocation31_spill] sm:$0xff]  ;;  %v4434_v4 = vmul.f32 %v4298_v28, %v6154_v18 }
 0x292   :  { %6147 = vst [vmem:[#allocation48_spill] sm:$0xff] %v4418_v58  ;;  %v4422_v14 = vmul.f32 %v4298_v28, %v6148_v2  ;;  %v4426_v1 = vmul.f32 %v4298_v28, %v6150_v33  ;;  %6153 = vst [vmem:[#allocation54_spill] sm:$0xff] %v4430_v40  ;;  %v6158_v58 = vld [vmem:[#allocation72_spill] sm:$0xff] }
 0x293   :  { %6145 = vst [vmem:[#allocation46_spill] sm:$0xff] %v4414_v53  ;;  %6155 = vst [vmem:[#allocation56_spill] sm:$0xff] %v4434_v4  ;;  %v6156_v53 = vld [vmem:[#allocation70_spill] sm:$0xff]  ;;  %v4442_v2 = vmul.f32 %v4298_v28, %v6158_v58  ;;  %v6164_v40 = vld [vmem:[#allocation76_spill] sm:$0xff] }
 0x294   :  { %6149 = vst [vmem:[#allocation50_spill] sm:$0xff] %v4422_v14  ;;  %6151 = vst [vmem:[#allocation52_spill] sm:$0xff] %v4426_v1  ;;  %v4438_v20 = vmul.f32 %v4298_v28, %v6156_v53  ;;  %v6160_v14 = vld [vmem:[#allocation73_spill] sm:$0xff]  ;;  %v6162_v1 = vld [vmem:[#allocation75_spill] sm:$0xff]  ;;  %v4454_v18 = vmul.f32 %v4298_v28, %v6164_v40 }
 0x295   :  { %6159 = vst [vmem:[#allocation60_spill] sm:$0xff] %v4442_v2  ;;  %v4446_v33 = vmul.f32 %v4298_v28, %v6160_v14  ;;  %v4450_v17 = vmul.f32 %v4298_v28, %v6162_v1  ;;  %v6166_v4 = vld [vmem:[#allocation13_spill] sm:$0xff]  ;;  %v6169_v2 = vld [vmem:[#allocation15_spill] sm:$0xff] }
 0x296   :  { %6157 = vst [vmem:[#allocation58_spill] sm:$0xff] %v4438_v20  ;;  %6165 = vst [vmem:[#allocation37_spill] sm:$0xff] %v4454_v18  ;;  %v4458_v53 = vmul.f32 %v4298_v28, %v6166_v4  ;;  %v6167_v20 = vld [vmem:[#allocation14_spill] sm:$0xff]  ;;  %v4466_v14 = vmul.f32 %v4298_v28, %v6169_v2  ;;  %v6172_v18 = vld [vmem:[#allocation20_spill] sm:$0xff] }
 0x297   :  { %6161 = vst [vmem:[#allocation62_spill] sm:$0xff] %v4446_v33  ;;  %6163 = vst [vmem:[#allocation64_spill] sm:$0xff] %v4450_v17  ;;  %v4462_v58 = vmul.f32 %v4298_v28, %v6167_v20  ;;  %v6170_v33 = vld [vmem:[#allocation16_spill] sm:$0xff]  ;;  %v6171_v17 = vld [vmem:[#allocation18_spill] sm:$0xff]  ;;  %v4478_v4 = vmul.f32 %v4298_v28, %v6172_v18  ;;  %v4482_v20 = vmul.f32 %v4298_v28, %v3957_v49 }
 0x298   :  { %v4470_v1 = vmul.f32 %v4298_v28, %v6170_v33  ;;  %v4474_v40 = vmul.f32 %v4298_v28, %v6171_v17  ;;  %v4490_v33 = vmul.f32 %v4298_v28, %v3972_v12  ;;  %v4494_v17 = vmul.f32 %v4298_v28, %v3978_v21 }
 0x299   :  { %6168 = vst [vmem:[#allocation2_spill] sm:$0xff] %v4462_v58  ;;  %v6173_v58 = vld [vmem:[#allocation22_spill] sm:$0xff]  ;;  %v4498_v18 = vmul.f32 %v4298_v28, %v3984_v61  ;;  %v4502_v49 = vmul.f32 %v4298_v28, %v3990_v60  ;;  %v4510_v12 = vmul.f32 %v4298_v28, %v4002_v43  ;;  %v4514_v21 = vmul.f32 %v4298_v28, %v4008_v16 }
 0x29a   :  { %v4486_v2 = vmul.f32 %v4298_v28, %v6173_v58  ;;  %v4506_v58 = vmul.f32 %v4298_v28, %v3996_v48  ;;  %v4518_v61 = vmul.f32 %v4298_v28, %v4014_v36  ;;  %v4522_v60 = vmul.f32 %v4298_v28, %v4020_v8 }
 0x29b   :  { %v4526_v48 = vmul.f32 %v4298_v28, %v4026_v37  ;;  %v4530_v43 = vmul.f32 %v4298_v28, %v4032_v34  ;;  %v4534_v16 = vmul.f32 %v4298_v28, %v4038_v56  ;;  %v4538_v36 = vmul.f32 %v4298_v28, %v4044_v26 }
 0x29c   :  { %v4542_v8 = vmul.f32 %v4298_v28, %v4050_v47  ;;  %v4546_v37 = vmul.f32 %v4298_v28, %v4056_v51  ;;  %v4550_v34 = vmul.f32 %v4298_v28, %v4062_v55  ;;  %v4554_v56 = vmul.f32 %v4298_v28, %v4068_v59 }
 0x29d   :  { %v4558_v26 = vmul.f32 %v4298_v28, %v4074_v63  ;;  %v4562_v47 = vmul.f32 %v4298_v28, %v4080_v3  ;;  %v4566_v51 = vmul.f32 %v4298_v28, %v4086_v7  ;;  %v4570_v55 = vmul.f32 %v4298_v28, %v4092_v11 }
 0x29e   :  { %v4574_v59 = vmul.f32 %v4298_v28, %v4098_v15  ;;  %v4578_v63 = vmul.f32 %v4298_v28, %v4104_v19  ;;  %v4582_v3 = vmul.f32 %v4298_v28, %v4110_v23  ;;  %v4586_v7 = vmul.f32 %v4298_v28, %v4116_v27 }
 0x29f   :  { %v4590_v11 = vmul.f32 %v4298_v28, %v4122_v0  ;;  %v4594_v15 = vmul.f32 %v4298_v28, %v4128_v45  ;;  %v4598_v19 = vmul.f32 %v4298_v28, %v4134_v41  ;;  %v4602_v23 = vmul.f32 %v4298_v28, %v4140_v46 }
 0x2a0   :  { %v4606_v27 = vmul.f32 %v4298_v28, %v4146_v54  ;;  %v4610_v0 = vmul.f32 %v4298_v28, %v4152_v62  ;;  %v4614_v45 = vmul.f32 %v4298_v28, %v4158_v6  ;;  %v4618_v41 = vmul.f32 %v4298_v28, %v4164_v10 }
 0x2a1   :  { %v4622_v46 = vmul.f32 %v4298_v28, %v4170_v22  ;;  %v4626_v54 = vmul.f32 %v4298_v28, %v4176_v9  ;;  %v4630_v62 = vmul.f32 %v4298_v28, %v4182_v57  ;;  %v4634_v6 = vmul.f32 %v4298_v28, %v4188_v32 }
 0x2a2   :  { %6174 = vst [vmem:[#allocation4_spill] sm:$0xff] %v4618_v41  ;;  %v4638_v10 = vmul.f32 %v4298_v28, %v4194_v42  ;;  %v6180_v41 = vld [vmem:[#allocation23_spill] sm:$0xff] }
 0x2a3   :  { %6175 = vst [vmem:[#allocation5_spill] sm:$0xff] %v4622_v46  ;;  %6176 = vst [vmem:[#allocation6_spill] sm:$0xff] %v4626_v54  ;;  %v4642_v22 = vmul.f32 %v4298_v28, %v6180_v41  ;;  %v6182_v46 = vld [vmem:[#allocation24_spill] sm:$0xff]  ;;  %v6184_v54 = vld [vmem:[#allocation25_spill] sm:$0xff] }
 0x2a4   :  { %6177 = vst [vmem:[#allocation7_spill] sm:$0xff] %v4630_v62  ;;  %6178 = vst [vmem:[#allocation8_spill] sm:$0xff] %v4634_v6  ;;  %v4646_v9 = vmul.f32 %v4298_v28, %v6182_v46  ;;  %v4650_v57 = vmul.f32 %v4298_v28, %v6184_v54  ;;  %v6186_v62 = vld [vmem:[#allocation26_spill] sm:$0xff]  ;;  %v6188_v6 = vld [vmem:[#allocation28_spill] sm:$0xff] }
 0x2a5   :  { %6179 = vst [vmem:[#allocation9_spill] sm:$0xff] %v4638_v10  ;;  %6181 = vst [vmem:[#allocation10_spill] sm:$0xff] %v4642_v22  ;;  %v4654_v32 = vmul.f32 %v4298_v28, %v6186_v62  ;;  %v4658_v42 = vmul.f32 %v4298_v28, %v6188_v6  ;;  %v6189_v10 = vld [vmem:[#allocation30_spill] sm:$0xff]  ;;  %v6190_v22 = vld [vmem:[#allocation32_spill] sm:$0xff] }
 0x2a6   :  { %6183 = vst [vmem:[#allocation11_spill] sm:$0xff] %v4646_v9  ;;  %6185 = vst [vmem:[#allocation12_spill] sm:$0xff] %v4650_v57  ;;  %v4662_v41 = vmul.f32 %v4298_v28, %v6189_v10  ;;  %v4666_v46 = vmul.f32 %v4298_v28, %v6190_v22  ;;  %v6191_v9 = vld [vmem:[#allocation34_spill] sm:$0xff]  ;;  %v6192_v57 = vld [vmem:[#allocation36_spill] sm:$0xff]  ;;  %v4682_v10 = vmul.f32 %v4298_v28, %v4260_v25 }
 0x2a7   :  { %6187 = vst [vmem:[#allocation59_spill] sm:$0xff] %v4654_v32  ;;  %v4670_v54 = vmul.f32 %v4298_v28, %v6191_v9  ;;  %v4674_v62 = vmul.f32 %v4298_v28, %v6192_v57  ;;  %v6193_v32 = vld [vmem:[#allocation38_spill] sm:$0xff]  ;;  %v4686_v22 = vmul.f32 %v4298_v28, %v4266_v52  ;;  %v4690_v9 = vmul.f32 %v4298_v28, %v4272_v50 }
 0x2a8   :  { %v4678_v6 = vmul.f32 %v4298_v28, %v6193_v32  ;;  %v4695_v57 = vld [vmem:[%s5632_s3] ss:$0 sm:$0xff]  ;;  %v4699_v32 = vmul.f32 %v4298_v28, %v4278_v13  ;;  %v4703_v25 = vmul.f32 %v4298_v28, %v4284_v29  ;;  %v4707_v52 = vmul.f32 %v4298_v28, %v4290_v5 }
 0x2a9   :  { %6194 = vst [vmem:[#allocation63_spill] sm:$0xff] %v4686_v22  ;;  %6195 = vst [vmem:[#allocation67_spill] sm:$0xff] %v4690_v9  ;;  %v6196_v22 = vld [vmem:[#allocation39_spill] sm:$0xff]  ;;  %v4715_v9 = vmul.f32 %v4298_v28, %v4304_v39  ;;  %v4719_v13 = vmul.f32 %v4298_v28, %v4310_v38  ;;  %v4723_v29 = vmul.f32 %v4298_v28, %v4316_v24 }
 0x2aa   :  { %v4711_v50 = vmul.f32 %v4298_v28, %v6196_v22  ;;  %v4727_v5 = vmul.f32 %v4298_v28, %v4322_v31  ;;  %v4731_v22 = vadd.f32 %v4695_v57, %v4326_v44  ;;  %v4735_v39 = vadd.f32 %v4695_v57, %v4330_v35  ;;  %v6206_v31 = vld [vmem:[#allocation42_spill] sm:$0xff] }
 0x2ab   :  { %6197 = vst [vmem:[#allocation69_spill] sm:$0xff] %v4719_v13  ;;  %6198 = vst [vmem:[#allocation71_spill] sm:$0xff] %v4723_v29  ;;  %v4739_v38 = vadd.f32 %v4695_v57, %v4334_v30  ;;  %v6202_v13 = vld [vmem:[#allocation40_spill] sm:$0xff]  ;;  %v6204_v29 = vld [vmem:[#allocation41_spill] sm:$0xff]  ;;  %v4751_v44 = vadd.f32 %v4695_v57, %v6206_v31 }
 0x2ac   :  { %6199 = vst [vmem:[#allocation74_spill] sm:$0xff] %v4731_v22  ;;  %6200 = vst [vmem:[#allocation3_spill] sm:$0xff] %v4735_v39  ;;  %v4743_v24 = vadd.f32 %v4695_v57, %v6202_v13  ;;  %v4747_v28 = vadd.f32 %v4695_v57, %v6204_v29  ;;  %v6208_v22 = vld [vmem:[#allocation43_spill] sm:$0xff]  ;;  %v6210_v39 = vld [vmem:[#allocation44_spill] sm:$0xff] }
 0x2ad   :  { %6201 = vst [vmem:[#allocation27_spill] sm:$0xff] %v4739_v38  ;;  %6207 = vst [vmem:[#allocation66_spill] sm:$0xff] %v4751_v44  ;;  %v4755_v35 = vadd.f32 %v4695_v57, %v6208_v22  ;;  %v4759_v30 = vadd.f32 %v4695_v57, %v6210_v39  ;;  %v6212_v38 = vld [vmem:[#allocation45_spill] sm:$0xff]  ;;  %v6218_v44 = vld [vmem:[#allocation51_spill] sm:$0xff] }
 0x2ae   :  { %6203 = vst [vmem:[#allocation29_spill] sm:$0xff] %v4743_v24  ;;  %6205 = vst [vmem:[#allocation31_spill] sm:$0xff] %v4747_v28  ;;  %v4763_v13 = vadd.f32 %v4695_v57, %v6212_v38  ;;  %v6214_v24 = vld [vmem:[#allocation47_spill] sm:$0xff]  ;;  %v6216_v28 = vld [vmem:[#allocation49_spill] sm:$0xff]  ;;  %v4775_v22 = vadd.f32 %v4695_v57, %v6218_v44 }
 0x2af   :  { %6209 = vst [vmem:[#allocation68_spill] sm:$0xff] %v4755_v35  ;;  %6211 = vst [vmem:[#allocation70_spill] sm:$0xff] %v4759_v30  ;;  %v4767_v29 = vadd.f32 %v4695_v57, %v6214_v24  ;;  %v4771_v31 = vadd.f32 %v4695_v57, %v6216_v28  ;;  %v6220_v35 = vld [vmem:[#allocation53_spill] sm:$0xff]  ;;  %v6222_v30 = vld [vmem:[#allocation55_spill] sm:$0xff] }
 0x2b0   :  { %6213 = vst [vmem:[#allocation72_spill] sm:$0xff] %v4763_v13  ;;  %6219 = vst [vmem:[#allocation76_spill] sm:$0xff] %v4775_v22  ;;  %v4779_v39 = vadd.f32 %v4695_v57, %v6220_v35  ;;  %v4783_v38 = vadd.f32 %v4695_v57, %v6222_v30  ;;  %v6224_v13 = vld [vmem:[#allocation57_spill] sm:$0xff] }
 0x2b1   :  { %6215 = vst [vmem:[#allocation73_spill] sm:$0xff] %v4767_v29  ;;  %6217 = vst [vmem:[#allocation75_spill] sm:$0xff] %v4771_v31  ;;  %v4787_v24 = vadd.f32 %v4695_v57, %v6224_v13  ;;  %v6226_v29 = vld [vmem:[#allocation33_spill] sm:$0xff]  ;;  %v6228_v31 = vld [vmem:[#allocation35_spill] sm:$0xff] }
 0x2b2   :  { %6221 = vst [vmem:[#allocation13_spill] sm:$0xff] %v4779_v39  ;;  %6223 = vst [vmem:[#allocation14_spill] sm:$0xff] %v4783_v38  ;;  %v4791_v28 = vadd.f32 %v4695_v57, %v6226_v29  ;;  %v4795_v44 = vadd.f32 %v4695_v57, %v6228_v31  ;;  %v6230_v22 = vld [vmem:[#allocation61_spill] sm:$0xff] }
 0x2b3   :  { %6225 = vst [vmem:[#allocation15_spill] sm:$0xff] %v4787_v24  ;;  %v4799_v35 = vadd.f32 %v4695_v57, %v6230_v22  ;;  %v6232_v39 = vld [vmem:[#allocation65_spill] sm:$0xff]  ;;  %v6236_v24 = vld [vmem:[#allocation19_spill] sm:$0xff] }
 0x2b4   :  { %6227 = vst [vmem:[#allocation16_spill] sm:$0xff] %v4791_v28  ;;  %6229 = vst [vmem:[#allocation18_spill] sm:$0xff] %v4795_v44  ;;  %v4803_v30 = vadd.f32 %v4695_v57, %v6232_v39  ;;  %v6234_v38 = vld [vmem:[#allocation17_spill] sm:$0xff]  ;;  %v4811_v29 = vadd.f32 %v4695_v57, %v6236_v24  ;;  %v6240_v44 = vld [vmem:[#allocation46_spill] sm:$0xff] }
 0x2b5   :  { %6231 = vst [vmem:[#allocation20_spill] sm:$0xff] %v4799_v35  ;;  %v4807_v13 = vadd.f32 %v4695_v57, %v6234_v38  ;;  %v6238_v28 = vld [vmem:[#allocation21_spill] sm:$0xff]  ;;  %v4819_v22 = vadd.f32 %v4695_v57, %v6240_v44  ;;  %v6242_v35 = vld [vmem:[#allocation48_spill] sm:$0xff] }
 0x2b6   :  { %6233 = vst [vmem:[#allocation22_spill] sm:$0xff] %v4803_v30  ;;  %6237 = vst [vmem:[#allocation24_spill] sm:$0xff] %v4811_v29  ;;  %v4815_v31 = vadd.f32 %v4695_v57, %v6238_v28  ;;  %v4823_v39 = vadd.f32 %v4695_v57, %v6242_v35  ;;  %v6244_v30 = vld [vmem:[#allocation50_spill] sm:$0xff] }
 0x2b7   :  { %6235 = vst [vmem:[#allocation23_spill] sm:$0xff] %v4807_v13  ;;  %6241 = vst [vmem:[#allocation26_spill] sm:$0xff] %v4819_v22  ;;  %v4827_v38 = vadd.f32 %v4695_v57, %v6244_v30  ;;  %v6246_v13 = vld [vmem:[#allocation52_spill] sm:$0xff]  ;;  %v6248_v29 = vld [vmem:[#allocation54_spill] sm:$0xff] }
 0x2b8   :  { %6239 = vst [vmem:[#allocation25_spill] sm:$0xff] %v4815_v31  ;;  %6243 = vst [vmem:[#allocation28_spill] sm:$0xff] %v4823_v39  ;;  %v4831_v24 = vadd.f32 %v4695_v57, %v6246_v13  ;;  %v4835_v28 = vadd.f32 %v4695_v57, %v6248_v29  ;;  %v6250_v31 = vld [vmem:[#allocation56_spill] sm:$0xff]  ;;  %v6251_v22 = vld [vmem:[#allocation58_spill] sm:$0xff] }
 0x2b9   :  { %6245 = vst [vmem:[#allocation30_spill] sm:$0xff] %v4827_v38  ;;  %v4839_v44 = vadd.f32 %v4695_v57, %v6250_v31  ;;  %v4843_v35 = vadd.f32 %v4695_v57, %v6251_v22  ;;  %v6253_v39 = vld [vmem:[#allocation60_spill] sm:$0xff]  ;;  %v6254_v38 = vld [vmem:[#allocation62_spill] sm:$0xff]  ;;  %v4863_v22 = vadd.f32 %v4695_v57, %v4458_v53  ;;  %v4883_v53 = vadd.f32 %v4695_v57, %v4478_v4 }
 0x2ba   :  { %6247 = vst [vmem:[#allocation32_spill] sm:$0xff] %v4831_v24  ;;  %6249 = vst [vmem:[#allocation34_spill] sm:$0xff] %v4835_v28  ;;  %v4847_v30 = vadd.f32 %v4695_v57, %v6253_v39  ;;  %v4851_v13 = vadd.f32 %v4695_v57, %v6254_v38  ;;  %v6255_v24 = vld [vmem:[#allocation64_spill] sm:$0xff]  ;;  %v6256_v28 = vld [vmem:[#allocation37_spill] sm:$0xff]  ;;  %v4871_v38 = vadd.f32 %v4695_v57, %v4466_v14 }
 0x2bb   :  { %6252 = vst [vmem:[#allocation36_spill] sm:$0xff] %v4843_v35  ;;  %v4855_v29 = vadd.f32 %v4695_v57, %v6255_v24  ;;  %v4859_v31 = vadd.f32 %v4695_v57, %v6256_v28  ;;  %v6257_v35 = vld [vmem:[#allocation2_spill] sm:$0xff]  ;;  %v4875_v24 = vadd.f32 %v4695_v57, %v4470_v1  ;;  %v4879_v28 = vadd.f32 %v4695_v57, %v4474_v40 }
 0x2bc   :  { %v4867_v39 = vadd.f32 %v4695_v57, %v6257_v35  ;;  %v4887_v35 = vadd.f32 %v4695_v57, %v4482_v20  ;;  %v4891_v14 = vadd.f32 %v4695_v57, %v4486_v2  ;;  %v4895_v1 = vadd.f32 %v4695_v57, %v4490_v33 }
 0x2bd   :  { %v4899_v40 = vadd.f32 %v4695_v57, %v4494_v17  ;;  %v4903_v4 = vadd.f32 %v4695_v57, %v4498_v18  ;;  %v4907_v20 = vadd.f32 %v4695_v57, %v4502_v49  ;;  %v4911_v2 = vadd.f32 %v4695_v57, %v4506_v58 }
 0x2be   :  { %v4915_v33 = vadd.f32 %v4695_v57, %v4510_v12  ;;  %v4919_v17 = vadd.f32 %v4695_v57, %v4514_v21  ;;  %v4923_v18 = vadd.f32 %v4695_v57, %v4518_v61  ;;  %v4927_v49 = vadd.f32 %v4695_v57, %v4522_v60 }
 0x2bf   :  { %v4931_v58 = vadd.f32 %v4695_v57, %v4526_v48  ;;  %v4935_v12 = vadd.f32 %v4695_v57, %v4530_v43  ;;  %v4939_v21 = vadd.f32 %v4695_v57, %v4534_v16  ;;  %v4943_v61 = vadd.f32 %v4695_v57, %v4538_v36 }
 0x2c0   :  { %v4947_v60 = vadd.f32 %v4695_v57, %v4542_v8  ;;  %v4951_v48 = vadd.f32 %v4695_v57, %v4546_v37  ;;  %v4955_v43 = vadd.f32 %v4695_v57, %v4550_v34  ;;  %v4959_v16 = vadd.f32 %v4695_v57, %v4554_v56 }
 0x2c1   :  { %v4963_v36 = vadd.f32 %v4695_v57, %v4558_v26  ;;  %v4967_v8 = vadd.f32 %v4695_v57, %v4562_v47  ;;  %v4971_v37 = vadd.f32 %v4695_v57, %v4566_v51  ;;  %v4975_v34 = vadd.f32 %v4695_v57, %v4570_v55 }
 0x2c2   :  { %v4979_v56 = vadd.f32 %v4695_v57, %v4574_v59  ;;  %v4983_v26 = vadd.f32 %v4695_v57, %v4578_v63  ;;  %v4987_v47 = vadd.f32 %v4695_v57, %v4582_v3  ;;  %v4991_v51 = vadd.f32 %v4695_v57, %v4586_v7 }
 0x2c3   :  { %v4995_v55 = vadd.f32 %v4695_v57, %v4590_v11  ;;  %v4999_v59 = vadd.f32 %v4695_v57, %v4594_v15  ;;  %v5003_v63 = vadd.f32 %v4695_v57, %v4598_v19  ;;  %v5007_v3 = vadd.f32 %v4695_v57, %v4602_v23 }
 0x2c4   :  { %v5011_v7 = vadd.f32 %v4695_v57, %v4606_v27  ;;  %v5015_v11 = vadd.f32 %v4695_v57, %v4610_v0  ;;  %v5019_v15 = vadd.f32 %v4695_v57, %v4614_v45 }
 0x2c5   :  { %6258 = vst [vmem:[#allocation38_spill] sm:$0xff] %v4999_v59  ;;  %6259 = vst [vmem:[#allocation39_spill] sm:$0xff] %v5003_v63  ;;  %v6264_v59 = vld [vmem:[#allocation4_spill] sm:$0xff]  ;;  %v6266_v63 = vld [vmem:[#allocation5_spill] sm:$0xff] }
 0x2c6   :  { %6260 = vst [vmem:[#allocation40_spill] sm:$0xff] %v5007_v3  ;;  %6261 = vst [vmem:[#allocation41_spill] sm:$0xff] %v5011_v7  ;;  %v5023_v19 = vadd.f32 %v4695_v57, %v6264_v59  ;;  %v5027_v23 = vadd.f32 %v4695_v57, %v6266_v63  ;;  %v6268_v3 = vld [vmem:[#allocation6_spill] sm:$0xff]  ;;  %v6270_v7 = vld [vmem:[#allocation7_spill] sm:$0xff] }
 0x2c7   :  { %6262 = vst [vmem:[#allocation42_spill] sm:$0xff] %v5015_v11  ;;  %6263 = vst [vmem:[#allocation43_spill] sm:$0xff] %v5019_v15  ;;  %v5031_v27 = vadd.f32 %v4695_v57, %v6268_v3  ;;  %v5035_v0 = vadd.f32 %v4695_v57, %v6270_v7  ;;  %v6272_v11 = vld [vmem:[#allocation8_spill] sm:$0xff]  ;;  %v6273_v15 = vld [vmem:[#allocation9_spill] sm:$0xff] }
 0x2c8   :  { %6265 = vst [vmem:[#allocation44_spill] sm:$0xff] %v5023_v19  ;;  %6267 = vst [vmem:[#allocation45_spill] sm:$0xff] %v5027_v23  ;;  %v5039_v45 = vadd.f32 %v4695_v57, %v6272_v11  ;;  %v5043_v59 = vadd.f32 %v4695_v57, %v6273_v15  ;;  %v6274_v19 = vld [vmem:[#allocation10_spill] sm:$0xff]  ;;  %v6275_v23 = vld [vmem:[#allocation11_spill] sm:$0xff]  ;;  %v5063_v15 = vadd.f32 %v4695_v57, %v4658_v42 }
 0x2c9   :  { %6269 = vst [vmem:[#allocation47_spill] sm:$0xff] %v5031_v27  ;;  %6271 = vst [vmem:[#allocation49_spill] sm:$0xff] %v5035_v0  ;;  %v5047_v63 = vadd.f32 %v4695_v57, %v6274_v19  ;;  %v5051_v3 = vadd.f32 %v4695_v57, %v6275_v23  ;;  %v6277_v27 = vld [vmem:[#allocation12_spill] sm:$0xff]  ;;  %v6279_v0 = vld [vmem:[#allocation59_spill] sm:$0xff]  ;;  %v5067_v19 = vadd.f32 %v4695_v57, %v4662_v41 }
 0x2ca   :  { %v5055_v7 = vadd.f32 %v4695_v57, %v6277_v27  ;;  %v5059_v11 = vadd.f32 %v4695_v57, %v6279_v0  ;;  %6281 = vst [vmem:[#allocation57_spill] sm:$0xff] %v5063_v15  ;;  %v5071_v23 = vadd.f32 %v4695_v57, %v4666_v46  ;;  %v5075_v27 = vadd.f32 %v4695_v57, %v4670_v54 }
 0x2cb   :  { %6276 = vst [vmem:[#allocation51_spill] sm:$0xff] %v5051_v3  ;;  %6282 = vst [vmem:[#allocation33_spill] sm:$0xff] %v5067_v19  ;;  %v5079_v0 = vadd.f32 %v4695_v57, %v4674_v62  ;;  %v5083_v42 = vadd.f32 %v4695_v57, %v4678_v6  ;;  %v5087_v41 = vadd.f32 %v4695_v57, %v4682_v10  ;;  %v6288_v19 = vld [vmem:[#allocation63_spill] sm:$0xff]  ;;  %v6313_v3 = vld [vmem:[#allocation76_spill] sm:$0xff] }
 0x2cc   :  { %6278 = vst [vmem:[#allocation53_spill] sm:$0xff] %v5055_v7  ;;  %6280 = vst [vmem:[#allocation55_spill] sm:$0xff] %v5059_v11  ;;  %v5091_v46 = vadd.f32 %v4695_v57, %v6288_v19  ;;  %v5099_v62 = vadd.f32 %v4695_v57, %v4699_v32  ;;  %v5103_v6 = vadd.f32 %v4695_v57, %v4703_v25  ;;  %v6310_v11 = vld [vmem:[#allocation72_spill] sm:$0xff] }
 0x2cd   :  { %6283 = vst [vmem:[#allocation35_spill] sm:$0xff] %v5071_v23  ;;  %6284 = vst [vmem:[#allocation61_spill] sm:$0xff] %v5075_v27  ;;  %v6290_v23 = vld [vmem:[#allocation67_spill] sm:$0xff]  ;;  %v5107_v10 = vadd.f32 %v4695_v57, %v4707_v52  ;;  %v5111_v19 = vadd.f32 %v4695_v57, %v4711_v50  ;;  %v5127_v52 = vadd.f32 %v4695_v57, %v4727_v5  ;;  %v6308_v27 = vld [vmem:[#allocation68_spill] sm:$0xff]  ;;  %v1753_v7 = vmax.f32 %v6310_v11, 0.0 }
 0x2ce   :  { %6285 = vst [vmem:[#allocation65_spill] sm:$0xff] %v5079_v0  ;;  %6286 = vst [vmem:[#allocation17_spill] sm:$0xff] %v5083_v42  ;;  %v5095_v54 = vadd.f32 %v4695_v57, %v6290_v23  ;;  %v5115_v23 = vadd.f32 %v4695_v57, %v4715_v9  ;;  %v6303_v50 = vld [vmem:[#allocation3_spill] sm:$0xff]  ;;  %v6305_v9 = vld [vmem:[#allocation29_spill] sm:$0xff]  ;;  %v1751_v15 = vmax.f32 %v6308_v27, 0.0 }
 0x2cf   :  { %6287 = vst [vmem:[#allocation19_spill] sm:$0xff] %v5087_v41  ;;  %6289 = vst [vmem:[#allocation21_spill] sm:$0xff] %v5091_v46  ;;  %v6304_v46 = vld [vmem:[#allocation27_spill] sm:$0xff]  ;;  %v6315_v27 = vld [vmem:[#allocation14_spill] sm:$0xff] }
 0x2d0   :  { %6291 = vst [vmem:[#allocation46_spill] sm:$0xff] %v5095_v54  ;;  %6292 = vst [vmem:[#allocation48_spill] sm:$0xff] %v5099_v62  ;;  %v6297_v54 = vld [vmem:[#allocation69_spill] sm:$0xff]  ;;  %v6299_v62 = vld [vmem:[#allocation71_spill] sm:$0xff]  ;;  %v1747_v41 = vmax.f32 %v6304_v46, 0.0 }
 0x2d1   :  { %6293 = vst [vmem:[#allocation50_spill] sm:$0xff] %v5103_v6  ;;  %6294 = vst [vmem:[#allocation52_spill] sm:$0xff] %v5107_v10  ;;  %v5119_v32 = vadd.f32 %v4695_v57, %v6297_v54  ;;  %v5123_v25 = vadd.f32 %v4695_v57, %v6299_v62  ;;  %v6302_v10 = vld [vmem:[#allocation74_spill] sm:$0xff]  ;;  %v6306_v42 = vld [vmem:[#allocation31_spill] sm:$0xff] }
 0x2d2   :  { %6295 = vst [vmem:[#allocation54_spill] sm:$0xff] %v5111_v19  ;;  %6296 = vst [vmem:[#allocation56_spill] sm:$0xff] %v5115_v23  ;;  %v1745_v6 = vmax.f32 %v6302_v10, 0.0  ;;  %v1746_v19 = vmax.f32 %v6303_v50, 0.0  ;;  %v1748_v23 = vmax.f32 %v6305_v9, 0.0  ;;  %v1749_v0 = vmax.f32 %v6306_v42, 0.0 }
 0x2d3   :  { %6298 = vst [vmem:[#allocation58_spill] sm:$0xff] %v5119_v32  ;;  %6300 = vst [vmem:[#allocation60_spill] sm:$0xff] %v5123_v25  ;;  %v6307_v54 = vld [vmem:[#allocation66_spill] sm:$0xff]  ;;  %v6311_v57 = vld [vmem:[#allocation73_spill] sm:$0xff]  ;;  %v1756_v50 = vmax.f32 %v6313_v3, 0.0  ;;  %v1758_v42 = vmax.f32 %v6315_v27, 0.0 }
 0x2d4   :  { %6301 = vst [vmem:[#allocation62_spill] sm:$0xff] %v5127_v52  ;;  %v1750_v32 = vmax.f32 %v6307_v54, 0.0  ;;  %v6309_v62 = vld [vmem:[#allocation70_spill] sm:$0xff]  ;;  %v1754_v5 = vmax.f32 %v6311_v57, 0.0  ;;  %v6312_v52 = vld [vmem:[#allocation75_spill] sm:$0xff]  ;;  %1845 = vst.msk [vmem:[%s5633_s4] sm:$0xff] %vm814_vm0, %v1745_v6 }
 0x2d5   :  { %v1752_v25 = vmax.f32 %v6309_v62, 0.0  ;;  %v1755_v10 = vmax.f32 %v6312_v52, 0.0  ;;  %1846 = vst.msk [vmem:[%s5633_s4 + $0x8] sm:$0xff] %vm814_vm0, %v1746_v19  ;;  %1847 = vst.msk [vmem:[%s5633_s4 + $0x10] sm:$0xff] %vm814_vm0, %v1747_v41  ;;  %v6314_v3 = vld [vmem:[#allocation13_spill] sm:$0xff]  ;;  %v6316_v46 = vld [vmem:[#allocation15_spill] sm:$0xff] }
 0x2d6   :  { %1848 = vst.msk [vmem:[%s5633_s4 + $0x18] sm:$0xff] %vm814_vm0, %v1748_v23  ;;  %v1757_v11 = vmax.f32 %v6314_v3, 0.0  ;;  %v1759_v6 = vmax.f32 %v6316_v46, 0.0  ;;  %v6317_v52 = vld [vmem:[#allocation16_spill] sm:$0xff]  ;;  %1849 = vst.msk [vmem:[%s5633_s4 + $0x20] sm:$0xff] %vm814_vm0, %v1749_v0  ;;  %v6318_v41 = vld [vmem:[#allocation18_spill] sm:$0xff] }
 0x2d7   :  { %v1760_v9 = vmax.f32 %v6317_v52, 0.0  ;;  %1850 = vst.msk [vmem:[%s5633_s4 + $0x28] sm:$0xff] %vm814_vm0, %v1750_v32  ;;  %1851 = vst.msk [vmem:[%s5633_s4 + $0x30] sm:$0xff] %vm814_vm0, %v1751_v15  ;;  %v1761_v19 = vmax.f32 %v6318_v41, 0.0  ;;  %v6319_v23 = vld [vmem:[#allocation20_spill] sm:$0xff]  ;;  %v6320_v0 = vld [vmem:[#allocation22_spill] sm:$0xff] }
 0x2d8   :  { %1852 = vst.msk [vmem:[%s5633_s4 + $0x38] sm:$0xff] %vm814_vm0, %v1752_v25  ;;  %v1762_v54 = vmax.f32 %v6319_v23, 0.0  ;;  %v1763_v62 = vmax.f32 %v6320_v0, 0.0  ;;  %v6321_v57 = vld [vmem:[#allocation23_spill] sm:$0xff]  ;;  %1853 = vst.msk [vmem:[%s5633_s4 + $0x40] sm:$0xff] %vm814_vm0, %v1753_v7  ;;  %v6322_v15 = vld [vmem:[#allocation24_spill] sm:$0xff] }
 0x2d9   :  { %v1764_v3 = vmax.f32 %v6321_v57, 0.0  ;;  %1854 = vst.msk [vmem:[%s5633_s4 + $0x48] sm:$0xff] %vm814_vm0, %v1754_v5  ;;  %1855 = vst.msk [vmem:[%s5633_s4 + $0x50] sm:$0xff] %vm814_vm0, %v1755_v10  ;;  %v1765_v32 = vmax.f32 %v6322_v15, 0.0  ;;  %v6323_v25 = vld [vmem:[#allocation25_spill] sm:$0xff]  ;;  %v6324_v7 = vld [vmem:[#allocation26_spill] sm:$0xff] }
 0x2da   :  { %1856 = vst.msk [vmem:[%s5633_s4 + $0x58] sm:$0xff] %vm814_vm0, %v1756_v50  ;;  %v1766_v27 = vmax.f32 %v6323_v25, 0.0  ;;  %v1767_v46 = vmax.f32 %v6324_v7, 0.0  ;;  %v6325_v52 = vld [vmem:[#allocation28_spill] sm:$0xff]  ;;  %1857 = vst.msk [vmem:[%s5633_s4 + $0x60] sm:$0xff] %vm814_vm0, %v1757_v11  ;;  %v6326_v5 = vld [vmem:[#allocation30_spill] sm:$0xff] }
 0x2db   :  { %v1768_v41 = vmax.f32 %v6325_v52, 0.0  ;;  %1858 = vst.msk [vmem:[%s5633_s4 + $0x68] sm:$0xff] %vm814_vm0, %v1758_v42  ;;  %1859 = vst.msk [vmem:[%s5633_s4 + $0x70] sm:$0xff] %vm814_vm0, %v1759_v6  ;;  %v1769_v10 = vmax.f32 %v6326_v5, 0.0  ;;  %v6327_v50 = vld [vmem:[#allocation32_spill] sm:$0xff]  ;;  %v6328_v11 = vld [vmem:[#allocation34_spill] sm:$0xff] }
 0x2dc   :  { %1860 = vst.msk [vmem:[%s5633_s4 + $0x78] sm:$0xff] %vm814_vm0, %v1760_v9  ;;  %v1770_v23 = vmax.f32 %v6327_v50, 0.0  ;;  %v1771_v0 = vmax.f32 %v6328_v11, 0.0  ;;  %v1772_v57 = vmax.f32 %v4839_v44, 0.0  ;;  %1861 = vst.msk [vmem:[%s5633_s4 + $0x80] sm:$0xff] %vm814_vm0, %v1761_v19  ;;  %v6329_v44 = vld [vmem:[#allocation36_spill] sm:$0xff] }
 0x2dd   :  { %1862 = vst.msk [vmem:[%s5633_s4 + $0x88] sm:$0xff] %vm814_vm0, %v1762_v54  ;;  %1863 = vst.msk [vmem:[%s5633_s4 + $0x90] sm:$0xff] %vm814_vm0, %v1763_v62  ;;  %v1773_v42 = vmax.f32 %v6329_v44, 0.0  ;;  %v1774_v6 = vmax.f32 %v4847_v30, 0.0  ;;  %v1775_v9 = vmax.f32 %v4851_v13, 0.0  ;;  %v1776_v19 = vmax.f32 %v4855_v29, 0.0 }
 0x2de   :  { %1864 = vst.msk [vmem:[%s5633_s4 + $0x98] sm:$0xff] %vm814_vm0, %v1764_v3  ;;  %1865 = vst.msk [vmem:[%s5633_s4 + $0xa0] sm:$0xff] %vm814_vm0, %v1765_v32  ;;  %v1777_v30 = vmax.f32 %v4859_v31, 0.0  ;;  %v1778_v13 = vmax.f32 %v4863_v22, 0.0  ;;  %v1779_v29 = vmax.f32 %v4867_v39, 0.0  ;;  %v1780_v54 = vmax.f32 %v4871_v38, 0.0 }
 0x2df   :  { %1866 = vst.msk [vmem:[%s5633_s4 + $0xa8] sm:$0xff] %vm814_vm0, %v1766_v27  ;;  %1867 = vst.msk [vmem:[%s5633_s4 + $0xb0] sm:$0xff] %vm814_vm0, %v1767_v46  ;;  %v1781_v31 = vmax.f32 %v4875_v24, 0.0  ;;  %v1782_v22 = vmax.f32 %v4879_v28, 0.0  ;;  %v1783_v39 = vmax.f32 %v4883_v53, 0.0  ;;  %v1784_v38 = vmax.f32 %v4887_v35, 0.0 }
 0x2e0   :  { %1868 = vst.msk [vmem:[%s5633_s4 + $0xb8] sm:$0xff] %vm814_vm0, %v1768_v41  ;;  %1869 = vst.msk [vmem:[%s5633_s4 + $0xc0] sm:$0xff] %vm814_vm0, %v1769_v10  ;;  %v1785_v24 = vmax.f32 %v4891_v14, 0.0  ;;  %v1786_v28 = vmax.f32 %v4895_v1, 0.0  ;;  %v1787_v53 = vmax.f32 %v4899_v40, 0.0  ;;  %v1788_v35 = vmax.f32 %v4903_v4, 0.0 }
 0x2e1   :  { %1870 = vst.msk [vmem:[%s5633_s4 + $0xc8] sm:$0xff] %vm814_vm0, %v1770_v23  ;;  %1871 = vst.msk [vmem:[%s5633_s4 + $0xd0] sm:$0xff] %vm814_vm0, %v1771_v0  ;;  %v1789_v14 = vmax.f32 %v4907_v20, 0.0  ;;  %v1790_v1 = vmax.f32 %v4911_v2, 0.0  ;;  %v1791_v40 = vmax.f32 %v4915_v33, 0.0  ;;  %v1792_v4 = vmax.f32 %v4919_v17, 0.0 }
 0x2e2   :  { %1872 = vst.msk [vmem:[%s5633_s4 + $0xd8] sm:$0xff] %vm814_vm0, %v1772_v57  ;;  %1873 = vst.msk [vmem:[%s5633_s4 + $0xe0] sm:$0xff] %vm814_vm0, %v1773_v42  ;;  %v1793_v20 = vmax.f32 %v4923_v18, 0.0  ;;  %v1794_v2 = vmax.f32 %v4927_v49, 0.0  ;;  %v1795_v33 = vmax.f32 %v4931_v58, 0.0  ;;  %v1796_v17 = vmax.f32 %v4935_v12, 0.0 }
 0x2e3   :  { %1874 = vst.msk [vmem:[%s5633_s4 + $0xe8] sm:$0xff] %vm814_vm0, %v1774_v6  ;;  %1875 = vst.msk [vmem:[%s5633_s4 + $0xf0] sm:$0xff] %vm814_vm0, %v1775_v9  ;;  %v1797_v18 = vmax.f32 %v4939_v21, 0.0  ;;  %v1798_v49 = vmax.f32 %v4943_v61, 0.0  ;;  %v1799_v58 = vmax.f32 %v4947_v60, 0.0  ;;  %v1800_v12 = vmax.f32 %v4951_v48, 0.0 }
 0x2e4   :  { %1876 = vst.msk [vmem:[%s5633_s4 + $0xf8] sm:$0xff] %vm814_vm0, %v1776_v19  ;;  %1877 = vst.msk [vmem:[%s5633_s4 + $0x100] sm:$0xff] %vm814_vm0, %v1777_v30  ;;  %v1801_v21 = vmax.f32 %v4955_v43, 0.0  ;;  %v1802_v61 = vmax.f32 %v4959_v16, 0.0  ;;  %v1803_v60 = vmax.f32 %v4963_v36, 0.0  ;;  %v1804_v48 = vmax.f32 %v4967_v8, 0.0 }
 0x2e5   :  { %1878 = vst.msk [vmem:[%s5633_s4 + $0x108] sm:$0xff] %vm814_vm0, %v1778_v13  ;;  %1879 = vst.msk [vmem:[%s5633_s4 + $0x110] sm:$0xff] %vm814_vm0, %v1779_v29  ;;  %v1805_v43 = vmax.f32 %v4971_v37, 0.0  ;;  %v1806_v16 = vmax.f32 %v4975_v34, 0.0  ;;  %v1807_v36 = vmax.f32 %v4979_v56, 0.0  ;;  %v1808_v8 = vmax.f32 %v4983_v26, 0.0 }
 0x2e6   :  { %1880 = vst.msk [vmem:[%s5633_s4 + $0x118] sm:$0xff] %vm814_vm0, %v1780_v54  ;;  %1881 = vst.msk [vmem:[%s5633_s4 + $0x120] sm:$0xff] %vm814_vm0, %v1781_v31  ;;  %v1809_v37 = vmax.f32 %v4987_v47, 0.0  ;;  %v1810_v34 = vmax.f32 %v4991_v51, 0.0  ;;  %v1811_v56 = vmax.f32 %v4995_v55, 0.0  ;;  %v6330_v26 = vld [vmem:[#allocation38_spill] sm:$0xff] }
 0x2e7   :  { %1882 = vst.msk [vmem:[%s5633_s4 + $0x128] sm:$0xff] %vm814_vm0, %v1782_v22  ;;  %1883 = vst.msk [vmem:[%s5633_s4 + $0x130] sm:$0xff] %vm814_vm0, %v1783_v39  ;;  %v1812_v62 = vmax.f32 %v6330_v26, 0.0  ;;  %v6331_v47 = vld [vmem:[#allocation39_spill] sm:$0xff]  ;;  %v6332_v55 = vld [vmem:[#allocation40_spill] sm:$0xff]  ;;  %v1822_v57 = vmax.f32 %v5039_v45, 0.0 }
 0x2e8   :  { %1884 = vst.msk [vmem:[%s5633_s4 + $0x138] sm:$0xff] %vm814_vm0, %v1784_v38  ;;  %1885 = vst.msk [vmem:[%s5633_s4 + $0x140] sm:$0xff] %vm814_vm0, %v1785_v24  ;;  %v1813_v51 = vmax.f32 %v6331_v47, 0.0  ;;  %v1814_v3 = vmax.f32 %v6332_v55, 0.0  ;;  %v6333_v15 = vld [vmem:[#allocation41_spill] sm:$0xff]  ;;  %v6334_v25 = vld [vmem:[#allocation42_spill] sm:$0xff] }
 0x2e9   :  { %1886 = vst.msk [vmem:[%s5633_s4 + $0x148] sm:$0xff] %vm814_vm0, %v1786_v28  ;;  %1887 = vst.msk [vmem:[%s5633_s4 + $0x150] sm:$0xff] %vm814_vm0, %v1787_v53  ;;  %v1815_v32 = vmax.f32 %v6333_v15, 0.0  ;;  %v1816_v27 = vmax.f32 %v6334_v25, 0.0  ;;  %v6335_v7 = vld [vmem:[#allocation43_spill] sm:$0xff]  ;;  %v6336_v52 = vld [vmem:[#allocation44_spill] sm:$0xff] }
 0x2ea   :  { %1888 = vst.msk [vmem:[%s5633_s4 + $0x158] sm:$0xff] %vm814_vm0, %v1788_v35  ;;  %1889 = vst.msk [vmem:[%s5633_s4 + $0x160] sm:$0xff] %vm814_vm0, %v1789_v14  ;;  %v1817_v46 = vmax.f32 %v6335_v7, 0.0  ;;  %v1818_v41 = vmax.f32 %v6336_v52, 0.0  ;;  %v6337_v5 = vld [vmem:[#allocation45_spill] sm:$0xff]  ;;  %v6338_v50 = vld [vmem:[#allocation47_spill] sm:$0xff] }
 0x2eb   :  { %1890 = vst.msk [vmem:[%s5633_s4 + $0x168] sm:$0xff] %vm814_vm0, %v1790_v1  ;;  %1891 = vst.msk [vmem:[%s5633_s4 + $0x170] sm:$0xff] %vm814_vm0, %v1791_v40  ;;  %v1819_v10 = vmax.f32 %v6337_v5, 0.0  ;;  %v1820_v23 = vmax.f32 %v6338_v50, 0.0  ;;  %v6339_v11 = vld [vmem:[#allocation49_spill] sm:$0xff]  ;;  %v1823_v44 = vmax.f32 %v5043_v59, 0.0 }
 0x2ec   :  { %1892 = vst.msk [vmem:[%s5633_s4 + $0x178] sm:$0xff] %vm814_vm0, %v1792_v4  ;;  %1893 = vst.msk [vmem:[%s5633_s4 + $0x180] sm:$0xff] %vm814_vm0, %v1793_v20  ;;  %v1821_v0 = vmax.f32 %v6339_v11, 0.0  ;;  %v1824_v42 = vmax.f32 %v5047_v63, 0.0  ;;  %v6340_v45 = vld [vmem:[#allocation51_spill] sm:$0xff]  ;;  %v6341_v63 = vld [vmem:[#allocation53_spill] sm:$0xff] }
 0x2ed   :  { %1894 = vst.msk [vmem:[%s5633_s4 + $0x188] sm:$0xff] %vm814_vm0, %v1794_v2  ;;  %1895 = vst.msk [vmem:[%s5633_s4 + $0x190] sm:$0xff] %vm814_vm0, %v1795_v33  ;;  %v1825_v59 = vmax.f32 %v6340_v45, 0.0  ;;  %v1826_v6 = vmax.f32 %v6341_v63, 0.0  ;;  %v6342_v9 = vld [vmem:[#allocation55_spill] sm:$0xff]  ;;  %v6343_v30 = vld [vmem:[#allocation57_spill] sm:$0xff] }
 0x2ee   :  { %1896 = vst.msk [vmem:[%s5633_s4 + $0x198] sm:$0xff] %vm814_vm0, %v1796_v17  ;;  %1897 = vst.msk [vmem:[%s5633_s4 + $0x1a0] sm:$0xff] %vm814_vm0, %v1797_v18  ;;  %v1827_v19 = vmax.f32 %v6342_v9, 0.0  ;;  %v1828_v13 = vmax.f32 %v6343_v30, 0.0  ;;  %v6344_v29 = vld [vmem:[#allocation33_spill] sm:$0xff]  ;;  %v6345_v31 = vld [vmem:[#allocation35_spill] sm:$0xff] }
 0x2ef   :  { %1898 = vst.msk [vmem:[%s5633_s4 + $0x1a8] sm:$0xff] %vm814_vm0, %v1798_v49  ;;  %1899 = vst.msk [vmem:[%s5633_s4 + $0x1b0] sm:$0xff] %vm814_vm0, %v1799_v58  ;;  %v1829_v54 = vmax.f32 %v6344_v29, 0.0  ;;  %v1830_v22 = vmax.f32 %v6345_v31, 0.0  ;;  %v6346_v39 = vld [vmem:[#allocation61_spill] sm:$0xff]  ;;  %v6349_v14 = vld [vmem:[#allocation19_spill] sm:$0xff] }
 0x2f0   :  { %1900 = vst.msk [vmem:[%s5633_s4 + $0x1b8] sm:$0xff] %vm814_vm0, %v1800_v12  ;;  %1901 = vst.msk [vmem:[%s5633_s4 + $0x1c0] sm:$0xff] %vm814_vm0, %v1801_v21  ;;  %v1831_v38 = vmax.f32 %v6346_v39, 0.0  ;;  %v6347_v24 = vld [vmem:[#allocation65_spill] sm:$0xff]  ;;  %v1834_v1 = vmax.f32 %v6349_v14, 0.0  ;;  %v6351_v20 = vld [vmem:[#allocation46_spill] sm:$0xff] }
 0x2f1   :  { %1902 = vst.msk [vmem:[%s5633_s4 + $0x1c8] sm:$0xff] %vm814_vm0, %v1802_v61  ;;  %1903 = vst.msk [vmem:[%s5633_s4 + $0x1d0] sm:$0xff] %vm814_vm0, %v1803_v60  ;;  %v1832_v28 = vmax.f32 %v6347_v24, 0.0  ;;  %v6348_v53 = vld [vmem:[#allocation17_spill] sm:$0xff]  ;;  %v1836_v2 = vmax.f32 %v6351_v20, 0.0  ;;  %v6352_v33 = vld [vmem:[#allocation48_spill] sm:$0xff] }
 0x2f2   :  { %1904 = vst.msk [vmem:[%s5633_s4 + $0x1d8] sm:$0xff] %vm814_vm0, %v1804_v48  ;;  %1905 = vst.msk [vmem:[%s5633_s4 + $0x1e0] sm:$0xff] %vm814_vm0, %v1805_v43  ;;  %v1833_v35 = vmax.f32 %v6348_v53, 0.0  ;;  %v6350_v40 = vld [vmem:[#allocation21_spill] sm:$0xff]  ;;  %v1837_v17 = vmax.f32 %v6352_v33, 0.0  ;;  %v6353_v18 = vld [vmem:[#allocation50_spill] sm:$0xff] }
 0x2f3   :  { %1906 = vst.msk [vmem:[%s5633_s4 + $0x1e8] sm:$0xff] %vm814_vm0, %v1806_v16  ;;  %1907 = vst.msk [vmem:[%s5633_s4 + $0x1f0] sm:$0xff] %vm814_vm0, %v1807_v36  ;;  %v1835_v4 = vmax.f32 %v6350_v40, 0.0  ;;  %v1838_v49 = vmax.f32 %v6353_v18, 0.0  ;;  %v6354_v58 = vld [vmem:[#allocation52_spill] sm:$0xff]  ;;  %v6355_v21 = vld [vmem:[#allocation54_spill] sm:$0xff] }
 0x2f4   :  { %1908 = vst.msk [vmem:[%s5633_s4 + $0x1f8] sm:$0xff] %vm814_vm0, %v1808_v8  ;;  %1909 = vst.msk [vmem:[%s5633_s4 + $0x200] sm:$0xff] %vm814_vm0, %v1809_v37  ;;  %v1839_v12 = vmax.f32 %v6354_v58, 0.0  ;;  %v1840_v61 = vmax.f32 %v6355_v21, 0.0  ;;  %v6356_v60 = vld [vmem:[#allocation56_spill] sm:$0xff]  ;;  %v6357_v43 = vld [vmem:[#allocation58_spill] sm:$0xff] }
 0x2f5   :  { %1910 = vst.msk [vmem:[%s5633_s4 + $0x208] sm:$0xff] %vm814_vm0, %v1810_v34  ;;  %1911 = vst.msk [vmem:[%s5633_s4 + $0x210] sm:$0xff] %vm814_vm0, %v1811_v56  ;;  %v1841_v48 = vmax.f32 %v6356_v60, 0.0  ;;  %v1842_v16 = vmax.f32 %v6357_v43, 0.0  ;;  %v6358_v36 = vld [vmem:[#allocation60_spill] sm:$0xff]  ;;  %v6359_v37 = vld [vmem:[#allocation62_spill] sm:$0xff] }
 0x2f6   :  { %1912 = vst.msk [vmem:[%s5633_s4 + $0x218] sm:$0xff] %vm814_vm0, %v1812_v62  ;;  %1913 = vst.msk [vmem:[%s5633_s4 + $0x220] sm:$0xff] %vm814_vm0, %v1813_v51  ;;  %v1843_v8 = vmax.f32 %v6358_v36, 0.0  ;;  %v1844_v34 = vmax.f32 %v6359_v37, 0.0 }
 0x2f7   :  { %1914 = vst.msk [vmem:[%s5633_s4 + $0x228] sm:$0xff] %vm814_vm0, %v1814_v3  ;;  %1915 = vst.msk [vmem:[%s5633_s4 + $0x230] sm:$0xff] %vm814_vm0, %v1815_v32 }
 0x2f8   :  { %1916 = vst.msk [vmem:[%s5633_s4 + $0x238] sm:$0xff] %vm814_vm0, %v1816_v27  ;;  %1917 = vst.msk [vmem:[%s5633_s4 + $0x240] sm:$0xff] %vm814_vm0, %v1817_v46 }
 0x2f9   :  { %1918 = vst.msk [vmem:[%s5633_s4 + $0x248] sm:$0xff] %vm814_vm0, %v1818_v41  ;;  %1919 = vst.msk [vmem:[%s5633_s4 + $0x250] sm:$0xff] %vm814_vm0, %v1819_v10 }
 0x2fa   :  { %1920 = vst.msk [vmem:[%s5633_s4 + $0x258] sm:$0xff] %vm814_vm0, %v1820_v23  ;;  %1921 = vst.msk [vmem:[%s5633_s4 + $0x260] sm:$0xff] %vm814_vm0, %v1821_v0 }
 0x2fb   :  { %1922 = vst.msk [vmem:[%s5633_s4 + $0x268] sm:$0xff] %vm814_vm0, %v1822_v57  ;;  %1923 = vst.msk [vmem:[%s5633_s4 + $0x270] sm:$0xff] %vm814_vm0, %v1823_v44 }
 0x2fc   :  { %1924 = vst.msk [vmem:[%s5633_s4 + $0x278] sm:$0xff] %vm814_vm0, %v1824_v42  ;;  %1925 = vst.msk [vmem:[%s5633_s4 + $0x280] sm:$0xff] %vm814_vm0, %v1825_v59 }
 0x2fd   :  { %1926 = vst.msk [vmem:[%s5633_s4 + $0x288] sm:$0xff] %vm814_vm0, %v1826_v6  ;;  %1927 = vst.msk [vmem:[%s5633_s4 + $0x290] sm:$0xff] %vm814_vm0, %v1827_v19 }
 0x2fe   :  { %1928 = vst.msk [vmem:[%s5633_s4 + $0x298] sm:$0xff] %vm814_vm0, %v1828_v13  ;;  %1929 = vst.msk [vmem:[%s5633_s4 + $0x2a0] sm:$0xff] %vm814_vm0, %v1829_v54 }
 0x2ff   :  { %1930 = vst.msk [vmem:[%s5633_s4 + $0x2a8] sm:$0xff] %vm814_vm0, %v1830_v22  ;;  %1931 = vst.msk [vmem:[%s5633_s4 + $0x2b0] sm:$0xff] %vm814_vm0, %v1831_v38 }
 0x300   :  { %1932 = vst.msk [vmem:[%s5633_s4 + $0x2b8] sm:$0xff] %vm814_vm0, %v1832_v28  ;;  %1933 = vst.msk [vmem:[%s5633_s4 + $0x2c0] sm:$0xff] %vm814_vm0, %v1833_v35 }
 0x301   :  { %1934 = vst.msk [vmem:[%s5633_s4 + $0x2c8] sm:$0xff] %vm814_vm0, %v1834_v1  ;;  %1935 = vst.msk [vmem:[%s5633_s4 + $0x2d0] sm:$0xff] %vm814_vm0, %v1835_v4 }
 0x302   :  { %1936 = vst.msk [vmem:[%s5633_s4 + $0x2d8] sm:$0xff] %vm814_vm0, %v1836_v2  ;;  %1937 = vst.msk [vmem:[%s5633_s4 + $0x2e0] sm:$0xff] %vm814_vm0, %v1837_v17 }
 0x303   :  { %1938 = vst.msk [vmem:[%s5633_s4 + $0x2e8] sm:$0xff] %vm814_vm0, %v1838_v49  ;;  %1939 = vst.msk [vmem:[%s5633_s4 + $0x2f0] sm:$0xff] %vm814_vm0, %v1839_v12 }
 0x304   :  { %1940 = vst.msk [vmem:[%s5633_s4 + $0x2f8] sm:$0xff] %vm814_vm0, %v1840_v61  ;;  %1941 = vst.msk [vmem:[%s5633_s4 + $0x300] sm:$0xff] %vm814_vm0, %v1841_v48 }
 0x305   :  { %1942 = vst.msk [vmem:[%s5633_s4 + $0x308] sm:$0xff] %vm814_vm0, %v1842_v16  ;;  %1943 = vst.msk [vmem:[%s5633_s4 + $0x310] sm:$0xff] %vm814_vm0, %v1843_v8 }
 0x306   :  { %1944 = vst.msk [vmem:[%s5633_s4 + $0x318] sm:$0xff] %vm814_vm0, %v1844_v34 }

// kernel: ddqn4_forward.5
= control target key start
LH: loop header
LB: loop body
LE: loop exit
PB: predicated region body
PF: predicated region fallthrough
CT: control target
= control target key end

     0   :  { %v777_v0 = vmov 0.0   ;;  %vm505_vm0 = vcmask 523264   ;;  %vm545_vm1 = vcmask 517120   ;;  %s1569_s1 = inlined_call_operand.vmem [shape: f32[512,64], index: 1, kind: input, shape index: {}]   ;;  %s1570_s0 = inlined_call_operand.vmem [shape: f32[162,512], index: 0, kind: input, shape index: {}]   ;;  %s1571_s2 = inlined_call_operand.vmem [shape: f32[1,64], index: 2, kind: input, shape index: {}]   ;;  %s1572_s3 = inlined_call_operand.vmem [shape: f32[1,64], index: 3, kind: input, shape index: {}]   ;;  %s1573_s4 = inlined_call_operand.vmem [shape: f32[162,64], index: 4, kind: output, shape index: {}]  }
   0x1   :  { %165 = vmatprep.subr.mxu0 %v777_v0  ;;  %335 = vmatprep.subr.mxu1 %v777_v0  ;;  %v116_v1 = vld [vmem:[%s1569_s1 + $0x78] sm:$0xff]  ;;  %v115_v3 = vld [vmem:[%s1569_s1 + $0x70] sm:$0xff]  ;;  %v114_v5 = vld [vmem:[%s1569_s1 + $0x68] sm:$0xff] }
   0x2   :  { %v148_v2 = vld [vmem:[%s1569_s1 + $0x178] sm:$0xff]  ;;  %166 = vmatpush1.msra.mxu0 %v116_v1  ;;  %v147_v4 = vld [vmem:[%s1569_s1 + $0x170] sm:$0xff]  ;;  %v146_v6 = vld [vmem:[%s1569_s1 + $0x168] sm:$0xff] }
   0x3   :  { %336 = vmatpush1.msra.mxu1 %v148_v2  ;;  %167 = vmatprep.subr.mxu0 %v777_v0  ;;  %v113_v7 = vld [vmem:[%s1569_s1 + $0x60] sm:$0xff]  ;;  %v112_v9 = vld [vmem:[%s1569_s1 + $0x58] sm:$0xff]  ;;  %v111_v11 = vld [vmem:[%s1569_s1 + $0x50] sm:$0xff] }
   0x4   :  { %337 = vmatprep.subr.mxu1 %v777_v0  ;;  %168 = vmatpush1.msra.mxu0 %v115_v3  ;;  %v145_v8 = vld [vmem:[%s1569_s1 + $0x160] sm:$0xff]  ;;  %v144_v10 = vld [vmem:[%s1569_s1 + $0x158] sm:$0xff]  ;;  %v143_v12 = vld [vmem:[%s1569_s1 + $0x150] sm:$0xff] }
   0x5   :  { %338 = vmatpush1.msra.mxu1 %v147_v4  ;;  %169 = vmatprep.subr.mxu0 %v777_v0  ;;  %v110_v13 = vld [vmem:[%s1569_s1 + $0x48] sm:$0xff]  ;;  %v109_v15 = vld [vmem:[%s1569_s1 + $0x40] sm:$0xff]  ;;  %v108_v17 = vld [vmem:[%s1569_s1 + $0x38] sm:$0xff] }
   0x6   :  { %339 = vmatprep.subr.mxu1 %v777_v0  ;;  %170 = vmatpush1.msra.mxu0 %v114_v5  ;;  %v142_v14 = vld [vmem:[%s1569_s1 + $0x148] sm:$0xff]  ;;  %v141_v16 = vld [vmem:[%s1569_s1 + $0x140] sm:$0xff]  ;;  %v140_v18 = vld [vmem:[%s1569_s1 + $0x138] sm:$0xff] }
   0x7   :  { %340 = vmatpush1.msra.mxu1 %v146_v6  ;;  %171 = vmatprep.subr.mxu0 %v777_v0  ;;  %v107_v19 = vld [vmem:[%s1569_s1 + $0x30] sm:$0xff]  ;;  %v106_v21 = vld [vmem:[%s1569_s1 + $0x28] sm:$0xff]  ;;  %v105_v23 = vld [vmem:[%s1569_s1 + $0x20] sm:$0xff] }
   0x8   :  { %341 = vmatprep.subr.mxu1 %v777_v0  ;;  %172 = vmatpush1.msra.mxu0 %v113_v7  ;;  %v139_v20 = vld [vmem:[%s1569_s1 + $0x130] sm:$0xff]  ;;  %v138_v22 = vld [vmem:[%s1569_s1 + $0x128] sm:$0xff]  ;;  %v137_v24 = vld [vmem:[%s1569_s1 + $0x120] sm:$0xff] }
   0x9   :  { %342 = vmatpush1.msra.mxu1 %v145_v8  ;;  %173 = vmatprep.subr.mxu0 %v777_v0  ;;  %v104_v25 = vld [vmem:[%s1569_s1 + $0x18] sm:$0xff]  ;;  %v103_v27 = vld [vmem:[%s1569_s1 + $0x10] sm:$0xff]  ;;  %v102_v29 = vld [vmem:[%s1569_s1 + $0x8] sm:$0xff] }
   0xa   :  { %343 = vmatprep.subr.mxu1 %v777_v0  ;;  %174 = vmatpush1.msra.mxu0 %v112_v9  ;;  %v136_v26 = vld [vmem:[%s1569_s1 + $0x118] sm:$0xff]  ;;  %v135_v28 = vld [vmem:[%s1569_s1 + $0x110] sm:$0xff]  ;;  %v134_v30 = vld [vmem:[%s1569_s1 + $0x108] sm:$0xff] }
   0xb   :  { %344 = vmatpush1.msra.mxu1 %v144_v10  ;;  %175 = vmatprep.subr.mxu0 %v777_v0  ;;  %v101_v31 = vld [vmem:[%s1569_s1] sm:$0xff]  ;;  %v132_v33 = vld [vmem:[%s1569_s1 + $0xf8] sm:$0xff]  ;;  %v131_v35 = vld [vmem:[%s1569_s1 + $0xf0] sm:$0xff] }
   0xc   :  { %345 = vmatprep.subr.mxu1 %v777_v0  ;;  %176 = vmatpush1.msra.mxu0 %v111_v11  ;;  %v133_v32 = vld [vmem:[%s1569_s1 + $0x100] sm:$0xff]  ;;  %v164_v34 = vld [vmem:[%s1569_s1 + $0x1f8] sm:$0xff]  ;;  %v163_v36 = vld [vmem:[%s1569_s1 + $0x1f0] sm:$0xff] }
   0xd   :  { %346 = vmatpush1.msra.mxu1 %v143_v12  ;;  %177 = vmatprep.subr.mxu0 %v777_v0  ;;  %v130_v37 = vld [vmem:[%s1569_s1 + $0xe8] sm:$0xff]  ;;  %v129_v39 = vld [vmem:[%s1569_s1 + $0xe0] sm:$0xff]  ;;  %v128_v41 = vld [vmem:[%s1569_s1 + $0xd8] sm:$0xff] }
   0xe   :  { %347 = vmatprep.subr.mxu1 %v777_v0  ;;  %178 = vmatpush1.msra.mxu0 %v110_v13  ;;  %v162_v38 = vld [vmem:[%s1569_s1 + $0x1e8] sm:$0xff]  ;;  %v161_v40 = vld [vmem:[%s1569_s1 + $0x1e0] sm:$0xff]  ;;  %v160_v42 = vld [vmem:[%s1569_s1 + $0x1d8] sm:$0xff] }
   0xf   :  { %348 = vmatpush1.msra.mxu1 %v142_v14  ;;  %179 = vmatprep.subr.mxu0 %v777_v0  ;;  %v127_v43 = vld [vmem:[%s1569_s1 + $0xd0] sm:$0xff]  ;;  %v126_v45 = vld [vmem:[%s1569_s1 + $0xc8] sm:$0xff]  ;;  %v125_v47 = vld [vmem:[%s1569_s1 + $0xc0] sm:$0xff] }
  0x10   :  { %349 = vmatprep.subr.mxu1 %v777_v0  ;;  %180 = vmatpush1.msra.mxu0 %v109_v15  ;;  %v159_v44 = vld [vmem:[%s1569_s1 + $0x1d0] sm:$0xff]  ;;  %v158_v46 = vld [vmem:[%s1569_s1 + $0x1c8] sm:$0xff]  ;;  %v157_v48 = vld [vmem:[%s1569_s1 + $0x1c0] sm:$0xff] }
  0x11   :  { %350 = vmatpush1.msra.mxu1 %v141_v16  ;;  %181 = vmatprep.subr.mxu0 %v777_v0  ;;  %v124_v49 = vld [vmem:[%s1569_s1 + $0xb8] sm:$0xff]  ;;  %v123_v51 = vld [vmem:[%s1569_s1 + $0xb0] sm:$0xff]  ;;  %v122_v53 = vld [vmem:[%s1569_s1 + $0xa8] sm:$0xff] }
  0x12   :  { %351 = vmatprep.subr.mxu1 %v777_v0  ;;  %182 = vmatpush1.msra.mxu0 %v108_v17  ;;  %v156_v50 = vld [vmem:[%s1569_s1 + $0x1b8] sm:$0xff]  ;;  %v155_v52 = vld [vmem:[%s1569_s1 + $0x1b0] sm:$0xff]  ;;  %v154_v54 = vld [vmem:[%s1569_s1 + $0x1a8] sm:$0xff] }
  0x13   :  { %352 = vmatpush1.msra.mxu1 %v140_v18  ;;  %183 = vmatprep.subr.mxu0 %v777_v0  ;;  %v121_v55 = vld [vmem:[%s1569_s1 + $0xa0] sm:$0xff]  ;;  %v120_v57 = vld [vmem:[%s1569_s1 + $0x98] sm:$0xff]  ;;  %v119_v59 = vld [vmem:[%s1569_s1 + $0x90] sm:$0xff] }
  0x14   :  { %353 = vmatprep.subr.mxu1 %v777_v0  ;;  %184 = vmatpush1.msra.mxu0 %v107_v19  ;;  %v153_v56 = vld [vmem:[%s1569_s1 + $0x1a0] sm:$0xff]  ;;  %v152_v58 = vld [vmem:[%s1569_s1 + $0x198] sm:$0xff]  ;;  %v151_v60 = vld [vmem:[%s1569_s1 + $0x190] sm:$0xff] }
  0x15   :  { %354 = vmatpush1.msra.mxu1 %v139_v20  ;;  %185 = vmatprep.subr.mxu0 %v777_v0  ;;  %v118_v61 = vld [vmem:[%s1569_s1 + $0x88] sm:$0xff]  ;;  %v117_v63 = vld [vmem:[%s1569_s1 + $0x80] sm:$0xff]  ;;  %v20_v3 = vld [vmem:[%s1570_s0 + $0x18] sm:$0xff] }
  0x16   :  { %355 = vmatprep.subr.mxu1 %v777_v0  ;;  %186 = vmatpush1.msra.mxu0 %v106_v21  ;;  %v150_v62 = vld [vmem:[%s1569_s1 + $0x188] sm:$0xff]  ;;  %v149_v2 = vld [vmem:[%s1569_s1 + $0x180] sm:$0xff]  ;;  %v19_v5 = vld [vmem:[%s1570_s0 + $0x10] sm:$0xff] }
  0x17   :  { %356 = vmatpush1.msra.mxu1 %v138_v22  ;;  %187 = vmatprep.subr.mxu0 %v777_v0  ;;  %v18_v1 = vld [vmem:[%s1570_s0 + $0x8] sm:$0xff]  ;;  %v17_v4 = vld [vmem:[%s1570_s0] sm:$0xff]  ;;  %v24_v7 = vld [vmem:[%s1570_s0 + $0x38] sm:$0xff] }
  0x18   :  { %357 = vmatprep.subr.mxu1 %v777_v0  ;;  %188 = vmatpush1.msra.mxu0 %v105_v23  ;;  %v22_v6 = vld [vmem:[%s1570_s0 + $0x28] sm:$0xff]  ;;  %v23_v8 = vld [vmem:[%s1570_s0 + $0x30] sm:$0xff]  ;;  %v28_v10 = vld [vmem:[%s1570_s0 + $0x58] sm:$0xff] }
  0x19   :  { %358 = vmatpush1.msra.mxu1 %v137_v24  ;;  %189 = vmatprep.subr.mxu0 %v777_v0  ;;  %v26_v9 = vld [vmem:[%s1570_s0 + $0x48] sm:$0xff]  ;;  %v25_v11 = vld [vmem:[%s1570_s0 + $0x40] sm:$0xff]  ;;  %v27_v12 = vld [vmem:[%s1570_s0 + $0x50] sm:$0xff] }
  0x1a   :  { %359 = vmatprep.subr.mxu1 %v777_v0  ;;  %190 = vmatpush1.msra.mxu0 %v104_v25  ;;  %v30_v13 = vld [vmem:[%s1570_s0 + $0x68] sm:$0xff]  ;;  %v32_v14 = vld [vmem:[%s1570_s0 + $0x78] sm:$0xff]  ;;  %v29_v15 = vld [vmem:[%s1570_s0 + $0x60] sm:$0xff] }
  0x1b   :  { %360 = vmatpush1.msra.mxu1 %v136_v26  ;;  %191 = vmatprep.subr.mxu0 %v777_v0  ;;  %v31_v16 = vld [vmem:[%s1570_s0 + $0x70] sm:$0xff]  ;;  %v34_v17 = vld [vmem:[%s1570_s0 + $0x88] sm:$0xff]  ;;  %v36_v18 = vld [vmem:[%s1570_s0 + $0x98] sm:$0xff] }
  0x1c   :  { %361 = vmatprep.subr.mxu1 %v777_v0  ;;  %192 = vmatpush1.msra.mxu0 %v103_v27  ;;  %v33_v19 = vld [vmem:[%s1570_s0 + $0x80] sm:$0xff]  ;;  %v35_v20 = vld [vmem:[%s1570_s0 + $0x90] sm:$0xff]  ;;  %v38_v21 = vld [vmem:[%s1570_s0 + $0xa8] sm:$0xff] }
  0x1d   :  { %362 = vmatpush1.msra.mxu1 %v135_v28  ;;  %193 = vmatprep.subr.mxu0 %v777_v0  ;;  %v40_v22 = vld [vmem:[%s1570_s0 + $0xb8] sm:$0xff]  ;;  %v37_v23 = vld [vmem:[%s1570_s0 + $0xa0] sm:$0xff]  ;;  %v39_v24 = vld [vmem:[%s1570_s0 + $0xb0] sm:$0xff] }
  0x1e   :  { %363 = vmatprep.subr.mxu1 %v777_v0  ;;  %194 = vmatpush1.msra.mxu0 %v102_v29  ;;  %v42_v25 = vld [vmem:[%s1570_s0 + $0xc8] sm:$0xff]  ;;  %v44_v26 = vld [vmem:[%s1570_s0 + $0xd8] sm:$0xff]  ;;  %v41_v27 = vld [vmem:[%s1570_s0 + $0xc0] sm:$0xff] }
  0x1f   :  { %364 = vmatpush1.msra.mxu1 %v134_v30  ;;  %195 = vmatprep.subr.mxu0 %v777_v0  ;;  %v43_v28 = vld [vmem:[%s1570_s0 + $0xd0] sm:$0xff]  ;;  %v46_v29 = vld [vmem:[%s1570_s0 + $0xe8] sm:$0xff]  ;;  %v48_v30 = vld [vmem:[%s1570_s0 + $0xf8] sm:$0xff] }
  0x20   :  { %365 = vmatprep.subr.mxu1 %v777_v0  ;;  %196 = vmatpush1.msra.mxu0 %v101_v31  ;;  %v45_v31 = vld [vmem:[%s1570_s0 + $0xe0] sm:$0xff] }
  0x21   :  { %366 = vmatpush1.msra.mxu1 %v133_v32  ;;  %197 = vmatprep.subr.mxu0 %v777_v0  ;;  %v47_v32 = vld [vmem:[%s1570_s0 + $0xf0] sm:$0xff] }
  0x22   :  { %367 = vmatprep.subr.mxu1 %v777_v0  ;;  %198 = vmatpush2.msra.mxu0 %v132_v33  ;;  %v50_v33 = vld [vmem:[%s1570_s0 + $0x108] sm:$0xff] }
  0x23   :  { %368 = vmatpush2.msra.mxu1 %v164_v34  ;;  %199 = vmatprep.subr.mxu0 %v777_v0  ;;  %v52_v34 = vld [vmem:[%s1570_s0 + $0x118] sm:$0xff] }
  0x24   :  { %369 = vmatprep.subr.mxu1 %v777_v0  ;;  %200 = vmatpush2.msra.mxu0 %v131_v35  ;;  %v49_v35 = vld [vmem:[%s1570_s0 + $0x100] sm:$0xff] }
  0x25   :  { %370 = vmatpush2.msra.mxu1 %v163_v36  ;;  %201 = vmatprep.subr.mxu0 %v777_v0  ;;  %v51_v36 = vld [vmem:[%s1570_s0 + $0x110] sm:$0xff] }
  0x26   :  { %371 = vmatprep.subr.mxu1 %v777_v0  ;;  %202 = vmatpush2.msra.mxu0 %v130_v37  ;;  %v54_v37 = vld [vmem:[%s1570_s0 + $0x128] sm:$0xff] }
  0x27   :  { %372 = vmatpush2.msra.mxu1 %v162_v38  ;;  %203 = vmatprep.subr.mxu0 %v777_v0  ;;  %v56_v38 = vld [vmem:[%s1570_s0 + $0x138] sm:$0xff] }
  0x28   :  { %373 = vmatprep.subr.mxu1 %v777_v0  ;;  %204 = vmatpush2.msra.mxu0 %v129_v39  ;;  %v53_v39 = vld [vmem:[%s1570_s0 + $0x120] sm:$0xff] }
  0x29   :  { %374 = vmatpush2.msra.mxu1 %v161_v40  ;;  %205 = vmatprep.subr.mxu0 %v777_v0  ;;  %v55_v40 = vld [vmem:[%s1570_s0 + $0x130] sm:$0xff] }
  0x2a   :  { %375 = vmatprep.subr.mxu1 %v777_v0  ;;  %206 = vmatpush2.msra.mxu0 %v128_v41  ;;  %v58_v41 = vld [vmem:[%s1570_s0 + $0x148] sm:$0xff] }
  0x2b   :  { %376 = vmatpush2.msra.mxu1 %v160_v42  ;;  %207 = vmatprep.subr.mxu0 %v777_v0  ;;  %v60_v42 = vld [vmem:[%s1570_s0 + $0x158] sm:$0xff] }
  0x2c   :  { %377 = vmatprep.subr.mxu1 %v777_v0  ;;  %208 = vmatpush2.msra.mxu0 %v127_v43  ;;  %v57_v43 = vld [vmem:[%s1570_s0 + $0x140] sm:$0xff] }
  0x2d   :  { %378 = vmatpush2.msra.mxu1 %v159_v44  ;;  %209 = vmatprep.subr.mxu0 %v777_v0  ;;  %v59_v44 = vld [vmem:[%s1570_s0 + $0x150] sm:$0xff] }
  0x2e   :  { %379 = vmatprep.subr.mxu1 %v777_v0  ;;  %210 = vmatpush2.msra.mxu0 %v126_v45  ;;  %v62_v45 = vld [vmem:[%s1570_s0 + $0x168] sm:$0xff] }
  0x2f   :  { %380 = vmatpush2.msra.mxu1 %v158_v46  ;;  %211 = vmatprep.subr.mxu0 %v777_v0  ;;  %v64_v46 = vld [vmem:[%s1570_s0 + $0x178] sm:$0xff] }
  0x30   :  { %381 = vmatprep.subr.mxu1 %v777_v0  ;;  %212 = vmatpush2.msra.mxu0 %v125_v47  ;;  %v61_v47 = vld [vmem:[%s1570_s0 + $0x160] sm:$0xff] }
  0x31   :  { %382 = vmatpush2.msra.mxu1 %v157_v48  ;;  %213 = vmatprep.subr.mxu0 %v777_v0  ;;  %v63_v48 = vld [vmem:[%s1570_s0 + $0x170] sm:$0xff] }
  0x32   :  { %383 = vmatprep.subr.mxu1 %v777_v0  ;;  %214 = vmatpush2.msra.mxu0 %v124_v49  ;;  %v66_v49 = vld [vmem:[%s1570_s0 + $0x188] sm:$0xff] }
  0x33   :  { %384 = vmatpush2.msra.mxu1 %v156_v50  ;;  %215 = vmatprep.subr.mxu0 %v777_v0  ;;  %v68_v50 = vld [vmem:[%s1570_s0 + $0x198] sm:$0xff] }
  0x34   :  { %385 = vmatprep.subr.mxu1 %v777_v0  ;;  %216 = vmatpush2.msra.mxu0 %v123_v51  ;;  %v65_v51 = vld [vmem:[%s1570_s0 + $0x180] sm:$0xff] }
  0x35   :  { %386 = vmatpush2.msra.mxu1 %v155_v52  ;;  %217 = vmatprep.subr.mxu0 %v777_v0  ;;  %v67_v52 = vld [vmem:[%s1570_s0 + $0x190] sm:$0xff] }
  0x36   :  { %387 = vmatprep.subr.mxu1 %v777_v0  ;;  %218 = vmatpush2.msra.mxu0 %v122_v53  ;;  %v70_v53 = vld [vmem:[%s1570_s0 + $0x1a8] sm:$0xff] }
  0x37   :  { %388 = vmatpush2.msra.mxu1 %v154_v54  ;;  %219 = vmatprep.subr.mxu0 %v777_v0  ;;  %v72_v54 = vld [vmem:[%s1570_s0 + $0x1b8] sm:$0xff] }
  0x38   :  { %389 = vmatprep.subr.mxu1 %v777_v0  ;;  %220 = vmatpush2.msra.mxu0 %v121_v55  ;;  %v69_v55 = vld [vmem:[%s1570_s0 + $0x1a0] sm:$0xff] }
  0x39   :  { %390 = vmatpush2.msra.mxu1 %v153_v56  ;;  %221 = vmatprep.subr.mxu0 %v777_v0  ;;  %v71_v56 = vld [vmem:[%s1570_s0 + $0x1b0] sm:$0xff] }
  0x3a   :  { %391 = vmatprep.subr.mxu1 %v777_v0  ;;  %222 = vmatpush2.msra.mxu0 %v120_v57  ;;  %v74_v57 = vld [vmem:[%s1570_s0 + $0x1c8] sm:$0xff] }
  0x3b   :  { %392 = vmatpush2.msra.mxu1 %v152_v58  ;;  %223 = vmatprep.subr.mxu0 %v777_v0  ;;  %v76_v58 = vld [vmem:[%s1570_s0 + $0x1d8] sm:$0xff] }
  0x3c   :  { %393 = vmatprep.subr.mxu1 %v777_v0  ;;  %224 = vmatpush2.msra.mxu0 %v119_v59  ;;  %v73_v59 = vld [vmem:[%s1570_s0 + $0x1c0] sm:$0xff] }
  0x3d   :  { %394 = vmatpush2.msra.mxu1 %v151_v60  ;;  %225 = vmatprep.subr.mxu0 %v777_v0  ;;  %v75_v60 = vld [vmem:[%s1570_s0 + $0x1d0] sm:$0xff] }
  0x3e   :  { %395 = vmatprep.subr.mxu1 %v777_v0  ;;  %226 = vmatpush2.msra.mxu0 %v118_v61  ;;  %v78_v61 = vld [vmem:[%s1570_s0 + $0x1e8] sm:$0xff] }
  0x3f   :  { %396 = vmatpush2.msra.mxu1 %v150_v62  ;;  %227 = vmatprep.subr.mxu0 %v777_v0  ;;  %v80_v62 = vld [vmem:[%s1570_s0 + $0x1f8] sm:$0xff] }
  0x40   :  { %397 = vmatprep.subr.mxu1 %v777_v0  ;;  %228 = vmatpush2.msra.mxu0 %v117_v63  ;;  %v21_v0 = vld [vmem:[%s1570_s0 + $0x20] sm:$0xff] }
  0x41   :  { %229 = vmatprep.mubr.f32.mxu0 %v18_v1  ;;  %398 = vmatpush2.msra.mxu1 %v149_v2  ;;  %v77_v63 = vld [vmem:[%s1570_s0 + $0x1e0] sm:$0xff]  ;;  %v79_v1 = vld [vmem:[%s1570_s0 + $0x1f0] sm:$0xff]  ;;  %v82_v2 = vld [vmem:[%s1570_s0 + $0x208] sm:$0xff] }
  0x42   :  { %399 = vmatprep.mubr.f32.mxu1 %v20_v3  ;;  %230 = vmatmul.mubr.f32.vlgmr.msra.gmra.mxu0 %v17_v4  ;;  %v84_v3 = vld [vmem:[%s1570_s0 + $0x218] sm:$0xff]  ;;  %v81_v4 = vld [vmem:[%s1570_s0 + $0x200] sm:$0xff] }
  0x43   :  { %400 = vmatmul.mubr.f32.vlgmr.msra.gmra.mxu1 %v19_v5  ;;  %234 = vmatprep.mubr.f32.mxu0 %v22_v6  ;;  %v83_v5 = vld [vmem:[%s1570_s0 + $0x210] sm:$0xff]  ;;  %v86_v6 = vld [vmem:[%s1570_s0 + $0x228] sm:$0xff] }
  0x44   :  { %404 = vmatprep.mubr.f32.mxu1 %v24_v7  ;;  %v88_v7 = vld [vmem:[%s1570_s0 + $0x238] sm:$0xff] }
  0x46   :  { %235 = vmatmul.mubr.f32.gmra.mxu0 %v21_v0  ;;  %v85_v0 = vld [vmem:[%s1570_s0 + $0x220] sm:$0xff] }
  0x47   :  { %405 = vmatmul.mubr.f32.gmra.mxu1 %v23_v8  ;;  %239 = vmatprep.mubr.f32.mxu0 %v26_v9  ;;  %v87_v8 = vld [vmem:[%s1570_s0 + $0x230] sm:$0xff]  ;;  %v90_v9 = vld [vmem:[%s1570_s0 + $0x248] sm:$0xff] }
  0x48   :  { %409 = vmatprep.mubr.f32.mxu1 %v28_v10  ;;  %v92_v10 = vld [vmem:[%s1570_s0 + $0x258] sm:$0xff] }
  0x4a   :  { %240 = vmatmul.mubr.f32.gmra.mxu0 %v25_v11  ;;  %v89_v11 = vld [vmem:[%s1570_s0 + $0x240] sm:$0xff] }
  0x4b   :  { %410 = vmatmul.mubr.f32.gmra.mxu1 %v27_v12  ;;  %244 = vmatprep.mubr.f32.mxu0 %v30_v13  ;;  %v91_v12 = vld [vmem:[%s1570_s0 + $0x250] sm:$0xff]  ;;  %v94_v13 = vld [vmem:[%s1570_s0 + $0x268] sm:$0xff] }
  0x4c   :  { %414 = vmatprep.mubr.f32.mxu1 %v32_v14  ;;  %v96_v14 = vld [vmem:[%s1570_s0 + $0x278] sm:$0xff] }
  0x4e   :  { %245 = vmatmul.mubr.f32.gmra.mxu0 %v29_v15  ;;  %v93_v15 = vld [vmem:[%s1570_s0 + $0x260] sm:$0xff] }
  0x4f   :  { %415 = vmatmul.mubr.f32.gmra.mxu1 %v31_v16  ;;  %249 = vmatprep.mubr.f32.mxu0 %v34_v17  ;;  %v95_v16 = vld [vmem:[%s1570_s0 + $0x270] sm:$0xff]  ;;  %v98_v17 = vld [vmem:[%s1570_s0 + $0x288] sm:$0x3] }
  0x50   :  { %419 = vmatprep.mubr.f32.mxu1 %v36_v18  ;;  %v100_v18 = vld [vmem:[%s1570_s0 + $0x298] sm:$0x3] }
  0x52   :  { %250 = vmatmul.mubr.f32.gmra.mxu0 %v33_v19  ;;  %v97_v19 = vld [vmem:[%s1570_s0 + $0x280] sm:$0x3] }
  0x53   :  { %420 = vmatmul.mubr.f32.gmra.mxu1 %v35_v20  ;;  %254 = vmatprep.mubr.f32.mxu0 %v38_v21  ;;  %v99_v20 = vld [vmem:[%s1570_s0 + $0x290] sm:$0x3] }
  0x54   :  { %424 = vmatprep.mubr.f32.mxu1 %v40_v22 }
  0x56   :  { %255 = vmatmul.mubr.f32.gmra.mxu0 %v37_v23 }
  0x57   :  { %425 = vmatmul.mubr.f32.gmra.mxu1 %v39_v24  ;;  %259 = vmatprep.mubr.f32.mxu0 %v42_v25 }
  0x58   :  { %429 = vmatprep.mubr.f32.mxu1 %v44_v26 }
  0x5a   :  { %260 = vmatmul.mubr.f32.gmra.mxu0 %v41_v27 }
  0x5b   :  { %430 = vmatmul.mubr.f32.gmra.mxu1 %v43_v28  ;;  %264 = vmatprep.mubr.f32.mxu0 %v46_v29 }
  0x5c   :  { %434 = vmatprep.mubr.f32.mxu1 %v48_v30 }
  0x5e   :  { %265 = vmatmul.mubr.f32.gmra.mxu0 %v45_v31 }
  0x5f   :  { %435 = vmatmul.mubr.f32.gmra.mxu1 %v47_v32  ;;  %269 = vmatprep.mubr.f32.mxu0 %v50_v33 }
  0x60   :  { %439 = vmatprep.mubr.f32.mxu1 %v52_v34 }
  0x62   :  { %270 = vmatmul.mubr.f32.gmra.mxu0 %v49_v35 }
  0x63   :  { %440 = vmatmul.mubr.f32.gmra.mxu1 %v51_v36  ;;  %274 = vmatprep.mubr.f32.mxu0 %v54_v37 }
  0x64   :  { %444 = vmatprep.mubr.f32.mxu1 %v56_v38 }
  0x66   :  { %275 = vmatmul.mubr.f32.gmra.mxu0 %v53_v39 }
  0x67   :  { %445 = vmatmul.mubr.f32.gmra.mxu1 %v55_v40  ;;  %279 = vmatprep.mubr.f32.mxu0 %v58_v41 }
  0x68   :  { %449 = vmatprep.mubr.f32.mxu1 %v60_v42 }
  0x6a   :  { %280 = vmatmul.mubr.f32.gmra.mxu0 %v57_v43 }
  0x6b   :  { %450 = vmatmul.mubr.f32.gmra.mxu1 %v59_v44  ;;  %284 = vmatprep.mubr.f32.mxu0 %v62_v45 }
  0x6c   :  { %454 = vmatprep.mubr.f32.mxu1 %v64_v46 }
  0x6e   :  { %285 = vmatmul.mubr.f32.gmra.mxu0 %v61_v47 }
  0x6f   :  { %455 = vmatmul.mubr.f32.gmra.mxu1 %v63_v48  ;;  %289 = vmatprep.mubr.f32.mxu0 %v66_v49 }
  0x70   :  { %459 = vmatprep.mubr.f32.mxu1 %v68_v50 }
  0x72   :  { %290 = vmatmul.mubr.f32.gmra.mxu0 %v65_v51 }
  0x73   :  { %460 = vmatmul.mubr.f32.gmra.mxu1 %v67_v52  ;;  %294 = vmatprep.mubr.f32.mxu0 %v70_v53 }
  0x74   :  { %464 = vmatprep.mubr.f32.mxu1 %v72_v54 }
  0x76   :  { %295 = vmatmul.mubr.f32.gmra.mxu0 %v69_v55 }
  0x77   :  { %465 = vmatmul.mubr.f32.gmra.mxu1 %v71_v56  ;;  %299 = vmatprep.mubr.f32.mxu0 %v74_v57 }
  0x78   :  { %469 = vmatprep.mubr.f32.mxu1 %v76_v58 }
  0x7a   :  { %300 = vmatmul.mubr.f32.gmra.mxu0 %v73_v59 }
  0x7b   :  { %470 = vmatmul.mubr.f32.gmra.mxu1 %v75_v60  ;;  %304 = vmatprep.mubr.f32.mxu0 %v78_v61 }
  0x7c   :  { %474 = vmatprep.mubr.f32.mxu1 %v80_v62 }
  0x7e   :  { %305 = vmatmul.mubr.f32.gmra.mxu0 %v77_v63 }
  0x7f   :  { %475 = vmatmul.mubr.f32.gmra.mxu1 %v79_v1  ;;  %309 = vmatprep.mubr.f32.mxu0 %v82_v2 }
  0x80   :  { %479 = vmatprep.mubr.f32.mxu1 %v84_v3 }
  0x82   :  { %310 = vmatmul.mubr.f32.gmra.mxu0 %v81_v4 }
  0x83   :  { %480 = vmatmul.mubr.f32.gmra.mxu1 %v83_v5  ;;  %314 = vmatprep.mubr.f32.mxu0 %v86_v6 }
  0x84   :  { %484 = vmatprep.mubr.f32.mxu1 %v88_v7 }
  0x86   :  { %315 = vmatmul.mubr.f32.gmra.mxu0 %v85_v0 }
  0x87   :  { %485 = vmatmul.mubr.f32.gmra.mxu1 %v87_v8  ;;  %319 = vmatprep.mubr.f32.mxu0 %v90_v9 }
  0x88   :  { %489 = vmatprep.mubr.f32.mxu1 %v92_v10 }
  0x8a   :  { %320 = vmatmul.mubr.f32.gmra.mxu0 %v89_v11 }
  0x8b   :  { %490 = vmatmul.mubr.f32.gmra.mxu1 %v91_v12  ;;  %324 = vmatprep.mubr.f32.mxu0 %v94_v13 }
  0x8c   :  { %494 = vmatprep.mubr.f32.mxu1 %v96_v14 }
  0x8e   :  { %325 = vmatmul.mubr.f32.gmra.mxu0 %v93_v15 }
  0x8f   :  { %495 = vmatmul.mubr.f32.gmra.mxu1 %v95_v16  ;;  %329 = vmatprep.mubr.f32.mxu0 %v98_v17 }
  0x90   :  { %499 = vmatprep.mubr.f32.mxu1 %v100_v18 }
  0x92   :  { %330 = vmatmul.mubr.f32.gmra.mxu0 %v97_v19 }
  0x93   :  { %500 = vmatmul.mubr.f32.gmra.mxu1 %v99_v20 }
 0x102   :  { %v231_v21 = vpop.f32.mrf.mxu0 }
 0x103   :  { %v401_v22 = vpop.f32.mrf.mxu1 }
 0x104   :  { %v233_v23 = vpop.f32.mrf.mxu0  ;;  %v1313_v60 = vadd.f32 %v401_v22, %v231_v21 }
 0x105   :  { %v403_v24 = vpop.f32.mrf.mxu1 }
 0x106   :  { %v236_v25 = vpop.f32.mrf.mxu0  ;;  %v555_v5 = vmul.f32 %v1313_v60, %v1313_v60  ;;  %v506_v10 = vsel %vm505_vm0, %v1313_v60, 0.0 }
 0x107   :  { %v406_v26 = vpop.f32.mrf.mxu1 }
 0x108   :  { %v238_v27 = vpop.f32.mrf.mxu0  ;;  %v1311_v59 = vadd.f32 %v406_v26, %v236_v25  ;;  %v576_v17 = vsel %vm505_vm0, %v555_v5, 0.0 }
 0x109   :  { %v408_v28 = vpop.f32.mrf.mxu1 }
 0x10a   :  { %v241_v29 = vpop.f32.mrf.mxu0  ;;  %v556_v3 = vmul.f32 %v1311_v59, %v1311_v59  ;;  %v507_v0 = vsel %vm505_vm0, %v1311_v59, 0.0 }
 0x10b   :  { %v411_v30 = vpop.f32.mrf.mxu1  ;;  %v508_v18 = vadd.f32 %v507_v0, %v506_v10 }
 0x10c   :  { %v243_v31 = vpop.f32.mrf.mxu0  ;;  %v1315_v63 = vadd.f32 %v411_v30, %v241_v29  ;;  %v577_v13 = vsel %vm505_vm0, %v556_v3, 0.0 }
 0x10d   :  { %v413_v32 = vpop.f32.mrf.mxu1  ;;  %v578_v25 = vadd.f32 %v577_v13, %v576_v17 }
 0x10e   :  { %v246_v33 = vpop.f32.mrf.mxu0  ;;  %v557_v8 = vmul.f32 %v1315_v63, %v1315_v63  ;;  %v509_v14 = vsel %vm505_vm0, %v1315_v63, 0.0 }
 0x10f   :  { %v416_v34 = vpop.f32.mrf.mxu1  ;;  %v510_v26 = vadd.f32 %v509_v14, %v508_v18 }
 0x110   :  { %v248_v35 = vpop.f32.mrf.mxu0  ;;  %v1319_v4 = vadd.f32 %v416_v34, %v246_v33  ;;  %v579_v21 = vsel %vm505_vm0, %v557_v8, 0.0 }
 0x111   :  { %v418_v36 = vpop.f32.mrf.mxu1  ;;  %v580_v33 = vadd.f32 %v579_v21, %v578_v25 }
 0x112   :  { %v251_v37 = vpop.f32.mrf.mxu0  ;;  %v558_v15 = vmul.f32 %v1319_v4, %v1319_v4  ;;  %v511_v22 = vsel %vm505_vm0, %v1319_v4, 0.0 }
 0x113   :  { %v421_v38 = vpop.f32.mrf.mxu1  ;;  %v512_v34 = vadd.f32 %v511_v22, %v510_v26 }
 0x114   :  { %v253_v39 = vpop.f32.mrf.mxu0  ;;  %v1327_v9 = vadd.f32 %v421_v38, %v251_v37  ;;  %v581_v29 = vsel %vm505_vm0, %v558_v15, 0.0 }
 0x115   :  { %v423_v40 = vpop.f32.mrf.mxu1 }
 0x116   :  { %v256_v41 = vpop.f32.mrf.mxu0  ;;  %v559_v23 = vmul.f32 %v1327_v9, %v1327_v9  ;;  %v513_v30 = vsel %vm505_vm0, %v1327_v9, 0.0 }
 0x117   :  { %v426_v42 = vpop.f32.mrf.mxu1 }
 0x118   :  { %v258_v43 = vpop.f32.mrf.mxu0  ;;  %v1336_v16 = vadd.f32 %v426_v42, %v256_v41  ;;  %v583_v37 = vsel %vm505_vm0, %v559_v23, 0.0  ;;  %v582_v41 = vadd.f32 %v581_v29, %v580_v33  ;;  %v514_v42 = vadd.f32 %v513_v30, %v512_v34 }
 0x119   :  { %v428_v44 = vpop.f32.mrf.mxu1 }
 0x11a   :  { %v261_v45 = vpop.f32.mrf.mxu0  ;;  %v560_v31 = vmul.f32 %v1336_v16, %v1336_v16  ;;  %v515_v38 = vsel %vm505_vm0, %v1336_v16, 0.0 }
 0x11b   :  { %v431_v46 = vpop.f32.mrf.mxu1 }
 0x11c   :  { %v263_v47 = vpop.f32.mrf.mxu0  ;;  %v1344_v24 = vadd.f32 %v431_v46, %v261_v45  ;;  %v585_v45 = vsel %vm505_vm0, %v560_v31, 0.0 }
 0x11d   :  { %v433_v48 = vpop.f32.mrf.mxu1 }
 0x11e   :  { %v266_v49 = vpop.f32.mrf.mxu0  ;;  %v561_v39 = vmul.f32 %v1344_v24, %v1344_v24  ;;  %v517_v46 = vsel %vm505_vm0, %v1344_v24, 0.0 }
 0x11f   :  { %v436_v50 = vpop.f32.mrf.mxu1 }
 0x120   :  { %v268_v51 = vpop.f32.mrf.mxu0  ;;  %v1351_v32 = vadd.f32 %v436_v50, %v266_v49  ;;  %v584_v49 = vadd.f32 %v583_v37, %v582_v41  ;;  %v516_v50 = vadd.f32 %v515_v38, %v514_v42 }
 0x121   :  { %v438_v52 = vpop.f32.mrf.mxu1 }
 0x122   :  { %v271_v53 = vpop.f32.mrf.mxu0  ;;  %v562_v47 = vmul.f32 %v1351_v32, %v1351_v32 }
 0x123   :  { %v441_v54 = vpop.f32.mrf.mxu1 }
 0x124   :  { %v273_v55 = vpop.f32.mrf.mxu0  ;;  %v1358_v40 = vadd.f32 %v441_v54, %v271_v53  ;;  %v587_v53 = vsel %vm505_vm0, %v561_v39, 0.0  ;;  %v519_v54 = vsel %vm505_vm0, %v1351_v32, 0.0 }
 0x125   :  { %v443_v56 = vpop.f32.mrf.mxu1 }
 0x126   :  { %v276_v57 = vpop.f32.mrf.mxu0  ;;  %v563_v55 = vmul.f32 %v1358_v40, %v1358_v40 }
 0x127   :  { %v446_v58 = vpop.f32.mrf.mxu1 }
 0x128   :  { %v278_v61 = vpop.f32.mrf.mxu0  ;;  %v1365_v48 = vadd.f32 %v446_v58, %v276_v57  ;;  %v589_v57 = vsel %vm505_vm0, %v562_v47, 0.0  ;;  %v521_v58 = vsel %vm505_vm0, %v1358_v40, 0.0 }
 0x129   :  { %v448_v62 = vpop.f32.mrf.mxu1  ;;  %v586_v61 = vadd.f32 %v585_v45, %v584_v49 }
 0x12a   :  { %v281_v1 = vpop.f32.mrf.mxu0  ;;  %v518_v62 = vadd.f32 %v517_v46, %v516_v50 }
 0x12b   :  { %v451_v2 = vpop.f32.mrf.mxu1  ;;  %v588_v0 = vadd.f32 %v587_v53, %v586_v61 }
 0x12c   :  { %v283_v6 = vpop.f32.mrf.mxu0  ;;  %v1372_v56 = vadd.f32 %v451_v2, %v281_v1  ;;  %v520_v8 = vadd.f32 %v519_v54, %v518_v62  ;;  %v591_v1 = vsel %vm505_vm0, %v563_v55, 0.0  ;;  %v523_v2 = vsel %vm505_vm0, %v1365_v48, 0.0 }
 0x12d   :  { %v453_v7 = vpop.f32.mrf.mxu1  ;;  %v564_v6 = vmul.f32 %v1365_v48, %v1365_v48  ;;  %v590_v17 = vadd.f32 %v589_v57, %v588_v0 }
 0x12e   :  { %v286_v11 = vpop.f32.mrf.mxu0  ;;  %v565_v14 = vmul.f32 %v1372_v56, %v1372_v56  ;;  %v522_v18 = vadd.f32 %v521_v58, %v520_v8 }
 0x12f   :  { %v456_v12 = vpop.f32.mrf.mxu1  ;;  %v592_v23 = vadd.f32 %v591_v1, %v590_v17 }
 0x130   :  { %v288_v19 = vpop.f32.mrf.mxu0  ;;  %v1379_v7 = vadd.f32 %v456_v12, %v286_v11  ;;  %v593_v11 = vsel %vm505_vm0, %v564_v6, 0.0  ;;  %v525_v12 = vsel %vm505_vm0, %v1372_v56, 0.0  ;;  %v524_v25 = vadd.f32 %v523_v2, %v522_v18 }
 0x131   :  { %v458_v20 = vpop.f32.mrf.mxu1  ;;  %v594_v33 = vadd.f32 %v593_v11, %v592_v23 }
 0x132   :  { %v291_v27 = vpop.f32.mrf.mxu0  ;;  %v566_v21 = vmul.f32 %v1379_v7, %v1379_v7  ;;  %v526_v34 = vadd.f32 %v525_v12, %v524_v25 }
 0x133   :  { %v461_v28 = vpop.f32.mrf.mxu1 }
 0x134   :  { %v293_v35 = vpop.f32.mrf.mxu0  ;;  %v1386_v15 = vadd.f32 %v461_v28, %v291_v27  ;;  %v595_v27 = vsel %vm505_vm0, %v565_v14, 0.0  ;;  %v527_v28 = vsel %vm505_vm0, %v1379_v7, 0.0  ;;  %v597_v37 = vsel %vm505_vm0, %v566_v21, 0.0 }
 0x135   :  { %v463_v36 = vpop.f32.mrf.mxu1  ;;  %v596_v42 = vadd.f32 %v595_v27, %v594_v33 }
 0x136   :  { %v296_v43 = vpop.f32.mrf.mxu0  ;;  %v567_v30 = vmul.f32 %v1386_v15, %v1386_v15  ;;  %v529_v38 = vsel %vm505_vm0, %v1386_v15, 0.0 }
 0x137   :  { %v466_v44 = vpop.f32.mrf.mxu1 }
 0x138   :  { %v298_v51 = vpop.f32.mrf.mxu0  ;;  %v1393_v22 = vadd.f32 %v466_v44, %v296_v43  ;;  %v528_v43 = vadd.f32 %v527_v28, %v526_v34  ;;  %v599_v46 = vsel %vm505_vm0, %v567_v30, 0.0 }
 0x139   :  { %v468_v52 = vpop.f32.mrf.mxu1  ;;  %v598_v51 = vadd.f32 %v597_v37, %v596_v42 }
 0x13a   :  { %v301_v3 = vpop.f32.mrf.mxu0  ;;  %v568_v39 = vmul.f32 %v1393_v22, %v1393_v22  ;;  %v531_v47 = vsel %vm505_vm0, %v1393_v22, 0.0  ;;  %v530_v52 = vadd.f32 %v529_v38, %v528_v43 }
 0x13b   :  { %v471_v5 = vpop.f32.mrf.mxu1 }
 0x13c   :  { %v303_v10 = vpop.f32.mrf.mxu0  ;;  %v1400_v31 = vadd.f32 %v471_v5, %v301_v3  ;;  %v601_v55 = vsel %vm505_vm0, %v568_v39, 0.0  ;;  %v600_v5 = vadd.f32 %v599_v46, %v598_v51  ;;  %v532_v57 = vadd.f32 %v531_v47, %v530_v52 }
 0x13d   :  { %v473_v13 = vpop.f32.mrf.mxu1 }
 0x13e   :  { %v306_v19 = vpop.f32.mrf.mxu0  ;;  %v569_v49 = vmul.f32 %v1400_v31, %v1400_v31  ;;  %v533_v61 = vsel %vm505_vm0, %v1400_v31, 0.0  ;;  %v602_v13 = vadd.f32 %v601_v55, %v600_v5 }
 0x13f   :  { %v476_v20 = vpop.f32.mrf.mxu1  ;;  %v534_v1 = vadd.f32 %v533_v61, %v532_v57 }
 0x140   :  { %v308_v26 = vpop.f32.mrf.mxu0  ;;  %v1407_v41 = vadd.f32 %v476_v20, %v306_v19  ;;  %v603_v0 = vsel %vm505_vm0, %v569_v49, 0.0 }
 0x141   :  { %v478_v29 = vpop.f32.mrf.mxu1  ;;  %v604_v11 = vadd.f32 %v603_v0, %v602_v13 }
 0x142   :  { %v311_v35 = vpop.f32.mrf.mxu0  ;;  %v570_v62 = vmul.f32 %v1407_v41, %v1407_v41  ;;  %v535_v8 = vsel %vm505_vm0, %v1407_v41, 0.0 }
 0x143   :  { %v481_v36 = vpop.f32.mrf.mxu1  ;;  %v536_v12 = vadd.f32 %v535_v8, %v534_v1 }
 0x144   :  { %v313_v44 = vpop.f32.mrf.mxu0  ;;  %v1414_v50 = vadd.f32 %v481_v36, %v311_v35  ;;  %v605_v17 = vsel %vm505_vm0, %v570_v62, 0.0 }
 0x145   :  { %v483_v45 = vpop.f32.mrf.mxu1  ;;  %v606_v27 = vadd.f32 %v605_v17, %v604_v11 }
 0x146   :  { %v316_v53 = vpop.f32.mrf.mxu0  ;;  %v571_v10 = vmul.f32 %v1414_v50, %v1414_v50  ;;  %v537_v18 = vsel %vm505_vm0, %v1414_v50, 0.0 }
 0x147   :  { %v486_v54 = vpop.f32.mrf.mxu1  ;;  %v538_v28 = vadd.f32 %v537_v18, %v536_v12 }
 0x148   :  { %v1421_v3 = vadd.f32 %v486_v54, %v316_v53  ;;  %v318_v58 = vpop.f32.mrf.mxu0  ;;  %v607_v25 = vsel %vm505_vm0, %v571_v10, 0.0 }
 0x149   :  { %v488_v6 = vpop.f32.mrf.mxu1  ;;  %v608_v37 = vadd.f32 %v607_v25, %v606_v27 }
 0x14a   :  { %v321_v2 = vpop.f32.mrf.mxu0  ;;  %v572_v19 = vmul.f32 %v1421_v3, %v1421_v3  ;;  %v539_v26 = vsel %vm505_vm0, %v1421_v3, 0.0 }
 0x14b   :  { %v491_v14 = vpop.f32.mrf.mxu1  ;;  %v540_v38 = vadd.f32 %v539_v26, %v538_v28 }
 0x14c   :  { %v1433_v20 = vadd.f32 %v491_v14, %v321_v2  ;;  %v323_v21 = vpop.f32.mrf.mxu0  ;;  %v609_v34 = vsel %vm505_vm0, %v572_v19, 0.0 }
 0x14d   :  { %v493_v23 = vpop.f32.mrf.mxu1  ;;  %v610_v46 = vadd.f32 %v609_v34, %v608_v37 }
 0x14e   :  { %v573_v29 = vmul.f32 %v1433_v20, %v1433_v20  ;;  %v326_v30 = vpop.f32.mrf.mxu0  ;;  %v541_v35 = vsel %vm505_vm0, %v1433_v20, 0.0 }
 0x14f   :  { %v496_v33 = vpop.f32.mrf.mxu1  ;;  %v542_v47 = vadd.f32 %v541_v35, %v540_v38 }
 0x150   :  { %v1443_v36 = vadd.f32 %v496_v33, %v326_v30  ;;  %v328_v39 = vpop.f32.mrf.mxu0  ;;  %v611_v43 = vsel %vm505_vm0, %v573_v29, 0.0 }
 0x151   :  { %v498_v42 = vpop.f32.mrf.mxu1  ;;  %v612_v54 = vadd.f32 %v611_v43, %v610_v46  ;;  %v772_v39 = vld [vmem:[%s1571_s2] ss:$0 sm:$0xff] }
 0x152   :  { %v543_v44 = vsel %vm505_vm0, %v1443_v36, 0.0  ;;  %v574_v45 = vmul.f32 %v1443_v36, %v1443_v36  ;;  %v331_v49 = vpop.f32.mrf.mxu0 }
 0x153   :  { %v501_v51 = vpop.f32.mrf.mxu1  ;;  %v544_v55 = vadd.f32 %v543_v44, %v542_v47 }
 0x154   :  { %v613_v52 = vsel %vm505_vm0, %v574_v45, 0.0  ;;  %v1451_v53 = vadd.f32 %v501_v51, %v331_v49  ;;  %v333_v61 = vpop.f32.mrf.mxu0 }
 0x155   :  { %v503_v62 = vpop.f32.mrf.mxu1  ;;  %v614_v58 = vadd.f32 %v613_v52, %v612_v54 }
 0x156   :  { %v546_v5 = vsel %vm545_vm1, %v1451_v53, 0.0  ;;  %v575_v57 = vmul.f32 %v1451_v53, %v1451_v53 }
 0x157   :  { %v547_v6 = vadd.f32 %v546_v5, %v544_v55 }
 0x158   :  { %v615_v0 = vsel %vm545_vm1, %v575_v57, 0.0 }
 0x159   :  { %v548_v8 = vrot.slane %v547_v6, 4  ;;  %v616_v10 = vadd.f32 %v615_v0, %v614_v58 }
 0x15b   :  { %v549_v13 = vadd.f32 %v548_v8, %v547_v6  ;;  %v617_v1 = vrot.slane %v616_v10, 4 }
 0x15d   :  { %v550_v2 = vrot.slane %v549_v13, 2  ;;  %v618_v14 = vadd.f32 %v617_v1, %v616_v10 }
 0x15f   :  { %v551_v17 = vadd.f32 %v550_v2, %v549_v13  ;;  %v619_v18 = vrot.slane %v618_v14, 2 }
 0x161   :  { %v552_v19 = vrot.slane %v551_v17, 1  ;;  %v620_v11 = vadd.f32 %v619_v18, %v618_v14 }
 0x163   :  { %v553_v12 = vadd.f32 %v552_v19, %v551_v17  ;;  %v621_v21 = vrot.slane %v620_v11, 1 }
 0x165   :  { %v554_v23 = vmul.f32 0.0061728396, %v553_v12  ;;  %v622_v25 = vadd.f32 %v621_v21, %v620_v11  ;;  %v773_v12 = vld [vmem:[%s1572_s3] ss:$0 sm:$0xff] }
 0x167   :  { %v623_v26 = vmul.f32 0.0061728396, %v622_v25  ;;  %v624_v29 = vmul.f32 %v554_v23, %v554_v23  ;;  %v627_v30 = vsub.f32 %v1313_v60, %v554_v23  ;;  %v628_v33 = vsub.f32 %v1311_v59, %v554_v23 }
 0x168   :  { %v629_v34 = vsub.f32 %v1315_v63, %v554_v23  ;;  %v630_v35 = vsub.f32 %v1319_v4, %v554_v23  ;;  %v631_v37 = vsub.f32 %v1327_v9, %v554_v23  ;;  %v632_v38 = vsub.f32 %v1336_v16, %v554_v23 }
 0x169   :  { %v625_v27 = vsub.f32 %v623_v26, %v624_v29  ;;  %v633_v42 = vsub.f32 %v1344_v24, %v554_v23  ;;  %v634_v43 = vsub.f32 %v1351_v32, %v554_v23  ;;  %v635_v60 = vsub.f32 %v1358_v40, %v554_v23 }
 0x16a   :  { %v636_v59 = vsub.f32 %v1365_v48, %v554_v23  ;;  %v637_v63 = vsub.f32 %v1372_v56, %v554_v23  ;;  %v638_v4 = vsub.f32 %v1379_v7, %v554_v23  ;;  %v639_v9 = vsub.f32 %v1386_v15, %v554_v23 }
 0x16b   :  { %v675_v28 = vadd.f32 1e-05, %v625_v27  ;;  %v640_v16 = vsub.f32 %v1393_v22, %v554_v23  ;;  %v641_v44 = vsub.f32 %v1400_v31, %v554_v23  ;;  %v642_v45 = vsub.f32 %v1407_v41, %v554_v23 }
 0x16c   :  { %v643_v24 = vsub.f32 %v1414_v50, %v554_v23  ;;  %v644_v32 = vsub.f32 %v1421_v3, %v554_v23  ;;  %v645_v40 = vsub.f32 %v1433_v20, %v554_v23  ;;  %v646_v48 = vsub.f32 %v1443_v36, %v554_v23 }
 0x16d   :  { %775 = vrsqrt.f32 %v675_v28  ;;  %v647_v56 = vsub.f32 %v1451_v53, %v554_v23  ;;  %v654_v46 = vmul.f32 %v772_v39, %v627_v30  ;;  %v655_v7 = vmul.f32 %v772_v39, %v628_v33 }
 0x16e   :  { %v656_v47 = vmul.f32 %v772_v39, %v629_v34  ;;  %v657_v15 = vmul.f32 %v772_v39, %v630_v35  ;;  %v658_v49 = vmul.f32 %v772_v39, %v631_v37  ;;  %v659_v22 = vmul.f32 %v772_v39, %v632_v38 }
 0x16f   :  { %v660_v51 = vmul.f32 %v772_v39, %v633_v42  ;;  %v661_v31 = vmul.f32 %v772_v39, %v634_v43  ;;  %v662_v52 = vmul.f32 %v772_v39, %v635_v60  ;;  %v663_v41 = vmul.f32 %v772_v39, %v636_v59 }
 0x170   :  { %v664_v54 = vmul.f32 %v772_v39, %v637_v63  ;;  %v665_v50 = vmul.f32 %v772_v39, %v638_v4  ;;  %v666_v55 = vmul.f32 %v772_v39, %v639_v9  ;;  %v667_v3 = vmul.f32 %v772_v39, %v640_v16 }
 0x171   :  { %v668_v61 = vmul.f32 %v772_v39, %v641_v44  ;;  %v669_v20 = vmul.f32 %v772_v39, %v642_v45  ;;  %v670_v62 = vmul.f32 %v772_v39, %v643_v24  ;;  %v671_v5 = vmul.f32 %v772_v39, %v644_v32 }
 0x172   :  { %v672_v53 = vmul.f32 %v772_v39, %v645_v40  ;;  %v673_v57 = vmul.f32 %v772_v39, %v646_v48  ;;  %v674_v58 = vmul.f32 %v772_v39, %v647_v56 }
 0x17a   :  { %v776_v36 = vpop.eup %775 }
 0x17b   :  { %v677_v6 = vmul.f32 %v776_v36, %v654_v46  ;;  %v678_v0 = vmul.f32 %v776_v36, %v655_v7  ;;  %v679_v8 = vmul.f32 %v776_v36, %v656_v47  ;;  %v680_v10 = vmul.f32 %v776_v36, %v657_v15 }
 0x17c   :  { %v681_v13 = vmul.f32 %v776_v36, %v658_v49  ;;  %v682_v1 = vmul.f32 %v776_v36, %v659_v22  ;;  %v683_v2 = vmul.f32 %v776_v36, %v660_v51  ;;  %v684_v14 = vmul.f32 %v776_v36, %v661_v31 }
 0x17d   :  { %v685_v17 = vmul.f32 %v776_v36, %v662_v52  ;;  %v686_v18 = vmul.f32 %v776_v36, %v663_v41  ;;  %v687_v19 = vmul.f32 %v776_v36, %v664_v54  ;;  %v688_v11 = vmul.f32 %v776_v36, %v665_v50 }
 0x17e   :  { %v689_v21 = vmul.f32 %v776_v36, %v666_v55  ;;  %v690_v23 = vmul.f32 %v776_v36, %v667_v3  ;;  %v691_v25 = vmul.f32 %v776_v36, %v668_v61  ;;  %v692_v26 = vmul.f32 %v776_v36, %v669_v20 }
 0x17f   :  { %v693_v29 = vmul.f32 %v776_v36, %v670_v62  ;;  %v694_v27 = vmul.f32 %v776_v36, %v671_v5  ;;  %v695_v28 = vmul.f32 %v776_v36, %v672_v53  ;;  %v696_v30 = vmul.f32 %v776_v36, %v673_v57 }
 0x180   :  { %v697_v33 = vmul.f32 %v776_v36, %v674_v58  ;;  %v705_v34 = vadd.f32 %v773_v12, %v677_v6  ;;  %v706_v35 = vadd.f32 %v773_v12, %v678_v0  ;;  %v707_v37 = vadd.f32 %v773_v12, %v679_v8 }
 0x181   :  { %v708_v38 = vadd.f32 %v773_v12, %v680_v10  ;;  %v709_v39 = vadd.f32 %v773_v12, %v681_v13  ;;  %v710_v42 = vadd.f32 %v773_v12, %v682_v1  ;;  %v711_v43 = vadd.f32 %v773_v12, %v683_v2 }
 0x182   :  { %v712_v60 = vadd.f32 %v773_v12, %v684_v14  ;;  %v713_v59 = vadd.f32 %v773_v12, %v685_v17  ;;  %v714_v63 = vadd.f32 %v773_v12, %v686_v18  ;;  %v715_v4 = vadd.f32 %v773_v12, %v687_v19 }
 0x183   :  { %v716_v9 = vadd.f32 %v773_v12, %v688_v11  ;;  %v717_v16 = vadd.f32 %v773_v12, %v689_v21  ;;  %v718_v44 = vadd.f32 %v773_v12, %v690_v23  ;;  %v719_v45 = vadd.f32 %v773_v12, %v691_v25 }
 0x184   :  { %v720_v24 = vadd.f32 %v773_v12, %v692_v26  ;;  %v721_v32 = vadd.f32 %v773_v12, %v693_v29  ;;  %v722_v40 = vadd.f32 %v773_v12, %v694_v27  ;;  %v723_v48 = vadd.f32 %v773_v12, %v695_v28 }
 0x185   :  { %v724_v56 = vadd.f32 %v773_v12, %v696_v30  ;;  %v725_v46 = vadd.f32 %v773_v12, %v697_v33  ;;  %v726_v7 = vmax.f32 %v705_v34, 0.0  ;;  %v727_v47 = vmax.f32 %v706_v35, 0.0 }
 0x186   :  { %v728_v15 = vmax.f32 %v707_v37, 0.0  ;;  %v729_v49 = vmax.f32 %v708_v38, 0.0  ;;  %v730_v22 = vmax.f32 %v709_v39, 0.0  ;;  %v731_v51 = vmax.f32 %v710_v42, 0.0 }
 0x187   :  { %v732_v31 = vmax.f32 %v711_v43, 0.0  ;;  %v733_v52 = vmax.f32 %v712_v60, 0.0  ;;  %v734_v41 = vmax.f32 %v713_v59, 0.0  ;;  %v735_v54 = vmax.f32 %v714_v63, 0.0  ;;  %747 = vst.msk [vmem:[%s1573_s4] sm:$0xff] %vm505_vm0, %v726_v7  ;;  %748 = vst.msk [vmem:[%s1573_s4 + $0x8] sm:$0xff] %vm505_vm0, %v727_v47 }
 0x188   :  { %v736_v50 = vmax.f32 %v715_v4, 0.0  ;;  %v737_v55 = vmax.f32 %v716_v9, 0.0  ;;  %v738_v3 = vmax.f32 %v717_v16, 0.0  ;;  %v739_v61 = vmax.f32 %v718_v44, 0.0  ;;  %749 = vst.msk [vmem:[%s1573_s4 + $0x10] sm:$0xff] %vm505_vm0, %v728_v15  ;;  %750 = vst.msk [vmem:[%s1573_s4 + $0x18] sm:$0xff] %vm505_vm0, %v729_v49 }
 0x189   :  { %751 = vst.msk [vmem:[%s1573_s4 + $0x20] sm:$0xff] %vm505_vm0, %v730_v22  ;;  %752 = vst.msk [vmem:[%s1573_s4 + $0x28] sm:$0xff] %vm505_vm0, %v731_v51  ;;  %v740_v20 = vmax.f32 %v719_v45, 0.0  ;;  %v741_v62 = vmax.f32 %v720_v24, 0.0  ;;  %v742_v36 = vmax.f32 %v721_v32, 0.0  ;;  %v743_v5 = vmax.f32 %v722_v40, 0.0 }
 0x18a   :  { %753 = vst.msk [vmem:[%s1573_s4 + $0x30] sm:$0xff] %vm505_vm0, %v732_v31  ;;  %754 = vst.msk [vmem:[%s1573_s4 + $0x38] sm:$0xff] %vm505_vm0, %v733_v52  ;;  %v744_v53 = vmax.f32 %v723_v48, 0.0  ;;  %v745_v57 = vmax.f32 %v724_v56, 0.0  ;;  %v746_v58 = vmax.f32 %v725_v46, 0.0 }
 0x18b   :  { %755 = vst.msk [vmem:[%s1573_s4 + $0x40] sm:$0xff] %vm505_vm0, %v734_v41  ;;  %756 = vst.msk [vmem:[%s1573_s4 + $0x48] sm:$0xff] %vm505_vm0, %v735_v54 }
 0x18c   :  { %757 = vst.msk [vmem:[%s1573_s4 + $0x50] sm:$0xff] %vm505_vm0, %v736_v50  ;;  %758 = vst.msk [vmem:[%s1573_s4 + $0x58] sm:$0xff] %vm505_vm0, %v737_v55 }
 0x18d   :  { %759 = vst.msk [vmem:[%s1573_s4 + $0x60] sm:$0xff] %vm505_vm0, %v738_v3  ;;  %760 = vst.msk [vmem:[%s1573_s4 + $0x68] sm:$0xff] %vm505_vm0, %v739_v61 }
 0x18e   :  { %761 = vst.msk [vmem:[%s1573_s4 + $0x70] sm:$0xff] %vm505_vm0, %v740_v20  ;;  %762 = vst.msk [vmem:[%s1573_s4 + $0x78] sm:$0xff] %vm505_vm0, %v741_v62 }
 0x18f   :  { %763 = vst.msk [vmem:[%s1573_s4 + $0x80] sm:$0xff] %vm505_vm0, %v742_v36  ;;  %764 = vst.msk [vmem:[%s1573_s4 + $0x88] sm:$0xff] %vm505_vm0, %v743_v5 }
 0x190   :  { %765 = vst.msk [vmem:[%s1573_s4 + $0x90] sm:$0xff] %vm505_vm0, %v744_v53  ;;  %766 = vst.msk [vmem:[%s1573_s4 + $0x98] sm:$0xff] %vm505_vm0, %v745_v57 }
 0x191   :  { %767 = vst.msk [vmem:[%s1573_s4 + $0xa0] sm:$0x3] %vm545_vm1, %v746_v58 }

// kernel: ddqn4_forward.6
= control target key start
LH: loop header
LB: loop body
LE: loop exit
PB: predicated region body
PF: predicated region fallthrough
CT: control target
= control target key end

     0   :  { %vm1016_vm0 = vmmov 0   ;;  %vm154_vm1 = vcmask 523264   ;;  %vm607_vm2 = vcmask 517120   ;;  %s1757_s1 = inlined_call_operand.vmem [shape: f32[576,64], index: 1, kind: input, shape index: {}]   ;;  %s1758_s0 = inlined_call_operand.vmem [shape: f32[98,576], index: 0, kind: input, shape index: {}]   ;;  %s1759_s2 = inlined_call_operand.vmem [shape: f32[1,64], index: 2, kind: input, shape index: {}]   ;;  %s1760_s3 = inlined_call_operand.vmem [shape: f32[1,64], index: 3, kind: input, shape index: {}]   ;;  %s1761_s4 = inlined_call_operand.vmem [shape: f32[98,64], index: 4, kind: output, shape index: {}]  }
   0x1   :  { %v113_v0 = vld [vmem:[%s1757_s1 + $0xf8] sm:$0xff]  ;;  %v112_v4 = vld [vmem:[%s1757_s1 + $0xf0] sm:$0xff]  ;;  %v111_v8 = vld [vmem:[%s1757_s1 + $0xe8] sm:$0xff] }
   0x2   :  { %v145_v1 = vld [vmem:[%s1757_s1 + $0x1f8] sm:$0xff]  ;;  %777 = vmatprep.subr.mxu0 %v113_v0  ;;  %v144_v5 = vld [vmem:[%s1757_s1 + $0x1f0] sm:$0xff]  ;;  %v143_v9 = vld [vmem:[%s1757_s1 + $0x1e8] sm:$0xff] }
   0x3   :  { %v97_v2 = vld [vmem:[%s1757_s1 + $0x78] sm:$0xff]  ;;  %848 = vmatprep.subr.mxu1 %v145_v1  ;;  %v96_v6 = vld [vmem:[%s1757_s1 + $0x70] sm:$0xff]  ;;  %v95_v10 = vld [vmem:[%s1757_s1 + $0x68] sm:$0xff] }
   0x4   :  { %v129_v3 = vld [vmem:[%s1757_s1 + $0x178] sm:$0xff]  ;;  %778 = vmatpush3.msra.mxu0 %v97_v2  ;;  %v128_v7 = vld [vmem:[%s1757_s1 + $0x170] sm:$0xff]  ;;  %v127_v11 = vld [vmem:[%s1757_s1 + $0x168] sm:$0xff] }
   0x5   :  { %849 = vmatpush3.msra.mxu1 %v129_v3  ;;  %779 = vmatprep.subr.mxu0 %v112_v4  ;;  %v110_v12 = vld [vmem:[%s1757_s1 + $0xe0] sm:$0xff]  ;;  %v109_v16 = vld [vmem:[%s1757_s1 + $0xd8] sm:$0xff]  ;;  %v108_v20 = vld [vmem:[%s1757_s1 + $0xd0] sm:$0xff] }
   0x6   :  { %850 = vmatprep.subr.mxu1 %v144_v5  ;;  %780 = vmatpush3.msra.mxu0 %v96_v6  ;;  %v142_v13 = vld [vmem:[%s1757_s1 + $0x1e0] sm:$0xff]  ;;  %v141_v17 = vld [vmem:[%s1757_s1 + $0x1d8] sm:$0xff]  ;;  %v140_v21 = vld [vmem:[%s1757_s1 + $0x1d0] sm:$0xff] }
   0x7   :  { %851 = vmatpush3.msra.mxu1 %v128_v7  ;;  %781 = vmatprep.subr.mxu0 %v111_v8  ;;  %v94_v14 = vld [vmem:[%s1757_s1 + $0x60] sm:$0xff]  ;;  %v93_v18 = vld [vmem:[%s1757_s1 + $0x58] sm:$0xff]  ;;  %v92_v22 = vld [vmem:[%s1757_s1 + $0x50] sm:$0xff]  ;;  %v1015_v7 = vmov 0.0  }
   0x8   :  { %852 = vmatprep.subr.mxu1 %v143_v9  ;;  %v126_v15 = vld [vmem:[%s1757_s1 + $0x160] sm:$0xff]  ;;  %782 = vmatpush3.msra.mxu0 %v95_v10  ;;  %v125_v19 = vld [vmem:[%s1757_s1 + $0x158] sm:$0xff]  ;;  %v124_v23 = vld [vmem:[%s1757_s1 + $0x150] sm:$0xff] }
   0x9   :  { %853 = vmatpush3.msra.mxu1 %v127_v11  ;;  %783 = vmatprep.subr.mxu0 %v110_v12  ;;  %v107_v24 = vld [vmem:[%s1757_s1 + $0xc8] sm:$0xff]  ;;  %v106_v28 = vld [vmem:[%s1757_s1 + $0xc0] sm:$0xff]  ;;  %v105_v32 = vld [vmem:[%s1757_s1 + $0xb8] sm:$0xff] }
   0xa   :  { %854 = vmatprep.subr.mxu1 %v142_v13  ;;  %784 = vmatpush3.msra.mxu0 %v94_v14  ;;  %v139_v25 = vld [vmem:[%s1757_s1 + $0x1c8] sm:$0xff]  ;;  %v138_v29 = vld [vmem:[%s1757_s1 + $0x1c0] sm:$0xff]  ;;  %v137_v33 = vld [vmem:[%s1757_s1 + $0x1b8] sm:$0xff] }
   0xb   :  { %855 = vmatpush3.msra.mxu1 %v126_v15  ;;  %785 = vmatprep.subr.mxu0 %v109_v16  ;;  %v91_v26 = vld [vmem:[%s1757_s1 + $0x48] sm:$0xff]  ;;  %v90_v30 = vld [vmem:[%s1757_s1 + $0x40] sm:$0xff]  ;;  %v89_v34 = vld [vmem:[%s1757_s1 + $0x38] sm:$0xff] }
   0xc   :  { %856 = vmatprep.subr.mxu1 %v141_v17  ;;  %786 = vmatpush3.msra.mxu0 %v93_v18  ;;  %v123_v27 = vld [vmem:[%s1757_s1 + $0x148] sm:$0xff]  ;;  %v122_v31 = vld [vmem:[%s1757_s1 + $0x140] sm:$0xff]  ;;  %v121_v35 = vld [vmem:[%s1757_s1 + $0x138] sm:$0xff] }
   0xd   :  { %857 = vmatpush3.msra.mxu1 %v125_v19  ;;  %787 = vmatprep.subr.mxu0 %v108_v20  ;;  %v104_v36 = vld [vmem:[%s1757_s1 + $0xb0] sm:$0xff]  ;;  %v103_v40 = vld [vmem:[%s1757_s1 + $0xa8] sm:$0xff]  ;;  %v102_v44 = vld [vmem:[%s1757_s1 + $0xa0] sm:$0xff] }
   0xe   :  { %858 = vmatprep.subr.mxu1 %v140_v21  ;;  %788 = vmatpush3.msra.mxu0 %v92_v22  ;;  %v136_v37 = vld [vmem:[%s1757_s1 + $0x1b0] sm:$0xff]  ;;  %v135_v41 = vld [vmem:[%s1757_s1 + $0x1a8] sm:$0xff]  ;;  %v134_v45 = vld [vmem:[%s1757_s1 + $0x1a0] sm:$0xff] }
   0xf   :  { %859 = vmatpush3.msra.mxu1 %v124_v23  ;;  %789 = vmatprep.subr.mxu0 %v107_v24  ;;  %v88_v38 = vld [vmem:[%s1757_s1 + $0x30] sm:$0xff]  ;;  %v87_v42 = vld [vmem:[%s1757_s1 + $0x28] sm:$0xff]  ;;  %v86_v46 = vld [vmem:[%s1757_s1 + $0x20] sm:$0xff] }
  0x10   :  { %860 = vmatprep.subr.mxu1 %v139_v25  ;;  %790 = vmatpush3.msra.mxu0 %v91_v26  ;;  %v120_v39 = vld [vmem:[%s1757_s1 + $0x130] sm:$0xff]  ;;  %v119_v43 = vld [vmem:[%s1757_s1 + $0x128] sm:$0xff]  ;;  %v118_v47 = vld [vmem:[%s1757_s1 + $0x120] sm:$0xff] }
  0x11   :  { %861 = vmatpush3.msra.mxu1 %v123_v27  ;;  %791 = vmatprep.subr.mxu0 %v106_v28  ;;  %v101_v48 = vld [vmem:[%s1757_s1 + $0x98] sm:$0xff]  ;;  %v100_v52 = vld [vmem:[%s1757_s1 + $0x90] sm:$0xff]  ;;  %v99_v56 = vld [vmem:[%s1757_s1 + $0x88] sm:$0xff] }
  0x12   :  { %862 = vmatprep.subr.mxu1 %v138_v29  ;;  %792 = vmatpush3.msra.mxu0 %v90_v30  ;;  %v133_v49 = vld [vmem:[%s1757_s1 + $0x198] sm:$0xff]  ;;  %v132_v53 = vld [vmem:[%s1757_s1 + $0x190] sm:$0xff]  ;;  %v131_v57 = vld [vmem:[%s1757_s1 + $0x188] sm:$0xff] }
  0x13   :  { %863 = vmatpush3.msra.mxu1 %v122_v31  ;;  %793 = vmatprep.subr.mxu0 %v105_v32  ;;  %v85_v50 = vld [vmem:[%s1757_s1 + $0x18] sm:$0xff]  ;;  %v84_v54 = vld [vmem:[%s1757_s1 + $0x10] sm:$0xff]  ;;  %v83_v58 = vld [vmem:[%s1757_s1 + $0x8] sm:$0xff] }
  0x14   :  { %864 = vmatprep.subr.mxu1 %v137_v33  ;;  %794 = vmatpush3.msra.mxu0 %v89_v34  ;;  %v117_v51 = vld [vmem:[%s1757_s1 + $0x118] sm:$0xff]  ;;  %v116_v55 = vld [vmem:[%s1757_s1 + $0x110] sm:$0xff]  ;;  %v115_v59 = vld [vmem:[%s1757_s1 + $0x108] sm:$0xff] }
  0x15   :  { %865 = vmatpush3.msra.mxu1 %v121_v35  ;;  %795 = vmatprep.subr.mxu0 %v104_v36  ;;  %v98_v60 = vld [vmem:[%s1757_s1 + $0x80] sm:$0xff]  ;;  %v18_v63 = vld [vmem:[%s1758_s0 + $0x8] sm:$0xff]  ;;  %v20_v1 = vld [vmem:[%s1758_s0 + $0x18] sm:$0xff] }
  0x16   :  { %866 = vmatprep.subr.mxu1 %v136_v37  ;;  %796 = vmatpush3.msra.mxu0 %v88_v38  ;;  %v130_v61 = vld [vmem:[%s1757_s1 + $0x180] sm:$0xff]  ;;  %v19_v3 = vld [vmem:[%s1758_s0 + $0x10] sm:$0xff]  ;;  %v153_v5 = vld [vmem:[%s1757_s1 + $0x238] sm:$0xff] }
  0x17   :  { %867 = vmatpush3.msra.mxu1 %v120_v39  ;;  %797 = vmatprep.subr.mxu0 %v103_v40  ;;  %v82_v62 = vld [vmem:[%s1757_s1] sm:$0xff]  ;;  %v23_v4 = vld [vmem:[%s1758_s0 + $0x30] sm:$0xff]  ;;  %v22_v8 = vld [vmem:[%s1758_s0 + $0x28] sm:$0xff] }
  0x18   :  { %868 = vmatprep.subr.mxu1 %v135_v41  ;;  %798 = vmatpush3.msra.mxu0 %v87_v42  ;;  %v114_v0 = vld [vmem:[%s1757_s1 + $0x100] sm:$0xff]  ;;  %v24_v9 = vld [vmem:[%s1758_s0 + $0x38] sm:$0xff]  ;;  %v30_v11 = vld [vmem:[%s1758_s0 + $0x68] sm:$0xff] }
  0x19   :  { %869 = vmatpush3.msra.mxu1 %v119_v43  ;;  %799 = vmatprep.subr.mxu0 %v102_v44  ;;  %v17_v2 = vld [vmem:[%s1758_s0] sm:$0xff]  ;;  %v28_v10 = vld [vmem:[%s1758_s0 + $0x58] sm:$0xff]  ;;  %v152_v12 = vld [vmem:[%s1757_s1 + $0x230] sm:$0xff] }
  0x1a   :  { %870 = vmatprep.subr.mxu1 %v134_v45  ;;  %800 = vmatpush3.msra.mxu0 %v86_v46  ;;  %v25_v6 = vld [vmem:[%s1758_s0 + $0x40] sm:$0xff]  ;;  %v27_v13 = vld [vmem:[%s1758_s0 + $0x50] sm:$0xff]  ;;  %v151_v17 = vld [vmem:[%s1757_s1 + $0x228] sm:$0xff] }
  0x1b   :  { %871 = vmatpush3.msra.mxu1 %v118_v47  ;;  %801 = vmatprep.subr.mxu0 %v101_v48  ;;  %v29_v14 = vld [vmem:[%s1758_s0 + $0x60] sm:$0xff]  ;;  %v35_v16 = vld [vmem:[%s1758_s0 + $0x90] sm:$0xff]  ;;  %v32_v18 = vld [vmem:[%s1758_s0 + $0x78] sm:$0xff] }
  0x1c   :  { %872 = vmatprep.subr.mxu1 %v133_v49  ;;  %802 = vmatpush3.msra.mxu0 %v85_v50  ;;  %v33_v15 = vld [vmem:[%s1758_s0 + $0x80] sm:$0xff]  ;;  %v34_v19 = vld [vmem:[%s1758_s0 + $0x88] sm:$0xff]  ;;  %v40_v21 = vld [vmem:[%s1758_s0 + $0xb8] sm:$0xff] }
  0x1d   :  { %873 = vmatpush3.msra.mxu1 %v117_v51  ;;  %803 = vmatprep.subr.mxu0 %v100_v52  ;;  %v38_v20 = vld [vmem:[%s1758_s0 + $0xa8] sm:$0xff]  ;;  %v150_v22 = vld [vmem:[%s1757_s1 + $0x220] sm:$0xff]  ;;  %v39_v24 = vld [vmem:[%s1758_s0 + $0xb0] sm:$0xff] }
  0x1e   :  { %874 = vmatprep.subr.mxu1 %v132_v53  ;;  %804 = vmatpush3.msra.mxu0 %v84_v54  ;;  %v37_v23 = vld [vmem:[%s1758_s0 + $0xa0] sm:$0xff]  ;;  %v43_v25 = vld [vmem:[%s1758_s0 + $0xd0] sm:$0xff]  ;;  %v149_v27 = vld [vmem:[%s1757_s1 + $0x218] sm:$0xff] }
  0x1f   :  { %875 = vmatpush3.msra.mxu1 %v116_v55  ;;  %805 = vmatprep.subr.mxu0 %v99_v56  ;;  %v45_v26 = vld [vmem:[%s1758_s0 + $0xe0] sm:$0xff]  ;;  %v42_v28 = vld [vmem:[%s1758_s0 + $0xc8] sm:$0xff]  ;;  %v44_v29 = vld [vmem:[%s1758_s0 + $0xd8] sm:$0xff] }
  0x20   :  { %876 = vmatprep.subr.mxu1 %v131_v57  ;;  %806 = vmatpush3.msra.mxu0 %v83_v58  ;;  %v48_v30 = vld [vmem:[%s1758_s0 + $0xf8] sm:$0xff]  ;;  %v50_v31 = vld [vmem:[%s1758_s0 + $0x108] sm:$0xff]  ;;  %v148_v32 = vld [vmem:[%s1757_s1 + $0x210] sm:$0xff] }
  0x21   :  { %877 = vmatpush3.msra.mxu1 %v115_v59  ;;  %807 = vmatprep.subr.mxu0 %v98_v60  ;;  %v47_v33 = vld [vmem:[%s1758_s0 + $0xf0] sm:$0xff]  ;;  %v49_v34 = vld [vmem:[%s1758_s0 + $0x100] sm:$0xff]  ;;  %v147_v37 = vld [vmem:[%s1757_s1 + $0x208] sm:$0xff] }
  0x22   :  { %878 = vmatprep.subr.mxu1 %v130_v61  ;;  %808 = vmatpush3.msra.mxu0 %v82_v62  ;;  %v53_v35 = vld [vmem:[%s1758_s0 + $0x120] sm:$0xff]  ;;  %v55_v36 = vld [vmem:[%s1758_s0 + $0x130] sm:$0xff]  ;;  %v52_v38 = vld [vmem:[%s1758_s0 + $0x118] sm:$0xff] }
  0x23   :  { %258 = vmatprep.mubr.f32.mxu0 %v18_v63  ;;  %879 = vmatpush3.msra.mxu1 %v114_v0  ;;  %v54_v39 = vld [vmem:[%s1758_s0 + $0x128] sm:$0xff]  ;;  %v60_v41 = vld [vmem:[%s1758_s0 + $0x158] sm:$0xff]  ;;  %v146_v42 = vld [vmem:[%s1757_s1 + $0x200] sm:$0xff] }
  0x24   :  { %388 = vmatprep.mubr.f32.mxu1 %v20_v1  ;;  %259 = vmatmul.mubr.f32.vlgmr.msra.gmra.mxu0 %v17_v2  ;;  %v58_v40 = vld [vmem:[%s1758_s0 + $0x148] sm:$0xff]  ;;  %v57_v43 = vld [vmem:[%s1758_s0 + $0x140] sm:$0xff]  ;;  %v59_v44 = vld [vmem:[%s1758_s0 + $0x150] sm:$0xff] }
  0x25   :  { %389 = vmatmul.mubr.f32.vlgmr.msra.gmra.mxu1 %v19_v3  ;;  %940 = vmatprep.subr.mxu0 %v1015_v7  ;;  %v63_v45 = vld [vmem:[%s1758_s0 + $0x170] sm:$0xff]  ;;  %v65_v46 = vld [vmem:[%s1758_s0 + $0x180] sm:$0xff]  ;;  %v62_v47 = vld [vmem:[%s1758_s0 + $0x168] sm:$0xff] }
  0x26   :  { %263 = vmatprep.mubr.f32.mxu0 %v23_v4  ;;  %941 = vmatpush3.msra.mxu0 %v153_v5  ;;  %v64_v48 = vld [vmem:[%s1758_s0 + $0x178] sm:$0xff]  ;;  %v70_v50 = vld [vmem:[%s1758_s0 + $0x1a8] sm:$0xff]  ;;  %v67_v51 = vld [vmem:[%s1758_s0 + $0x190] sm:$0xff] }
  0x27   :  { %393 = vmatprep.mubr.f32.mxu1 %v25_v6  ;;  %942 = vmatprep.subr.mxu0 %v1015_v7  ;;  %v68_v49 = vld [vmem:[%s1758_s0 + $0x198] sm:$0xff]  ;;  %v69_v52 = vld [vmem:[%s1758_s0 + $0x1a0] sm:$0xff]  ;;  %v75_v54 = vld [vmem:[%s1758_s0 + $0x1d0] sm:$0xff] }
  0x28   :  { %995 = vmatprep.subr.mxu1 %v1015_v7  ;;  %264 = vmatmul.mubr.f32.gmra.mxu0 %v22_v8  ;;  %v73_v53 = vld [vmem:[%s1758_s0 + $0x1c0] sm:$0xff]  ;;  %v72_v55 = vld [vmem:[%s1758_s0 + $0x1b8] sm:$0xff]  ;;  %v74_v56 = vld [vmem:[%s1758_s0 + $0x1c8] sm:$0xff] }
  0x29   :  { %394 = vmatmul.mubr.f32.gmra.mxu1 %v24_v9  ;;  %268 = vmatprep.mubr.f32.mxu0 %v28_v10  ;;  %v78_v57 = vld [vmem:[%s1758_s0 + $0x1e8] sm:$0x3]  ;;  %v80_v58 = vld [vmem:[%s1758_s0 + $0x1f8] sm:$0x3]  ;;  %v77_v59 = vld [vmem:[%s1758_s0 + $0x1e0] sm:$0x3] }
  0x2a   :  { %398 = vmatprep.mubr.f32.mxu1 %v30_v11  ;;  %943 = vmatpush3.msra.mxu0 %v152_v12  ;;  %v79_v60 = vld [vmem:[%s1758_s0 + $0x1f0] sm:$0x3]  ;;  %v21_v61 = vld [vmem:[%s1758_s0 + $0x20] sm:$0xff]  ;;  %v56_v62 = vld [vmem:[%s1758_s0 + $0x138] sm:$0xff] }
  0x2b   :  { %1003 = vmatpush3.msra.mxu1 %v153_v5  ;;  %944 = vmatprep.subr.mxu0 %v1015_v7  ;;  %v26_v63 = vld [vmem:[%s1758_s0 + $0x48] sm:$0xff]  ;;  %v61_v0 = vld [vmem:[%s1758_s0 + $0x160] sm:$0xff]  ;;  %v31_v1 = vld [vmem:[%s1758_s0 + $0x70] sm:$0xff] }
  0x2c   :  { %996 = vmatprep.subr.mxu1 %v1015_v7  ;;  %269 = vmatmul.mubr.f32.gmra.mxu0 %v27_v13  ;;  %v66_v2 = vld [vmem:[%s1758_s0 + $0x188] sm:$0xff]  ;;  %v36_v3 = vld [vmem:[%s1758_s0 + $0x98] sm:$0xff]  ;;  %v71_v4 = vld [vmem:[%s1758_s0 + $0x1b0] sm:$0xff] }
  0x2d   :  { %399 = vmatmul.mubr.f32.gmra.mxu1 %v29_v14  ;;  %273 = vmatprep.mubr.f32.mxu0 %v33_v15  ;;  %v41_v5 = vld [vmem:[%s1758_s0 + $0xc0] sm:$0xff]  ;;  %v76_v6 = vld [vmem:[%s1758_s0 + $0x1d8] sm:$0xff]  ;;  %v46_v8 = vld [vmem:[%s1758_s0 + $0xe8] sm:$0xff] }
  0x2e   :  { %403 = vmatprep.mubr.f32.mxu1 %v35_v16  ;;  %945 = vmatpush3.msra.mxu0 %v151_v17  ;;  %v81_v9 = vld [vmem:[%s1758_s0 + $0x200] sm:$0x3]  ;;  %v51_v10 = vld [vmem:[%s1758_s0 + $0x110] sm:$0xff] }
  0x2f   :  { %1004 = vmatpush3.msra.mxu1 %v152_v12  ;;  %946 = vmatprep.subr.mxu0 %v1015_v7 }
  0x30   :  { %997 = vmatprep.subr.mxu1 %v1015_v7  ;;  %274 = vmatmul.mubr.f32.gmra.mxu0 %v32_v18 }
  0x31   :  { %404 = vmatmul.mubr.f32.gmra.mxu1 %v34_v19  ;;  %278 = vmatprep.mubr.f32.mxu0 %v38_v20 }
  0x32   :  { %408 = vmatprep.mubr.f32.mxu1 %v40_v21  ;;  %947 = vmatpush3.msra.mxu0 %v150_v22 }
  0x33   :  { %1005 = vmatpush3.msra.mxu1 %v151_v17  ;;  %948 = vmatprep.subr.mxu0 %v1015_v7 }
  0x34   :  { %998 = vmatprep.subr.mxu1 %v1015_v7  ;;  %279 = vmatmul.mubr.f32.gmra.mxu0 %v37_v23 }
  0x35   :  { %409 = vmatmul.mubr.f32.gmra.mxu1 %v39_v24  ;;  %283 = vmatprep.mubr.f32.mxu0 %v43_v25 }
  0x36   :  { %413 = vmatprep.mubr.f32.mxu1 %v45_v26  ;;  %949 = vmatpush3.msra.mxu0 %v149_v27 }
  0x37   :  { %1006 = vmatpush3.msra.mxu1 %v150_v22  ;;  %950 = vmatprep.subr.mxu0 %v1015_v7 }
  0x38   :  { %999 = vmatprep.subr.mxu1 %v1015_v7  ;;  %284 = vmatmul.mubr.f32.gmra.mxu0 %v42_v28 }
  0x39   :  { %414 = vmatmul.mubr.f32.gmra.mxu1 %v44_v29  ;;  %288 = vmatprep.mubr.f32.mxu0 %v48_v30 }
  0x3a   :  { %418 = vmatprep.mubr.f32.mxu1 %v50_v31  ;;  %951 = vmatpush3.msra.mxu0 %v148_v32 }
  0x3b   :  { %1007 = vmatpush3.msra.mxu1 %v149_v27  ;;  %952 = vmatprep.subr.mxu0 %v1015_v7 }
  0x3c   :  { %1000 = vmatprep.subr.mxu1 %v1015_v7  ;;  %289 = vmatmul.mubr.f32.gmra.mxu0 %v47_v33 }
  0x3d   :  { %419 = vmatmul.mubr.f32.gmra.mxu1 %v49_v34  ;;  %293 = vmatprep.mubr.f32.mxu0 %v53_v35 }
  0x3e   :  { %423 = vmatprep.mubr.f32.mxu1 %v55_v36  ;;  %953 = vmatpush3.msra.mxu0 %v147_v37 }
  0x3f   :  { %1008 = vmatpush3.msra.mxu1 %v148_v32  ;;  %954 = vmatprep.subr.mxu0 %v1015_v7 }
  0x40   :  { %1001 = vmatprep.subr.mxu1 %v1015_v7  ;;  %294 = vmatmul.mubr.f32.gmra.mxu0 %v52_v38 }
  0x41   :  { %424 = vmatmul.mubr.f32.gmra.mxu1 %v54_v39  ;;  %298 = vmatprep.mubr.f32.mxu0 %v58_v40 }
  0x42   :  { %428 = vmatprep.mubr.f32.mxu1 %v60_v41  ;;  %955 = vmatpush3.msra.mxu0 %v146_v42 }
  0x43   :  { %1009 = vmatpush3.msra.mxu1 %v147_v37 }
  0x44   :  { %1002 = vmatprep.subr.mxu1 %v1015_v7  ;;  %299 = vmatmul.mubr.f32.gmra.mxu0 %v57_v43 }
  0x45   :  { %429 = vmatmul.mubr.f32.gmra.mxu1 %v59_v44  ;;  %303 = vmatprep.mubr.f32.mxu0 %v63_v45 }
  0x46   :  { %433 = vmatprep.mubr.f32.mxu1 %v65_v46  ;;  %1010 = vmatpush3.msra.mxu1 %v146_v42 }
  0x48   :  { %304 = vmatmul.mubr.f32.gmra.mxu0 %v62_v47 }
  0x49   :  { %434 = vmatmul.mubr.f32.gmra.mxu1 %v64_v48  ;;  %308 = vmatprep.mubr.f32.mxu0 %v68_v49 }
  0x4a   :  { %438 = vmatprep.mubr.f32.mxu1 %v70_v50 }
  0x4c   :  { %309 = vmatmul.mubr.f32.gmra.mxu0 %v67_v51 }
  0x4d   :  { %439 = vmatmul.mubr.f32.gmra.mxu1 %v69_v52  ;;  %313 = vmatprep.mubr.f32.mxu0 %v73_v53 }
  0x4e   :  { %443 = vmatprep.mubr.f32.mxu1 %v75_v54 }
  0x50   :  { %314 = vmatmul.mubr.f32.gmra.mxu0 %v72_v55 }
  0x51   :  { %444 = vmatmul.mubr.f32.gmra.mxu1 %v74_v56  ;;  %318 = vmatprep.mubr.f32.mxu0 %v78_v57 }
  0x52   :  { %448 = vmatprep.mubr.f32.mxu1 %v80_v58 }
  0x54   :  { %319 = vmatmul.mubr.f32.gmra.mxu0 %v77_v59 }
  0x55   :  { %449 = vmatmul.mubr.f32.gmra.mxu1 %v79_v60  ;;  %956 = vmatprep.mubr.msk.f32.mxu0 %vm1016_vm0, %v1015_v7 }
  0x56   :  { %977 = vmatprep.mubr.msk.f32.mxu1 %vm1016_vm0, %v1015_v7 }
  0x58   :  { %957 = vmatmul.mubr.msk.f32.vlgmr.msra.gmra.mxu0 %vm154_vm1, %v21_v61 }
  0x59   :  { %978 = vmatmul.mubr.msk.f32.vlgmr.msra.gmra.mxu1 %vm154_vm1, %v56_v62  ;;  %959 = vmatprep.mubr.msk.f32.mxu0 %vm1016_vm0, %v1015_v7 }
  0x5a   :  { %980 = vmatprep.mubr.msk.f32.mxu1 %vm1016_vm0, %v1015_v7 }
  0x5c   :  { %960 = vmatmul.mubr.msk.f32.gmra.mxu0 %vm154_vm1, %v26_v63 }
  0x5d   :  { %981 = vmatmul.mubr.msk.f32.gmra.mxu1 %vm154_vm1, %v61_v0  ;;  %962 = vmatprep.mubr.msk.f32.mxu0 %vm1016_vm0, %v1015_v7 }
  0x5e   :  { %983 = vmatprep.mubr.msk.f32.mxu1 %vm1016_vm0, %v1015_v7 }
  0x60   :  { %963 = vmatmul.mubr.msk.f32.gmra.mxu0 %vm154_vm1, %v31_v1 }
  0x61   :  { %984 = vmatmul.mubr.msk.f32.gmra.mxu1 %vm154_vm1, %v66_v2  ;;  %965 = vmatprep.mubr.msk.f32.mxu0 %vm1016_vm0, %v1015_v7 }
  0x62   :  { %986 = vmatprep.mubr.msk.f32.mxu1 %vm1016_vm0, %v1015_v7 }
  0x64   :  { %966 = vmatmul.mubr.msk.f32.gmra.mxu0 %vm154_vm1, %v36_v3 }
  0x65   :  { %987 = vmatmul.mubr.msk.f32.gmra.mxu1 %vm154_vm1, %v71_v4  ;;  %968 = vmatprep.mubr.msk.f32.mxu0 %vm1016_vm0, %v1015_v7 }
  0x66   :  { %989 = vmatprep.mubr.msk.f32.mxu1 %vm1016_vm0, %v1015_v7 }
  0x68   :  { %969 = vmatmul.mubr.msk.f32.gmra.mxu0 %vm154_vm1, %v41_v5 }
  0x69   :  { %990 = vmatmul.mubr.msk.f32.gmra.mxu1 %vm154_vm1, %v76_v6  ;;  %971 = vmatprep.mubr.msk.f32.mxu0 %vm1016_vm0, %v1015_v7 }
  0x6a   :  { %992 = vmatprep.mubr.msk.f32.mxu1 %vm1016_vm0, %v1015_v7 }
  0x6c   :  { %972 = vmatmul.mubr.msk.f32.gmra.mxu0 %vm154_vm1, %v46_v8 }
  0x6d   :  { %993 = vmatmul.mubr.msk.f32.gmra.mxu1 %vm154_vm1, %v81_v9  ;;  %974 = vmatprep.mubr.msk.f32.mxu0 %vm1016_vm0, %v1015_v7 }
  0x70   :  { %975 = vmatmul.mubr.msk.f32.gmra.mxu0 %vm154_vm1, %v51_v10 }
  0xe4   :  { %v809_v11 = vpop.f32.mrf.mxu0 }
  0xe5   :  { %v880_v12 = vpop.f32.mrf.mxu1 }
  0xe6   :  { %v810_v13 = vpop.f32.mrf.mxu0 }
  0xe7   :  { %v881_v14 = vpop.f32.mrf.mxu1  ;;  %v811_v15 = vadd.f32 %v810_v13, %v809_v11 }
  0xe8   :  { %v882_v16 = vadd.f32 %v881_v14, %v880_v12  ;;  %v812_v17 = vpop.f32.mrf.mxu0 }
  0xe9   :  { %v883_v18 = vpop.f32.mrf.mxu1 }
  0xea   :  { %v1508_v19 = vadd.f32 %v882_v16, %v811_v15  ;;  %v813_v20 = vpop.f32.mrf.mxu0 }
  0xeb   :  { %v884_v21 = vpop.f32.mrf.mxu1  ;;  %v814_v5 = vadd.f32 %v813_v20, %v812_v17 }
  0xec   :  { %v815_v22 = vpop.f32.mrf.mxu0  ;;  %v885_v6 = vadd.f32 %v884_v21, %v883_v18 }
  0xed   :  { %v886_v7 = vpop.f32.mrf.mxu1 }
  0xee   :  { %v816_v23 = vpop.f32.mrf.mxu0  ;;  %v396_v16 = vadd.f32 %v885_v6, %v814_v5 }
  0xef   :  { %v887_v24 = vpop.f32.mrf.mxu1  ;;  %v817_v10 = vadd.f32 %v816_v23, %v815_v22 }
  0xf0   :  { %v818_v25 = vpop.f32.mrf.mxu0  ;;  %v888_v11 = vadd.f32 %v887_v24, %v886_v7 }
  0xf1   :  { %v889_v26 = vpop.f32.mrf.mxu1 }
  0xf2   :  { %v819_v27 = vpop.f32.mrf.mxu0 }
  0xf3   :  { %v890_v28 = vpop.f32.mrf.mxu1  ;;  %v820_v12 = vadd.f32 %v819_v27, %v818_v25 }
  0xf4   :  { %v821_v29 = vpop.f32.mrf.mxu0  ;;  %v891_v13 = vadd.f32 %v890_v28, %v889_v26 }
  0xf5   :  { %v892_v30 = vpop.f32.mrf.mxu1 }
  0xf6   :  { %v822_v31 = vpop.f32.mrf.mxu0 }
  0xf7   :  { %v893_v32 = vpop.f32.mrf.mxu1 }
  0xf8   :  { %v824_v33 = vpop.f32.mrf.mxu0  ;;  %v894_v17 = vadd.f32 %v893_v32, %v892_v30 }
  0xf9   :  { %v895_v34 = vpop.f32.mrf.mxu1 }
  0xfa   :  { %v825_v35 = vpop.f32.mrf.mxu0 }
  0xfb   :  { %v896_v36 = vpop.f32.mrf.mxu1  ;;  %v826_v18 = vadd.f32 %v825_v35, %v824_v33 }
  0xfc   :  { %v827_v37 = vpop.f32.mrf.mxu0  ;;  %v897_v20 = vadd.f32 %v896_v36, %v895_v34 }
  0xfd   :  { %v898_v38 = vpop.f32.mrf.mxu1 }
  0xfe   :  { %v828_v39 = vpop.f32.mrf.mxu0  ;;  %v416_v32 = vadd.f32 %v897_v20, %v826_v18 }
  0xff   :  { %v899_v40 = vpop.f32.mrf.mxu1  ;;  %v829_v22 = vadd.f32 %v828_v39, %v827_v37 }
 0x100   :  { %v1510_v41 = vpop.f32.mrf.mxu0  ;;  %v900_v7 = vadd.f32 %v899_v40, %v898_v38 }
 0x101   :  { %v1512_v42 = vpop.f32.mrf.mxu1 }
 0x102   :  { %v1514_v43 = vpop.f32.mrf.mxu0  ;;  %v421_v35 = vadd.f32 %v900_v7, %v829_v22 }
 0x103   :  { %v1516_v44 = vpop.f32.mrf.mxu1  ;;  %v832_v36 = vadd.f32 %v1514_v43, %v1510_v41 }
 0x104   :  { %v1518_v45 = vpop.f32.mrf.mxu0  ;;  %v903_v37 = vadd.f32 %v1516_v44, %v1512_v42 }
 0x105   :  { %v1520_v46 = vpop.f32.mrf.mxu1 }
 0x106   :  { %v834_v47 = vpop.f32.mrf.mxu0 }
 0x107   :  { %v1522_v48 = vpop.f32.mrf.mxu1  ;;  %v835_v38 = vadd.f32 %v834_v47, %v1518_v45 }
 0x108   :  { %v1524_v49 = vpop.f32.mrf.mxu0  ;;  %v906_v42 = vadd.f32 %v1522_v48, %v1520_v46  ;;  %v426_v48 = vadd.f32 %v903_v37, %v832_v36 }
 0x109   :  { %v1526_v50 = vpop.f32.mrf.mxu1 }
 0x10a   :  { %v1528_v51 = vpop.f32.mrf.mxu0 }
 0x10b   :  { %v1530_v52 = vpop.f32.mrf.mxu1  ;;  %v838_v43 = vadd.f32 %v1528_v51, %v1524_v49 }
 0x10c   :  { %v1532_v53 = vpop.f32.mrf.mxu0  ;;  %v909_v44 = vadd.f32 %v1530_v52, %v1526_v50 }
 0x10d   :  { %v1534_v54 = vpop.f32.mrf.mxu1 }
 0x10e   :  { %v1536_v55 = vpop.f32.mrf.mxu0 }
 0x10f   :  { %v1538_v56 = vpop.f32.mrf.mxu1  ;;  %v841_v46 = vadd.f32 %v1536_v55, %v1532_v53 }
 0x110   :  { %v1540_v57 = vpop.f32.mrf.mxu0 }
 0x111   :  { %v1542_v58 = vpop.f32.mrf.mxu1 }
 0x112   :  { %v1544_v59 = vpop.f32.mrf.mxu0 }
 0x113   :  { %v1546_v60 = vpop.f32.mrf.mxu1 }
 0x114   :  { %v1548_v61 = vpop.f32.mrf.mxu0  ;;  %v915_v22 = vadd.f32 %v1546_v60, %v1542_v58 }
 0x115   :  { %1762 = vst [vmem:[#allocation2_spill] sm:$0xff] %v1548_v61  ;;  %v1550_v62 = vpop.f32.mrf.mxu1  ;;  %v401_v61 = vadd.f32 %v888_v11, %v817_v10 }
 0x116   :  { %1763 = vst [vmem:[#allocation3_spill] sm:$0xff] %v1550_v62  ;;  %v1552_v63 = vpop.f32.mrf.mxu0 }
 0x117   :  { %1764 = vst [vmem:[#allocation4_spill] sm:$0xff] %v1552_v63  ;;  %v1554_v0 = vpop.f32.mrf.mxu1 }
 0x118   :  { %1765 = vst [vmem:[#allocation5_spill] sm:$0xff] %v1554_v0  ;;  %v520_v1 = vpop.f32.mrf.mxu0 }
 0x119   :  { %v1556_v2 = vpop.f32.mrf.mxu1  ;;  %v1565_v23 = vadd.f32 %v520_v1, %v1508_v19 }
 0x11a   :  { %v958_v3 = vpop.f32.mrf.mxu0  ;;  %v1619_v18 = vadd.f32 %v1556_v2, %v426_v48 }
 0x11b   :  { %v979_v4 = vpop.f32.mrf.mxu1  ;;  %v406_v3 = vadd.f32 %v891_v13, %v820_v12  ;;  %v617_v33 = vmul.f32 %v1565_v23, %v1565_v23  ;;  %v584_v39 = vsel %vm154_vm1, %v1565_v23, 0.0  ;;  %v912_v12 = vadd.f32 %v1538_v56, %v1534_v54 }
 0x11c   :  { %v525_v8 = vpop.f32.mrf.mxu0  ;;  %v823_v4 = vadd.f32 %v822_v31, %v821_v29  ;;  %v624_v60 = vmul.f32 %v1619_v18, %v1619_v18 }
 0x11d   :  { %v1558_v9 = vpop.f32.mrf.mxu1  ;;  %v1562_v0 = vadd.f32 %v525_v8, %v396_v16  ;;  %v630_v8 = vsel %vm154_vm1, %v617_v33, 0.0  ;;  %v431_v16 = vadd.f32 %v906_v42, %v835_v38  ;;  %v1768_v33 = vld [vmem:[#allocation2_spill] sm:$0xff]  ;;  %v1770_v36 = vld [vmem:[#allocation3_spill] sm:$0xff]  ;;  %v597_v42 = vsel %vm154_vm1, %v1619_v18, 0.0 }
 0x11e   :  { %1766 = vst [vmem:[#allocation6_spill] sm:$0xff] %v1558_v9  ;;  %v961_v14 = vpop.f32.mrf.mxu0  ;;  %v411_v31 = vadd.f32 %v894_v17, %v823_v4  ;;  %v436_v4 = vadd.f32 %v909_v44, %v838_v43 }
 0x11f   :  { %v982_v15 = vpop.f32.mrf.mxu1  ;;  %v618_v27 = vmul.f32 %v1562_v0, %v1562_v0  ;;  %v585_v19 = vsel %vm154_vm1, %v1562_v0, 0.0  ;;  %v1771_v37 = vld [vmem:[#allocation5_spill] sm:$0xff] }
 0x120   :  { %v530_v62 = vpop.f32.mrf.mxu0  ;;  %v586_v45 = vadd.f32 %v585_v19, %v584_v39  ;;  %v1769_v19 = vld [vmem:[#allocation4_spill] sm:$0xff] }
 0x121   :  { %v1560_v63 = vpop.f32.mrf.mxu1  ;;  %v1567_v24 = vadd.f32 %v530_v62, %v401_v61  ;;  %v631_v62 = vsel %vm154_vm1, %v618_v27, 0.0 }
 0x122   :  { %v964_v21 = vpop.f32.mrf.mxu0  ;;  %v632_v49 = vadd.f32 %v631_v62, %v630_v8  ;;  %v1643_v39 = vadd.f32 %v1560_v63, %v436_v4  ;;  %v643_v8 = vsel %vm154_vm1, %v624_v60, 0.0 }
 0x123   :  { %v985_v9 = vpop.f32.mrf.mxu1  ;;  %v619_v34 = vmul.f32 %v1567_v24, %v1567_v24  ;;  %v587_v1 = vsel %vm154_vm1, %v1567_v24, 0.0  ;;  %v844_v21 = vadd.f32 %v1544_v59, %v1540_v57  ;;  %v918_v57 = vadd.f32 %v1771_v37, %v1770_v36 }
 0x124   :  { %v535_v25 = vpop.f32.mrf.mxu0  ;;  %v588_v51 = vadd.f32 %v587_v1, %v586_v45 }
 0x125   :  { %v1569_v26 = vpop.f32.mrf.mxu1  ;;  %v1573_v28 = vadd.f32 %v535_v25, %v406_v3  ;;  %v633_v9 = vsel %vm154_vm1, %v619_v34, 0.0  ;;  %v847_v34 = vadd.f32 %v1769_v19, %v1768_v33  ;;  %v446_v62 = vadd.f32 %v915_v22, %v844_v21 }
 0x126   :  { %v967_v29 = vpop.f32.mrf.mxu0  ;;  %v634_v3 = vadd.f32 %v633_v9, %v632_v49  ;;  %v601_v49 = vsel %vm154_vm1, %v1643_v39, 0.0 }
 0x127   :  { %v988_v30 = vpop.f32.mrf.mxu1  ;;  %v620_v5 = vmul.f32 %v1573_v28, %v1573_v28  ;;  %v589_v10 = vsel %vm154_vm1, %v1573_v28, 0.0  ;;  %v1767_v29 = vld [vmem:[#allocation6_spill] sm:$0xff]  ;;  %v451_v45 = vadd.f32 %v918_v57, %v847_v34 }
 0x128   :  { %v540_v40 = vpop.f32.mrf.mxu0  ;;  %v590_v17 = vadd.f32 %v589_v10, %v588_v51  ;;  %v1631_v2 = vadd.f32 %v1767_v29, %v431_v16  ;;  %v441_v30 = vadd.f32 %v912_v12, %v841_v46  ;;  %v626_v10 = vmul.f32 %v1643_v39, %v1643_v39 }
 0x129   :  { %v1588_v61 = vpop.f32.mrf.mxu1  ;;  %v1595_v41 = vadd.f32 %v540_v40, %v411_v31  ;;  %v635_v13 = vsel %vm154_vm1, %v620_v5, 0.0 }
 0x12a   :  { %v970_v47 = vpop.f32.mrf.mxu0  ;;  %v636_v7 = vadd.f32 %v635_v13, %v634_v3  ;;  %v625_v43 = vmul.f32 %v1631_v2, %v1631_v2  ;;  %v1654_v44 = vadd.f32 %v1569_v26, %v441_v30  ;;  %v599_v9 = vsel %vm154_vm1, %v1631_v2, 0.0 }
 0x12b   :  { %v991_v6 = vpop.f32.mrf.mxu1  ;;  %v621_v11 = vmul.f32 %v1595_v41, %v1595_v41  ;;  %v591_v14 = vsel %vm154_vm1, %v1595_v41, 0.0 }
 0x12c   :  { %v545_v50 = vpop.f32.mrf.mxu0  ;;  %v592_v25 = vadd.f32 %v591_v14, %v590_v17  ;;  %v645_v26 = vsel %vm154_vm1, %v625_v43, 0.0  ;;  %v627_v51 = vmul.f32 %v1654_v44, %v1654_v44  ;;  %v647_v14 = vsel %vm154_vm1, %v626_v10, 0.0 }
 0x12d   :  { %v580_v52 = vpop.f32.mrf.mxu1  ;;  %v1616_v15 = vadd.f32 %v545_v50, %v416_v32  ;;  %v637_v20 = vsel %vm154_vm1, %v621_v11, 0.0  ;;  %v1663_v11 = vadd.f32 %v1588_v61, %v446_v62  ;;  %v603_v61 = vsel %vm154_vm1, %v1654_v44, 0.0 }
 0x12e   :  { %v973_v53 = vpop.f32.mrf.mxu0  ;;  %v638_v59 = vadd.f32 %v637_v20, %v636_v7  ;;  %v1670_v50 = vadd.f32 %v580_v52, %v451_v45  ;;  %v649_v17 = vsel %vm154_vm1, %v627_v51, 0.0 }
 0x12f   :  { %v994_v55 = vpop.f32.mrf.mxu1  ;;  %v593_v54 = vsel %vm154_vm1, %v1616_v15, 0.0  ;;  %v622_v56 = vmul.f32 %v1616_v15, %v1616_v15  ;;  %v628_v16 = vmul.f32 %v1663_v11, %v1663_v11  ;;  %v605_v53 = vsel %vm154_vm1, %v1663_v11, 0.0 }
 0x130   :  { %v550_v27 = vpop.f32.mrf.mxu0  ;;  %v594_v38 = vadd.f32 %v593_v54, %v592_v25  ;;  %v629_v52 = vmul.f32 %v1670_v50, %v1670_v50 }
 0x131   :  { %v639_v31 = vsel %vm154_vm1, %v622_v56, 0.0  ;;  %v1634_v32 = vadd.f32 %v550_v27, %v421_v35  ;;  %v651_v54 = vsel %vm154_vm1, %v628_v16, 0.0  ;;  %v608_v56 = vsel %vm607_vm2, %v1670_v50, 0.0 }
 0x132   :  { %v976_v58 = vpop.f32.mrf.mxu0  ;;  %v640_v1 = vadd.f32 %v639_v31, %v638_v59  ;;  %v653_v7 = vsel %vm607_vm2, %v629_v52, 0.0 }
 0x133   :  { %v595_v40 = vsel %vm154_vm1, %v1634_v32, 0.0  ;;  %v623_v35 = vmul.f32 %v1634_v32, %v1634_v32 }
 0x134   :  { %v596_v5 = vadd.f32 %v595_v40, %v594_v38 }
 0x135   :  { %v641_v63 = vsel %vm154_vm1, %v623_v35, 0.0 }
 0x136   :  { %v598_v47 = vadd.f32 %v597_v42, %v596_v5  ;;  %v642_v6 = vadd.f32 %v641_v63, %v640_v1  ;;  %v775_v5 = vld [vmem:[%s1759_s2] ss:$0 sm:$0xff] }
 0x138   :  { %v600_v46 = vadd.f32 %v599_v9, %v598_v47  ;;  %v644_v48 = vadd.f32 %v643_v8, %v642_v6 }
 0x13a   :  { %v602_v12 = vadd.f32 %v601_v49, %v600_v46  ;;  %v646_v13 = vadd.f32 %v645_v26, %v644_v48 }
 0x13c   :  { %v604_v3 = vadd.f32 %v603_v61, %v602_v12  ;;  %v648_v4 = vadd.f32 %v647_v14, %v646_v13 }
 0x13e   :  { %v606_v55 = vadd.f32 %v605_v53, %v604_v3  ;;  %v650_v20 = vadd.f32 %v649_v17, %v648_v4 }
 0x140   :  { %v609_v21 = vadd.f32 %v608_v56, %v606_v55  ;;  %v652_v22 = vadd.f32 %v651_v54, %v650_v20 }
 0x142   :  { %v610_v25 = vrot.slane %v609_v21, 4  ;;  %v654_v27 = vadd.f32 %v653_v7, %v652_v22 }
 0x144   :  { %v611_v29 = vadd.f32 %v610_v25, %v609_v21  ;;  %v655_v30 = vrot.slane %v654_v27, 4 }
 0x146   :  { %v612_v31 = vrot.slane %v611_v29, 2  ;;  %v656_v33 = vadd.f32 %v655_v30, %v654_v27 }
 0x148   :  { %v613_v19 = vadd.f32 %v612_v31, %v611_v29  ;;  %v657_v34 = vrot.slane %v656_v33, 2 }
 0x14a   :  { %v614_v36 = vrot.slane %v613_v19, 1  ;;  %v658_v37 = vadd.f32 %v657_v34, %v656_v33 }
 0x14c   :  { %v615_v57 = vadd.f32 %v614_v36, %v613_v19  ;;  %v659_v59 = vrot.slane %v658_v37, 1 }
 0x14e   :  { %v616_v38 = vmul.f32 0.010204081, %v615_v57  ;;  %v660_v58 = vadd.f32 %v659_v59, %v658_v37 }
 0x150   :  { %v661_v60 = vmul.f32 0.010204081, %v660_v58  ;;  %v662_v40 = vmul.f32 %v616_v38, %v616_v38  ;;  %v665_v1 = vsub.f32 %v1565_v23, %v616_v38  ;;  %v666_v42 = vsub.f32 %v1562_v0, %v616_v38 }
 0x151   :  { %v667_v43 = vsub.f32 %v1567_v24, %v616_v38  ;;  %v668_v63 = vsub.f32 %v1573_v28, %v616_v38  ;;  %v669_v45 = vsub.f32 %v1595_v41, %v616_v38  ;;  %v670_v47 = vsub.f32 %v1616_v15, %v616_v38 }
 0x152   :  { %v663_v35 = vsub.f32 %v661_v60, %v662_v40  ;;  %v671_v6 = vsub.f32 %v1634_v32, %v616_v38  ;;  %v672_v8 = vsub.f32 %v1619_v18, %v616_v38  ;;  %v673_v23 = vsub.f32 %v1631_v2, %v616_v38 }
 0x153   :  { %v674_v9 = vsub.f32 %v1643_v39, %v616_v38  ;;  %v675_v10 = vsub.f32 %v1654_v44, %v616_v38  ;;  %v676_v0 = vsub.f32 %v1663_v11, %v616_v38  ;;  %v677_v24 = vsub.f32 %v1670_v50, %v616_v38  ;;  %v776_v50 = vld [vmem:[%s1760_s3] ss:$0 sm:$0xff] }
 0x154   :  { %v697_v62 = vadd.f32 1e-05, %v663_v35  ;;  %v684_v46 = vmul.f32 %v775_v5, %v665_v1  ;;  %v685_v28 = vmul.f32 %v775_v5, %v666_v42  ;;  %v686_v48 = vmul.f32 %v775_v5, %v667_v43 }
 0x155   :  { %v687_v41 = vmul.f32 %v775_v5, %v668_v63  ;;  %v688_v26 = vmul.f32 %v775_v5, %v669_v45  ;;  %v689_v15 = vmul.f32 %v775_v5, %v670_v47  ;;  %v690_v49 = vmul.f32 %v775_v5, %v671_v6 }
 0x156   :  { %1013 = vrsqrt.f32 %v697_v62  ;;  %v691_v32 = vmul.f32 %v775_v5, %v672_v8  ;;  %v692_v51 = vmul.f32 %v775_v5, %v673_v23  ;;  %v693_v12 = vmul.f32 %v775_v5, %v674_v9 }
 0x157   :  { %v694_v2 = vmul.f32 %v775_v5, %v675_v10  ;;  %v695_v13 = vmul.f32 %v775_v5, %v676_v0  ;;  %v696_v39 = vmul.f32 %v775_v5, %v677_v24 }
 0x163   :  { %v1014_v18 = vpop.eup %1013 }
 0x164   :  { %v699_v14 = vmul.f32 %v1014_v18, %v684_v46  ;;  %v700_v44 = vmul.f32 %v1014_v18, %v685_v28  ;;  %v701_v61 = vmul.f32 %v1014_v18, %v686_v48  ;;  %v702_v11 = vmul.f32 %v1014_v18, %v687_v41 }
 0x165   :  { %v703_v16 = vmul.f32 %v1014_v18, %v688_v26  ;;  %v704_v3 = vmul.f32 %v1014_v18, %v689_v15  ;;  %v705_v4 = vmul.f32 %v1014_v18, %v690_v49  ;;  %v706_v17 = vmul.f32 %v1014_v18, %v691_v32 }
 0x166   :  { %v707_v53 = vmul.f32 %v1014_v18, %v692_v51  ;;  %v708_v52 = vmul.f32 %v1014_v18, %v693_v12  ;;  %v709_v55 = vmul.f32 %v1014_v18, %v694_v2  ;;  %v710_v20 = vmul.f32 %v1014_v18, %v695_v13 }
 0x167   :  { %v711_v54 = vmul.f32 %v1014_v18, %v696_v39  ;;  %v719_v56 = vadd.f32 %v776_v50, %v699_v14  ;;  %v720_v21 = vadd.f32 %v776_v50, %v700_v44  ;;  %v721_v22 = vadd.f32 %v776_v50, %v701_v61 }
 0x168   :  { %v722_v7 = vadd.f32 %v776_v50, %v702_v11  ;;  %v723_v25 = vadd.f32 %v776_v50, %v703_v16  ;;  %v724_v27 = vadd.f32 %v776_v50, %v704_v3  ;;  %v725_v29 = vadd.f32 %v776_v50, %v705_v4 }
 0x169   :  { %v726_v30 = vadd.f32 %v776_v50, %v706_v17  ;;  %v727_v31 = vadd.f32 %v776_v50, %v707_v53  ;;  %v728_v33 = vadd.f32 %v776_v50, %v708_v52  ;;  %v729_v19 = vadd.f32 %v776_v50, %v709_v55 }
 0x16a   :  { %v730_v34 = vadd.f32 %v776_v50, %v710_v20  ;;  %v731_v36 = vadd.f32 %v776_v50, %v711_v54  ;;  %v732_v37 = vmax.f32 %v719_v56, 0.0  ;;  %v733_v57 = vmax.f32 %v720_v21, 0.0 }
 0x16b   :  { %v734_v59 = vmax.f32 %v721_v22, 0.0  ;;  %v735_v38 = vmax.f32 %v722_v7, 0.0  ;;  %v736_v58 = vmax.f32 %v723_v25, 0.0  ;;  %v737_v60 = vmax.f32 %v724_v27, 0.0 }
 0x16c   :  { %v738_v40 = vmax.f32 %v725_v29, 0.0  ;;  %v739_v35 = vmax.f32 %v726_v30, 0.0  ;;  %v740_v62 = vmax.f32 %v727_v31, 0.0  ;;  %v741_v1 = vmax.f32 %v728_v33, 0.0  ;;  %745 = vst.msk [vmem:[%s1761_s4] sm:$0xff] %vm154_vm1, %v732_v37  ;;  %746 = vst.msk [vmem:[%s1761_s4 + $0x8] sm:$0xff] %vm154_vm1, %v733_v57 }
 0x16d   :  { %v742_v5 = vmax.f32 %v729_v19, 0.0  ;;  %v743_v42 = vmax.f32 %v730_v34, 0.0  ;;  %v744_v43 = vmax.f32 %v731_v36, 0.0  ;;  %747 = vst.msk [vmem:[%s1761_s4 + $0x10] sm:$0xff] %vm154_vm1, %v734_v59  ;;  %748 = vst.msk [vmem:[%s1761_s4 + $0x18] sm:$0xff] %vm154_vm1, %v735_v38 }
 0x16e   :  { %749 = vst.msk [vmem:[%s1761_s4 + $0x20] sm:$0xff] %vm154_vm1, %v736_v58  ;;  %750 = vst.msk [vmem:[%s1761_s4 + $0x28] sm:$0xff] %vm154_vm1, %v737_v60 }
 0x16f   :  { %751 = vst.msk [vmem:[%s1761_s4 + $0x30] sm:$0xff] %vm154_vm1, %v738_v40  ;;  %752 = vst.msk [vmem:[%s1761_s4 + $0x38] sm:$0xff] %vm154_vm1, %v739_v35 }
 0x170   :  { %753 = vst.msk [vmem:[%s1761_s4 + $0x40] sm:$0xff] %vm154_vm1, %v740_v62  ;;  %754 = vst.msk [vmem:[%s1761_s4 + $0x48] sm:$0xff] %vm154_vm1, %v741_v1 }
 0x171   :  { %755 = vst.msk [vmem:[%s1761_s4 + $0x50] sm:$0xff] %vm154_vm1, %v742_v5  ;;  %756 = vst.msk [vmem:[%s1761_s4 + $0x58] sm:$0xff] %vm154_vm1, %v743_v42 }
 0x172   :  { %757 = vst.msk [vmem:[%s1761_s4 + $0x60] sm:$0x3] %vm607_vm2, %v744_v43 }

// kernel: ddqn4_forward.7
= control target key start
LH: loop header
LB: loop body
LE: loop exit
PB: predicated region body
PF: predicated region fallthrough
CT: control target
= control target key end

     0   :  { %10 = vsyncpa [#allocation4], 0  ;;  %s3909_s18 = smov 0   ;;  %s4758_s0 = inlined_call_operand.vmem [shape: f32[2,3200], index: 0, kind: input, shape index: {}]   ;;  %s4759_s1 = inlined_call_operand.vmem [shape: bf16[3200,1024], index: 1, kind: input, shape index: {}]   ;;  %s4760_s2 = inlined_call_operand.vmem [shape: f32[1,1024], index: 2, kind: input, shape index: {}]   ;;  %s4761_s3 = inlined_call_operand.vmem [shape: f32[1024,2], index: 3, kind: input, shape index: {}]   ;;  %s4762_s4 = inlined_call_operand.vmem [shape: f32[1,2], index: 4, kind: input, shape index: {}]   ;;  %s4763_s5 = inlined_call_operand.hbm [shape: f32[2,2], index: 5, kind: output, shape index: {}]  }
   0x1 LB: > { %s3915_s19 = sadd.s32 4294967295, %s3873_s18   ;;  %p3347_p0 = scmp.ge.s32.totalorder %s3873_s18, 1  ;;  %s3873_s18 = sphi %s3909_s18, %s16_s18  }
   0x2   : > { %p196_p1 = scmp.lt.s32.totalorder %s3873_s18, 6 }
   0x4   : > { %p197_p2 = pnand %p3347_p0, %p196_p1 }
   0x5   : > { %s225_s20 = smul.u32 (!%p197_p2), 5, %s3915_s19  ;;  %p3351_p5 = scmp.ne.s32.totalorder (!%p197_p2), %s3915_s19, 0 }
   0x6   : > { %200 = sbr.rel (%p197_p2) target bundleno = 841 (0x349), region = 40 }
   0x7   : > { %s231_s21 = smul.u32 (!%p197_p2), 80, %s3915_s19  ;;  %p226_p3 = scmp.lt.s32.totalorder (!%p197_p2), %s225_s20, 24 }
   0x9   : > { %p232_p4 = scmp.lt.s32.totalorder (!%p197_p2), %s231_s21, 399 }
   0xb   : > { %s4765_s20 = smov (!%p226_p3, %s225_s20), 24  ;;  %s4767_s21 = smov (!%p232_p4, %s231_s21), 399 }
   0xc   : > { %s3348_s22 = sshll.u32 %s4765_s20, 1  ;;  %s3679_s26 = sshll.u32 %s4767_s21, 5 }
   0xd   : > { %s3924_s25 = scalar_lea.vmem %s4758_s0, %s3348_s22  ;;  %s3929_s29 = scalar_lea.vmem %s4759_s1, %s3679_s26 }
   0xe   : > { %242 = sbr.rel (%p3351_p5) target bundleno = 21 (0x15), region = 44 }
  0x13   : > { %v3875_v0 = vmov 0.0  }
  0x14   : > { %243 = vst [vmem:[#allocation2] sm:$0xff] %v3875_v0  ;;  %244 = vst [vmem:[#allocation2 + $0x8] sm:$0xff] %v3875_v0 }
  0x15 PF: > { %v341_v1 = vld [vmem:[%s3929_s29 + $0x1c0] sm:$0xff]  ;;  %v3876_v33 = vmov 1983009808   ;;  %v255_v35 = vlaneseq  ;;  %p3673_p6 = scmp.ne.s32.totalorder %s3915_s19, 4 }
  0x16   : > { %v345_v2 = vld [vmem:[%s3929_s29 + $0x1e0] sm:$0xff]  ;;  %v253_v34 = vunpack.c.l.s4 %v3876_v33 }
  0x17   : > { %v469_v3 = vld [vmem:[%s3929_s29 + $0x5c0] sm:$0xff]  ;;  %v3410_v4 = vcombine.high %v341_v1, %v345_v2  ;;  %v3409_v6 = vcombine.low %v341_v1, %v345_v2  ;;  %v3954_v45 = vshrl.u32 %v255_v35, 7 }
  0x18   : > { %v473_v5 = vld [vmem:[%s3929_s29 + $0x5e0] sm:$0xff]  ;;  %v254_v44 = vunpack.c.0.s8 %v253_v34 }
  0x19   : > { %v333_v7 = vld [vmem:[%s3929_s29 + $0x180] sm:$0xff]  ;;  %v3538_v9 = vcombine.high %v469_v3, %v473_v5  ;;  %v3537_v10 = vcombine.low %v469_v3, %v473_v5  ;;  %2205 = vmatprep.subr.bf16.mxu0 %v3410_v4 }
  0x1a   : > { %v337_v8 = vld [vmem:[%s3929_s29 + $0x1a0] sm:$0xff]  ;;  %2206 = vmatpush1.bf16.msra.mxu0 %v3409_v6  ;;  %v3961_v54 = vsub.s32 %v254_v44, %v3954_v45 }
  0x1b   : > { %v3402_v11 = vcombine.high %v333_v7, %v337_v8  ;;  %v461_v12 = vld [vmem:[%s3929_s29 + $0x580] sm:$0xff]  ;;  %2246 = vmatprep.subr.bf16.mxu1 %v3538_v9  ;;  %v3401_v19 = vcombine.low %v333_v7, %v337_v8 }
  0x1c   : > { %v465_v13 = vld [vmem:[%s3929_s29 + $0x5a0] sm:$0xff]  ;;  %2247 = vmatpush1.bf16.msra.mxu1 %v3537_v10 }
  0x1d   : > { %v325_v14 = vld [vmem:[%s3929_s29 + $0x140] sm:$0xff]  ;;  %v3530_v15 = vcombine.high %v461_v12, %v465_v13  ;;  %2207 = vmatprep.subr.bf16.mxu0 %v3402_v11  ;;  %v3529_v20 = vcombine.low %v461_v12, %v465_v13 }
  0x1e   : > { %v329_v16 = vld [vmem:[%s3929_s29 + $0x160] sm:$0xff]  ;;  %2208 = vmatpush1.bf16.msra.mxu0 %v3401_v19 }
  0x1f   : > { %v453_v17 = vld [vmem:[%s3929_s29 + $0x540] sm:$0xff]  ;;  %v3394_v21 = vcombine.high %v325_v14, %v329_v16  ;;  %2248 = vmatprep.subr.bf16.mxu1 %v3530_v15  ;;  %v3393_v27 = vcombine.low %v325_v14, %v329_v16 }
  0x20   : > { %v457_v18 = vld [vmem:[%s3929_s29 + $0x560] sm:$0xff]  ;;  %2249 = vmatpush1.bf16.msra.mxu1 %v3529_v20 }
  0x21   : > { %v3522_v22 = vcombine.high %v453_v17, %v457_v18  ;;  %v317_v23 = vld [vmem:[%s3929_s29 + $0x100] sm:$0xff]  ;;  %2209 = vmatprep.subr.bf16.mxu0 %v3394_v21  ;;  %v3521_v28 = vcombine.low %v453_v17, %v457_v18 }
  0x22   : > { %v321_v24 = vld [vmem:[%s3929_s29 + $0x120] sm:$0xff]  ;;  %2210 = vmatpush1.bf16.msra.mxu0 %v3393_v27 }
  0x23   : > { %v445_v25 = vld [vmem:[%s3929_s29 + $0x500] sm:$0xff]  ;;  %v3386_v29 = vcombine.high %v317_v23, %v321_v24  ;;  %2250 = vmatprep.subr.bf16.mxu1 %v3522_v22  ;;  %v3385_v38 = vcombine.low %v317_v23, %v321_v24 }
  0x24   : > { %v449_v26 = vld [vmem:[%s3929_s29 + $0x520] sm:$0xff]  ;;  %2251 = vmatpush1.bf16.msra.mxu1 %v3521_v28 }
  0x25   : > { %v3514_v30 = vcombine.high %v445_v25, %v449_v26  ;;  %v309_v31 = vld [vmem:[%s3929_s29 + $0xc0] sm:$0xff]  ;;  %2211 = vmatprep.subr.bf16.mxu0 %v3386_v29  ;;  %v3513_v39 = vcombine.low %v445_v25, %v449_v26 }
  0x26   : > { %v313_v32 = vld [vmem:[%s3929_s29 + $0xe0] sm:$0xff]  ;;  %2212 = vmatpush1.bf16.msra.mxu0 %v3385_v38 }
  0x27   : > { %v437_v36 = vld [vmem:[%s3929_s29 + $0x4c0] sm:$0xff]  ;;  %v3378_v40 = vcombine.high %v309_v31, %v313_v32  ;;  %2252 = vmatprep.subr.bf16.mxu1 %v3514_v30  ;;  %v3377_v48 = vcombine.low %v309_v31, %v313_v32 }
  0x28   : > { %v441_v37 = vld [vmem:[%s3929_s29 + $0x4e0] sm:$0xff]  ;;  %2253 = vmatpush1.bf16.msra.mxu1 %v3513_v39 }
  0x29   : > { %v3506_v41 = vcombine.high %v437_v36, %v441_v37  ;;  %v301_v42 = vld [vmem:[%s3929_s29 + $0x80] sm:$0xff]  ;;  %2213 = vmatprep.subr.bf16.mxu0 %v3378_v40  ;;  %v3505_v49 = vcombine.low %v437_v36, %v441_v37 }
  0x2a   : > { %v305_v43 = vld [vmem:[%s3929_s29 + $0xa0] sm:$0xff]  ;;  %2214 = vmatpush1.bf16.msra.mxu0 %v3377_v48 }
  0x2b   : > { %v429_v46 = vld [vmem:[%s3929_s29 + $0x480] sm:$0xff]  ;;  %v3370_v50 = vcombine.high %v301_v42, %v305_v43  ;;  %2254 = vmatprep.subr.bf16.mxu1 %v3506_v41  ;;  %v3369_v57 = vcombine.low %v301_v42, %v305_v43 }
  0x2c   : > { %v433_v47 = vld [vmem:[%s3929_s29 + $0x4a0] sm:$0xff]  ;;  %2255 = vmatpush1.bf16.msra.mxu1 %v3505_v49 }
  0x2d   : > { %v3498_v51 = vcombine.high %v429_v46, %v433_v47  ;;  %v293_v52 = vld [vmem:[%s3929_s29 + $0x40] sm:$0xff]  ;;  %2215 = vmatprep.subr.bf16.mxu0 %v3370_v50  ;;  %v3497_v58 = vcombine.low %v429_v46, %v433_v47 }
  0x2e   : > { %v297_v53 = vld [vmem:[%s3929_s29 + $0x60] sm:$0xff]  ;;  %2216 = vmatpush1.bf16.msra.mxu0 %v3369_v57 }
  0x2f   : > { %v421_v55 = vld [vmem:[%s3929_s29 + $0x440] sm:$0xff]  ;;  %v3362_v59 = vcombine.high %v293_v52, %v297_v53  ;;  %2256 = vmatprep.subr.bf16.mxu1 %v3498_v51  ;;  %v3361_v4 = vcombine.low %v293_v52, %v297_v53 }
  0x30   : > { %v425_v56 = vld [vmem:[%s3929_s29 + $0x460] sm:$0xff]  ;;  %2257 = vmatpush1.bf16.msra.mxu1 %v3497_v58 }
  0x31   : > { %v247_v60 = vld [vmem:[%s3924_s25] sm:$0xff]  ;;  %v3490_v61 = vcombine.high %v421_v55, %v425_v56  ;;  %2217 = vmatprep.subr.bf16.mxu0 %v3362_v59  ;;  %v3489_v7 = vcombine.low %v421_v55, %v425_v56 }
  0x32   : > { %v285_v62 = vld [vmem:[%s3929_s29] sm:$0xff]  ;;  %v3969_v0 = vrot.slane %v247_v60, %v3961_v54  ;;  %v251_v1 = vcombine.high %v247_v60, %v247_v60  ;;  %2218 = vmatpush1.bf16.msra.mxu0 %v3361_v4 }
  0x33   : > { %v289_v63 = vld [vmem:[%s3929_s29 + $0x20] sm:$0xff]  ;;  %2258 = vmatprep.subr.bf16.mxu1 %v3490_v61 }
  0x34   : > { %v413_v2 = vld [vmem:[%s3929_s29 + $0x400] sm:$0xff]  ;;  %v266_v5 = vcombine.high %v3969_v0, %v3969_v0  ;;  %v3976_v6 = vrot.slane %v251_v1, %v3961_v54  ;;  %v3354_v8 = vcombine.high %v285_v62, %v289_v63  ;;  %v3353_v16 = vcombine.low %v285_v62, %v289_v63  ;;  %2259 = vmatpush1.bf16.msra.mxu1 %v3489_v7 }
  0x35   : > { %v417_v3 = vld [vmem:[%s3929_s29 + $0x420] sm:$0xff] }
  0x36   : > { %v3482_v9 = vcombine.high %v413_v2, %v417_v3  ;;  %v405_v10 = vld [vmem:[%s3929_s29 + $0x3c0] sm:$0xff]  ;;  %v3980_v12 = vpack.c.bf16 %v266_v5, %v266_v5  ;;  %v267_v13 = vcombine.high %v3976_v6, %v3976_v6  ;;  %2219 = vmatprep.subr.bf16.mxu0 %v3354_v8  ;;  %v3481_v18 = vcombine.low %v413_v2, %v417_v3 }
  0x37   : > { %v409_v11 = vld [vmem:[%s3929_s29 + $0x3e0] sm:$0xff]  ;;  %2220 = vmatpush1.bf16.msra.mxu0 %v3353_v16 }
  0x38   : > { %v533_v14 = vld [vmem:[%s3929_s29 + $0x7c0] sm:$0xff]  ;;  %2237 = vmatprep.mubr.bf16.mxu0 %v3980_v12  ;;  %v3987_v17 = vpack.c.bf16 %v267_v13, %v267_v13  ;;  %v3474_v19 = vcombine.high %v405_v10, %v409_v11  ;;  %2260 = vmatprep.subr.bf16.mxu1 %v3482_v9  ;;  %v3473_v25 = vcombine.low %v405_v10, %v409_v11 }
  0x39   : > { %v537_v15 = vld [vmem:[%s3929_s29 + $0x7e0] sm:$0xff]  ;;  %2261 = vmatpush1.bf16.msra.mxu1 %v3481_v18 }
  0x3a   : > { %v3602_v20 = vcombine.high %v533_v14, %v537_v15  ;;  %v397_v21 = vld [vmem:[%s3929_s29 + $0x380] sm:$0xff]  ;;  %2278 = vmatprep.mubr.bf16.mxu1 %v3987_v17  ;;  %2221 = vmatprep.subr.bf16.mxu0 %v3474_v19  ;;  %v3601_v26 = vcombine.low %v533_v14, %v537_v15 }
  0x3b   : > { %v401_v22 = vld [vmem:[%s3929_s29 + $0x3a0] sm:$0xff]  ;;  %2222 = vmatpush2.bf16.msra.mxu0 %v3473_v25 }
  0x3c   : > { %v525_v23 = vld [vmem:[%s3929_s29 + $0x780] sm:$0xff]  ;;  %v3466_v27 = vcombine.high %v397_v21, %v401_v22  ;;  %2262 = vmatprep.subr.bf16.mxu1 %v3602_v20  ;;  %v3465_v33 = vcombine.low %v397_v21, %v401_v22  ;;  %v342_v21 = vld [vmem:[%s3929_s29 + $0x1c8] sm:$0xff] }
  0x3d   : > { %v529_v24 = vld [vmem:[%s3929_s29 + $0x7a0] sm:$0xff]  ;;  %2263 = vmatpush2.bf16.msra.mxu1 %v3601_v26  ;;  %v346_v22 = vld [vmem:[%s3929_s29 + $0x1e8] sm:$0xff] }
  0x3e   : > { %v3594_v28 = vcombine.high %v525_v23, %v529_v24  ;;  %v389_v29 = vld [vmem:[%s3929_s29 + $0x340] sm:$0xff]  ;;  %2223 = vmatprep.subr.bf16.mxu0 %v3466_v27  ;;  %v3593_v34 = vcombine.low %v525_v23, %v529_v24  ;;  %v3412_v26 = vcombine.high %v342_v21, %v346_v22 }
  0x3f   : > { %v393_v30 = vld [vmem:[%s3929_s29 + $0x360] sm:$0xff]  ;;  %2224 = vmatpush2.bf16.msra.mxu0 %v3465_v33 }
  0x40   : > { %v517_v31 = vld [vmem:[%s3929_s29 + $0x740] sm:$0xff]  ;;  %v3458_v35 = vcombine.high %v389_v29, %v393_v30  ;;  %2264 = vmatprep.subr.bf16.mxu1 %v3594_v28  ;;  %v3457_v41 = vcombine.low %v389_v29, %v393_v30  ;;  %v4026_v29 = vpack.c.bf16 %v3969_v0, %v3969_v0  ;;  %v334_v30 = vld [vmem:[%s3929_s29 + $0x188] sm:$0xff] }
  0x41   : > { %v521_v32 = vld [vmem:[%s3929_s29 + $0x760] sm:$0xff]  ;;  %2265 = vmatpush2.bf16.msra.mxu1 %v3593_v34  ;;  %v3411_v34 = vcombine.low %v342_v21, %v346_v22  ;;  %v290_v21 = vld [vmem:[%s3929_s29 + $0x28] sm:$0xff] }
  0x42   : > { %v3586_v36 = vcombine.high %v517_v31, %v521_v32  ;;  %v381_v37 = vld [vmem:[%s3929_s29 + $0x300] sm:$0xff]  ;;  %2225 = vmatprep.subr.bf16.mxu0 %v3458_v35  ;;  %v3585_v42 = vcombine.low %v517_v31, %v521_v32  ;;  %v338_v31 = vld [vmem:[%s3929_s29 + $0x1a8] sm:$0xff]  ;;  %v4032_v32 = vpack.c.bf16 %v3976_v6, %v3976_v6 }
  0x43   : > { %v385_v38 = vld [vmem:[%s3929_s29 + $0x320] sm:$0xff]  ;;  %2226 = vmatpush2.bf16.msra.mxu0 %v3457_v41 }
  0x44   : > { %v509_v39 = vld [vmem:[%s3929_s29 + $0x700] sm:$0xff]  ;;  %v3450_v43 = vcombine.high %v381_v37, %v385_v38  ;;  %2266 = vmatprep.subr.bf16.mxu1 %v3586_v36  ;;  %v3449_v50 = vcombine.low %v381_v37, %v385_v38  ;;  %v3404_v36 = vcombine.high %v334_v30, %v338_v31  ;;  %v326_v38 = vld [vmem:[%s3929_s29 + $0x148] sm:$0xff] }
  0x45   : > { %v513_v40 = vld [vmem:[%s3929_s29 + $0x720] sm:$0xff]  ;;  %2267 = vmatpush2.bf16.msra.mxu1 %v3585_v42 }
  0x46   : > { %v3578_v44 = vcombine.high %v509_v39, %v513_v40  ;;  %v373_v46 = vld [vmem:[%s3929_s29 + $0x2c0] sm:$0xff]  ;;  %2227 = vmatprep.subr.bf16.mxu0 %v3450_v43  ;;  %v3577_v51 = vcombine.low %v509_v39, %v513_v40  ;;  %v330_v39 = vld [vmem:[%s3929_s29 + $0x168] sm:$0xff]  ;;  %v3403_v40 = vcombine.low %v334_v30, %v338_v31 }
  0x47   : > { %v377_v47 = vld [vmem:[%s3929_s29 + $0x2e0] sm:$0xff]  ;;  %2228 = vmatpush2.bf16.msra.mxu0 %v3449_v50  ;;  %v3396_v42 = vcombine.high %v326_v38, %v330_v39  ;;  %v3395_v50 = vcombine.low %v326_v38, %v330_v39  ;;  %v410_v30 = vld [vmem:[%s3929_s29 + $0x3e8] sm:$0xff] }
  0x48   : > { %v501_v48 = vld [vmem:[%s3929_s29 + $0x6c0] sm:$0xff]  ;;  %v3442_v52 = vcombine.high %v373_v46, %v377_v47  ;;  %2268 = vmatprep.subr.bf16.mxu1 %v3578_v44  ;;  %v3441_v59 = vcombine.low %v373_v46, %v377_v47  ;;  %v3877_v46 = vmov 0   ;;  %v318_v47 = vld [vmem:[%s3929_s29 + $0x108] sm:$0xff] }
  0x49   : > { %v505_v49 = vld [vmem:[%s3929_s29 + $0x6e0] sm:$0xff]  ;;  %2269 = vmatpush2.bf16.msra.mxu1 %v3577_v51  ;;  %v398_v39 = vld [vmem:[%s3929_s29 + $0x388] sm:$0xff] }
  0x4a   : > { %v3570_v53 = vcombine.high %v501_v48, %v505_v49  ;;  %v365_v55 = vld [vmem:[%s3929_s29 + $0x280] sm:$0xff]  ;;  %2229 = vmatprep.subr.bf16.mxu0 %v3442_v52  ;;  %v3569_v60 = vcombine.low %v501_v48, %v505_v49  ;;  %v322_v48 = vld [vmem:[%s3929_s29 + $0x128] sm:$0xff] }
  0x4b   : > { %v369_v56 = vld [vmem:[%s3929_s29 + $0x2a0] sm:$0xff]  ;;  %2230 = vmatpush2.bf16.msra.mxu0 %v3441_v59  ;;  %v3388_v52 = vcombine.high %v318_v47, %v322_v48  ;;  %v3387_v59 = vcombine.low %v318_v47, %v322_v48  ;;  %v458_v47 = vld [vmem:[%s3929_s29 + $0x568] sm:$0xff] }
  0x4c   : > { %v493_v57 = vld [vmem:[%s3929_s29 + $0x680] sm:$0xff]  ;;  %v3434_v61 = vcombine.high %v365_v55, %v369_v56  ;;  %2270 = vmatprep.subr.bf16.mxu1 %v3570_v53  ;;  %v3433_v4 = vcombine.low %v365_v55, %v369_v56  ;;  %v310_v56 = vld [vmem:[%s3929_s29 + $0xc8] sm:$0xff] }
  0x4d   : > { %v497_v58 = vld [vmem:[%s3929_s29 + $0x6a0] sm:$0xff]  ;;  %2271 = vmatpush2.bf16.msra.mxu1 %v3569_v60  ;;  %v390_v48 = vld [vmem:[%s3929_s29 + $0x348] sm:$0xff] }
  0x4e   : > { %v3562_v62 = vcombine.high %v493_v57, %v497_v58  ;;  %v357_v63 = vld [vmem:[%s3929_s29 + $0x240] sm:$0xff]  ;;  %2231 = vmatprep.subr.bf16.mxu0 %v3434_v61  ;;  %v3561_v5 = vcombine.low %v493_v57, %v497_v58  ;;  %v314_v57 = vld [vmem:[%s3929_s29 + $0xe8] sm:$0xff] }
  0x4f   : > { %v361_v1 = vld [vmem:[%s3929_s29 + $0x260] sm:$0xff]  ;;  %2232 = vmatpush2.bf16.msra.mxu0 %v3433_v4  ;;  %v3380_v61 = vcombine.high %v310_v56, %v314_v57  ;;  %v3379_v4 = vcombine.low %v310_v56, %v314_v57  ;;  %v450_v56 = vld [vmem:[%s3929_s29 + $0x528] sm:$0xff] }
  0x50   : > { %v485_v2 = vld [vmem:[%s3929_s29 + $0x640] sm:$0xff]  ;;  %v3426_v7 = vcombine.high %v357_v63, %v361_v1  ;;  %2272 = vmatprep.subr.bf16.mxu1 %v3562_v62  ;;  %v3425_v14 = vcombine.low %v357_v63, %v361_v1  ;;  %v302_v1 = vld [vmem:[%s3929_s29 + $0x88] sm:$0xff] }
  0x51   : > { %v489_v3 = vld [vmem:[%s3929_s29 + $0x660] sm:$0xff]  ;;  %2273 = vmatpush2.bf16.msra.mxu1 %v3561_v5  ;;  %v382_v57 = vld [vmem:[%s3929_s29 + $0x308] sm:$0xff] }
  0x52   : > { %v3554_v8 = vcombine.high %v485_v2, %v489_v3  ;;  %v349_v9 = vld [vmem:[%s3929_s29 + $0x200] sm:$0xff]  ;;  %2233 = vmatprep.subr.bf16.mxu0 %v3426_v7  ;;  %v3553_v15 = vcombine.low %v485_v2, %v489_v3  ;;  %v306_v2 = vld [vmem:[%s3929_s29 + $0xa8] sm:$0xff] }
  0x53   : > { %v353_v10 = vld [vmem:[%s3929_s29 + $0x220] sm:$0xff]  ;;  %2234 = vmatpush2.bf16.msra.mxu0 %v3425_v14  ;;  %v3372_v7 = vcombine.high %v302_v1, %v306_v2  ;;  %v3371_v14 = vcombine.low %v302_v1, %v306_v2  ;;  %v442_v1 = vld [vmem:[%s3929_s29 + $0x4e8] sm:$0xff] }
  0x54   : > { %v477_v11 = vld [vmem:[%s3929_s29 + $0x600] sm:$0xff]  ;;  %v3418_v16 = vcombine.high %v349_v9, %v353_v10  ;;  %2274 = vmatprep.subr.bf16.mxu1 %v3554_v8  ;;  %v3417_v23 = vcombine.low %v349_v9, %v353_v10  ;;  %v294_v10 = vld [vmem:[%s3929_s29 + $0x48] sm:$0xff] }
  0x55   : > { %v481_v13 = vld [vmem:[%s3929_s29 + $0x620] sm:$0xff]  ;;  %2275 = vmatpush2.bf16.msra.mxu1 %v3553_v15  ;;  %v374_v2 = vld [vmem:[%s3929_s29 + $0x2c8] sm:$0xff] }
  0x56   : > { %v3546_v18 = vcombine.high %v477_v11, %v481_v13  ;;  %v597_v19 = vld [vmem:[%s3929_s29 + $0x9c0] sm:$0xff]  ;;  %2235 = vmatprep.subr.bf16.mxu0 %v3418_v16  ;;  %v3545_v24 = vcombine.low %v477_v11, %v481_v13  ;;  %v298_v11 = vld [vmem:[%s3929_s29 + $0x68] sm:$0xff] }
  0x57   : > { %v601_v20 = vld [vmem:[%s3929_s29 + $0x9e0] sm:$0xff]  ;;  %2236 = vmatpush2.bf16.msra.mxu0 %v3417_v23  ;;  %v3364_v16 = vcombine.high %v294_v10, %v298_v11  ;;  %v3363_v23 = vcombine.low %v294_v10, %v298_v11  ;;  %v434_v10 = vld [vmem:[%s3929_s29 + $0x4a8] sm:$0xff] }
  0x58   : > { %v3666_v25 = vcombine.high %v597_v19, %v601_v20  ;;  %2276 = vmatprep.subr.bf16.mxu1 %v3546_v18  ;;  %v589_v27 = vld [vmem:[%s3929_s29 + $0x980] sm:$0xff]  ;;  %v3665_v33 = vcombine.low %v597_v19, %v601_v20  ;;  %v286_v20 = vld [vmem:[%s3929_s29 + $0x8] sm:$0xff] }
  0x59   : > { %v593_v28 = vld [vmem:[%s3929_s29 + $0x9a0] sm:$0xff]  ;;  %2277 = vmatpush2.bf16.msra.mxu1 %v3545_v24  ;;  %v366_v11 = vld [vmem:[%s3929_s29 + $0x288] sm:$0xff] }
  0x5a   : > { %2287 = vmatprep.subr.bf16.mxu0 %v3666_v25  ;;  %v3658_v35 = vcombine.high %v589_v27, %v593_v28  ;;  %2328 = vmatprep.subr.bf16.mxu1 %v3412_v26  ;;  %v581_v37 = vld [vmem:[%s3929_s29 + $0x940] sm:$0xff]  ;;  %v3657_v6 = vcombine.low %v589_v27, %v593_v28  ;;  %v3356_v25 = vcombine.high %v286_v20, %v290_v21  ;;  %v470_v26 = vld [vmem:[%s3929_s29 + $0x5c8] sm:$0xff] }
  0x5b   : > { %v585_v0 = vld [vmem:[%s3929_s29 + $0x960] sm:$0xff]  ;;  %2238 = vmatmul.mubr.bf16.vlgmr.msra.gmra.mxu0 %v4026_v29  ;;  %v474_v27 = vld [vmem:[%s3929_s29 + $0x5e8] sm:$0xff] }
  0x5c   : > { %2279 = vmatmul.mubr.bf16.vlgmr.msra.gmra.mxu1 %v4032_v32  ;;  %2288 = vmatpush1.bf16.msra.mxu0 %v3665_v33  ;;  %v3650_v41 = vcombine.high %v581_v37, %v585_v0  ;;  %v573_v43 = vld [vmem:[%s3929_s29 + $0x900] sm:$0xff]  ;;  %v3649_v49 = vcombine.low %v581_v37, %v585_v0  ;;  %v406_v28 = vld [vmem:[%s3929_s29 + $0x3c8] sm:$0xff] }
  0x5d   : > { %2329 = vmatpush1.bf16.msra.mxu1 %v3411_v34  ;;  %2289 = vmatprep.subr.bf16.mxu0 %v3658_v35  ;;  %v577_v44 = vld [vmem:[%s3929_s29 + $0x920] sm:$0xff]  ;;  %v3352_v33 = vld.sshfl [vmem:[%s3924_s25 + $0x8] sm:$0x3 pattern:$0x76325410]  ;;  %v3355_v34 = vcombine.low %v286_v20, %v290_v21  ;;  %v3540_v35 = vcombine.high %v470_v26, %v474_v27 }
  0x5e   : > { %2330 = vmatprep.subr.bf16.mxu1 %v3404_v36  ;;  %2319 = vmatprep.mubr.bf16.mxu0 %v3877_v46  ;;  %v3642_v51 = vcombine.high %v573_v43, %v577_v44  ;;  %v565_v53 = vld [vmem:[%s3929_s29 + $0x8c0] sm:$0xff]  ;;  %v3641_v58 = vcombine.low %v573_v43, %v577_v44  ;;  %v3476_v36 = vcombine.high %v406_v28, %v410_v30  ;;  %v462_v37 = vld [vmem:[%s3929_s29 + $0x588] sm:$0xff] }
  0x5f   : > { %2360 = vmatprep.mubr.bf16.mxu1 %v3980_v12  ;;  %v569_v55 = vld [vmem:[%s3929_s29 + $0x8e0] sm:$0xff]  ;;  %v466_v0 = vld [vmem:[%s3929_s29 + $0x5a8] sm:$0xff]  ;;  %v4069_v38 = vpack.c.bf16 %v3352_v33, %v3352_v33 }
  0x60   : > { %2290 = vmatpush1.bf16.msra.mxu0 %v3657_v6  ;;  %v3634_v60 = vcombine.high %v565_v53, %v569_v55  ;;  %v557_v62 = vld [vmem:[%s3929_s29 + $0x880] sm:$0xff]  ;;  %v3633_v3 = vcombine.low %v565_v53, %v569_v55  ;;  %v402_v6 = vld [vmem:[%s3929_s29 + $0x3a8] sm:$0xff] }
  0x61   : > { %2331 = vmatpush1.bf16.msra.mxu1 %v3403_v40  ;;  %2291 = vmatprep.subr.bf16.mxu0 %v3650_v41  ;;  %v561_v63 = vld [vmem:[%s3929_s29 + $0x8a0] sm:$0xff]  ;;  %v3539_v40 = vcombine.low %v470_v26, %v474_v27  ;;  %v3475_v41 = vcombine.low %v406_v28, %v410_v30  ;;  %v3468_v43 = vcombine.high %v398_v39, %v402_v6  ;;  %v454_v44 = vld [vmem:[%s3929_s29 + $0x548] sm:$0xff] }
  0x62   : > { %2332 = vmatprep.subr.bf16.mxu1 %v3396_v42  ;;  %v3626_v5 = vcombine.high %v557_v62, %v561_v63  ;;  %v549_v8 = vld [vmem:[%s3929_s29 + $0x840] sm:$0xff]  ;;  %v3625_v13 = vcombine.low %v557_v62, %v561_v63  ;;  %v3532_v42 = vcombine.high %v462_v37, %v466_v0  ;;  %v446_v55 = vld [vmem:[%s3929_s29 + $0x508] sm:$0xff] }
  0x63   : > { %v553_v9 = vld [vmem:[%s3929_s29 + $0x860] sm:$0xff]  ;;  %v438_v63 = vld [vmem:[%s3929_s29 + $0x4c8] sm:$0xff] }
  0x64   : > { %2292 = vmatpush1.bf16.msra.mxu0 %v3649_v49  ;;  %v3618_v15 = vcombine.high %v549_v8, %v553_v9  ;;  %v541_v18 = vld [vmem:[%s3929_s29 + $0x800] sm:$0xff]  ;;  %v3617_v22 = vcombine.low %v549_v8, %v553_v9  ;;  %v394_v49 = vld [vmem:[%s3929_s29 + $0x368] sm:$0xff] }
  0x65   : > { %2333 = vmatpush1.bf16.msra.mxu1 %v3395_v50  ;;  %2293 = vmatprep.subr.bf16.mxu0 %v3642_v51  ;;  %v545_v19 = vld [vmem:[%s3929_s29 + $0x820] sm:$0xff]  ;;  %v3531_v50 = vcombine.low %v462_v37, %v466_v0  ;;  %v3467_v51 = vcombine.low %v398_v39, %v402_v6  ;;  %v3460_v53 = vcombine.high %v390_v48, %v394_v49  ;;  %v430_v9 = vld [vmem:[%s3929_s29 + $0x488] sm:$0xff] }
  0x66   : > { %2334 = vmatprep.subr.bf16.mxu1 %v3388_v52  ;;  %v3610_v24 = vcombine.high %v541_v18, %v545_v19  ;;  %v3609_v31 = vcombine.low %v541_v18, %v545_v19  ;;  %v3524_v52 = vcombine.high %v454_v44, %v458_v47  ;;  %v422_v19 = vld [vmem:[%s3929_s29 + $0x448] sm:$0xff] }
  0x67   : > { %v426_v20 = vld [vmem:[%s3929_s29 + $0x468] sm:$0xff] }
  0x68   : > { %2294 = vmatpush1.bf16.msra.mxu0 %v3641_v58  ;;  %v386_v58 = vld [vmem:[%s3929_s29 + $0x328] sm:$0xff]  ;;  %v3491_v33 = vcombine.low %v422_v19, %v426_v20 }
  0x69   : > { %2335 = vmatpush1.bf16.msra.mxu1 %v3387_v59  ;;  %2295 = vmatprep.subr.bf16.mxu0 %v3634_v60  ;;  %v3523_v59 = vcombine.low %v454_v44, %v458_v47  ;;  %v3459_v60 = vcombine.low %v390_v48, %v394_v49  ;;  %v3452_v62 = vcombine.high %v382_v57, %v386_v58  ;;  %v358_v21 = vld [vmem:[%s3929_s29 + $0x248] sm:$0xff] }
  0x6a   : > { %2336 = vmatprep.subr.bf16.mxu1 %v3380_v61  ;;  %v3516_v61 = vcombine.high %v446_v55, %v450_v56  ;;  %v414_v27 = vld [vmem:[%s3929_s29 + $0x408] sm:$0xff] }
  0x6b   : > { %v418_v28 = vld [vmem:[%s3929_s29 + $0x428] sm:$0xff] }
  0x6c   : > { %2296 = vmatpush1.bf16.msra.mxu0 %v3633_v3  ;;  %v378_v3 = vld [vmem:[%s3929_s29 + $0x2e8] sm:$0xff] }
  0x6d   : > { %2337 = vmatpush1.bf16.msra.mxu1 %v3379_v4  ;;  %2297 = vmatprep.subr.bf16.mxu0 %v3626_v5  ;;  %v3515_v4 = vcombine.low %v446_v55, %v450_v56  ;;  %v3451_v5 = vcombine.low %v382_v57, %v386_v58  ;;  %v3444_v8 = vcombine.high %v374_v2, %v378_v3  ;;  %v350_v30 = vld [vmem:[%s3929_s29 + $0x208] sm:$0xff] }
  0x6e   : > { %2338 = vmatprep.subr.bf16.mxu1 %v3372_v7  ;;  %v3508_v7 = vcombine.high %v438_v63, %v442_v1  ;;  %v534_v37 = vld [vmem:[%s3929_s29 + $0x7c8] sm:$0xff] }
  0x6f   : > { %v538_v0 = vld [vmem:[%s3929_s29 + $0x7e8] sm:$0xff] }
  0x70   : > { %2298 = vmatpush1.bf16.msra.mxu0 %v3625_v13  ;;  %v370_v13 = vld [vmem:[%s3929_s29 + $0x2a8] sm:$0xff] }
  0x71   : > { %2339 = vmatpush1.bf16.msra.mxu1 %v3371_v14  ;;  %2299 = vmatprep.subr.bf16.mxu0 %v3618_v15  ;;  %v3507_v14 = vcombine.low %v438_v63, %v442_v1  ;;  %v3443_v15 = vcombine.low %v374_v2, %v378_v3  ;;  %v3436_v18 = vcombine.high %v366_v11, %v370_v13  ;;  %v598_v39 = vld [vmem:[%s3929_s29 + $0x9c8] sm:$0xff] }
  0x72   : > { %2340 = vmatprep.subr.bf16.mxu1 %v3364_v16  ;;  %v3500_v16 = vcombine.high %v430_v9, %v434_v10  ;;  %v602_v6 = vld [vmem:[%s3929_s29 + $0x9e8] sm:$0xff] }
  0x73   : > { %v526_v44 = vld [vmem:[%s3929_s29 + $0x788] sm:$0xff] }
  0x74   : > { %2300 = vmatpush1.bf16.msra.mxu0 %v3617_v22  ;;  %v362_v22 = vld [vmem:[%s3929_s29 + $0x268] sm:$0xff] }
  0x75   : > { %2341 = vmatpush1.bf16.msra.mxu1 %v3363_v23  ;;  %2301 = vmatprep.subr.bf16.mxu0 %v3610_v24  ;;  %v3499_v23 = vcombine.low %v430_v9, %v434_v10  ;;  %v3435_v24 = vcombine.low %v366_v11, %v370_v13  ;;  %v3428_v26 = vcombine.high %v358_v21, %v362_v22  ;;  %v530_v47 = vld [vmem:[%s3929_s29 + $0x7a8] sm:$0xff] }
  0x76   : > { %2342 = vmatprep.subr.bf16.mxu1 %v3356_v25  ;;  %v3492_v25 = vcombine.high %v422_v19, %v426_v20  ;;  %v590_v48 = vld [vmem:[%s3929_s29 + $0x988] sm:$0xff] }
  0x77   : > { %v594_v49 = vld [vmem:[%s3929_s29 + $0x9a8] sm:$0xff] }
  0x78   : > { %2302 = vmatpush1.bf16.msra.mxu0 %v3609_v31  ;;  %v354_v31 = vld [vmem:[%s3929_s29 + $0x228] sm:$0xff] }
  0x79   : > { %2343 = vmatpush1.bf16.msra.mxu1 %v3355_v34  ;;  %2369 = vmatprep.subr.bf16.mxu0 %v3540_v35  ;;  %v3427_v34 = vcombine.low %v358_v21, %v362_v22  ;;  %v3484_v35 = vcombine.high %v414_v27, %v418_v28  ;;  %v518_v55 = vld [vmem:[%s3929_s29 + $0x748] sm:$0xff] }
  0x7a   : > { %2344 = vmatprep.subr.bf16.mxu1 %v3476_v36  ;;  %v3420_v36 = vcombine.high %v350_v30, %v354_v31  ;;  %v522_v56 = vld [vmem:[%s3929_s29 + $0x768] sm:$0xff] }
  0x7b   : > { %2320 = vmatmul.mubr.bf16.vlgmr.msra.gmra.mxu0 %v4069_v38  ;;  %v582_v57 = vld [vmem:[%s3929_s29 + $0x948] sm:$0xff] }
  0x7c   : > { %2370 = vmatpush1.bf16.msra.mxu0 %v3539_v40  ;;  %2401 = vmatprep.mubr.bf16.mxu0 %v3987_v17  ;;  %v3483_v40 = vcombine.low %v414_v27, %v418_v28  ;;  %v586_v58 = vld [vmem:[%s3929_s29 + $0x968] sm:$0xff] }
  0x7d   : > { %2345 = vmatpush2.bf16.msra.mxu1 %v3475_v41  ;;  %2371 = vmatprep.subr.bf16.mxu0 %v3532_v42  ;;  %v3419_v41 = vcombine.low %v350_v30, %v354_v31  ;;  %v3604_v42 = vcombine.high %v534_v37, %v538_v0  ;;  %v510_v63 = vld [vmem:[%s3929_s29 + $0x708] sm:$0xff] }
  0x7e   : > { %2346 = vmatprep.subr.bf16.mxu1 %v3468_v43  ;;  %v3668_v43 = vcombine.high %v598_v39, %v602_v6  ;;  %v514_v1 = vld [vmem:[%s3929_s29 + $0x728] sm:$0xff] }
  0x7f   : > { %v574_v2 = vld [vmem:[%s3929_s29 + $0x908] sm:$0xff] }
  0x80   : > { %2372 = vmatpush1.bf16.msra.mxu0 %v3531_v50  ;;  %v3603_v50 = vcombine.low %v534_v37, %v538_v0  ;;  %v578_v3 = vld [vmem:[%s3929_s29 + $0x928] sm:$0xff] }
  0x81   : > { %2347 = vmatpush2.bf16.msra.mxu1 %v3467_v51  ;;  %2373 = vmatprep.subr.bf16.mxu0 %v3524_v52  ;;  %v3667_v51 = vcombine.low %v598_v39, %v602_v6  ;;  %v3596_v52 = vcombine.high %v526_v44, %v530_v47  ;;  %v502_v9 = vld [vmem:[%s3929_s29 + $0x6c8] sm:$0xff] }
  0x82   : > { %2348 = vmatprep.subr.bf16.mxu1 %v3460_v53  ;;  %v3660_v53 = vcombine.high %v590_v48, %v594_v49  ;;  %v506_v10 = vld [vmem:[%s3929_s29 + $0x6e8] sm:$0xff] }
  0x83   : > { %v566_v11 = vld [vmem:[%s3929_s29 + $0x8c8] sm:$0xff] }
  0x84   : > { %2374 = vmatpush1.bf16.msra.mxu0 %v3523_v59  ;;  %v3595_v59 = vcombine.low %v526_v44, %v530_v47  ;;  %v570_v13 = vld [vmem:[%s3929_s29 + $0x8e8] sm:$0xff]  ;;  %v343_v44 = vld [vmem:[%s3929_s29 + $0x1d0] sm:$0xff] }
  0x85   : > { %2349 = vmatpush2.bf16.msra.mxu1 %v3459_v60  ;;  %2375 = vmatprep.subr.bf16.mxu0 %v3516_v61  ;;  %v3659_v60 = vcombine.low %v590_v48, %v594_v49  ;;  %v3588_v61 = vcombine.high %v518_v55, %v522_v56  ;;  %v494_v19 = vld [vmem:[%s3929_s29 + $0x688] sm:$0xff]  ;;  %v347_v47 = vld [vmem:[%s3929_s29 + $0x1f0] sm:$0xff] }
  0x86   : > { %2350 = vmatprep.subr.bf16.mxu1 %v3452_v62  ;;  %v3652_v62 = vcombine.high %v582_v57, %v586_v58  ;;  %v498_v20 = vld [vmem:[%s3929_s29 + $0x6a8] sm:$0xff]  ;;  %v471_v48 = vld [vmem:[%s3929_s29 + $0x5d0] sm:$0xff] }
  0x87   : > { %v558_v21 = vld [vmem:[%s3929_s29 + $0x888] sm:$0xff]  ;;  %v475_v49 = vld [vmem:[%s3929_s29 + $0x5f0] sm:$0xff] }
  0x88   : > { %2376 = vmatpush1.bf16.msra.mxu0 %v3515_v4  ;;  %v3587_v4 = vcombine.low %v518_v55, %v522_v56  ;;  %v562_v22 = vld [vmem:[%s3929_s29 + $0x8a8] sm:$0xff]  ;;  %v335_v55 = vld [vmem:[%s3929_s29 + $0x190] sm:$0xff] }
  0x89   : > { %2351 = vmatpush2.bf16.msra.mxu1 %v3451_v5  ;;  %2377 = vmatprep.subr.bf16.mxu0 %v3508_v7  ;;  %v3651_v5 = vcombine.low %v582_v57, %v586_v58  ;;  %v3580_v7 = vcombine.high %v510_v63, %v514_v1  ;;  %v486_v27 = vld [vmem:[%s3929_s29 + $0x648] sm:$0xff]  ;;  %v339_v56 = vld [vmem:[%s3929_s29 + $0x1b0] sm:$0xff] }
  0x8a   : > { %2352 = vmatprep.subr.bf16.mxu1 %v3444_v8  ;;  %v3644_v8 = vcombine.high %v574_v2, %v578_v3  ;;  %v490_v28 = vld [vmem:[%s3929_s29 + $0x668] sm:$0xff]  ;;  %v463_v57 = vld [vmem:[%s3929_s29 + $0x590] sm:$0xff] }
  0x8b   : > { %v550_v30 = vld [vmem:[%s3929_s29 + $0x848] sm:$0xff]  ;;  %v467_v58 = vld [vmem:[%s3929_s29 + $0x5b0] sm:$0xff] }
  0x8c   : > { %2378 = vmatpush1.bf16.msra.mxu0 %v3507_v14  ;;  %v3579_v14 = vcombine.low %v510_v63, %v514_v1  ;;  %v554_v31 = vld [vmem:[%s3929_s29 + $0x868] sm:$0xff]  ;;  %v327_v63 = vld [vmem:[%s3929_s29 + $0x150] sm:$0xff] }
  0x8d   : > { %2353 = vmatpush2.bf16.msra.mxu1 %v3443_v15  ;;  %2379 = vmatprep.subr.bf16.mxu0 %v3500_v16  ;;  %v3643_v15 = vcombine.low %v574_v2, %v578_v3  ;;  %v3572_v16 = vcombine.high %v502_v9, %v506_v10  ;;  %v478_v37 = vld [vmem:[%s3929_s29 + $0x608] sm:$0xff]  ;;  %v331_v1 = vld [vmem:[%s3929_s29 + $0x170] sm:$0xff] }
  0x8e   : > { %2354 = vmatprep.subr.bf16.mxu1 %v3436_v18  ;;  %v3636_v18 = vcombine.high %v566_v11, %v570_v13  ;;  %v482_v0 = vld [vmem:[%s3929_s29 + $0x628] sm:$0xff]  ;;  %v455_v2 = vld [vmem:[%s3929_s29 + $0x550] sm:$0xff] }
  0x8f   : > { %v542_v39 = vld [vmem:[%s3929_s29 + $0x808] sm:$0xff]  ;;  %v459_v3 = vld [vmem:[%s3929_s29 + $0x570] sm:$0xff] }
  0x90   : > { %2380 = vmatpush1.bf16.msra.mxu0 %v3499_v23  ;;  %v3571_v23 = vcombine.low %v502_v9, %v506_v10  ;;  %v546_v6 = vld [vmem:[%s3929_s29 + $0x828] sm:$0xff]  ;;  %v319_v9 = vld [vmem:[%s3929_s29 + $0x110] sm:$0xff] }
  0x91   : > { %2355 = vmatpush2.bf16.msra.mxu1 %v3435_v24  ;;  %2381 = vmatprep.subr.bf16.mxu0 %v3492_v25  ;;  %v3635_v24 = vcombine.low %v566_v11, %v570_v13  ;;  %v3564_v25 = vcombine.high %v494_v19, %v498_v20  ;;  %v323_v10 = vld [vmem:[%s3929_s29 + $0x130] sm:$0xff] }
  0x92   : > { %2356 = vmatprep.subr.bf16.mxu1 %v3428_v26  ;;  %v3628_v26 = vcombine.high %v558_v21, %v562_v22  ;;  %v447_v11 = vld [vmem:[%s3929_s29 + $0x510] sm:$0xff] }
  0x93   : > { %v451_v13 = vld [vmem:[%s3929_s29 + $0x530] sm:$0xff] }
  0x94   : > { %2382 = vmatpush1.bf16.msra.mxu0 %v3491_v33  ;;  %v3563_v33 = vcombine.low %v494_v19, %v498_v20  ;;  %v311_v19 = vld [vmem:[%s3929_s29 + $0xd0] sm:$0xff] }
  0x95   : > { %2357 = vmatpush2.bf16.msra.mxu1 %v3427_v34  ;;  %2383 = vmatprep.subr.bf16.mxu0 %v3484_v35  ;;  %v3627_v34 = vcombine.low %v558_v21, %v562_v22  ;;  %v3556_v35 = vcombine.high %v486_v27, %v490_v28  ;;  %v315_v20 = vld [vmem:[%s3929_s29 + $0xf0] sm:$0xff] }
  0x96   : > { %2358 = vmatprep.subr.bf16.mxu1 %v3420_v36  ;;  %v3620_v36 = vcombine.high %v550_v30, %v554_v31  ;;  %v439_v21 = vld [vmem:[%s3929_s29 + $0x4d0] sm:$0xff] }
  0x97   : > { %v443_v22 = vld [vmem:[%s3929_s29 + $0x4f0] sm:$0xff] }
  0x98   : > { %2384 = vmatpush1.bf16.msra.mxu0 %v3483_v40  ;;  %v3555_v40 = vcombine.low %v486_v27, %v490_v28  ;;  %v303_v27 = vld [vmem:[%s3929_s29 + $0x90] sm:$0xff] }
  0x99   : > { %2359 = vmatpush2.bf16.msra.mxu1 %v3419_v41  ;;  %2385 = vmatprep.subr.bf16.mxu0 %v3604_v42  ;;  %v3619_v41 = vcombine.low %v550_v30, %v554_v31  ;;  %v3548_v42 = vcombine.high %v478_v37, %v482_v0  ;;  %v307_v28 = vld [vmem:[%s3929_s29 + $0xb0] sm:$0xff] }
  0x9a   : > { %2410 = vmatprep.subr.bf16.mxu1 %v3668_v43  ;;  %v3612_v43 = vcombine.high %v542_v39, %v546_v6  ;;  %v431_v30 = vld [vmem:[%s3929_s29 + $0x490] sm:$0xff] }
  0x9b   : > { %v435_v31 = vld [vmem:[%s3929_s29 + $0x4b0] sm:$0xff] }
  0x9c   : > { %2361 = vmatmul.mubr.bf16.vlgmr.msra.gmra.mxu1 %v4026_v29  ;;  %2386 = vmatpush2.bf16.msra.mxu0 %v3603_v50  ;;  %v3547_v50 = vcombine.low %v478_v37, %v482_v0  ;;  %v295_v37 = vld [vmem:[%s3929_s29 + $0x50] sm:$0xff] }
  0x9d   : > { %2411 = vmatpush1.bf16.msra.mxu1 %v3667_v51  ;;  %2387 = vmatprep.subr.bf16.mxu0 %v3596_v52  ;;  %v3611_v51 = vcombine.low %v542_v39, %v546_v6  ;;  %v3414_v52 = vcombine.high %v343_v44, %v347_v47  ;;  %v299_v0 = vld [vmem:[%s3929_s29 + $0x70] sm:$0xff] }
  0x9e   : > { %2412 = vmatprep.subr.bf16.mxu1 %v3660_v53  ;;  %2442 = vmatprep.mubr.bf16.mxu1 %v3877_v46  ;;  %v3542_v53 = vcombine.high %v471_v48, %v475_v49  ;;  %v423_v39 = vld [vmem:[%s3929_s29 + $0x450] sm:$0xff] }
  0x9f   : > { %v427_v6 = vld [vmem:[%s3929_s29 + $0x470] sm:$0xff] }
  0xa0   : > { %2388 = vmatpush2.bf16.msra.mxu0 %v3595_v59  ;;  %v3413_v59 = vcombine.low %v343_v44, %v347_v47  ;;  %v287_v44 = vld [vmem:[%s3929_s29 + $0x10] sm:$0xff] }
  0xa1   : > { %2413 = vmatpush1.bf16.msra.mxu1 %v3659_v60  ;;  %2389 = vmatprep.subr.bf16.mxu0 %v3588_v61  ;;  %v3541_v60 = vcombine.low %v471_v48, %v475_v49  ;;  %v3406_v61 = vcombine.high %v335_v55, %v339_v56  ;;  %v291_v47 = vld [vmem:[%s3929_s29 + $0x30] sm:$0xff] }
  0xa2   : > { %2414 = vmatprep.subr.bf16.mxu1 %v3652_v62  ;;  %v3534_v62 = vcombine.high %v463_v57, %v467_v58  ;;  %v415_v48 = vld [vmem:[%s3929_s29 + $0x410] sm:$0xff] }
  0xa3   : > { %v419_v49 = vld [vmem:[%s3929_s29 + $0x430] sm:$0xff] }
  0xa4   : > { %2390 = vmatpush2.bf16.msra.mxu0 %v3587_v4  ;;  %v3405_v4 = vcombine.low %v335_v55, %v339_v56  ;;  %v407_v55 = vld [vmem:[%s3929_s29 + $0x3d0] sm:$0xff] }
  0xa5   : > { %2415 = vmatpush1.bf16.msra.mxu1 %v3651_v5  ;;  %2391 = vmatprep.subr.bf16.mxu0 %v3580_v7  ;;  %v3533_v5 = vcombine.low %v463_v57, %v467_v58  ;;  %v3398_v7 = vcombine.high %v327_v63, %v331_v1  ;;  %v411_v56 = vld [vmem:[%s3929_s29 + $0x3f0] sm:$0xff] }
  0xa6   : > { %2416 = vmatprep.subr.bf16.mxu1 %v3644_v8  ;;  %v3526_v8 = vcombine.high %v455_v2, %v459_v3  ;;  %v535_v57 = vld [vmem:[%s3929_s29 + $0x7d0] sm:$0xff] }
  0xa7   : > { %v539_v58 = vld [vmem:[%s3929_s29 + $0x7f0] sm:$0xff] }
  0xa8   : > { %2392 = vmatpush2.bf16.msra.mxu0 %v3579_v14  ;;  %v3397_v14 = vcombine.low %v327_v63, %v331_v1  ;;  %v399_v63 = vld [vmem:[%s3929_s29 + $0x390] sm:$0xff] }
  0xa9   : > { %2417 = vmatpush1.bf16.msra.mxu1 %v3643_v15  ;;  %2393 = vmatprep.subr.bf16.mxu0 %v3572_v16  ;;  %v3525_v15 = vcombine.low %v455_v2, %v459_v3  ;;  %v3390_v16 = vcombine.high %v319_v9, %v323_v10  ;;  %v403_v1 = vld [vmem:[%s3929_s29 + $0x3b0] sm:$0xff] }
  0xaa   : > { %2418 = vmatprep.subr.bf16.mxu1 %v3636_v18  ;;  %v3518_v18 = vcombine.high %v447_v11, %v451_v13  ;;  %v527_v2 = vld [vmem:[%s3929_s29 + $0x790] sm:$0xff] }
  0xab   : > { %v531_v3 = vld [vmem:[%s3929_s29 + $0x7b0] sm:$0xff] }
  0xac   : > { %2394 = vmatpush2.bf16.msra.mxu0 %v3571_v23  ;;  %v3389_v23 = vcombine.low %v319_v9, %v323_v10  ;;  %v391_v9 = vld [vmem:[%s3929_s29 + $0x350] sm:$0xff] }
  0xad   : > { %2419 = vmatpush1.bf16.msra.mxu1 %v3635_v24  ;;  %2395 = vmatprep.subr.bf16.mxu0 %v3564_v25  ;;  %v3517_v24 = vcombine.low %v447_v11, %v451_v13  ;;  %v3382_v25 = vcombine.high %v311_v19, %v315_v20  ;;  %v395_v10 = vld [vmem:[%s3929_s29 + $0x370] sm:$0xff] }
  0xae   : > { %2420 = vmatprep.subr.bf16.mxu1 %v3628_v26  ;;  %v3510_v26 = vcombine.high %v439_v21, %v443_v22  ;;  %v519_v11 = vld [vmem:[%s3929_s29 + $0x750] sm:$0xff] }
  0xaf   : > { %v523_v13 = vld [vmem:[%s3929_s29 + $0x770] sm:$0xff] }
  0xb0   : > { %2396 = vmatpush2.bf16.msra.mxu0 %v3563_v33  ;;  %v3381_v33 = vcombine.low %v311_v19, %v315_v20  ;;  %v383_v19 = vld [vmem:[%s3929_s29 + $0x310] sm:$0xff] }
  0xb1   : > { %2421 = vmatpush1.bf16.msra.mxu1 %v3627_v34  ;;  %2397 = vmatprep.subr.bf16.mxu0 %v3556_v35  ;;  %v3509_v34 = vcombine.low %v439_v21, %v443_v22  ;;  %v3374_v35 = vcombine.high %v303_v27, %v307_v28  ;;  %v387_v20 = vld [vmem:[%s3929_s29 + $0x330] sm:$0xff] }
  0xb2   : > { %2422 = vmatprep.subr.bf16.mxu1 %v3620_v36  ;;  %v3502_v36 = vcombine.high %v431_v30, %v435_v31  ;;  %v511_v21 = vld [vmem:[%s3929_s29 + $0x710] sm:$0xff] }
  0xb3   : > { %v515_v22 = vld [vmem:[%s3929_s29 + $0x730] sm:$0xff] }
  0xb4   : > { %2398 = vmatpush2.bf16.msra.mxu0 %v3555_v40  ;;  %v3373_v40 = vcombine.low %v303_v27, %v307_v28  ;;  %v375_v27 = vld [vmem:[%s3929_s29 + $0x2d0] sm:$0xff] }
  0xb5   : > { %2423 = vmatpush1.bf16.msra.mxu1 %v3619_v41  ;;  %2399 = vmatprep.subr.bf16.mxu0 %v3548_v42  ;;  %v3501_v41 = vcombine.low %v431_v30, %v435_v31  ;;  %v3366_v42 = vcombine.high %v295_v37, %v299_v0  ;;  %v379_v28 = vld [vmem:[%s3929_s29 + $0x2f0] sm:$0xff] }
  0xb6   : > { %2424 = vmatprep.subr.bf16.mxu1 %v3612_v43  ;;  %v3494_v43 = vcombine.high %v423_v39, %v427_v6  ;;  %v503_v30 = vld [vmem:[%s3929_s29 + $0x6d0] sm:$0xff] }
  0xb7   : > { %v507_v31 = vld [vmem:[%s3929_s29 + $0x6f0] sm:$0xff] }
  0xb8   : > { %2400 = vmatpush2.bf16.msra.mxu0 %v3547_v50  ;;  %v3365_v50 = vcombine.low %v295_v37, %v299_v0  ;;  %v367_v37 = vld [vmem:[%s3929_s29 + $0x290] sm:$0xff] }
  0xb9   : > { %2425 = vmatpush1.bf16.msra.mxu1 %v3611_v51  ;;  %2451 = vmatprep.subr.bf16.mxu0 %v3414_v52  ;;  %v3493_v51 = vcombine.low %v423_v39, %v427_v6  ;;  %v3358_v52 = vcombine.high %v287_v44, %v291_v47  ;;  %v371_v0 = vld [vmem:[%s3929_s29 + $0x2b0] sm:$0xff] }
  0xba   : > { %2492 = vmatprep.subr.bf16.mxu1 %v3542_v53  ;;  %v3486_v53 = vcombine.high %v415_v48, %v419_v49  ;;  %v495_v39 = vld [vmem:[%s3929_s29 + $0x690] sm:$0xff] }
  0xbb   : > { %2402 = vmatmul.mubr.bf16.vlgmr.msra.gmra.mxu0 %v4032_v32  ;;  %v499_v6 = vld [vmem:[%s3929_s29 + $0x6b0] sm:$0xff] }
  0xbc   : > { %2443 = vmatmul.mubr.bf16.vlgmr.msra.gmra.mxu1 %v4069_v38  ;;  %2452 = vmatpush1.bf16.msra.mxu0 %v3413_v59  ;;  %v3357_v59 = vcombine.low %v287_v44, %v291_v47  ;;  %v359_v44 = vld [vmem:[%s3929_s29 + $0x250] sm:$0xff] }
  0xbd   : > { %2493 = vmatpush1.bf16.msra.mxu1 %v3541_v60  ;;  %2453 = vmatprep.subr.bf16.mxu0 %v3406_v61  ;;  %v3485_v60 = vcombine.low %v415_v48, %v419_v49  ;;  %v3478_v61 = vcombine.high %v407_v55, %v411_v56  ;;  %v363_v47 = vld [vmem:[%s3929_s29 + $0x270] sm:$0xff] }
  0xbe   : > { %2494 = vmatprep.subr.bf16.mxu1 %v3534_v62  ;;  %2483 = vmatprep.mubr.bf16.mxu0 %v3980_v12  ;;  %v3606_v62 = vcombine.high %v535_v57, %v539_v58  ;;  %v487_v48 = vld [vmem:[%s3929_s29 + $0x650] sm:$0xff] }
  0xbf   : > { %2524 = vmatprep.mubr.bf16.mxu1 %v3987_v17  ;;  %v491_v49 = vld [vmem:[%s3929_s29 + $0x670] sm:$0xff] }
  0xc0   : > { %2454 = vmatpush1.bf16.msra.mxu0 %v3405_v4  ;;  %v3477_v4 = vcombine.low %v407_v55, %v411_v56  ;;  %v351_v55 = vld [vmem:[%s3929_s29 + $0x210] sm:$0xff] }
  0xc1   : > { %2495 = vmatpush1.bf16.msra.mxu1 %v3533_v5  ;;  %2455 = vmatprep.subr.bf16.mxu0 %v3398_v7  ;;  %v3605_v5 = vcombine.low %v535_v57, %v539_v58  ;;  %v3470_v7 = vcombine.high %v399_v63, %v403_v1  ;;  %v355_v56 = vld [vmem:[%s3929_s29 + $0x230] sm:$0xff] }
  0xc2   : > { %2496 = vmatprep.subr.bf16.mxu1 %v3526_v8  ;;  %v3598_v8 = vcombine.high %v527_v2, %v531_v3  ;;  %v479_v57 = vld [vmem:[%s3929_s29 + $0x610] sm:$0xff] }
  0xc3   : > { %v483_v58 = vld [vmem:[%s3929_s29 + $0x630] sm:$0xff] }
  0xc4   : > { %2456 = vmatpush1.bf16.msra.mxu0 %v3397_v14  ;;  %v3469_v14 = vcombine.low %v399_v63, %v403_v1  ;;  %v599_v63 = vld [vmem:[%s3929_s29 + $0x9d0] sm:$0xff] }
  0xc5   : > { %2497 = vmatpush1.bf16.msra.mxu1 %v3525_v15  ;;  %2457 = vmatprep.subr.bf16.mxu0 %v3390_v16  ;;  %v3597_v15 = vcombine.low %v527_v2, %v531_v3  ;;  %v3462_v16 = vcombine.high %v391_v9, %v395_v10  ;;  %v603_v1 = vld [vmem:[%s3929_s29 + $0x9f0] sm:$0xff]  ;;  %v344_v2 = vld [vmem:[%s3929_s29 + $0x1d8] sm:$0xff] }
  0xc6   : > { %2498 = vmatprep.subr.bf16.mxu1 %v3518_v18  ;;  %v3590_v18 = vcombine.high %v519_v11, %v523_v13  ;;  %v348_v3 = vld [vmem:[%s3929_s29 + $0x1f8] sm:$0xff] }
  0xc8   : > { %2458 = vmatpush1.bf16.msra.mxu0 %v3389_v23  ;;  %v3461_v23 = vcombine.low %v391_v9, %v395_v10  ;;  %v591_v9 = vld [vmem:[%s3929_s29 + $0x990] sm:$0xff] }
  0xc9   : > { %2499 = vmatpush1.bf16.msra.mxu1 %v3517_v24  ;;  %2459 = vmatprep.subr.bf16.mxu0 %v3382_v25  ;;  %v3589_v24 = vcombine.low %v519_v11, %v523_v13  ;;  %v3454_v25 = vcombine.high %v383_v19, %v387_v20  ;;  %v595_v10 = vld [vmem:[%s3929_s29 + $0x9b0] sm:$0xff]  ;;  %v336_v11 = vld [vmem:[%s3929_s29 + $0x198] sm:$0xff] }
  0xca   : > { %2500 = vmatprep.subr.bf16.mxu1 %v3510_v26  ;;  %v3582_v26 = vcombine.high %v511_v21, %v515_v22  ;;  %v340_v13 = vld [vmem:[%s3929_s29 + $0x1b8] sm:$0xff] }
  0xcc   : > { %2460 = vmatpush1.bf16.msra.mxu0 %v3381_v33  ;;  %v3453_v33 = vcombine.low %v383_v19, %v387_v20  ;;  %v583_v19 = vld [vmem:[%s3929_s29 + $0x950] sm:$0xff] }
  0xcd   : > { %2501 = vmatpush1.bf16.msra.mxu1 %v3509_v34  ;;  %2461 = vmatprep.subr.bf16.mxu0 %v3374_v35  ;;  %v3581_v34 = vcombine.low %v511_v21, %v515_v22  ;;  %v3446_v35 = vcombine.high %v375_v27, %v379_v28  ;;  %v587_v20 = vld [vmem:[%s3929_s29 + $0x970] sm:$0xff]  ;;  %v328_v21 = vld [vmem:[%s3929_s29 + $0x158] sm:$0xff] }
  0xce   : > { %2502 = vmatprep.subr.bf16.mxu1 %v3502_v36  ;;  %v3574_v36 = vcombine.high %v503_v30, %v507_v31  ;;  %v332_v22 = vld [vmem:[%s3929_s29 + $0x178] sm:$0xff] }
  0xd0   : > { %2462 = vmatpush1.bf16.msra.mxu0 %v3373_v40  ;;  %v3445_v40 = vcombine.low %v375_v27, %v379_v28  ;;  %v575_v27 = vld [vmem:[%s3929_s29 + $0x910] sm:$0xff] }
  0xd1   : > { %2503 = vmatpush1.bf16.msra.mxu1 %v3501_v41  ;;  %2463 = vmatprep.subr.bf16.mxu0 %v3366_v42  ;;  %v3573_v41 = vcombine.low %v503_v30, %v507_v31  ;;  %v3438_v42 = vcombine.high %v367_v37, %v371_v0  ;;  %v579_v28 = vld [vmem:[%s3929_s29 + $0x930] sm:$0xff]  ;;  %v320_v30 = vld [vmem:[%s3929_s29 + $0x118] sm:$0xff] }
  0xd2   : > { %2504 = vmatprep.subr.bf16.mxu1 %v3494_v43  ;;  %v3566_v43 = vcombine.high %v495_v39, %v499_v6  ;;  %v324_v31 = vld [vmem:[%s3929_s29 + $0x138] sm:$0xff] }
  0xd4   : > { %2464 = vmatpush1.bf16.msra.mxu0 %v3365_v50  ;;  %v3437_v50 = vcombine.low %v367_v37, %v371_v0  ;;  %v567_v37 = vld [vmem:[%s3929_s29 + $0x8d0] sm:$0xff] }
  0xd5   : > { %2505 = vmatpush1.bf16.msra.mxu1 %v3493_v51  ;;  %2465 = vmatprep.subr.bf16.mxu0 %v3358_v52  ;;  %v3565_v51 = vcombine.low %v495_v39, %v499_v6  ;;  %v3430_v52 = vcombine.high %v359_v44, %v363_v47  ;;  %v571_v0 = vld [vmem:[%s3929_s29 + $0x8f0] sm:$0xff]  ;;  %v312_v39 = vld [vmem:[%s3929_s29 + $0xd8] sm:$0xff] }
  0xd6   : > { %2506 = vmatprep.subr.bf16.mxu1 %v3486_v53  ;;  %v3558_v53 = vcombine.high %v487_v48, %v491_v49  ;;  %v316_v6 = vld [vmem:[%s3929_s29 + $0xf8] sm:$0xff] }
  0xd8   : > { %2466 = vmatpush1.bf16.msra.mxu0 %v3357_v59  ;;  %v3429_v59 = vcombine.low %v359_v44, %v363_v47  ;;  %v563_v44 = vld [vmem:[%s3929_s29 + $0x8b0] sm:$0xff]  ;;  %v304_v47 = vld [vmem:[%s3929_s29 + $0x98] sm:$0xff] }
  0xd9   : > { %2507 = vmatpush1.bf16.msra.mxu1 %v3485_v60  ;;  %2467 = vmatprep.subr.bf16.mxu0 %v3478_v61  ;;  %v3557_v60 = vcombine.low %v487_v48, %v491_v49  ;;  %v3422_v61 = vcombine.high %v351_v55, %v355_v56  ;;  %v308_v48 = vld [vmem:[%s3929_s29 + $0xb8] sm:$0xff]  ;;  %v3637_v49 = vcombine.low %v567_v37, %v571_v0 }
  0xda   : > { %2508 = vmatprep.subr.bf16.mxu1 %v3606_v62  ;;  %v3550_v62 = vcombine.high %v479_v57, %v483_v58 }
  0xdc   : > { %2468 = vmatpush2.bf16.msra.mxu0 %v3477_v4  ;;  %v3421_v4 = vcombine.low %v351_v55, %v355_v56  ;;  %v555_v55 = vld [vmem:[%s3929_s29 + $0x870] sm:$0xff]  ;;  %v296_v56 = vld [vmem:[%s3929_s29 + $0x58] sm:$0xff] }
  0xdd   : > { %2509 = vmatpush2.bf16.msra.mxu1 %v3605_v5  ;;  %2469 = vmatprep.subr.bf16.mxu0 %v3470_v7  ;;  %v3549_v5 = vcombine.low %v479_v57, %v483_v58  ;;  %v3670_v7 = vcombine.high %v599_v63, %v603_v1  ;;  %v300_v57 = vld [vmem:[%s3929_s29 + $0x78] sm:$0xff] }
  0xde   : > { %2510 = vmatprep.subr.bf16.mxu1 %v3598_v8  ;;  %v3416_v8 = vcombine.high %v344_v2, %v348_v3 }
  0xe0   : > { %2470 = vmatpush2.bf16.msra.mxu0 %v3469_v14  ;;  %v3669_v14 = vcombine.low %v599_v63, %v603_v1  ;;  %v547_v63 = vld [vmem:[%s3929_s29 + $0x830] sm:$0xff]  ;;  %v288_v1 = vld [vmem:[%s3929_s29 + $0x18] sm:$0xff] }
  0xe1   : > { %2511 = vmatpush2.bf16.msra.mxu1 %v3597_v15  ;;  %2471 = vmatprep.subr.bf16.mxu0 %v3462_v16  ;;  %v3415_v15 = vcombine.low %v344_v2, %v348_v3  ;;  %v3662_v16 = vcombine.high %v591_v9, %v595_v10  ;;  %v292_v2 = vld [vmem:[%s3929_s29 + $0x38] sm:$0xff] }
  0xe2   : > { %2512 = vmatprep.subr.bf16.mxu1 %v3590_v18  ;;  %v3408_v18 = vcombine.high %v336_v11, %v340_v13 }
  0xe4   : > { %2472 = vmatpush2.bf16.msra.mxu0 %v3461_v23  ;;  %v3661_v23 = vcombine.low %v591_v9, %v595_v10  ;;  %v476_v9 = vld [vmem:[%s3929_s29 + $0x5f8] sm:$0xff] }
  0xe5   : > { %2513 = vmatpush2.bf16.msra.mxu1 %v3589_v24  ;;  %2473 = vmatprep.subr.bf16.mxu0 %v3454_v25  ;;  %v3407_v24 = vcombine.low %v336_v11, %v340_v13  ;;  %v3654_v25 = vcombine.high %v583_v19, %v587_v20  ;;  %v408_v10 = vld [vmem:[%s3929_s29 + $0x3d8] sm:$0xff] }
  0xe6   : > { %2514 = vmatprep.subr.bf16.mxu1 %v3582_v26  ;;  %v3400_v26 = vcombine.high %v328_v21, %v332_v22  ;;  %v412_v11 = vld [vmem:[%s3929_s29 + $0x3f8] sm:$0xff] }
  0xe8   : > { %2474 = vmatpush2.bf16.msra.mxu0 %v3453_v33  ;;  %v3653_v33 = vcombine.low %v583_v19, %v587_v20  ;;  %v468_v19 = vld [vmem:[%s3929_s29 + $0x5b8] sm:$0xff] }
  0xe9   : > { %2515 = vmatpush2.bf16.msra.mxu1 %v3581_v34  ;;  %2475 = vmatprep.subr.bf16.mxu0 %v3446_v35  ;;  %v3399_v34 = vcombine.low %v328_v21, %v332_v22  ;;  %v3646_v35 = vcombine.high %v575_v27, %v579_v28  ;;  %v400_v20 = vld [vmem:[%s3929_s29 + $0x398] sm:$0xff] }
  0xea   : > { %2516 = vmatprep.subr.bf16.mxu1 %v3574_v36  ;;  %v3392_v36 = vcombine.high %v320_v30, %v324_v31  ;;  %v404_v21 = vld [vmem:[%s3929_s29 + $0x3b8] sm:$0xff] }
  0xec   : > { %2476 = vmatpush2.bf16.msra.mxu0 %v3445_v40  ;;  %v3645_v40 = vcombine.low %v575_v27, %v579_v28  ;;  %v460_v27 = vld [vmem:[%s3929_s29 + $0x578] sm:$0xff] }
  0xed   : > { %2517 = vmatpush2.bf16.msra.mxu1 %v3573_v41  ;;  %2477 = vmatprep.subr.bf16.mxu0 %v3438_v42  ;;  %v3638_v41 = vcombine.high %v567_v37, %v571_v0  ;;  %v3384_v42 = vcombine.high %v312_v39, %v316_v6  ;;  %v3471_v37 = vcombine.low %v400_v20, %v404_v21 }
  0xee   : > { %2518 = vmatprep.subr.bf16.mxu1 %v3566_v43  ;;  %v559_v43 = vld [vmem:[%s3929_s29 + $0x890] sm:$0xff] }
  0xef   : > { %v3629_v58 = vcombine.low %v559_v43, %v563_v44 }
  0xf0   : > { %2478 = vmatpush2.bf16.msra.mxu0 %v3437_v50  ;;  %v3383_v50 = vcombine.low %v312_v39, %v316_v6 }
  0xf1   : > { %2519 = vmatpush2.bf16.msra.mxu1 %v3565_v51  ;;  %2479 = vmatprep.subr.bf16.mxu0 %v3430_v52  ;;  %v3630_v51 = vcombine.high %v559_v43, %v563_v44  ;;  %v3376_v52 = vcombine.high %v304_v47, %v308_v48  ;;  %v384_v43 = vld [vmem:[%s3929_s29 + $0x318] sm:$0xff] }
  0xf2   : > { %2520 = vmatprep.subr.bf16.mxu1 %v3558_v53  ;;  %v551_v53 = vld [vmem:[%s3929_s29 + $0x850] sm:$0xff] }
  0xf3   : > { %v3621_v3 = vcombine.low %v551_v53, %v555_v55 }
  0xf4   : > { %2480 = vmatpush2.bf16.msra.mxu0 %v3429_v59  ;;  %v3375_v59 = vcombine.low %v304_v47, %v308_v48 }
  0xf5   : > { %2521 = vmatpush2.bf16.msra.mxu1 %v3557_v60  ;;  %2481 = vmatprep.subr.bf16.mxu0 %v3422_v61  ;;  %v3622_v60 = vcombine.high %v551_v53, %v555_v55  ;;  %v3368_v61 = vcombine.high %v296_v56, %v300_v57  ;;  %v440_v53 = vld [vmem:[%s3929_s29 + $0x4d8] sm:$0xff] }
  0xf6   : > { %2522 = vmatprep.subr.bf16.mxu1 %v3550_v62  ;;  %v543_v62 = vld [vmem:[%s3929_s29 + $0x810] sm:$0xff]  ;;  %v444_v55 = vld [vmem:[%s3929_s29 + $0x4f8] sm:$0xff] }
  0xf7   : > { %v3613_v13 = vcombine.low %v543_v62, %v547_v63 }
  0xf8   : > { %2482 = vmatpush2.bf16.msra.mxu0 %v3421_v4  ;;  %v3367_v4 = vcombine.low %v296_v56, %v300_v57  ;;  %v376_v56 = vld [vmem:[%s3929_s29 + $0x2d8] sm:$0xff] }
  0xf9   : > { %2523 = vmatpush2.bf16.msra.mxu1 %v3549_v5  ;;  %2533 = vmatprep.subr.bf16.mxu0 %v3670_v7  ;;  %v3614_v5 = vcombine.high %v543_v62, %v547_v63  ;;  %v3360_v7 = vcombine.high %v288_v1, %v292_v2  ;;  %v380_v57 = vld [vmem:[%s3929_s29 + $0x2f8] sm:$0xff] }
  0xfa   : > { %2574 = vmatprep.subr.bf16.mxu1 %v3416_v8  ;;  %v472_v8 = vld [vmem:[%s3929_s29 + $0x5d8] sm:$0xff] }
  0xfb   : > { %2484 = vmatmul.mubr.bf16.vlgmr.msra.gmra.mxu0 %v4026_v29  ;;  %v3543_v22 = vcombine.low %v472_v8, %v476_v9  ;;  %v432_v62 = vld [vmem:[%s3929_s29 + $0x498] sm:$0xff] }
  0xfc   : > { %2525 = vmatmul.mubr.bf16.vlgmr.msra.gmra.mxu1 %v4032_v32  ;;  %2534 = vmatpush1.bf16.msra.mxu0 %v3669_v14  ;;  %v3359_v14 = vcombine.low %v288_v1, %v292_v2  ;;  %v436_v63 = vld [vmem:[%s3929_s29 + $0x4b8] sm:$0xff] }
  0xfd   : > { %2575 = vmatpush1.bf16.msra.mxu1 %v3415_v15  ;;  %2535 = vmatprep.subr.bf16.mxu0 %v3662_v16  ;;  %v3544_v15 = vcombine.high %v472_v8, %v476_v9  ;;  %v3480_v16 = vcombine.high %v408_v10, %v412_v11  ;;  %v368_v1 = vld [vmem:[%s3929_s29 + $0x298] sm:$0xff] }
  0xfe   : > { %2576 = vmatprep.subr.bf16.mxu1 %v3408_v18  ;;  %2565 = vmatprep.mubr.bf16.mxu0 %v3877_v46  ;;  %v464_v18 = vld [vmem:[%s3929_s29 + $0x598] sm:$0xff] }
  0xff   : > { %2606 = vmatprep.mubr.bf16.mxu1 %v3980_v12  ;;  %v3391_v12 = vcombine.low %v320_v30, %v324_v31  ;;  %v392_v30 = vld [vmem:[%s3929_s29 + $0x358] sm:$0xff] }
 0x100   : > { %2536 = vmatpush1.bf16.msra.mxu0 %v3661_v23  ;;  %v3479_v23 = vcombine.low %v408_v10, %v412_v11  ;;  %v396_v31 = vld [vmem:[%s3929_s29 + $0x378] sm:$0xff] }
 0x101   : > { %2577 = vmatpush1.bf16.msra.mxu1 %v3407_v24  ;;  %2537 = vmatprep.subr.bf16.mxu0 %v3654_v25  ;;  %v3536_v24 = vcombine.high %v464_v18, %v468_v19  ;;  %v3472_v25 = vcombine.high %v400_v20, %v404_v21  ;;  %v3464_v6 = vcombine.high %v392_v30, %v396_v31  ;;  %v372_v2 = vld [vmem:[%s3929_s29 + $0x2b8] sm:$0xff] }
 0x102   : > { %2578 = vmatprep.subr.bf16.mxu1 %v3400_v26  ;;  %v456_v26 = vld [vmem:[%s3929_s29 + $0x558] sm:$0xff] }
 0x103   : > { %v3528_v0 = vcombine.high %v456_v26, %v460_v27  ;;  %v3527_v47 = vcombine.low %v456_v26, %v460_v27  ;;  %v424_v8 = vld [vmem:[%s3929_s29 + $0x458] sm:$0xff] }
 0x104   : > { %2538 = vmatpush1.bf16.msra.mxu0 %v3653_v33  ;;  %v428_v9 = vld [vmem:[%s3929_s29 + $0x478] sm:$0xff] }
 0x105   : > { %2579 = vmatpush1.bf16.msra.mxu1 %v3399_v34  ;;  %2539 = vmatprep.subr.bf16.mxu0 %v3646_v35  ;;  %v3535_v34 = vcombine.low %v464_v18, %v468_v19  ;;  %v360_v10 = vld [vmem:[%s3929_s29 + $0x258] sm:$0xff] }
 0x106   : > { %2580 = vmatprep.subr.bf16.mxu1 %v3392_v36  ;;  %v364_v11 = vld [vmem:[%s3929_s29 + $0x278] sm:$0xff] }
 0x107   : > { %v416_v18 = vld [vmem:[%s3929_s29 + $0x418] sm:$0xff] }
 0x108   : > { %2540 = vmatpush1.bf16.msra.mxu0 %v3645_v40  ;;  %v448_v40 = vld [vmem:[%s3929_s29 + $0x518] sm:$0xff] }
 0x109   : > { %2581 = vmatpush1.bf16.msra.mxu1 %v3391_v12  ;;  %2541 = vmatprep.subr.bf16.mxu0 %v3638_v41  ;;  %v452_v12 = vld [vmem:[%s3929_s29 + $0x538] sm:$0xff] }
 0x10a   : > { %2582 = vmatprep.subr.bf16.mxu1 %v3384_v42  ;;  %v420_v19 = vld [vmem:[%s3929_s29 + $0x438] sm:$0xff] }
 0x10b   : > { %v352_v20 = vld [vmem:[%s3929_s29 + $0x218] sm:$0xff] }
 0x10c   : > { %2542 = vmatpush1.bf16.msra.mxu0 %v3637_v49  ;;  %v3463_v49 = vcombine.low %v392_v30, %v396_v31  ;;  %v356_v21 = vld [vmem:[%s3929_s29 + $0x238] sm:$0xff]  ;;  %v3487_v31 = vcombine.low %v416_v18, %v420_v19 }
 0x10d   : > { %2583 = vmatpush1.bf16.msra.mxu1 %v3383_v50  ;;  %2543 = vmatprep.subr.bf16.mxu0 %v3630_v51  ;;  %v3520_v50 = vcombine.high %v448_v40, %v452_v12  ;;  %v536_v26 = vld [vmem:[%s3929_s29 + $0x7d8] sm:$0xff] }
 0x10e   : > { %2584 = vmatprep.subr.bf16.mxu1 %v3376_v52  ;;  %v540_v27 = vld [vmem:[%s3929_s29 + $0x7f8] sm:$0xff] }
 0x10f   : > { %v604_v30 = vld [vmem:[%s3929_s29 + $0x9f8] sm:$0xff] }
 0x110   : > { %2544 = vmatpush1.bf16.msra.mxu0 %v3629_v58  ;;  %v3519_v58 = vcombine.low %v448_v40, %v452_v12  ;;  %v3607_v40 = vcombine.low %v536_v26, %v540_v27 }
 0x111   : > { %2585 = vmatpush1.bf16.msra.mxu1 %v3375_v59  ;;  %2545 = vmatprep.subr.bf16.mxu0 %v3622_v60  ;;  %v3512_v60 = vcombine.high %v440_v53, %v444_v55 }
 0x112   : > { %2586 = vmatprep.subr.bf16.mxu1 %v3368_v61  ;;  %v3448_v61 = vcombine.high %v376_v56, %v380_v57 }
 0x114   : > { %2546 = vmatpush1.bf16.msra.mxu0 %v3621_v3  ;;  %v3511_v3 = vcombine.low %v440_v53, %v444_v55 }
 0x115   : > { %2587 = vmatpush1.bf16.msra.mxu1 %v3367_v4  ;;  %2547 = vmatprep.subr.bf16.mxu0 %v3614_v5  ;;  %v3447_v4 = vcombine.low %v376_v56, %v380_v57  ;;  %v3504_v5 = vcombine.high %v432_v62, %v436_v63 }
 0x116   : > { %2588 = vmatprep.subr.bf16.mxu1 %v3360_v7  ;;  %v3440_v7 = vcombine.high %v368_v1, %v372_v2 }
 0x118   : > { %2548 = vmatpush1.bf16.msra.mxu0 %v3613_v13  ;;  %v3503_v13 = vcombine.low %v432_v62, %v436_v63 }
 0x119   : > { %2589 = vmatpush1.bf16.msra.mxu1 %v3359_v14  ;;  %2615 = vmatprep.subr.bf16.mxu0 %v3544_v15  ;;  %v3439_v14 = vcombine.low %v368_v1, %v372_v2  ;;  %v3496_v15 = vcombine.high %v424_v8, %v428_v9  ;;  %v504_v2 = vld [vmem:[%s3929_s29 + $0x6d8] sm:$0xff] }
 0x11a   : > { %2590 = vmatprep.subr.bf16.mxu1 %v3480_v16  ;;  %v3432_v16 = vcombine.high %v360_v10, %v364_v11 }
 0x11b   : > { %v2239_v28 = vpop.f32.mrf.mxu0  ;;  %2566 = vmatmul.mubr.bf16.vlgmr.msra.gmra.mxu0 %v4069_v38 }
 0x11c   : > { %v2280_v33 = vpop.f32.mrf.mxu1  ;;  %2616 = vmatpush1.bf16.msra.mxu0 %v3543_v22  ;;  %2647 = vmatprep.mubr.bf16.mxu0 %v3987_v17  ;;  %v388_v17 = vld [vmem:[%s3929_s29 + $0x338] sm:$0xff]  ;;  %v3495_v22 = vcombine.low %v424_v8, %v428_v9 }
 0x11d   : > { %v4251_v35 = vadd.f32 %v2280_v33, %v2239_v28  ;;  %2591 = vmatpush2.bf16.msra.mxu1 %v3479_v23  ;;  %v2241_v36 = vpop.f32.mrf.mxu0  ;;  %2617 = vmatprep.subr.bf16.mxu0 %v3536_v24  ;;  %v3456_v52 = vcombine.high %v384_v43, %v388_v17  ;;  %v3455_v59 = vcombine.low %v384_v43, %v388_v17  ;;  %v600_v28 = vld [vmem:[%s3929_s29 + $0x9d8] sm:$0xff] }
 0x11e   : > { %v2282_v39 = vpop.f32.mrf.mxu1  ;;  %2592 = vmatprep.subr.bf16.mxu1 %v3472_v25  ;;  %v3431_v23 = vcombine.low %v360_v10, %v364_v11  ;;  %v3488_v24 = vcombine.high %v416_v18, %v420_v19  ;;  %v3424_v25 = vcombine.high %v352_v20, %v356_v21  ;;  %v3423_v33 = vcombine.low %v352_v20, %v356_v21  ;;  %v520_v17 = vld [vmem:[%s3929_s29 + $0x758] sm:$0xff] }
 0x11f   : > { %v4255_v41 = vadd.f32 %v2282_v39, %v2241_v36  ;;  %v2243_v42 = vpop.f32.mrf.mxu0  ;;  %v3672_v36 = vcombine.high %v600_v28, %v604_v30  ;;  %v592_v39 = vld [vmem:[%s3929_s29 + $0x998] sm:$0xff]  ;;  %v3671_v12 = vcombine.low %v600_v28, %v604_v30 }
 0x120   : > { %v2284_v44 = vpop.f32.mrf.mxu1  ;;  %2618 = vmatpush1.bf16.msra.mxu0 %v3535_v34  ;;  %v3608_v34 = vcombine.high %v536_v26, %v540_v27  ;;  %v496_v11 = vld [vmem:[%s3929_s29 + $0x698] sm:$0xff] }
 0x121   : > { %2593 = vmatpush2.bf16.msra.mxu1 %v3471_v37  ;;  %v2244_v48 = vpop.f32.mrf.mxu0  ;;  %2619 = vmatprep.subr.bf16.mxu0 %v3528_v0  ;;  %v528_v37 = vld [vmem:[%s3929_s29 + $0x798] sm:$0xff] }
 0x122   : > { %v2285_v51 = vpop.f32.mrf.mxu1  ;;  %2594 = vmatprep.subr.bf16.mxu1 %v3464_v6  ;;  %v532_v0 = vld [vmem:[%s3929_s29 + $0x7b8] sm:$0xff] }
 0x123   : > { %v596_v6 = vld [vmem:[%s3929_s29 + $0x9b8] sm:$0xff]  ;;  %v3600_v42 = vcombine.high %v528_v37, %v532_v0  ;;  %v3599_v51 = vcombine.low %v528_v37, %v532_v0 }
 0x124   : > { %2620 = vmatpush1.bf16.msra.mxu0 %v3527_v47  ;;  %v3664_v43 = vcombine.high %v592_v39, %v596_v6  ;;  %v524_v44 = vld [vmem:[%s3929_s29 + $0x778] sm:$0xff]  ;;  %v3663_v53 = vcombine.low %v592_v39, %v596_v6 }
 0x125   : > { %2595 = vmatpush2.bf16.msra.mxu1 %v3463_v49  ;;  %2621 = vmatprep.subr.bf16.mxu0 %v3520_v50  ;;  %v584_v48 = vld [vmem:[%s3929_s29 + $0x958] sm:$0xff]  ;;  %v3592_v55 = vcombine.high %v520_v17, %v524_v44  ;;  %v3591_v62 = vcombine.low %v520_v17, %v524_v44 }
 0x126   : > { %2596 = vmatprep.subr.bf16.mxu1 %v3456_v52  ;;  %v588_v49 = vld [vmem:[%s3929_s29 + $0x978] sm:$0xff] }
 0x127   : > { %v3656_v57 = vcombine.high %v584_v48, %v588_v49  ;;  %v3655_v63 = vcombine.low %v584_v48, %v588_v49  ;;  %v488_v21 = vld [vmem:[%s3929_s29 + $0x658] sm:$0xff] }
 0x128   : > { %2622 = vmatpush1.bf16.msra.mxu0 %v3519_v58  ;;  %v512_v58 = vld [vmem:[%s3929_s29 + $0x718] sm:$0xff] }
 0x129   : > { %2597 = vmatpush2.bf16.msra.mxu1 %v3455_v59  ;;  %2623 = vmatprep.subr.bf16.mxu0 %v3512_v60  ;;  %v576_v59 = vld [vmem:[%s3929_s29 + $0x918] sm:$0xff] }
 0x12a   : > { %2598 = vmatprep.subr.bf16.mxu1 %v3448_v61  ;;  %v580_v60 = vld [vmem:[%s3929_s29 + $0x938] sm:$0xff] }
 0x12b   : > { %v3647_v8 = vcombine.low %v576_v59, %v580_v60  ;;  %v480_v30 = vld [vmem:[%s3929_s29 + $0x618] sm:$0xff] }
 0x12c   : > { %2624 = vmatpush1.bf16.msra.mxu0 %v3511_v3  ;;  %v508_v3 = vld [vmem:[%s3929_s29 + $0x6f8] sm:$0xff] }
 0x12d   : > { %2599 = vmatpush2.bf16.msra.mxu1 %v3447_v4  ;;  %2625 = vmatprep.subr.bf16.mxu0 %v3504_v5  ;;  %v568_v4 = vld [vmem:[%s3929_s29 + $0x8d8] sm:$0xff]  ;;  %v3576_v9 = vcombine.high %v504_v2, %v508_v3 }
 0x12e   : > { %2600 = vmatprep.subr.bf16.mxu1 %v3440_v7  ;;  %v572_v5 = vld [vmem:[%s3929_s29 + $0x8f8] sm:$0xff] }
 0x12f   : > { %v3640_v10 = vcombine.high %v568_v4, %v572_v5  ;;  %v3639_v18 = vcombine.low %v568_v4, %v572_v5 }
 0x130   : > { %2626 = vmatpush1.bf16.msra.mxu0 %v3503_v13  ;;  %v500_v13 = vld [vmem:[%s3929_s29 + $0x6b8] sm:$0xff] }
 0x131   : > { %2601 = vmatpush2.bf16.msra.mxu1 %v3439_v14  ;;  %2627 = vmatprep.subr.bf16.mxu0 %v3496_v15  ;;  %v560_v14 = vld [vmem:[%s3929_s29 + $0x898] sm:$0xff]  ;;  %v3568_v19 = vcombine.high %v496_v11, %v500_v13 }
 0x132   : > { %2602 = vmatprep.subr.bf16.mxu1 %v3432_v16  ;;  %v564_v15 = vld [vmem:[%s3929_s29 + $0x8b8] sm:$0xff]  ;;  %v3575_v16 = vcombine.low %v504_v2, %v508_v3 }
 0x133   : > { %v3632_v20 = vcombine.high %v560_v14, %v564_v15  ;;  %v3631_v26 = vcombine.low %v560_v14, %v564_v15 }
 0x134   : > { %2628 = vmatpush1.bf16.msra.mxu0 %v3495_v22  ;;  %v492_v22 = vld [vmem:[%s3929_s29 + $0x678] sm:$0xff] }
 0x135   : > { %2603 = vmatpush2.bf16.msra.mxu1 %v3431_v23  ;;  %2629 = vmatprep.subr.bf16.mxu0 %v3488_v24  ;;  %v552_v23 = vld [vmem:[%s3929_s29 + $0x858] sm:$0xff]  ;;  %v3560_v27 = vcombine.high %v488_v21, %v492_v22 }
 0x136   : > { %2604 = vmatprep.subr.bf16.mxu1 %v3424_v25  ;;  %v556_v24 = vld [vmem:[%s3929_s29 + $0x878] sm:$0xff]  ;;  %v3567_v25 = vcombine.low %v496_v11, %v500_v13 }
 0x137   : > { %v3624_v28 = vcombine.high %v552_v23, %v556_v24  ;;  %v3623_v37 = vcombine.low %v552_v23, %v556_v24 }
 0x138   : > { %2630 = vmatpush1.bf16.msra.mxu0 %v3487_v31  ;;  %v484_v31 = vld [vmem:[%s3929_s29 + $0x638] sm:$0xff] }
 0x139   : > { %2605 = vmatpush2.bf16.msra.mxu1 %v3423_v33  ;;  %2631 = vmatprep.subr.bf16.mxu0 %v3608_v34  ;;  %v544_v33 = vld [vmem:[%s3929_s29 + $0x818] sm:$0xff]  ;;  %v3552_v0 = vcombine.high %v480_v30, %v484_v31  ;;  %v3551_v6 = vcombine.low %v480_v30, %v484_v31 }
 0x13a   : > { %2656 = vmatprep.subr.bf16.mxu1 %v3672_v36  ;;  %v548_v34 = vld [vmem:[%s3929_s29 + $0x838] sm:$0xff]  ;;  %v3559_v36 = vcombine.low %v488_v21, %v492_v22 }
 0x13b   : > { %v2321_v47 = vpop.f32.mrf.mxu0  ;;  %v3616_v39 = vcombine.high %v544_v33, %v548_v34 }
 0x13c   : > { %v4288_v50 = vadd.f32 %v2321_v47, %v4251_v35  ;;  %2607 = vmatmul.mubr.bf16.vlgmr.msra.gmra.mxu1 %v4026_v29  ;;  %2632 = vmatpush2.bf16.msra.mxu0 %v3607_v40  ;;  %v516_v35 = vld [vmem:[%s3929_s29 + $0x738] sm:$0xff]  ;;  %v3615_v40 = vcombine.low %v544_v33, %v548_v34 }
 0x13d   : > { %2657 = vmatpush1.bf16.msra.mxu1 %v3671_v12  ;;  %v2323_v52 = vpop.f32.mrf.mxu0  ;;  %2633 = vmatprep.subr.bf16.mxu0 %v3600_v42  ;;  %v3584_v1 = vcombine.high %v512_v58, %v516_v35  ;;  %v3583_v7 = vcombine.low %v512_v58, %v516_v35 }
 0x13e   : > { %v4292_v56 = vadd.f32 %v2323_v52, %v4255_v41  ;;  %2658 = vmatprep.subr.bf16.mxu1 %v3664_v43  ;;  %2688 = vmatprep.mubr.bf16.mxu1 %v3877_v46  ;;  %v3648_v46 = vcombine.high %v576_v59, %v580_v60  ;;  %v245_v60 = vld [vmem:[#allocation2] sm:$0xff] }
 0x13f   : > { %v2325_v29 = vpop.f32.mrf.mxu0 }
 0x140   : > { %v2705_v61 = vcombine.low %v4288_v50, %v4292_v56  ;;  %2634 = vmatpush2.bf16.msra.mxu0 %v3599_v51 }
 0x141   : > { %2659 = vmatpush1.bf16.msra.mxu1 %v3663_v53  ;;  %v2326_v41 = vpop.f32.mrf.mxu0  ;;  %2635 = vmatprep.subr.bf16.mxu0 %v3592_v55 }
 0x142   : > { %2660 = vmatprep.subr.bf16.mxu1 %v3656_v57 }
 0x144   : > { %2636 = vmatpush2.bf16.msra.mxu0 %v3591_v62 }
 0x145   : > { %2661 = vmatpush1.bf16.msra.mxu1 %v3655_v63  ;;  %2637 = vmatprep.subr.bf16.mxu0 %v3584_v1 }
 0x146   : > { %2662 = vmatprep.subr.bf16.mxu1 %v3648_v46 }
 0x148   : > { %2638 = vmatpush2.bf16.msra.mxu0 %v3583_v7 }
 0x149   : > { %2663 = vmatpush1.bf16.msra.mxu1 %v3647_v8  ;;  %2639 = vmatprep.subr.bf16.mxu0 %v3576_v9 }
 0x14a   : > { %2664 = vmatprep.subr.bf16.mxu1 %v3640_v10 }
 0x14c   : > { %2640 = vmatpush2.bf16.msra.mxu0 %v3575_v16 }
 0x14d   : > { %2665 = vmatpush1.bf16.msra.mxu1 %v3639_v18  ;;  %2641 = vmatprep.subr.bf16.mxu0 %v3568_v19 }
 0x14e   : > { %2666 = vmatprep.subr.bf16.mxu1 %v3632_v20 }
 0x150   : > { %2642 = vmatpush2.bf16.msra.mxu0 %v3567_v25 }
 0x151   : > { %2667 = vmatpush1.bf16.msra.mxu1 %v3631_v26  ;;  %2643 = vmatprep.subr.bf16.mxu0 %v3560_v27 }
 0x152   : > { %2668 = vmatprep.subr.bf16.mxu1 %v3624_v28 }
 0x154   : > { %2644 = vmatpush2.bf16.msra.mxu0 %v3559_v36 }
 0x155   : > { %2669 = vmatpush1.bf16.msra.mxu1 %v3623_v37  ;;  %2645 = vmatprep.subr.bf16.mxu0 %v3552_v0  ;;  %v246_v0 = vld [vmem:[#allocation2 + $0x8] sm:$0xff] }
 0x156   : > { %2670 = vmatprep.subr.bf16.mxu1 %v3616_v39 }
 0x158   : > { %2646 = vmatpush2.bf16.msra.mxu0 %v3551_v6 }
 0x159   : > { %2671 = vmatpush1.bf16.msra.mxu1 %v3615_v40 }
 0x15b   : > { %2648 = vmatmul.mubr.bf16.vlgmr.msra.gmra.mxu0 %v4032_v32  ;;  %v2713_v32 = vrot.slane %v2705_v61, %v3961_v54 }
 0x15c   : > { %v2362_v12 = vpop.f32.mrf.mxu1  ;;  %2689 = vmatmul.mubr.bf16.vlgmr.msra.gmra.mxu1 %v4069_v38 }
 0x15e   : > { %v2364_v42 = vpop.f32.mrf.mxu1 }
 0x160   : > { %v2366_v43 = vpop.f32.mrf.mxu1 }
 0x162   : > { %v2367_v17 = vpop.f32.mrf.mxu1 }
 0x17b   : > { %v2403_v44 = vpop.f32.mrf.mxu0 }
 0x17c   : > { %v2404_v47 = vadd.f32 %v2403_v44, %v2362_v12  ;;  %v2444_v48 = vpop.f32.mrf.mxu1 }
 0x17d   : > { %v2405_v49 = vpop.f32.mrf.mxu0 }
 0x17e   : > { %v2406_v51 = vadd.f32 %v2405_v49, %v2364_v42  ;;  %v2446_v52 = vpop.f32.mrf.mxu1  ;;  %v2445_v55 = vadd.f32 %v2444_v48, %v2404_v47 }
 0x17f   : > { %v2407_v53 = vpop.f32.mrf.mxu0 }
 0x180   : > { %v2447_v57 = vadd.f32 %v2446_v52, %v2406_v51  ;;  %v2448_v58 = vpop.f32.mrf.mxu1 }
 0x181   : > { %v2408_v35 = vpop.f32.mrf.mxu0 }
 0x182   : > { %v2706_v29 = vcombine.low %v2445_v55, %v2447_v57  ;;  %v2449_v59 = vpop.f32.mrf.mxu1 }
 0x184   : > { %v2720_v38 = vrot.slane %v2706_v29, %v3961_v54 }
 0x186   : > { %v2721_v62 = vcombine.low %v2713_v32, %v2720_v38 }
 0x188   : > { %v2741_v41 = vadd.f32 %v2721_v62, %v245_v60 }
 0x18a   : > { %2743 = vst [vmem:[#allocation2] sm:$0xff] %v2741_v41 }
 0x1bb   : > { %v2485_v63 = vpop.f32.mrf.mxu0 }
 0x1bc   : > { %v2526_v1 = vpop.f32.mrf.mxu1 }
 0x1bd   : > { %v2527_v46 = vadd.f32 %v2526_v1, %v2485_v63  ;;  %v2487_v2 = vpop.f32.mrf.mxu0 }
 0x1be   : > { %v2528_v3 = vpop.f32.mrf.mxu1 }
 0x1bf   : > { %v2529_v4 = vadd.f32 %v2528_v3, %v2487_v2  ;;  %v2489_v5 = vpop.f32.mrf.mxu0 }
 0x1c0   : > { %v2530_v7 = vpop.f32.mrf.mxu1 }
 0x1c1   : > { %v2490_v8 = vpop.f32.mrf.mxu0 }
 0x1c2   : > { %v2531_v9 = vpop.f32.mrf.mxu1 }
 0x1db   : > { %v2567_v10 = vpop.f32.mrf.mxu0 }
 0x1dc   : > { %v2568_v11 = vadd.f32 %v2567_v10, %v2527_v46 }
 0x1dd   : > { %v2569_v50 = vpop.f32.mrf.mxu0 }
 0x1de   : > { %v2570_v56 = vadd.f32 %v2569_v50, %v2529_v4 }
 0x1df   : > { %v2571_v61 = vpop.f32.mrf.mxu0 }
 0x1e0   : > { %v2722_v13 = vcombine.low %v2568_v11, %v2570_v56 }
 0x1e1   : > { %v2572_v14 = vpop.f32.mrf.mxu0 }
 0x1e2   : > { %v2730_v36 = vrot.slane %v2722_v13, %v3961_v54 }
 0x1fc   : > { %v2608_v15 = vpop.f32.mrf.mxu1 }
 0x1fe   : > { %v2610_v16 = vpop.f32.mrf.mxu1 }
 0x200   : > { %v2612_v18 = vpop.f32.mrf.mxu1 }
 0x202   : > { %v2613_v19 = vpop.f32.mrf.mxu1 }
 0x21b   : > { %v2649_v20 = vpop.f32.mrf.mxu0 }
 0x21c   : > { %v2650_v21 = vadd.f32 %v2649_v20, %v2608_v15  ;;  %v2690_v22 = vpop.f32.mrf.mxu1 }
 0x21d   : > { %v2651_v23 = vpop.f32.mrf.mxu0 }
 0x21e   : > { %v2652_v24 = vadd.f32 %v2651_v23, %v2610_v16  ;;  %v2692_v25 = vpop.f32.mrf.mxu1  ;;  %v2691_v27 = vadd.f32 %v2690_v22, %v2650_v21 }
 0x21f   : > { %v2653_v26 = vpop.f32.mrf.mxu0 }
 0x220   : > { %v2693_v28 = vadd.f32 %v2692_v25, %v2652_v24  ;;  %v2694_v30 = vpop.f32.mrf.mxu1 }
 0x221   : > { %v2654_v31 = vpop.f32.mrf.mxu0 }
 0x222   : > { %v2723_v33 = vcombine.low %v2691_v27, %v2693_v28  ;;  %v2695_v34 = vpop.f32.mrf.mxu1 }
 0x224   : > { %v2737_v37 = vrot.slane %v2723_v33, %v3961_v54 }
 0x226   : > { %v2738_v39 = vcombine.low %v2730_v36, %v2737_v37  ;;  %2748 = sbr.rel (%p3673_p6) target bundleno = 826 (0x33a), region = 48 }
 0x228   : > { %v2742_v6 = vadd.f32 %v2738_v39, %v246_v0 }
 0x22a   : > { %2744 = vst [vmem:[#allocation2 + $0x8] sm:$0xff] %v2742_v6 }
 0x22b   : > { %v2856_v40 = vld [vmem:[%s4761_s3 + $0xf8] sm:$0xff]  ;;  %v2855_v17 = vld [vmem:[%s4761_s3 + $0xf0] sm:$0xff]  ;;  %v2854_v49 = vld [vmem:[%s4761_s3 + $0xe8] sm:$0xff]  ;;  %v2755_v18 = vsub.s32 0, %v3954_v45  ;;  %v2759_v19 = vsub.s32 1, %v3954_v45  ;;  %v2763_v20 = vsub.s32 2, %v3954_v45 }
 0x22c   : > { %v2888_v12 = vld [vmem:[%s4761_s3 + $0x1f8] sm:$0xff]  ;;  %3680 = vmatprep.subr.mxu0 %v2856_v40  ;;  %v2887_v44 = vld [vmem:[%s4761_s3 + $0x1f0] sm:$0xff]  ;;  %v2886_v51 = vld [vmem:[%s4761_s3 + $0x1e8] sm:$0xff]  ;;  %v2767_v23 = vsub.s32 3, %v3954_v45  ;;  %vm3284_vm0 = vcmask 9216  }
 0x22d   : > { %v2840_v42 = vld [vmem:[%s4761_s3 + $0x78] sm:$0xff]  ;;  %3715 = vmatprep.subr.mxu1 %v2888_v12  ;;  %v2839_v47 = vld [vmem:[%s4761_s3 + $0x70] sm:$0xff]  ;;  %v2838_v52 = vld [vmem:[%s4761_s3 + $0x68] sm:$0xff] }
 0x22e   : > { %v2872_v43 = vld [vmem:[%s4761_s3 + $0x178] sm:$0xff]  ;;  %3681 = vmatpush3.msra.mxu0 %v2840_v42  ;;  %v2871_v48 = vld [vmem:[%s4761_s3 + $0x170] sm:$0xff]  ;;  %v2870_v53 = vld [vmem:[%s4761_s3 + $0x168] sm:$0xff] }
 0x22f   : > { %3716 = vmatpush3.msra.mxu1 %v2872_v43  ;;  %3682 = vmatprep.subr.mxu0 %v2855_v17  ;;  %v2853_v55 = vld [vmem:[%s4761_s3 + $0xe0] sm:$0xff]  ;;  %v2852_v29 = vld [vmem:[%s4761_s3 + $0xd8] sm:$0xff]  ;;  %v2851_v60 = vld [vmem:[%s4761_s3 + $0xd0] sm:$0xff] }
 0x230   : > { %3717 = vmatprep.subr.mxu1 %v2887_v44  ;;  %3683 = vmatpush3.msra.mxu0 %v2839_v47  ;;  %v2885_v57 = vld [vmem:[%s4761_s3 + $0x1e0] sm:$0xff]  ;;  %v2884_v59 = vld [vmem:[%s4761_s3 + $0x1d8] sm:$0xff]  ;;  %v2883_v62 = vld [vmem:[%s4761_s3 + $0x1d0] sm:$0xff] }
 0x231   : > { %3718 = vmatpush3.msra.mxu1 %v2871_v48  ;;  %3684 = vmatprep.subr.mxu0 %v2854_v49  ;;  %v2837_v58 = vld [vmem:[%s4761_s3 + $0x60] sm:$0xff]  ;;  %v2836_v32 = vld [vmem:[%s4761_s3 + $0x58] sm:$0xff]  ;;  %v2835_v41 = vld [vmem:[%s4761_s3 + $0x50] sm:$0xff] }
 0x232   : > { %3719 = vmatprep.subr.mxu1 %v2886_v51  ;;  %v2869_v35 = vld [vmem:[%s4761_s3 + $0x160] sm:$0xff]  ;;  %3685 = vmatpush3.msra.mxu0 %v2838_v52  ;;  %v2868_v38 = vld [vmem:[%s4761_s3 + $0x158] sm:$0xff]  ;;  %v2867_v63 = vld [vmem:[%s4761_s3 + $0x150] sm:$0xff] }
 0x233   : > { %3720 = vmatpush3.msra.mxu1 %v2870_v53  ;;  %3686 = vmatprep.subr.mxu0 %v2853_v55  ;;  %v2850_v1 = vld [vmem:[%s4761_s3 + $0xc8] sm:$0xff]  ;;  %v2849_v4 = vld [vmem:[%s4761_s3 + $0xc0] sm:$0xff]  ;;  %v2848_v9 = vld [vmem:[%s4761_s3 + $0xb8] sm:$0xff] }
 0x234   : > { %3721 = vmatprep.subr.mxu1 %v2885_v57  ;;  %3687 = vmatpush3.msra.mxu0 %v2837_v58  ;;  %v2882_v46 = vld [vmem:[%s4761_s3 + $0x1c8] sm:$0xff]  ;;  %v2881_v5 = vld [vmem:[%s4761_s3 + $0x1c0] sm:$0xff]  ;;  %v2880_v10 = vld [vmem:[%s4761_s3 + $0x1b8] sm:$0xff] }
 0x235   : > { %3722 = vmatpush3.msra.mxu1 %v2869_v35  ;;  %3688 = vmatprep.subr.mxu0 %v2852_v29  ;;  %v2834_v2 = vld [vmem:[%s4761_s3 + $0x48] sm:$0xff]  ;;  %v2833_v7 = vld [vmem:[%s4761_s3 + $0x40] sm:$0xff]  ;;  %v2832_v11 = vld [vmem:[%s4761_s3 + $0x38] sm:$0xff] }
 0x236   : > { %3723 = vmatprep.subr.mxu1 %v2884_v59  ;;  %3689 = vmatpush3.msra.mxu0 %v2836_v32  ;;  %v2866_v3 = vld [vmem:[%s4761_s3 + $0x148] sm:$0xff]  ;;  %v2865_v8 = vld [vmem:[%s4761_s3 + $0x140] sm:$0xff]  ;;  %v2864_v50 = vld [vmem:[%s4761_s3 + $0x138] sm:$0xff] }
 0x237   : > { %3724 = vmatpush3.msra.mxu1 %v2868_v38  ;;  %3690 = vmatprep.subr.mxu0 %v2851_v60  ;;  %v2847_v56 = vld [vmem:[%s4761_s3 + $0xb0] sm:$0xff]  ;;  %v2846_v15 = vld [vmem:[%s4761_s3 + $0xa8] sm:$0xff]  ;;  %v2845_v24 = vld [vmem:[%s4761_s3 + $0xa0] sm:$0xff]  ;;  %v2771_v60 = vsub.s32 4, %v3954_v45 }
 0x238   : > { %3725 = vmatprep.subr.mxu1 %v2883_v62  ;;  %3691 = vmatpush3.msra.mxu0 %v2835_v41  ;;  %v2879_v61 = vld [vmem:[%s4761_s3 + $0x1b0] sm:$0xff]  ;;  %v2878_v16 = vld [vmem:[%s4761_s3 + $0x1a8] sm:$0xff]  ;;  %v2877_v25 = vld [vmem:[%s4761_s3 + $0x1a0] sm:$0xff]  ;;  %v2775_v62 = vsub.s32 5, %v3954_v45 }
 0x239   : > { %3726 = vmatpush3.msra.mxu1 %v2867_v63  ;;  %3692 = vmatprep.subr.mxu0 %v2850_v1  ;;  %v2831_v13 = vld [vmem:[%s4761_s3 + $0x30] sm:$0xff]  ;;  %v2830_v21 = vld [vmem:[%s4761_s3 + $0x28] sm:$0xff]  ;;  %v2829_v26 = vld [vmem:[%s4761_s3 + $0x20] sm:$0xff]  ;;  %v2779_v63 = vsub.s32 6, %v3954_v45  ;;  %v2783_v1 = vsub.s32 7, %v3954_v45 }
 0x23a   : > { %3727 = vmatprep.subr.mxu1 %v2882_v46  ;;  %3693 = vmatpush3.msra.mxu0 %v2834_v2  ;;  %v2863_v14 = vld [vmem:[%s4761_s3 + $0x130] sm:$0xff]  ;;  %v2862_v22 = vld [vmem:[%s4761_s3 + $0x128] sm:$0xff]  ;;  %v2861_v27 = vld [vmem:[%s4761_s3 + $0x120] sm:$0xff] }
 0x23b   : > { %3728 = vmatpush3.msra.mxu1 %v2866_v3  ;;  %3694 = vmatprep.subr.mxu0 %v2849_v4  ;;  %v4478_v28 = vld [vmem:[%s4760_s2] sm:$0xff]  ;;  %v2844_v30 = vld [vmem:[%s4761_s3 + $0x98] sm:$0xff]  ;;  %v2843_v6 = vld [vmem:[%s4761_s3 + $0x90] sm:$0xff] }
 0x23c   : > { %3729 = vmatprep.subr.mxu1 %v2881_v5  ;;  %3695 = vmatpush3.msra.mxu0 %v2833_v7  ;;  %v2876_v31 = vld [vmem:[%s4761_s3 + $0x198] sm:$0xff]  ;;  %v2756_v33 = vrot.slane %v4478_v28, %v2755_v18  ;;  %v2760_v34 = vrot.slane %v4478_v28, %v2759_v19  ;;  %v2764_v36 = vrot.slane %v4478_v28, %v2763_v20  ;;  %v2875_v40 = vld [vmem:[%s4761_s3 + $0x190] sm:$0xff]  ;;  %v2842_v44 = vld [vmem:[%s4761_s3 + $0x88] sm:$0xff] }
 0x23d   : > { %3730 = vmatpush3.msra.mxu1 %v2865_v8  ;;  %3696 = vmatprep.subr.mxu0 %v2848_v9  ;;  %v2828_v37 = vld [vmem:[%s4761_s3 + $0x18] sm:$0xff]  ;;  %v2768_v39 = vrot.slane %v4478_v28, %v2767_v23  ;;  %v2827_v42 = vld [vmem:[%s4761_s3 + $0x10] sm:$0xff]  ;;  %v2874_v47 = vld [vmem:[%s4761_s3 + $0x188] sm:$0xff]  ;;  %v2772_v3 = vrot.slane %v4478_v28, %v2771_v60  ;;  %v2776_v4 = vrot.slane %v4478_v28, %v2775_v62 }
 0x23e   : > { %3731 = vmatprep.subr.mxu1 %v2880_v10  ;;  %3697 = vmatpush3.msra.mxu0 %v2832_v11  ;;  %v2860_v0 = vld [vmem:[%s4761_s3 + $0x118] sm:$0xff]  ;;  %v2785_v12 = vcombine.low %v2756_v33, %v2760_v34  ;;  %v2859_v43 = vld [vmem:[%s4761_s3 + $0x110] sm:$0xff]  ;;  %v2826_v49 = vld [vmem:[%s4761_s3 + $0x8] sm:$0xff]  ;;  %v2780_v8 = vrot.slane %v4478_v28, %v2779_v63  ;;  %v2784_v9 = vrot.slane %v4478_v28, %v2783_v1 }
 0x23f   : > { %3732 = vmatpush3.msra.mxu1 %v2864_v50  ;;  %3698 = vmatprep.subr.mxu0 %v2847_v56  ;;  %v2786_v17 = vcombine.low %v2764_v36, %v2768_v39  ;;  %v2858_v51 = vld [vmem:[%s4761_s3 + $0x108] sm:$0xff]  ;;  %v2841_v53 = vld [vmem:[%s4761_s3 + $0x80] sm:$0xff]  ;;  %v2920_v59 = vld [vmem:[%s4761_s3 + $0x2f8] sm:$0xff] }
 0x240   : > { %3733 = vmatprep.subr.mxu1 %v2879_v61  ;;  %3699 = vmatpush3.msra.mxu0 %v2831_v13  ;;  %v2793_v48 = vrot.slane %v2785_v12, %v3961_v54  ;;  %v2873_v55 = vld [vmem:[%s4761_s3 + $0x180] sm:$0xff]  ;;  %v2952_v32 = vld [vmem:[%s4761_s3 + $0x3f8] sm:$0xff]  ;;  %v2919_v11 = vld [vmem:[%s4761_s3 + $0x2f0] sm:$0xff] }
 0x241   : > { %3734 = vmatpush3.msra.mxu1 %v2863_v14  ;;  %3700 = vmatprep.subr.mxu0 %v2846_v15  ;;  %v2800_v52 = vrot.slane %v2786_v17, %v3961_v54  ;;  %v2749_v57 = vld [vmem:[#allocation2] sm:$0xff]  ;;  %v2904_v10 = vld [vmem:[%s4761_s3 + $0x278] sm:$0xff]  ;;  %v2903_v56 = vld [vmem:[%s4761_s3 + $0x270] sm:$0xff]  ;;  %v2802_v14 = vcombine.low %v2772_v3, %v2776_v4  ;;  %v2803_v15 = vcombine.low %v2780_v8, %v2784_v9 }
 0x242   : > { %3735 = vmatprep.subr.mxu1 %v2878_v16  ;;  %3701 = vmatpush3.msra.mxu0 %v2830_v21  ;;  %v2825_v58 = vld [vmem:[%s4761_s3] sm:$0xff]  ;;  %v2936_v50 = vld [vmem:[%s4761_s3 + $0x378] sm:$0xff]  ;;  %v2951_v61 = vld [vmem:[%s4761_s3 + $0x3f0] sm:$0xff] }
 0x243   : > { %3736 = vmatpush3.msra.mxu1 %v2862_v22  ;;  %3702 = vmatprep.subr.mxu0 %v2845_v24  ;;  %v2801_v35 = vcombine.low %v2793_v48, %v2800_v52  ;;  %v2857_v29 = vld [vmem:[%s4761_s3 + $0x100] sm:$0xff]  ;;  %v2918_v13 = vld [vmem:[%s4761_s3 + $0x2e8] sm:$0xff]  ;;  %v2935_v16 = vld [vmem:[%s4761_s3 + $0x370] sm:$0xff] }
 0x244   : > { %3737 = vmatprep.subr.mxu1 %v2877_v25  ;;  %3703 = vmatpush3.msra.mxu0 %v2829_v26  ;;  %v2902_v18 = vld [vmem:[%s4761_s3 + $0x268] sm:$0xff]  ;;  %v2917_v20 = vld [vmem:[%s4761_s3 + $0x2e0] sm:$0xff]  ;;  %v2916_v24 = vld [vmem:[%s4761_s3 + $0x2d8] sm:$0xff]  ;;  %v2810_v25 = vrot.slane %v2802_v14, %v3961_v54  ;;  %v2817_v26 = vrot.slane %v2803_v15, %v3961_v54 }
 0x245   : > { %3738 = vmatpush3.msra.mxu1 %v2861_v27  ;;  %3704 = vmatprep.subr.mxu0 %v2844_v30  ;;  %v2821_v38 = vadd.f32 %v2801_v35, %v2749_v57  ;;  %v2950_v19 = vld [vmem:[%s4761_s3 + $0x3e8] sm:$0xff]  ;;  %v2901_v22 = vld [vmem:[%s4761_s3 + $0x260] sm:$0xff]  ;;  %v2900_v28 = vld [vmem:[%s4761_s3 + $0x258] sm:$0xff] }
 0x246   : > { %3739 = vmatprep.subr.mxu1 %v2876_v31  ;;  %3705 = vmatpush3.msra.mxu0 %v2828_v37  ;;  %v2934_v21 = vld [vmem:[%s4761_s3 + $0x368] sm:$0xff]  ;;  %v2949_v23 = vld [vmem:[%s4761_s3 + $0x3e0] sm:$0xff]  ;;  %v2948_v30 = vld [vmem:[%s4761_s3 + $0x3d8] sm:$0xff] }
 0x247   : > { %3740 = vmatpush3.msra.mxu1 %v2860_v0  ;;  %3706 = vmatprep.subr.mxu0 %v2843_v6  ;;  %v2823_v41 = vmax.f32 %v2821_v38, 0.0  ;;  %v2933_v27 = vld [vmem:[%s4761_s3 + $0x360] sm:$0xff]  ;;  %v2915_v31 = vld [vmem:[%s4761_s3 + $0x2d0] sm:$0xff]  ;;  %v2932_v33 = vld [vmem:[%s4761_s3 + $0x358] sm:$0xff]  ;;  %v2818_v0 = vcombine.low %v2810_v25, %v2817_v26 }
 0x248   : > { %3741 = vmatprep.subr.mxu1 %v2875_v40  ;;  %3707 = vmatpush3.msra.mxu0 %v2827_v42  ;;  %v2899_v34 = vld [vmem:[%s4761_s3 + $0x250] sm:$0xff]  ;;  %v2914_v37 = vld [vmem:[%s4761_s3 + $0x2c8] sm:$0xff]  ;;  %v2913_v42 = vld [vmem:[%s4761_s3 + $0x2c0] sm:$0xff] }
 0x249   : > { %3742 = vmatpush3.msra.mxu1 %v2859_v43  ;;  %3708 = vmatprep.subr.mxu0 %v2842_v44  ;;  %v2969_v46 = vrot.slane %v2823_v41, %v3961_v54  ;;  %v2962_v2 = vcombine.high %v2823_v41, %v2823_v41  ;;  %v2947_v36 = vld [vmem:[%s4761_s3 + $0x3d0] sm:$0xff]  ;;  %v2898_v6 = vld [vmem:[%s4761_s3 + $0x248] sm:$0xff]  ;;  %v2897_v17 = vld [vmem:[%s4761_s3 + $0x240] sm:$0xff] }
 0x24a   : > { %3743 = vmatprep.subr.mxu1 %v2874_v47  ;;  %3709 = vmatpush3.msra.mxu0 %v2826_v49  ;;  %v2931_v39 = vld [vmem:[%s4761_s3 + $0x350] sm:$0xff]  ;;  %v2750_v40 = vld [vmem:[#allocation2 + $0x8] sm:$0xff]  ;;  %v2945_v44 = vld [vmem:[%s4761_s3 + $0x3c0] sm:$0xff] }
 0x24b   : > { %3744 = vmatpush3.msra.mxu1 %v2858_v51  ;;  %3710 = vmatprep.subr.mxu0 %v2841_v53  ;;  %v2977_v5 = vcombine.high %v2969_v46, %v2969_v46  ;;  %v2976_v7 = vrot.slane %v2962_v2, %v3961_v54  ;;  %v2946_v12 = vld [vmem:[%s4761_s3 + $0x3c8] sm:$0xff]  ;;  %v2912_v47 = vld [vmem:[%s4761_s3 + $0x2b8] sm:$0xff]  ;;  %v2822_v48 = vadd.f32 %v2818_v0, %v2750_v40  ;;  %v2929_v49 = vld [vmem:[%s4761_s3 + $0x340] sm:$0xff] }
 0x24c   : > { %3745 = vmatprep.subr.mxu1 %v2873_v55  ;;  %3711 = vmatpush3.msra.mxu0 %v2825_v58  ;;  %v2930_v43 = vld [vmem:[%s4761_s3 + $0x348] sm:$0xff]  ;;  %v2896_v51 = vld [vmem:[%s4761_s3 + $0x238] sm:$0xff]  ;;  %v2911_v53 = vld [vmem:[%s4761_s3 + $0x2b0] sm:$0xff] }
 0x24d   : > { %3746 = vmatpush3.msra.mxu1 %v2857_v29  ;;  %3750 = vmatprep.subr.mxu0 %v2920_v59  ;;  %v2978_v45 = vcombine.high %v2976_v7, %v2976_v7  ;;  %v2944_v52 = vld [vmem:[%s4761_s3 + $0x3b8] sm:$0xff]  ;;  %v2895_v57 = vld [vmem:[%s4761_s3 + $0x230] sm:$0xff]  ;;  %v2910_v35 = vld [vmem:[%s4761_s3 + $0x2a8] sm:$0xff]  ;;  %v2824_v29 = vmax.f32 %v2822_v48, 0.0 }
 0x24e   : > { %3785 = vmatprep.subr.mxu1 %v2952_v32  ;;  %3068 = vmatprep.mubr.f32.mxu0 %v2977_v5  ;;  %v2928_v55 = vld [vmem:[%s4761_s3 + $0x338] sm:$0xff]  ;;  %v2943_v58 = vld [vmem:[%s4761_s3 + $0x3b0] sm:$0xff]  ;;  %v2894_v32 = vld [vmem:[%s4761_s3 + $0x228] sm:$0xff] }
 0x24f   : > { %3069 = vmatmul.mubr.f32.vlgmr.msra.gmra.mxu0 %v2969_v46  ;;  %3138 = vmatprep.mubr.f32.mxu1 %v2978_v45  ;;  %v2927_v59 = vld [vmem:[%s4761_s3 + $0x330] sm:$0xff]  ;;  %v2942_v38 = vld [vmem:[%s4761_s3 + $0x3a8] sm:$0xff]  ;;  %v2909_v60 = vld [vmem:[%s4761_s3 + $0x2a0] sm:$0xff]  ;;  %v2979_v46 = vcombine.high %v2824_v29, %v2824_v29  ;;  %v2986_v9 = vrot.slane %v2824_v29, %v3961_v54 }
 0x250   : > { %3751 = vmatpush3.msra.mxu0 %v2904_v10  ;;  %3139 = vmatmul.mubr.f32.vlgmr.msra.gmra.mxu1 %v2976_v7  ;;  %v2926_v62 = vld [vmem:[%s4761_s3 + $0x328] sm:$0xff]  ;;  %v2893_v41 = vld [vmem:[%s4761_s3 + $0x220] sm:$0xff]  ;;  %v2908_v1 = vld [vmem:[%s4761_s3 + $0x298] sm:$0xff] }
 0x251   : > { %3752 = vmatprep.subr.mxu0 %v2919_v11  ;;  %3786 = vmatpush3.msra.mxu1 %v2936_v50  ;;  %v2941_v63 = vld [vmem:[%s4761_s3 + $0x3a0] sm:$0xff]  ;;  %v2892_v3 = vld [vmem:[%s4761_s3 + $0x218] sm:$0xff]  ;;  %v2907_v5 = vld [vmem:[%s4761_s3 + $0x290] sm:$0xff]  ;;  %v2993_v11 = vrot.slane %v2979_v46, %v3961_v54  ;;  %v2994_v15 = vcombine.high %v2986_v9, %v2986_v9 }
 0x252   : > { %3753 = vmatpush3.msra.mxu0 %v2903_v56  ;;  %3787 = vmatprep.subr.mxu1 %v2951_v61  ;;  %v2925_v2 = vld [vmem:[%s4761_s3 + $0x320] sm:$0xff]  ;;  %v2940_v4 = vld [vmem:[%s4761_s3 + $0x398] sm:$0xff]  ;;  %v2891_v8 = vld [vmem:[%s4761_s3 + $0x210] sm:$0xff] }
 0x253   : > { %3754 = vmatprep.subr.mxu0 %v2918_v13  ;;  %3788 = vmatpush3.msra.mxu1 %v2935_v16  ;;  %v2924_v7 = vld [vmem:[%s4761_s3 + $0x318] sm:$0xff]  ;;  %v2939_v10 = vld [vmem:[%s4761_s3 + $0x390] sm:$0xff]  ;;  %v2906_v45 = vld [vmem:[%s4761_s3 + $0x288] sm:$0xff] }
 0x254   : > { %3755 = vmatpush3.msra.mxu0 %v2902_v18  ;;  %3789 = vmatprep.subr.mxu1 %v2950_v19  ;;  %v2923_v50 = vld [vmem:[%s4761_s3 + $0x310] sm:$0xff]  ;;  %v2890_v56 = vld [vmem:[%s4761_s3 + $0x208] sm:$0xff]  ;;  %v2905_v54 = vld [vmem:[%s4761_s3 + $0x280] sm:$0xff]  ;;  %v2995_v18 = vcombine.high %v2993_v11, %v2993_v11 }
 0x255   : > { %3756 = vmatprep.subr.mxu0 %v2917_v20  ;;  %3790 = vmatpush3.msra.mxu1 %v2934_v21  ;;  %v2938_v61 = vld [vmem:[%s4761_s3 + $0x388] sm:$0xff]  ;;  %v2889_v14 = vld [vmem:[%s4761_s3 + $0x200] sm:$0xff] }
 0x256   : > { %3757 = vmatpush3.msra.mxu0 %v2901_v22  ;;  %3791 = vmatprep.subr.mxu1 %v2949_v23  ;;  %v2922_v13 = vld [vmem:[%s4761_s3 + $0x308] sm:$0xff]  ;;  %v2937_v16 = vld [vmem:[%s4761_s3 + $0x380] sm:$0xff] }
 0x257   : > { %3758 = vmatprep.subr.mxu0 %v2916_v24  ;;  %3792 = vmatpush3.msra.mxu1 %v2933_v27  ;;  %v2921_v19 = vld [vmem:[%s4761_s3 + $0x300] sm:$0xff] }
 0x258   : > { %3759 = vmatpush3.msra.mxu0 %v2900_v28  ;;  %3793 = vmatprep.subr.mxu1 %v2948_v30  ;;  %v3674_v24 = vld [vmem:[%s4762_s4] ss:$0 sm:$0xff] }
 0x259   : > { %3760 = vmatprep.subr.mxu0 %v2915_v31  ;;  %3794 = vmatpush3.msra.mxu1 %v2932_v33 }
 0x25a   : > { %3761 = vmatpush3.msra.mxu0 %v2899_v34  ;;  %3795 = vmatprep.subr.mxu1 %v2947_v36 }
 0x25b   : > { %3762 = vmatprep.subr.mxu0 %v2914_v37  ;;  %3796 = vmatpush3.msra.mxu1 %v2931_v39 }
 0x25c   : > { %3763 = vmatpush3.msra.mxu0 %v2898_v6  ;;  %3797 = vmatprep.subr.mxu1 %v2946_v12 }
 0x25d   : > { %3764 = vmatprep.subr.mxu0 %v2913_v42  ;;  %3798 = vmatpush3.msra.mxu1 %v2930_v43 }
 0x25e   : > { %3765 = vmatpush3.msra.mxu0 %v2897_v17  ;;  %3799 = vmatprep.subr.mxu1 %v2945_v44 }
 0x25f   : > { %3766 = vmatprep.subr.mxu0 %v2912_v47  ;;  %3800 = vmatpush3.msra.mxu1 %v2929_v49 }
 0x260   : > { %3767 = vmatpush3.msra.mxu0 %v2896_v51  ;;  %3801 = vmatprep.subr.mxu1 %v2944_v52 }
 0x261   : > { %3768 = vmatprep.subr.mxu0 %v2911_v53  ;;  %3802 = vmatpush3.msra.mxu1 %v2928_v55 }
 0x262   : > { %3769 = vmatpush3.msra.mxu0 %v2895_v57  ;;  %3803 = vmatprep.subr.mxu1 %v2943_v58 }
 0x263   : > { %3770 = vmatprep.subr.mxu0 %v2910_v35  ;;  %3804 = vmatpush3.msra.mxu1 %v2927_v59 }
 0x264   : > { %3771 = vmatpush3.msra.mxu0 %v2894_v32  ;;  %3805 = vmatprep.subr.mxu1 %v2942_v38 }
 0x265   : > { %3772 = vmatprep.subr.mxu0 %v2909_v60  ;;  %3806 = vmatpush3.msra.mxu1 %v2926_v62 }
 0x266   : > { %3773 = vmatpush3.msra.mxu0 %v2893_v41  ;;  %3807 = vmatprep.subr.mxu1 %v2941_v63 }
 0x267   : > { %3774 = vmatprep.subr.mxu0 %v2908_v1  ;;  %3808 = vmatpush3.msra.mxu1 %v2925_v2 }
 0x268   : > { %3775 = vmatpush3.msra.mxu0 %v2892_v3  ;;  %3809 = vmatprep.subr.mxu1 %v2940_v4 }
 0x269   : > { %3776 = vmatprep.subr.mxu0 %v2907_v5  ;;  %3810 = vmatpush3.msra.mxu1 %v2924_v7 }
 0x26a   : > { %3777 = vmatpush3.msra.mxu0 %v2891_v8  ;;  %3811 = vmatprep.subr.mxu1 %v2939_v10 }
 0x26b   : > { %3778 = vmatprep.subr.mxu0 %v2906_v45  ;;  %3812 = vmatpush3.msra.mxu1 %v2923_v50 }
 0x26c   : > { %3779 = vmatpush3.msra.mxu0 %v2890_v56  ;;  %3813 = vmatprep.subr.mxu1 %v2938_v61 }
 0x26d   : > { %3780 = vmatprep.subr.mxu0 %v2905_v54  ;;  %3814 = vmatpush3.msra.mxu1 %v2922_v13 }
 0x26e   : > { %3781 = vmatpush3.msra.mxu0 %v2889_v14  ;;  %3815 = vmatprep.subr.mxu1 %v2937_v16 }
 0x26f   : > { %3208 = vmatprep.mubr.f32.mxu0 %v2994_v15  ;;  %3816 = vmatpush3.msra.mxu1 %v2921_v19 }
 0x270   : > { %3278 = vmatprep.mubr.f32.mxu1 %v2995_v18  ;;  %3209 = vmatmul.mubr.f32.vlgmr.msra.gmra.mxu0 %v2986_v9 }
 0x271   : > { %3279 = vmatmul.mubr.f32.vlgmr.msra.gmra.mxu1 %v2993_v11 }
 0x30f   : > { %v3712_v20 = vpop.f32.mrf.mxu0 }
 0x310   : > { %v3747_v21 = vpop.f32.mrf.mxu1 }
 0x311   : > { %v3713_v22 = vpop.f32.mrf.mxu0 }
 0x312   : > { %v3714_v23 = vadd.f32 %v3713_v22, %v3712_v20  ;;  %v3748_v25 = vpop.f32.mrf.mxu1 }
 0x313   : > { %v3749_v27 = vadd.f32 %v3748_v25, %v3747_v21 }
 0x314   : > { %v3071_v26 = vadd.f32 %v3714_v23, %v3674_v24 }
 0x316   : > { %v3141_v34 = vadd.f32 %v3749_v27, %v3071_v26 }
 0x330   : > { %v3782_v28 = vpop.f32.mrf.mxu0 }
 0x331   : > { %v3817_v30 = vpop.f32.mrf.mxu1 }
 0x332   : > { %v3783_v31 = vpop.f32.mrf.mxu0 }
 0x333   : > { %v3818_v33 = vpop.f32.mrf.mxu1  ;;  %v3784_v36 = vadd.f32 %v3783_v31, %v3782_v28 }
 0x334   : > { %v3819_v0 = vadd.f32 %v3818_v33, %v3817_v30 }
 0x335   : > { %v3211_v37 = vadd.f32 %v3784_v36, %v3141_v34 }
 0x337   : > { %v3281_v39 = vadd.f32 %v3819_v0, %v3211_v37 }
 0x339   : > { %3285 = vst.msk [vmem:[#allocation3] sm:$0x3] %vm3284_vm0, %v3281_v39 }
 0x33a PF: > { %p3824_p7 = scmp.eq.s32.totalorder %s3915_s19, 4  ;;  %s3878_s12 = smov [#allocation3]  }
 0x33b   : > { %s3293_s13 = sshll.u32 %s3878_s12, 4  ;;  %s3294_s13 = int_to_ptr.vmem [resolvable:$true] %s3293_s13 }
 0x33c   : > { %s3839_s14 = scalar_lea.vmem %s3294_s13, 32  ;;  %p3846_p11 = scmp.lt.s32.totalorder %s3294_s13, %s3294_s13 }
 0x33d   : > { %p3840_p8 = scmp.ne.s32.totalorder %s3294_s13, %s3839_s14  ;;  %p3847_p12 = scmp.lt.s32.totalorder %s3839_s14, %s3839_s14 }
 0x33f   : > { %p3841_p9 = pnand %p3840_p8, %p3824_p7  ;;  %p3848_p13 = por %p3847_p12, %p3846_p11 }
 0x341   : > { %p3842_p10 = pneg %p3841_p9 }
 0x343   : > { %p3849_p0 = pnand %p3848_p13, %p3842_p10 }
 0x345   : > { %3852 = shalt.err (!%p3849_p0)
}
 0x346   : > { %3821 = dma.vmem_to_hbm [thread:$0]  (%p3824_p7), %s3294_s13, 32, %s4763_s5, [#allocation4]  }
 0x347   : > { %3868 = dma.done.wait (%p3824_p7), [#allocation4], 32  }
 0x348   : > { %3870 = vsyncadd (%p3824_p7), [#allocation4], 4294967264 }
 0x349 PF: > { %s16_s18 = sadd.s32 1, %s3873_s18  }
 0x34a   : > { %p13_p1 = scmp.ge.s32.totalorder %s16_s18, 7  }
 0x34c   :  { %15 = sbr.rel (!%p13_p1) target bundleno = 1 (0x1), region = 78 }
 0x351   :  { %3306 = vsyncpa [#allocation4], 1 }
 0x352   :  { %3308 = vsyncpa [#allocation4 + $0x1], 1 }

</bundles_post_ra>
